<compile_context>
chip_gen: v7x
topology: tpu7x:2x2x1
jax: 0.10.0
libtpu: 0.0.40
codegen_flags: <defaults>
</compile_context>

<pallas_src>
import functools

import jax
import jax.numpy as jnp
from jax.experimental import pallas as pl
from jax.experimental.pallas import tpu as pltpu


_VMEM_LIMIT_BYTES = 48 * 1024 * 1024  # leave headroom under v7x's 64 MiB physical VMEM


def _round_up(x, m):
    return (x + m - 1) // m * m


# --------------------- conv-as-matmul kernels (taps folded into K) ---------------------
def _matmul_bias_kernel(x_ref, w_ref, b_ref, o_ref):
    acc = jnp.dot(x_ref[...], w_ref[...], preferred_element_type=jnp.float32)
    o_ref[...] = (acc + b_ref[...].astype(jnp.float32)).astype(o_ref.dtype)


def _matmul_bias_residual_kernel(x_ref, w_ref, b_ref, r_ref, o_ref):
    acc = jnp.dot(x_ref[...], w_ref[...], preferred_element_type=jnp.float32)
    acc = acc + b_ref[...].astype(jnp.float32) + r_ref[...].astype(jnp.float32)
    o_ref[...] = acc.astype(o_ref.dtype)


def _pick_tile_m(M, K, itemsize):
    """Largest M tile keeping the double-buffered taps stream within a fixed VMEM budget."""
    budget = (16 * 1024 * 1024) // 2            # per-buffer budget for the (TM, K) taps block
    tm = budget // max(1, K * itemsize)
    tm = max(128, min(2048, tm))
    tm = (tm // 8) * 8                          # sublane-aligned
    return M if M <= tm else tm


def _matmul_bias_rows(x2d, w2d, bias, residual=None, out_dtype=None, compute_dtype=None):
    """out[m, co] = sum_k x2d[m, k] * w2d[k, co] + bias[co] (+ residual[m, co])."""
    M, K = x2d.shape
    Kw, cout = w2d.shape
    assert K == Kw
    out_dtype = out_dtype or x2d.dtype

    if compute_dtype is not None:               # e.g. bf16 for full MXU rate
        x2d = x2d.astype(compute_dtype)
        w2d = w2d.astype(compute_dtype)

    # Lane-dense output: pad Cout up to a multiple of 128 (sliced away afterwards).
    coutp = _round_up(cout, 128)
    if coutp != cout:
        w2d = jnp.pad(w2d, ((0, 0), (0, coutp - cout)))
        bias = jnp.pad(bias, (0, coutp - cout))
        if residual is not None:
            residual = jnp.pad(residual, ((0, 0), (0, coutp - cout)))
    bias2 = bias.reshape(1, coutp).astype(jnp.float32)

    tn = 128
    tm = _pick_tile_m(M, K, jnp.dtype(x2d.dtype).itemsize)
    grid = (pl.cdiv(M, tm), coutp // tn)        # Cout axis last so the big taps block stays resident

    in_specs = [
        pl.BlockSpec((tm, K), lambda m, n: (m, 0)),
        pl.BlockSpec((K, tn), lambda m, n: (0, n)),
        pl.BlockSpec((1, tn), lambda m, n: (0, n)),
    ]
    args = [x2d, w2d, bias2]
    if residual is not None:
        in_specs.append(pl.BlockSpec((tm, tn), lambda m, n: (m, n)))
        args.append(residual)
        kernel = _matmul_bias_residual_kernel
    else:
        kernel = _matmul_bias_kernel

    out = pl.pallas_call(
        kernel,
        out_shape=jax.ShapeDtypeStruct((M, coutp), out_dtype),
        grid_spec=pltpu.PrefetchScalarGridSpec(
            num_scalar_prefetch=0,
            grid=grid,
            in_specs=in_specs,
            out_specs=pl.BlockSpec((tm, tn), lambda m, n: (m, n)),
        ),
        compiler_params=pltpu.CompilerParams(
            dimension_semantics=("parallel", "parallel"),
            vmem_limit_bytes=_VMEM_LIMIT_BYTES,
        ),
    )(*args)
    return out[:, :cout] if coutp != cout else out


def _conv2d_3x3(x_nhwc, weight_oihw, bias, *, stride, pad, residual_rows=None,
                compute_dtype=None):
    """3x3 conv (NHWC in/out) as one tap-folded matmul; pad = (top, bottom, left, right)."""
    N, H, W, cin = x_nhwc.shape
    cout, cin_w, kh_, kw_ = weight_oihw.shape
    assert cin == cin_w and kh_ == 3 and kw_ == 3
    pt, pb, plft, prt = pad
    xp = jnp.pad(x_nhwc, ((0, 0), (pt, pb), (plft, prt), (0, 0)))
    hp, wp = H + pt + pb, W + plft + prt
    ho = (hp - 3) // stride + 1
    wo = (wp - 3) // stride + 1
    M = N * ho * wo

    # im2col with the 9 taps folded into the contraction dim: (M, 9*Cin).
    # TODO(synk): replace this HBM-materialised im2col with in-kernel halo DMA
    # (memory_space=pl.ANY row strips) or a space-to-depth layout to cut ~2-3x HBM traffic.
    taps = []
    for kh in range(3):
        for kw in range(3):
            t = jax.lax.slice(
                xp, (0, kh, kw, 0),
                (N, kh + stride * (ho - 1) + 1, kw + stride * (wo - 1) + 1, cin),
                (1, stride, stride, 1))
            taps.append(t.reshape(M, cin))
    taps = jnp.concatenate(taps, axis=-1)                         # (M, 9*Cin)
    w = jnp.transpose(weight_oihw, (2, 3, 1, 0)).reshape(9 * cin, cout)

    rows = _matmul_bias_rows(taps, w, bias, residual=residual_rows,
                             out_dtype=x_nhwc.dtype, compute_dtype=compute_dtype)
    return rows.reshape(N, ho, wo, cout)


# ------------------------------ GroupNorm + SiLU kernels ------------------------------
def _gn_stats_kernel(x_ref, s_ref, *, hw_total):
    t = pl.program_id(1)

    @pl.when(t == 0)
    def _():
        s_ref[...] = jnp.zeros_like(s_ref)

    x = x_ref[0].astype(jnp.float32)                              # (THW, C)
    thw = x.shape[0]
    row = jax.lax.broadcasted_iota(jnp.int32, x.shape, 0) + t * thw
    x = jnp.where(row < hw_total, x, 0.0)                         # mask ragged edge tile
    ps = jnp.sum(x, axis=0, keepdims=True)                        # (1, C)  sum
    pss = jnp.sum(x * x, axis=0, keepdims=True)                   # (1, C)  sum of squares
    s_ref[0] = s_ref[0] + jnp.concatenate([ps, pss], axis=0)      # accumulate in resident output


def _gn_apply_silu_kernel(x_ref, scale_ref, shift_ref, o_ref):
    x = x_ref[0].astype(jnp.float32)                              # (THW, C)
    y = x * scale_ref[0] + shift_ref[0]
    o_ref[0] = (y * (1.0 / (1.0 + jnp.exp(-y)))).astype(o_ref.dtype)


def _group_norm_silu(x_nhwc, gamma, beta, *, groups, eps):
    N, H, W, C = x_nhwc.shape
    assert C % groups == 0
    cg = C // groups
    HW = H * W
    x3 = x_nhwc.reshape(N, HW, C)

    thw = HW if HW <= 2048 else 2048
    grid = (N, pl.cdiv(HW, thw))

    stats = pl.pallas_call(
        functools.partial(_gn_stats_kernel, hw_total=HW),
        out_shape=jax.ShapeDtypeStruct((N, 2, C), jnp.float32),
        grid_spec=pltpu.PrefetchScalarGridSpec(
            num_scalar_prefetch=0,
            grid=grid,
            in_specs=[pl.BlockSpec((1, thw, C), lambda n, t: (n, t, 0))],
            out_specs=pl.BlockSpec((1, 2, C), lambda n, t: (n, 0, 0)),
        ),
        compiler_params=pltpu.CompilerParams(
            dimension_semantics=("parallel", "arbitrary"),
            vmem_limit_bytes=_VMEM_LIMIT_BYTES,
        ),
    )(x3)

    # Tiny (N, C)-sized glue: fold per-channel sums into per-group statistics.
    cnt = float(HW * cg)
    csum, csq = stats[:, 0, :], stats[:, 1, :]
    gsum = csum.reshape(N, groups, cg).sum(axis=-1)
    gsq = csq.reshape(N, groups, cg).sum(axis=-1)
    mean_g = gsum / cnt
    var_g = jnp.maximum(gsq / cnt - mean_g * mean_g, 0.0)
    inv_g = jax.lax.rsqrt(var_g + eps)
    mean_c = jnp.repeat(mean_g, cg, axis=-1)                      # (N, C)
    inv_c = jnp.repeat(inv_g, cg, axis=-1)
    scale = gamma[None, :].astype(jnp.float32) * inv_c            # (N, C)
    shift = beta[None, :].astype(jnp.float32) - mean_c * scale

    y3 = pl.pallas_call(
        _gn_apply_silu_kernel,
        out_shape=jax.ShapeDtypeStruct((N, HW, C), x_nhwc.dtype),
        grid_spec=pltpu.PrefetchScalarGridSpec(
            num_scalar_prefetch=0,
            grid=grid,
            in_specs=[
                pl.BlockSpec((1, thw, C), lambda n, t: (n, t, 0)),
                pl.BlockSpec((1, 1, C), lambda n, t: (n, 0, 0)),
                pl.BlockSpec((1, 1, C), lambda n, t: (n, 0, 0)),
            ],
            out_specs=pl.BlockSpec((1, thw, C), lambda n, t: (n, t, 0)),
        ),
        compiler_params=pltpu.CompilerParams(
            dimension_semantics=("parallel", "parallel"),
            vmem_limit_bytes=_VMEM_LIMIT_BYTES,
        ),
    )(x3, scale[:, None, :], shift[:, None, :])
    return y3.reshape(N, H, W, C)


# ------------------------------------ forward ------------------------------------
@functools.partial(jax.jit,
                   static_argnames=("groups", "eps", "add_downsample", "compute_dtype"))
def down_encoder_block2d_forward(x_nchw, params, *, groups=32, eps=1e-6,
                                 add_downsample=True, compute_dtype=None):
    # NCHW -> NHWC once at the boundary (channels-last is lane-dense on TPU).
    # TODO(synk): carry NHWC through the surrounding model to drop these two transposes.
    x = jnp.transpose(x_nchw, (0, 2, 3, 1))

    for rp in params["resnets"]:
        N, H, W, cin = x.shape
        cout = rp["conv1_w"].shape[0]

        h = _group_norm_silu(x, rp["norm1_gamma"], rp["norm1_beta"], groups=groups, eps=eps)
        h = _conv2d_3x3(h, rp["conv1_w"], rp["conv1_b"], stride=1, pad=(1, 1, 1, 1),
                        compute_dtype=compute_dtype)
        h = _group_norm_silu(h, rp["norm2_gamma"], rp["norm2_beta"], groups=groups, eps=eps)

        if rp.get("shortcut_w") is not None:                      # 1x1 conv shortcut
            sc_w = rp["shortcut_w"].reshape(cout, cin).T          # (Cin, Cout)
            sc = _matmul_bias_rows(x.reshape(N * H * W, cin), sc_w, rp["shortcut_b"],
                                   out_dtype=x.dtype, compute_dtype=compute_dtype)
        else:
            sc = x.reshape(N * H * W, cout)

        # conv2 with the residual add fused into the matmul kernel.
        x = _conv2d_3x3(h, rp["conv2_w"], rp["conv2_b"], stride=1, pad=(1, 1, 1, 1),
                        residual_rows=sc, compute_dtype=compute_dtype)

    if add_downsample:
        # Downsample2D(padding=0): F.pad(0,1,0,1) then 3x3/stride-2 conv.
        x = _conv2d_3x3(x, params["down_w"], params["down_b"], stride=2,
                        pad=(0, 1, 0, 1), compute_dtype=compute_dtype)

    return jnp.transpose(x, (0, 3, 1, 2))                         # back to NCHW


# -------------------------------------- main --------------------------------------
if __name__ == "__main__":
    key = jax.random.PRNGKey(0)
    keys = jax.random.split(key, 9)

    N, Cin, Cout, H, W = 2, 32, 64, 16, 16
    groups, eps = 32, 1e-6

    def conv_init(k, co, ci, kh, kw):
        fan_in = ci * kh * kw
        kw_, kb_ = jax.random.split(k)
        w = jax.random.normal(kw_, (co, ci, kh, kw), jnp.float32) / jnp.sqrt(fan_in)
        b = jax.random.normal(kb_, (co,), jnp.float32) * 0.1
        return w, b

    x = jax.random.normal(keys[0], (N, Cin, H, W), jnp.float32)
    w1, b1 = conv_init(keys[1], Cout, Cin, 3, 3)
    w2, b2 = conv_init(keys[2], Cout, Cout, 3, 3)
    ws, bs = conv_init(keys[3], Cout, Cin, 1, 1)
    wd, bd = conv_init(keys[4], Cout, Cout, 3, 3)
    g1 = 1.0 + 0.1 * jax.random.normal(keys[5], (Cin,), jnp.float32)
    be1 = 0.1 * jax.random.normal(keys[6], (Cin,), jnp.float32)
    g2 = 1.0 + 0.1 * jax.random.normal(keys[7], (Cout,), jnp.float32)
    be2 = 0.1 * jax.random.normal(keys[8], (Cout,), jnp.float32)

    params = {
        "resnets": [{
            "norm1_gamma": g1, "norm1_beta": be1,
            "conv1_w": w1, "conv1_b": b1,
            "norm2_gamma": g2, "norm2_beta": be2,
            "conv2_w": w2, "conv2_b": b2,
            "shortcut_w": ws, "shortcut_b": bs,
        }],
        "down_w": wd, "down_b": bd,
    }

    out = down_encoder_block2d_forward(x, params, groups=groups, eps=eps)
    out = jax.block_until_ready(out)

    # ------------------------- pure-JAX reference -------------------------
    def ref_gn(v, gamma, beta):
        n, c, h, w = v.shape
        vg = v.reshape(n, groups, c // groups, h, w)
        mean = vg.mean(axis=(2, 3, 4), keepdims=True)
        var = vg.var(axis=(2, 3, 4), keepdims=True)
        vn = ((vg - mean) / jnp.sqrt(var + eps)).reshape(n, c, h, w)
        return vn * gamma[None, :, None, None] + beta[None, :, None, None]

    def ref_silu(v):
        return v * (1.0 / (1.0 + jnp.exp(-v)))

    def ref_conv(v, w, b, stride, pad):
        return jax.lax.conv_general_dilated(
            v, w, (stride, stride),
            padding=((pad[0], pad[1]), (pad[2], pad[3])),
            dimension_numbers=("NCHW", "OIHW", "NCHW"),
        ) + b[None, :, None, None]

    h = ref_conv(ref_silu(ref_gn(x, g1, be1)), w1, b1, 1, (1, 1, 1, 1))
    h = ref_conv(ref_silu(ref_gn(h, g2, be2)), w2, b2, 1, (1, 1, 1, 1))
    ref = ref_conv(x, ws, bs, 1, (0, 0, 0, 0)) + h
    ref = ref_conv(ref, wd, bd, 2, (0, 1, 0, 1))

    assert out.shape == (N, Cout, H // 2, W // 2), out.shape
    assert jnp.allclose(out, ref, atol=5e-2, rtol=5e-2), float(jnp.max(jnp.abs(out - ref)))

    print("KERNEL_OK")
</pallas_src>

<mosaic_0001>
module attributes {stable_mosaic.version = 11 : i64} {
  func.func @_gn_apply_silu_kernel(%arg0: i32, %arg1: i32, %arg2: memref<1x256x32xf32, #tpu.memory_space<vmem>>, %arg3: memref<1x1x32xf32, #tpu.memory_space<vmem>>, %arg4: memref<1x1x32xf32, #tpu.memory_space<vmem>>, %arg5: memref<1x256x32xf32, #tpu.memory_space<vmem>>) attributes {dimension_semantics = [#tpu.dimension_semantics<parallel>, #tpu.dimension_semantics<parallel>], iteration_bounds = array<i64: 2, 1>, scalar_prefetch = 0 : i64, scratch_operands = 0 : i64, tpu.core_type = #tpu.core_type<tc>, window_params = [{transform_indices = @transform_0, window_bounds = array<i64: 1, 256, 32>}, {transform_indices = @transform_1, window_bounds = array<i64: 1, 1, 32>}, {transform_indices = @transform_2, window_bounds = array<i64: 1, 1, 32>}, {transform_indices = @transform_3, window_bounds = array<i64: 1, 256, 32>}]} {
    %c0 = arith.constant 0 : index
    %c0_0 = arith.constant 0 : index
    %c0_1 = arith.constant 0 : index
    %0 = vector.load %arg2[%c0, %c0_0, %c0_1] : memref<1x256x32xf32, #tpu.memory_space<vmem>>, vector<1x256x32xf32>
    %1 = vector.shape_cast %0 : vector<1x256x32xf32> to vector<256x32xf32>
    %c0_2 = arith.constant 0 : index
    %c0_3 = arith.constant 0 : index
    %c0_4 = arith.constant 0 : index
    %2 = vector.load %arg3[%c0_2, %c0_3, %c0_4] : memref<1x1x32xf32, #tpu.memory_space<vmem>>, vector<1x1x32xf32>
    %3 = vector.shape_cast %2 : vector<1x1x32xf32> to vector<1x32xf32>
    %4 = vector.broadcast %3 : vector<1x32xf32> to vector<256x32xf32>
    %5 = arith.mulf %1, %4 : vector<256x32xf32>
    %c0_5 = arith.constant 0 : index
    %c0_6 = arith.constant 0 : index
    %c0_7 = arith.constant 0 : index
    %6 = vector.load %arg4[%c0_5, %c0_6, %c0_7] : memref<1x1x32xf32, #tpu.memory_space<vmem>>, vector<1x1x32xf32>
    %7 = vector.shape_cast %6 : vector<1x1x32xf32> to vector<1x32xf32>
    %8 = vector.broadcast %7 : vector<1x32xf32> to vector<256x32xf32>
    %9 = arith.addf %5, %8 : vector<256x32xf32>
    %cst = arith.constant 0.000000e+00 : f32
    %10 = vector.broadcast %cst : f32 to vector<256x32xf32>
    %11 = arith.subf %10, %9 : vector<256x32xf32>
    %12 = math.exp %11 : vector<256x32xf32>
    %cst_8 = arith.constant 1.000000e+00 : f32
    %13 = vector.broadcast %cst_8 : f32 to vector<256x32xf32>
    %14 = arith.addf %13, %12 : vector<256x32xf32>
    %cst_9 = arith.constant 1.000000e+00 : f32
    %15 = vector.broadcast %cst_9 : f32 to vector<256x32xf32>
    %16 = arith.divf %15, %14 : vector<256x32xf32>
    %17 = arith.mulf %9, %16 : vector<256x32xf32>
    %c0_10 = arith.constant 0 : index
    %c0_11 = arith.constant 0 : index
    %c0_12 = arith.constant 0 : index
    %18 = vector.load %arg5[%c0_10, %c0_11, %c0_12] : memref<1x256x32xf32, #tpu.memory_space<vmem>>, vector<1x256x32xf32>
    %19 = vector.shape_cast %18 : vector<1x256x32xf32> to vector<256x32xf32>
    %20 = vector.shape_cast %17 : vector<256x32xf32> to vector<1x256x32xf32>
    tpu.vector_store %arg5[%c0_10, %c0_11, %c0_12], %20 {strides = array<i32>} : memref<1x256x32xf32, #tpu.memory_space<vmem>>, vector<1x256x32xf32>,
    return
  }
  func.func @transform_0(%arg0: i32, %arg1: i32) -> (i32, i32, i32) {
    %c0_i32 = arith.constant 0 : i32
    %c0_i32_0 = arith.constant 0 : i32
    return %arg0, %arg1, %c0_i32 : i32, i32, i32
  }
  func.func @transform_1(%arg0: i32, %arg1: i32) -> (i32, i32, i32) {
    %c0_i32 = arith.constant 0 : i32
    %c0_i32_0 = arith.constant 0 : i32
    %c0_i32_1 = arith.constant 0 : i32
    return %arg0, %c0_i32, %c0_i32_0 : i32, i32, i32
  }
  func.func @transform_2(%arg0: i32, %arg1: i32) -> (i32, i32, i32) {
    %c0_i32 = arith.constant 0 : i32
    %c0_i32_0 = arith.constant 0 : i32
    %c0_i32_1 = arith.constant 0 : i32
    return %arg0, %c0_i32, %c0_i32_0 : i32, i32, i32
  }
  func.func @transform_3(%arg0: i32, %arg1: i32) -> (i32, i32, i32) {
    %c0_i32 = arith.constant 0 : i32
    %c0_i32_0 = arith.constant 0 : i32
    return %arg0, %arg1, %c0_i32 : i32, i32, i32
  }
}

module attributes {stable_mosaic.version = 11 : i64} {
  func.func @_gn_stats_kernel(%arg0: i32, %arg1: i32, %arg2: memref<1x256x32xf32, #tpu.memory_space<vmem>>, %arg3: memref<1x2x32xf32, #tpu.memory_space<vmem>>) attributes {dimension_semantics = [#tpu.dimension_semantics<parallel>, #tpu.dimension_semantics<arbitrary>], iteration_bounds = array<i64: 2, 1>, scalar_prefetch = 0 : i64, scratch_operands = 0 : i64, tpu.core_type = #tpu.core_type<tc>, window_params = [{transform_indices = @transform_0, window_bounds = array<i64: 1, 256, 32>}, {transform_indices = @transform_1, window_bounds = array<i64: 1, 2, 32>}]} {
    %c0_i32 = arith.constant 0 : i32
    %0 = arith.cmpi eq, %arg1, %c0_i32 : i32
    %1 = arith.extui %0 : i1 to i32
    %c0_i32_0 = arith.constant 0 : i32
    %2 = arith.cmpi ne, %1, %c0_i32_0 : i32
    scf.if %2 {
      %cst_12 = arith.constant 0.000000e+00 : f32
      %25 = vector.broadcast %cst_12 : f32 to vector<1x2x32xf32>
      %c0_13 = arith.constant 0 : index
      %c0_14 = arith.constant 0 : index
      %c0_15 = arith.constant 0 : index
      %26 = vector.load %arg3[%c0_13, %c0_14, %c0_15] : memref<1x2x32xf32, #tpu.memory_space<vmem>>, vector<1x2x32xf32>
      tpu.vector_store %arg3[%c0_13, %c0_14, %c0_15], %25 {strides = array<i32>} : memref<1x2x32xf32, #tpu.memory_space<vmem>>, vector<1x2x32xf32>,
    } else {
    }
    %c0 = arith.constant 0 : index
    %c0_1 = arith.constant 0 : index
    %c0_2 = arith.constant 0 : index
    %3 = vector.load %arg2[%c0, %c0_1, %c0_2] : memref<1x256x32xf32, #tpu.memory_space<vmem>>, vector<1x256x32xf32>
    %4 = vector.shape_cast %3 : vector<1x256x32xf32> to vector<256x32xf32>
    %5 = tpu.iota {dimensions = array<i32: 0>} : vector<256x32xi32>
    %c256_i32 = arith.constant 256 : i32
    %6 = arith.muli %arg1, %c256_i32 : i32
    %7 = vector.broadcast %6 : i32 to vector<256x32xi32>
    %8 = arith.addi %5, %7 : vector<256x32xi32>
    %c256_i32_3 = arith.constant 256 : i32
    %9 = vector.broadcast %c256_i32_3 : i32 to vector<256x32xi32>
    %10 = arith.cmpi slt, %8, %9 : vector<256x32xi32>
    %cst = arith.constant 0.000000e+00 : f32
    %11 = vector.broadcast %cst : f32 to vector<256x32xf32>
    %12 = arith.select %10, %4, %11 : vector<256x32xi1>, vector<256x32xf32>
    %cst_4 = arith.constant dense<0.000000e+00> : vector<32xf32>
    %13 = vector.multi_reduction <add>, %12, %cst_4 [0] : vector<256x32xf32> to vector<32xf32>
    %14 = vector.shape_cast %13 : vector<32xf32> to vector<1x32xf32>
    %15 = arith.mulf %12, %12 : vector<256x32xf32>
    %cst_5 = arith.constant dense<0.000000e+00> : vector<32xf32>
    %16 = vector.multi_reduction <add>, %15, %cst_5 [0] : vector<256x32xf32> to vector<32xf32>
    %17 = vector.shape_cast %16 : vector<32xf32> to vector<1x32xf32>
    %c0_6 = arith.constant 0 : index
    %c0_7 = arith.constant 0 : index
    %c0_8 = arith.constant 0 : index
    %18 = vector.load %arg3[%c0_6, %c0_7, %c0_8] : memref<1x2x32xf32, #tpu.memory_space<vmem>>, vector<1x2x32xf32>
    %19 = vector.shape_cast %18 : vector<1x2x32xf32> to vector<2x32xf32>
    %20 = tpu.concatenate %14, %17 in 0 : vector<1x32xf32>, vector<1x32xf32> -> vector<2x32xf32>
    %21 = arith.addf %19, %20 : vector<2x32xf32>
    %c0_9 = arith.constant 0 : index
    %c0_10 = arith.constant 0 : index
    %c0_11 = arith.constant 0 : index
    %22 = vector.load %arg3[%c0_9, %c0_10, %c0_11] : memref<1x2x32xf32, #tpu.memory_space<vmem>>, vector<1x2x32xf32>
    %23 = vector.shape_cast %22 : vector<1x2x32xf32> to vector<2x32xf32>
    %24 = vector.shape_cast %21 : vector<2x32xf32> to vector<1x2x32xf32>
    tpu.vector_store %arg3[%c0_9, %c0_10, %c0_11], %24 {strides = array<i32>} : memref<1x2x32xf32, #tpu.memory_space<vmem>>, vector<1x2x32xf32>,
    return
  }
  func.func @transform_0(%arg0: i32, %arg1: i32) -> (i32, i32, i32) {
    %c0_i32 = arith.constant 0 : i32
    %c0_i32_0 = arith.constant 0 : i32
    return %arg0, %arg1, %c0_i32 : i32, i32, i32
  }
  func.func @transform_1(%arg0: i32, %arg1: i32) -> (i32, i32, i32) {
    %c0_i32 = arith.constant 0 : i32
    %c0_i32_0 = arith.constant 0 : i32
    %c0_i32_1 = arith.constant 0 : i32
    return %arg0, %c0_i32, %c0_i32_0 : i32, i32, i32
  }
}

module attributes {stable_mosaic.version = 11 : i64} {
  func.func @_matmul_bias_kernel(%arg0: i32, %arg1: i32, %arg2: memref<512x288xf32, #tpu.memory_space<vmem>>, %arg3: memref<288x128xf32, #tpu.memory_space<vmem>>, %arg4: memref<1x128xf32, #tpu.memory_space<vmem>>, %arg5: memref<512x128xf32, #tpu.memory_space<vmem>>) attributes {dimension_semantics = [#tpu.dimension_semantics<parallel>, #tpu.dimension_semantics<parallel>], iteration_bounds = array<i64: 1, 1>, scalar_prefetch = 0 : i64, scratch_operands = 0 : i64, tpu.core_type = #tpu.core_type<tc>, window_params = [{transform_indices = @transform_0, window_bounds = array<i64: 512, 288>}, {transform_indices = @transform_1, window_bounds = array<i64: 288, 128>}, {transform_indices = @transform_2, window_bounds = array<i64: 1, 128>}, {transform_indices = @transform_3, window_bounds = array<i64: 512, 128>}]} {
    %c0 = arith.constant 0 : index
    %c0_0 = arith.constant 0 : index
    %0 = vector.load %arg2[%c0, %c0_0] : memref<512x288xf32, #tpu.memory_space<vmem>>, vector<512x288xf32>
    %c0_1 = arith.constant 0 : index
    %c0_2 = arith.constant 0 : index
    %1 = vector.load %arg3[%c0_1, %c0_2] : memref<288x128xf32, #tpu.memory_space<vmem>>, vector<288x128xf32>
    %cst = arith.constant dense<0.000000e+00> : vector<512x128xf32>
    %2 = tpu.matmul %0, %1, %cst {dimension_numbers = #tpu.dot_dimension_numbers<[1], [0], [0], [1], [0, 0, 1, 1], [], []>} : vector<512x288xf32>, vector<288x128xf32>, vector<512x128xf32> -> vector<512x128xf32>
    %c0_3 = arith.constant 0 : index
    %c0_4 = arith.constant 0 : index
    %3 = vector.load %arg4[%c0_3, %c0_4] : memref<1x128xf32, #tpu.memory_space<vmem>>, vector<1x128xf32>
    %4 = vector.broadcast %3 : vector<1x128xf32> to vector<512x128xf32>
    %5 = arith.addf %2, %4 : vector<512x128xf32>
    %c0_5 = arith.constant 0 : index
    %c0_6 = arith.constant 0 : index
    %6 = vector.load %arg5[%c0_5, %c0_6] : memref<512x128xf32, #tpu.memory_space<vmem>>, vector<512x128xf32>
    tpu.vector_store %arg5[%c0_5, %c0_6], %5 {strides = array<i32>} : memref<512x128xf32, #tpu.memory_space<vmem>>, vector<512x128xf32>,
    return
  }
  func.func @transform_0(%arg0: i32, %arg1: i32) -> (i32, i32) {
    %c0_i32 = arith.constant 0 : i32
    %c0_i32_0 = arith.constant 0 : i32
    return %arg0, %c0_i32 : i32, i32
  }
  func.func @transform_1(%arg0: i32, %arg1: i32) -> (i32, i32) {
    %c0_i32 = arith.constant 0 : i32
    %c0_i32_0 = arith.constant 0 : i32
    return %c0_i32, %arg1 : i32, i32
  }
  func.func @transform_2(%arg0: i32, %arg1: i32) -> (i32, i32) {
    %c0_i32 = arith.constant 0 : i32
    %c0_i32_0 = arith.constant 0 : i32
    return %c0_i32, %arg1 : i32, i32
  }
  func.func @transform_3(%arg0: i32, %arg1: i32) -> (i32, i32) {
    %c0_i32 = arith.constant 0 : i32
    return %arg0, %arg1 : i32, i32
  }
}

module attributes {stable_mosaic.version = 11 : i64} {
  func.func @_gn_stats_kernel(%arg0: i32, %arg1: i32, %arg2: memref<1x256x64xf32, #tpu.memory_space<vmem>>, %arg3: memref<1x2x64xf32, #tpu.memory_space<vmem>>) attributes {dimension_semantics = [#tpu.dimension_semantics<parallel>, #tpu.dimension_semantics<arbitrary>], iteration_bounds = array<i64: 2, 1>, scalar_prefetch = 0 : i64, scratch_operands = 0 : i64, tpu.core_type = #tpu.core_type<tc>, window_params = [{transform_indices = @transform_0, window_bounds = array<i64: 1, 256, 64>}, {transform_indices = @transform_1, window_bounds = array<i64: 1, 2, 64>}]} {
    %c0_i32 = arith.constant 0 : i32
    %0 = arith.cmpi eq, %arg1, %c0_i32 : i32
    %1 = arith.extui %0 : i1 to i32
    %c0_i32_0 = arith.constant 0 : i32
    %2 = arith.cmpi ne, %1, %c0_i32_0 : i32
    scf.if %2 {
      %cst_12 = arith.constant 0.000000e+00 : f32
      %25 = vector.broadcast %cst_12 : f32 to vector<1x2x64xf32>
      %c0_13 = arith.constant 0 : index
      %c0_14 = arith.constant 0 : index
      %c0_15 = arith.constant 0 : index
      %26 = vector.load %arg3[%c0_13, %c0_14, %c0_15] : memref<1x2x64xf32, #tpu.memory_space<vmem>>, vector<1x2x64xf32>
      tpu.vector_store %arg3[%c0_13, %c0_14, %c0_15], %25 {strides = array<i32>} : memref<1x2x64xf32, #tpu.memory_space<vmem>>, vector<1x2x64xf32>,
    } else {
    }
    %c0 = arith.constant 0 : index
    %c0_1 = arith.constant 0 : index
    %c0_2 = arith.constant 0 : index
    %3 = vector.load %arg2[%c0, %c0_1, %c0_2] : memref<1x256x64xf32, #tpu.memory_space<vmem>>, vector<1x256x64xf32>
    %4 = vector.shape_cast %3 : vector<1x256x64xf32> to vector<256x64xf32>
    %5 = tpu.iota {dimensions = array<i32: 0>} : vector<256x64xi32>
    %c256_i32 = arith.constant 256 : i32
    %6 = arith.muli %arg1, %c256_i32 : i32
    %7 = vector.broadcast %6 : i32 to vector<256x64xi32>
    %8 = arith.addi %5, %7 : vector<256x64xi32>
    %c256_i32_3 = arith.constant 256 : i32
    %9 = vector.broadcast %c256_i32_3 : i32 to vector<256x64xi32>
    %10 = arith.cmpi slt, %8, %9 : vector<256x64xi32>
    %cst = arith.constant 0.000000e+00 : f32
    %11 = vector.broadcast %cst : f32 to vector<256x64xf32>
    %12 = arith.select %10, %4, %11 : vector<256x64xi1>, vector<256x64xf32>
    %cst_4 = arith.constant dense<0.000000e+00> : vector<64xf32>
    %13 = vector.multi_reduction <add>, %12, %cst_4 [0] : vector<256x64xf32> to vector<64xf32>
    %14 = vector.shape_cast %13 : vector<64xf32> to vector<1x64xf32>
    %15 = arith.mulf %12, %12 : vector<256x64xf32>
    %cst_5 = arith.constant dense<0.000000e+00> : vector<64xf32>
    %16 = vector.multi_reduction <add>, %15, %cst_5 [0] : vector<256x64xf32> to vector<64xf32>
    %17 = vector.shape_cast %16 : vector<64xf32> to vector<1x64xf32>
    %c0_6 = arith.constant 0 : index
    %c0_7 = arith.constant 0 : index
    %c0_8 = arith.constant 0 : index
    %18 = vector.load %arg3[%c0_6, %c0_7, %c0_8] : memref<1x2x64xf32, #tpu.memory_space<vmem>>, vector<1x2x64xf32>
    %19 = vector.shape_cast %18 : vector<1x2x64xf32> to vector<2x64xf32>
    %20 = tpu.concatenate %14, %17 in 0 : vector<1x64xf32>, vector<1x64xf32> -> vector<2x64xf32>
    %21 = arith.addf %19, %20 : vector<2x64xf32>
    %c0_9 = arith.constant 0 : index
    %c0_10 = arith.constant 0 : index
    %c0_11 = arith.constant 0 : index
    %22 = vector.load %arg3[%c0_9, %c0_10, %c0_11] : memref<1x2x64xf32, #tpu.memory_space<vmem>>, vector<1x2x64xf32>
    %23 = vector.shape_cast %22 : vector<1x2x64xf32> to vector<2x64xf32>
    %24 = vector.shape_cast %21 : vector<2x64xf32> to vector<1x2x64xf32>
    tpu.vector_store %arg3[%c0_9, %c0_10, %c0_11], %24 {strides = array<i32>} : memref<1x2x64xf32, #tpu.memory_space<vmem>>, vector<1x2x64xf32>,
    return
  }
  func.func @transform_0(%arg0: i32, %arg1: i32) -> (i32, i32, i32) {
    %c0_i32 = arith.constant 0 : i32
    %c0_i32_0 = arith.constant 0 : i32
    return %arg0, %arg1, %c0_i32 : i32, i32, i32
  }
  func.func @transform_1(%arg0: i32, %arg1: i32) -> (i32, i32, i32) {
    %c0_i32 = arith.constant 0 : i32
    %c0_i32_0 = arith.constant 0 : i32
    %c0_i32_1 = arith.constant 0 : i32
    return %arg0, %c0_i32, %c0_i32_0 : i32, i32, i32
  }
}

module attributes {stable_mosaic.version = 11 : i64} {
  func.func @_gn_apply_silu_kernel(%arg0: i32, %arg1: i32, %arg2: memref<1x256x64xf32, #tpu.memory_space<vmem>>, %arg3: memref<1x1x64xf32, #tpu.memory_space<vmem>>, %arg4: memref<1x1x64xf32, #tpu.memory_space<vmem>>, %arg5: memref<1x256x64xf32, #tpu.memory_space<vmem>>) attributes {dimension_semantics = [#tpu.dimension_semantics<parallel>, #tpu.dimension_semantics<parallel>], iteration_bounds = array<i64: 2, 1>, scalar_prefetch = 0 : i64, scratch_operands = 0 : i64, tpu.core_type = #tpu.core_type<tc>, window_params = [{transform_indices = @transform_0, window_bounds = array<i64: 1, 256, 64>}, {transform_indices = @transform_1, window_bounds = array<i64: 1, 1, 64>}, {transform_indices = @transform_2, window_bounds = array<i64: 1, 1, 64>}, {transform_indices = @transform_3, window_bounds = array<i64: 1, 256, 64>}]} {
    %c0 = arith.constant 0 : index
    %c0_0 = arith.constant 0 : index
    %c0_1 = arith.constant 0 : index
    %0 = vector.load %arg2[%c0, %c0_0, %c0_1] : memref<1x256x64xf32, #tpu.memory_space<vmem>>, vector<1x256x64xf32>
    %1 = vector.shape_cast %0 : vector<1x256x64xf32> to vector<256x64xf32>
    %c0_2 = arith.constant 0 : index
    %c0_3 = arith.constant 0 : index
    %c0_4 = arith.constant 0 : index
    %2 = vector.load %arg3[%c0_2, %c0_3, %c0_4] : memref<1x1x64xf32, #tpu.memory_space<vmem>>, vector<1x1x64xf32>
    %3 = vector.shape_cast %2 : vector<1x1x64xf32> to vector<1x64xf32>
    %4 = vector.broadcast %3 : vector<1x64xf32> to vector<256x64xf32>
    %5 = arith.mulf %1, %4 : vector<256x64xf32>
    %c0_5 = arith.constant 0 : index
    %c0_6 = arith.constant 0 : index
    %c0_7 = arith.constant 0 : index
    %6 = vector.load %arg4[%c0_5, %c0_6, %c0_7] : memref<1x1x64xf32, #tpu.memory_space<vmem>>, vector<1x1x64xf32>
    %7 = vector.shape_cast %6 : vector<1x1x64xf32> to vector<1x64xf32>
    %8 = vector.broadcast %7 : vector<1x64xf32> to vector<256x64xf32>
    %9 = arith.addf %5, %8 : vector<256x64xf32>
    %cst = arith.constant 0.000000e+00 : f32
    %10 = vector.broadcast %cst : f32 to vector<256x64xf32>
    %11 = arith.subf %10, %9 : vector<256x64xf32>
    %12 = math.exp %11 : vector<256x64xf32>
    %cst_8 = arith.constant 1.000000e+00 : f32
    %13 = vector.broadcast %cst_8 : f32 to vector<256x64xf32>
    %14 = arith.addf %13, %12 : vector<256x64xf32>
    %cst_9 = arith.constant 1.000000e+00 : f32
    %15 = vector.broadcast %cst_9 : f32 to vector<256x64xf32>
    %16 = arith.divf %15, %14 : vector<256x64xf32>
    %17 = arith.mulf %9, %16 : vector<256x64xf32>
    %c0_10 = arith.constant 0 : index
    %c0_11 = arith.constant 0 : index
    %c0_12 = arith.constant 0 : index
    %18 = vector.load %arg5[%c0_10, %c0_11, %c0_12] : memref<1x256x64xf32, #tpu.memory_space<vmem>>, vector<1x256x64xf32>
    %19 = vector.shape_cast %18 : vector<1x256x64xf32> to vector<256x64xf32>
    %20 = vector.shape_cast %17 : vector<256x64xf32> to vector<1x256x64xf32>
    tpu.vector_store %arg5[%c0_10, %c0_11, %c0_12], %20 {strides = array<i32>} : memref<1x256x64xf32, #tpu.memory_space<vmem>>, vector<1x256x64xf32>,
    return
  }
  func.func @transform_0(%arg0: i32, %arg1: i32) -> (i32, i32, i32) {
    %c0_i32 = arith.constant 0 : i32
    %c0_i32_0 = arith.constant 0 : i32
    return %arg0, %arg1, %c0_i32 : i32, i32, i32
  }
  func.func @transform_1(%arg0: i32, %arg1: i32) -> (i32, i32, i32) {
    %c0_i32 = arith.constant 0 : i32
    %c0_i32_0 = arith.constant 0 : i32
    %c0_i32_1 = arith.constant 0 : i32
    return %arg0, %c0_i32, %c0_i32_0 : i32, i32, i32
  }
  func.func @transform_2(%arg0: i32, %arg1: i32) -> (i32, i32, i32) {
    %c0_i32 = arith.constant 0 : i32
    %c0_i32_0 = arith.constant 0 : i32
    %c0_i32_1 = arith.constant 0 : i32
    return %arg0, %c0_i32, %c0_i32_0 : i32, i32, i32
  }
  func.func @transform_3(%arg0: i32, %arg1: i32) -> (i32, i32, i32) {
    %c0_i32 = arith.constant 0 : i32
    %c0_i32_0 = arith.constant 0 : i32
    return %arg0, %arg1, %c0_i32 : i32, i32, i32
  }
}

module attributes {stable_mosaic.version = 11 : i64} {
  func.func @_matmul_bias_kernel(%arg0: i32, %arg1: i32, %arg2: memref<512x32xf32, #tpu.memory_space<vmem>>, %arg3: memref<32x128xf32, #tpu.memory_space<vmem>>, %arg4: memref<1x128xf32, #tpu.memory_space<vmem>>, %arg5: memref<512x128xf32, #tpu.memory_space<vmem>>) attributes {dimension_semantics = [#tpu.dimension_semantics<parallel>, #tpu.dimension_semantics<parallel>], iteration_bounds = array<i64: 1, 1>, scalar_prefetch = 0 : i64, scratch_operands = 0 : i64, tpu.core_type = #tpu.core_type<tc>, window_params = [{transform_indices = @transform_0, window_bounds = array<i64: 512, 32>}, {transform_indices = @transform_1, window_bounds = array<i64: 32, 128>}, {transform_indices = @transform_2, window_bounds = array<i64: 1, 128>}, {transform_indices = @transform_3, window_bounds = array<i64: 512, 128>}]} {
    %c0 = arith.constant 0 : index
    %c0_0 = arith.constant 0 : index
    %0 = vector.load %arg2[%c0, %c0_0] : memref<512x32xf32, #tpu.memory_space<vmem>>, vector<512x32xf32>
    %c0_1 = arith.constant 0 : index
    %c0_2 = arith.constant 0 : index
    %1 = vector.load %arg3[%c0_1, %c0_2] : memref<32x128xf32, #tpu.memory_space<vmem>>, vector<32x128xf32>
    %cst = arith.constant dense<0.000000e+00> : vector<512x128xf32>
    %2 = tpu.matmul %0, %1, %cst {dimension_numbers = #tpu.dot_dimension_numbers<[1], [0], [0], [1], [0, 0, 1, 1], [], []>} : vector<512x32xf32>, vector<32x128xf32>, vector<512x128xf32> -> vector<512x128xf32>
    %c0_3 = arith.constant 0 : index
    %c0_4 = arith.constant 0 : index
    %3 = vector.load %arg4[%c0_3, %c0_4] : memref<1x128xf32, #tpu.memory_space<vmem>>, vector<1x128xf32>
    %4 = vector.broadcast %3 : vector<1x128xf32> to vector<512x128xf32>
    %5 = arith.addf %2, %4 : vector<512x128xf32>
    %c0_5 = arith.constant 0 : index
    %c0_6 = arith.constant 0 : index
    %6 = vector.load %arg5[%c0_5, %c0_6] : memref<512x128xf32, #tpu.memory_space<vmem>>, vector<512x128xf32>
    tpu.vector_store %arg5[%c0_5, %c0_6], %5 {strides = array<i32>} : memref<512x128xf32, #tpu.memory_space<vmem>>, vector<512x128xf32>,
    return
  }
  func.func @transform_0(%arg0: i32, %arg1: i32) -> (i32, i32) {
    %c0_i32 = arith.constant 0 : i32
    %c0_i32_0 = arith.constant 0 : i32
    return %arg0, %c0_i32 : i32, i32
  }
  func.func @transform_1(%arg0: i32, %arg1: i32) -> (i32, i32) {
    %c0_i32 = arith.constant 0 : i32
    %c0_i32_0 = arith.constant 0 : i32
    return %c0_i32, %arg1 : i32, i32
  }
  func.func @transform_2(%arg0: i32, %arg1: i32) -> (i32, i32) {
    %c0_i32 = arith.constant 0 : i32
    %c0_i32_0 = arith.constant 0 : i32
    return %c0_i32, %arg1 : i32, i32
  }
  func.func @transform_3(%arg0: i32, %arg1: i32) -> (i32, i32) {
    %c0_i32 = arith.constant 0 : i32
    return %arg0, %arg1 : i32, i32
  }
}

module attributes {stable_mosaic.version = 11 : i64} {
  func.func @_matmul_bias_residual_kernel(%arg0: i32, %arg1: i32, %arg2: memref<512x576xf32, #tpu.memory_space<vmem>>, %arg3: memref<576x128xf32, #tpu.memory_space<vmem>>, %arg4: memref<1x128xf32, #tpu.memory_space<vmem>>, %arg5: memref<512x128xf32, #tpu.memory_space<vmem>>, %arg6: memref<512x128xf32, #tpu.memory_space<vmem>>) attributes {dimension_semantics = [#tpu.dimension_semantics<parallel>, #tpu.dimension_semantics<parallel>], iteration_bounds = array<i64: 1, 1>, scalar_prefetch = 0 : i64, scratch_operands = 0 : i64, tpu.core_type = #tpu.core_type<tc>, window_params = [{transform_indices = @transform_0, window_bounds = array<i64: 512, 576>}, {transform_indices = @transform_1, window_bounds = array<i64: 576, 128>}, {transform_indices = @transform_2, window_bounds = array<i64: 1, 128>}, {transform_indices = @transform_3, window_bounds = array<i64: 512, 128>}, {transform_indices = @transform_4, window_bounds = array<i64: 512, 128>}]} {
    %c0 = arith.constant 0 : index
    %c0_0 = arith.constant 0 : index
    %0 = vector.load %arg2[%c0, %c0_0] : memref<512x576xf32, #tpu.memory_space<vmem>>, vector<512x576xf32>
    %c0_1 = arith.constant 0 : index
    %c0_2 = arith.constant 0 : index
    %1 = vector.load %arg3[%c0_1, %c0_2] : memref<576x128xf32, #tpu.memory_space<vmem>>, vector<576x128xf32>
    %cst = arith.constant dense<0.000000e+00> : vector<512x128xf32>
    %2 = tpu.matmul %0, %1, %cst {dimension_numbers = #tpu.dot_dimension_numbers<[1], [0], [0], [1], [0, 0, 1, 1], [], []>} : vector<512x576xf32>, vector<576x128xf32>, vector<512x128xf32> -> vector<512x128xf32>
    %c0_3 = arith.constant 0 : index
    %c0_4 = arith.constant 0 : index
    %3 = vector.load %arg4[%c0_3, %c0_4] : memref<1x128xf32, #tpu.memory_space<vmem>>, vector<1x128xf32>
    %4 = vector.broadcast %3 : vector<1x128xf32> to vector<512x128xf32>
    %5 = arith.addf %2, %4 : vector<512x128xf32>
    %c0_5 = arith.constant 0 : index
    %c0_6 = arith.constant 0 : index
    %6 = vector.load %arg5[%c0_5, %c0_6] : memref<512x128xf32, #tpu.memory_space<vmem>>, vector<512x128xf32>
    %7 = arith.addf %5, %6 : vector<512x128xf32>
    %c0_7 = arith.constant 0 : index
    %c0_8 = arith.constant 0 : index
    %8 = vector.load %arg6[%c0_7, %c0_8] : memref<512x128xf32, #tpu.memory_space<vmem>>, vector<512x128xf32>
    tpu.vector_store %arg6[%c0_7, %c0_8], %7 {strides = array<i32>} : memref<512x128xf32, #tpu.memory_space<vmem>>, vector<512x128xf32>,
    return
  }
  func.func @transform_0(%arg0: i32, %arg1: i32) -> (i32, i32) {
    %c0_i32 = arith.constant 0 : i32
    %c0_i32_0 = arith.constant 0 : i32
    return %arg0, %c0_i32 : i32, i32
  }
  func.func @transform_1(%arg0: i32, %arg1: i32) -> (i32, i32) {
    %c0_i32 = arith.constant 0 : i32
    %c0_i32_0 = arith.constant 0 : i32
    return %c0_i32, %arg1 : i32, i32
  }
  func.func @transform_2(%arg0: i32, %arg1: i32) -> (i32, i32) {
    %c0_i32 = arith.constant 0 : i32
    %c0_i32_0 = arith.constant 0 : i32
    return %c0_i32, %arg1 : i32, i32
  }
  func.func @transform_3(%arg0: i32, %arg1: i32) -> (i32, i32) {
    %c0_i32 = arith.constant 0 : i32
    return %arg0, %arg1 : i32, i32
  }
  func.func @transform_4(%arg0: i32, %arg1: i32) -> (i32, i32) {
    %c0_i32 = arith.constant 0 : i32
    return %arg0, %arg1 : i32, i32
  }
}

module attributes {stable_mosaic.version = 11 : i64} {
  func.func @_matmul_bias_kernel(%arg0: i32, %arg1: i32, %arg2: memref<128x576xf32, #tpu.memory_space<vmem>>, %arg3: memref<576x128xf32, #tpu.memory_space<vmem>>, %arg4: memref<1x128xf32, #tpu.memory_space<vmem>>, %arg5: memref<128x128xf32, #tpu.memory_space<vmem>>) attributes {dimension_semantics = [#tpu.dimension_semantics<parallel>, #tpu.dimension_semantics<parallel>], iteration_bounds = array<i64: 1, 1>, scalar_prefetch = 0 : i64, scratch_operands = 0 : i64, tpu.core_type = #tpu.core_type<tc>, window_params = [{transform_indices = @transform_0, window_bounds = array<i64: 128, 576>}, {transform_indices = @transform_1, window_bounds = array<i64: 576, 128>}, {transform_indices = @transform_2, window_bounds = array<i64: 1, 128>}, {transform_indices = @transform_3, window_bounds = array<i64: 128, 128>}]} {
    %c0 = arith.constant 0 : index
    %c0_0 = arith.constant 0 : index
    %0 = vector.load %arg2[%c0, %c0_0] : memref<128x576xf32, #tpu.memory_space<vmem>>, vector<128x576xf32>
    %c0_1 = arith.constant 0 : index
    %c0_2 = arith.constant 0 : index
    %1 = vector.load %arg3[%c0_1, %c0_2] : memref<576x128xf32, #tpu.memory_space<vmem>>, vector<576x128xf32>
    %cst = arith.constant dense<0.000000e+00> : vector<128x128xf32>
    %2 = tpu.matmul %0, %1, %cst {dimension_numbers = #tpu.dot_dimension_numbers<[1], [0], [0], [1], [0, 0, 1, 1], [], []>} : vector<128x576xf32>, vector<576x128xf32>, vector<128x128xf32> -> vector<128x128xf32>
    %c0_3 = arith.constant 0 : index
    %c0_4 = arith.constant 0 : index
    %3 = vector.load %arg4[%c0_3, %c0_4] : memref<1x128xf32, #tpu.memory_space<vmem>>, vector<1x128xf32>
    %4 = vector.broadcast %3 : vector<1x128xf32> to vector<128x128xf32>
    %5 = arith.addf %2, %4 : vector<128x128xf32>
    %c0_5 = arith.constant 0 : index
    %c0_6 = arith.constant 0 : index
    %6 = vector.load %arg5[%c0_5, %c0_6] : memref<128x128xf32, #tpu.memory_space<vmem>>, vector<128x128xf32>
    tpu.vector_store %arg5[%c0_5, %c0_6], %5 {strides = array<i32>} : memref<128x128xf32, #tpu.memory_space<vmem>>, vector<128x128xf32>,
    return
  }
  func.func @transform_0(%arg0: i32, %arg1: i32) -> (i32, i32) {
    %c0_i32 = arith.constant 0 : i32
    %c0_i32_0 = arith.constant 0 : i32
    return %arg0, %c0_i32 : i32, i32
  }
  func.func @transform_1(%arg0: i32, %arg1: i32) -> (i32, i32) {
    %c0_i32 = arith.constant 0 : i32
    %c0_i32_0 = arith.constant 0 : i32
    return %c0_i32, %arg1 : i32, i32
  }
  func.func @transform_2(%arg0: i32, %arg1: i32) -> (i32, i32) {
    %c0_i32 = arith.constant 0 : i32
    %c0_i32_0 = arith.constant 0 : i32
    return %c0_i32, %arg1 : i32, i32
  }
  func.func @transform_3(%arg0: i32, %arg1: i32) -> (i32, i32) {
    %c0_i32 = arith.constant 0 : i32
    return %arg0, %arg1 : i32, i32
  }
}

</mosaic_0001>

<bundles_post_ra>
// kernel: down_encoder_block2d_forward.9
= control target key start
LH: loop header
LB: loop body
LE: loop exit
PB: predicated region body
PF: predicated region fallthrough
CT: control target
= control target key end

     0   :  { %8 = vsyncpa [#allocation3], 0  ;;  %s1477_s0 = inlined_call_operand.hbm [shape: f32[2,256,32], index: 0, kind: input, shape index: {}]   ;;  %s1478_s1 = inlined_call_operand.vmem [shape: f32[2,1,32], index: 1, kind: input, shape index: {}]   ;;  %s1479_s2 = inlined_call_operand.vmem [shape: f32[2,1,32], index: 2, kind: input, shape index: {}]   ;;  %s1480_s3 = inlined_call_operand.vmem [shape: f32[2,256,32], index: 3, kind: output, shape index: {}]  }
   0x1   :  { %10 = vsyncpa [#allocation3 + $0x1], 0  ;;  %s1034_s12 = smov 0   ;;  %s1036_s13 = smov 0  }
   0x2   :  { %s1038_s14 = smov 0   ;;  %s1040_s15 = smov 0  }
   0x3   :  { %s1042_s16 = smov 0   ;;  %s1044_s17 = smov 0  }
   0x4 LB: > { %s727_s18 = sadd.s32 4294967295, %s1009_s17   ;;  %s28_s19 = sadd.s32 1, %s1005_s16  ;;  %s1009_s17 = sphi %s1044_s17, %s16_s17   ;;  %s1005_s16 = sphi %s1042_s16, %s1488_s16   ;;  %s1001_s15 = sphi %s1040_s15, %s1487_s15   ;;  %s997_s14 = sphi %s1038_s14, %s1486_s14   ;;  %s993_s13 = sphi %s1036_s13, %s1485_s13   ;;  %s989_s12 = sphi %s1034_s12, %s1484_s12  }
   0x5   : > { %p30_p0 = scmp.ge.s32.totalorder %s28_s19, 2  ;;  %s37_s20 = sadd.s32 1, %s997_s14 }
   0x6   : > { %p44_p1 = scmp.ne.s32.totalorder %s997_s14, %s993_s13  ;;  %p45_p2 = scmp.eq.s32.totalorder %s1009_s17, 0 }
   0x7   : > { %s1490_s19 = smov (%p30_p0, %s28_s19), 0  ;;  %p50_p4 = scmp.ne.s32.totalorder %s993_s13, %s989_s12 }
   0x8   : > { %p1070_p3 = por %p45_p2, %p44_p1  ;;  %s32_s22 = ssub.s32 %s1005_s16, %s1490_s19 }
   0x9   : > { %p51_p5 = scmp.eq.s32.totalorder %s727_s18, 0  ;;  %p35_p6 = scmp.eq.s32.totalorder %s32_s22, 0 }
   0xa   : > { %p750_p8 = scmp.lt.s32.totalorder %s1009_s17, 2  ;;  %s154_s25 = sand.u32 1, %s997_s14  }
   0xb   : > { %p1077_p7 = por %p51_p5, %p50_p4  ;;  %s742_s26 = sshll.u32 %s1005_s16, 12 }
   0xc   : > { %s1083_s24 = scalar_select %p35_p6, %s997_s14, %s37_s20  }
   0xd   : > { %s731_s27 = sshll.u32 %s154_s25, 8  ;;  %s1090_s30 = scalar_lea.hbm %s1477_s0, %s742_s26 }
   0xe   : > { %s158_s4 = scalar_lea.vmem [#allocation2], %s731_s27  ;;  %p1094_p9 = pnand %p750_p8, %p1070_p3 }
   0xf   : > { %s167_s5 = sshll.u32 %s158_s4, 4  ;;  %s1100_s7 = scalar_lea.sflag [#allocation3], %s154_s25  ;;  %s1098_s5 = int_to_ptr.vmem [resolvable:$true] %s167_s5 }
  0x10   : > { %s929_s8 = scalar_lea.hbm %s1090_s30, 4096  ;;  %p931_p11 = pneg %p1094_p9 }
  0x11   : > { %p930_p10 = scmp.ne.s32.totalorder %s1090_s30, %s929_s8  ;;  %s934_s11 = scalar_lea.hbm %s1477_s0, 8192 }
  0x12   : > { %p935_p0 = scmp.lt.u32.totalorder %s1090_s30, %s1477_s0  ;;  %p936_p1 = scmp.lt.u32.totalorder %s934_s11, %s929_s8 }
  0x13   : > { %p932_p12 = pnand %p931_p11, %p930_p10  ;;  %p938_p3 = scmp.lt.u32.totalorder %s929_s8, %s1090_s30 }
  0x14   : > { %p937_p2 = por %p936_p1, %p935_p0 }
  0x15   : > { %p933_p13 = pneg %p932_p12 }
  0x16   : > { %p939_p4 = por %p938_p3, %p937_p2 }
  0x18   : > { %p940_p5 = pnand %p939_p4, %p933_p13 }
  0x1a   : > { %943 = shalt.err (!%p940_p5)
}
  0x1b   : > { %s944_s20 = scalar_lea.vmem %s1098_s5, 4096  ;;  %s1011_s21 = smov [#allocation2]  }
  0x1c   : > { %p945_p6 = scmp.ne.s32.totalorder %s1098_s5, %s944_s20  ;;  %s949_s22 = sshll.u32 %s1011_s21, 4  ;;  %s950_s22 = int_to_ptr.vmem [resolvable:$false] %s949_s22 }
  0x1d   : > { %s951_s25 = scalar_lea.vmem %s950_s22, 8192  ;;  %p952_p12 = scmp.lt.s32.totalorder %s1098_s5, %s950_s22 }
  0x1e   : > { %p947_p8 = pnand %p945_p6, %p931_p11  ;;  %p953_p0 = scmp.lt.s32.totalorder %s951_s25, %s944_s20 }
  0x20   : > { %p948_p10 = pneg %p947_p8  ;;  %p954_p1 = por %p953_p0, %p952_p12 }
  0x22   : > { %p955_p2 = pnand %p954_p1, %p948_p10 }
  0x24   : > { %958 = shalt.err (!%p955_p2)
}
  0x25   : > { %s1012_s26 = smov 128   ;;  %s1013_s27 = smov 8  }
  0x26   : > { %749 = dma.hbm_to_vmem [thread:$0]  (!%p1094_p9), %s1090_s30, 4096, %s1098_s5, %s1100_s7, %s1012_s26, %s1012_s26, %s1013_s27  }
  0x27   : > { %p734_p11 = scmp.ge.s32.totalorder %s1009_s17, 1  ;;  %p187_p13 = scmp.lt.s32.totalorder %s1009_s17, 3 }
  0x29   : > { %p188_p3 = pnand %p734_p11, %p187_p13 }
  0x2a   : > { %s193_s28 = sand.u32 (!%p188_p3), 1, %s993_s13  }
  0x2b   : > { %191 = sbr.rel (%p188_p3) target bundleno = 148 (0x94), region = 32  ;;  %s735_s29 = sshll.u32 (!%p188_p3), %s193_s28, 8 }
  0x2c   : > { %s194_s4 = scalar_lea.sflag (!%p188_p3), [#allocation3], %s193_s28  ;;  %s1131_s8 = scalar_lea.vmem (!%p188_p3), [#allocation2], %s735_s29 }
  0x32   : > { %984 = dma.done.wait (%p1077_p7), %s194_s4, 4096  }
  0x33   : > { %986 = vsyncadd (%p1077_p7), %s194_s4, 4294963200  ;;  %p231_p9 = scmp.lt.s32.totalorder %s1001_s15, 1  ;;  %v247_v0 = vld [vmem:[%s1131_s8] sm:$0xff]  ;;  %v248_v4 = vld [vmem:[%s1131_s8 + $0x8] sm:$0xff]  ;;  %vm581_vm0 = vcmask 261120  }
  0x34   : > { %v249_v5 = vld [vmem:[%s1131_s8 + $0x10] sm:$0xff]  ;;  %v250_v6 = vld [vmem:[%s1131_s8 + $0x18] sm:$0xff]  ;;  %v251_v10 = vld [vmem:[%s1131_s8 + $0x20] sm:$0xff] }
  0x35   : > { %s1492_s15 = smov (!%p231_p9, %s1001_s15), 1  ;;  %v252_v11 = vld [vmem:[%s1131_s8 + $0x28] sm:$0xff]  ;;  %v253_v12 = vld [vmem:[%s1131_s8 + $0x30] sm:$0xff]  ;;  %v254_v17 = vld [vmem:[%s1131_s8 + $0x38] sm:$0xff] }
  0x36   : > { %s233_s6 = scalar_lea.vmem %s1478_s1, %s1492_s15  ;;  %s236_s9 = scalar_lea.vmem %s1479_s2, %s1492_s15  ;;  %v255_v26 = vld [vmem:[%s1131_s8 + $0x40] sm:$0xff]  ;;  %v256_v31 = vld [vmem:[%s1131_s8 + $0x48] sm:$0xff]  ;;  %v257_v32 = vld [vmem:[%s1131_s8 + $0x50] sm:$0xff] }
  0x37   : > { %v1150_v1 = vld [vmem:[%s233_s6] ss:$0 sm:$0xff]  ;;  %v258_v33 = vld [vmem:[%s1131_s8 + $0x58] sm:$0xff]  ;;  %v260_v52 = vld [vmem:[%s1131_s8 + $0x68] sm:$0xff]  ;;  %s743_s10 = sshll.u32 %s1492_s15, 8 }
  0x38   : > { %v1152_v2 = vld [vmem:[%s236_s9] ss:$0 sm:$0xff]  ;;  %v286_v3 = vmul.f32 %v1150_v1, %v247_v0  ;;  %v287_v7 = vmul.f32 %v1150_v1, %v248_v4  ;;  %v288_v8 = vmul.f32 %v1150_v1, %v249_v5  ;;  %v289_v9 = vmul.f32 %v1150_v1, %v250_v6  ;;  %v261_v59 = vld [vmem:[%s1131_s8 + $0x70] sm:$0xff]  ;;  %v262_v4 = vld [vmem:[%s1131_s8 + $0x78] sm:$0xff]  ;;  %s1298_s12 = scalar_lea.vmem %s1480_s3, %s743_s10 }
  0x39   : > { %v290_v14 = vmul.f32 %v1150_v1, %v251_v10  ;;  %v291_v15 = vmul.f32 %v1150_v1, %v252_v11  ;;  %v292_v16 = vmul.f32 %v1150_v1, %v253_v12  ;;  %v293_v21 = vmul.f32 %v1150_v1, %v254_v17  ;;  %v259_v38 = vld [vmem:[%s1131_s8 + $0x60] sm:$0xff]  ;;  %v265_v10 = vld [vmem:[%s1131_s8 + $0x90] sm:$0xff] }
  0x3a   : > { %v1165_v13 = vadd.f32 %v1152_v2, %v286_v3  ;;  %v1172_v18 = vadd.f32 %v1152_v2, %v287_v7  ;;  %v1175_v19 = vadd.f32 %v1152_v2, %v288_v8  ;;  %v1178_v20 = vadd.f32 %v1152_v2, %v289_v9  ;;  %v263_v8 = vld [vmem:[%s1131_s8 + $0x80] sm:$0xff]  ;;  %v264_v9 = vld [vmem:[%s1131_s8 + $0x88] sm:$0xff] }
  0x3b   : > { %v1183_v23 = vadd.f32 %v1152_v2, %v290_v14  ;;  %v1186_v24 = vadd.f32 %v1152_v2, %v291_v15  ;;  %v1189_v25 = vadd.f32 %v1152_v2, %v292_v16  ;;  %v1196_v30 = vadd.f32 %v1152_v2, %v293_v21 }
  0x3c   : > { %v357_v22 = vsub.f32 0.0, %v1165_v13  ;;  %v358_v27 = vsub.f32 0.0, %v1172_v18  ;;  %v359_v28 = vsub.f32 0.0, %v1175_v19  ;;  %v360_v29 = vsub.f32 0.0, %v1178_v20 }
  0x3d   : > { %v361_v35 = vsub.f32 0.0, %v1183_v23  ;;  %v362_v36 = vsub.f32 0.0, %v1186_v24  ;;  %v363_v37 = vsub.f32 0.0, %v1189_v25  ;;  %v294_v42 = vmul.f32 %v1150_v1, %v255_v26 }
  0x3e   : > { %v389_v34 = vmul.f32 1.442695, %v357_v22  ;;  %v391_v39 = vmul.f32 1.442695, %v358_v27  ;;  %v393_v40 = vmul.f32 1.442695, %v359_v28  ;;  %v295_v48 = vmul.f32 %v1150_v1, %v256_v31 }
  0x3f   : > { %v395_v41 = vmul.f32 1.442695, %v360_v29  ;;  %v397_v43 = vmul.f32 1.442695, %v361_v35  ;;  %v399_v44 = vmul.f32 1.442695, %v362_v36  ;;  %v1208_v47 = vadd.f32 %v1152_v2, %v294_v42 }
  0x40   : > { %801 = vpow2.f32 %v389_v34  ;;  %v401_v45 = vmul.f32 1.442695, %v363_v37  ;;  %v364_v46 = vsub.f32 0.0, %v1196_v30  ;;  %v296_v49 = vmul.f32 %v1150_v1, %v257_v32 }
  0x41   : > { %803 = vpow2.f32 %v391_v39  ;;  %v297_v50 = vmul.f32 %v1150_v1, %v258_v33  ;;  %v298_v51 = vmul.f32 %v1150_v1, %v259_v38  ;;  %v365_v54 = vsub.f32 0.0, %v1208_v47 }
  0x42   : > { %805 = vpow2.f32 %v393_v40  ;;  %v403_v53 = vmul.f32 1.442695, %v364_v46  ;;  %v1217_v55 = vadd.f32 %v1152_v2, %v295_v48  ;;  %v1220_v56 = vadd.f32 %v1152_v2, %v296_v49  ;;  %v266_v48 = vld [vmem:[%s1131_s8 + $0x98] sm:$0xff]  ;;  %v267_v49 = vld [vmem:[%s1131_s8 + $0xa0] sm:$0xff] }
  0x43   : > { %807 = vpow2.f32 %v395_v41  ;;  %v1223_v57 = vadd.f32 %v1152_v2, %v297_v50  ;;  %v1226_v58 = vadd.f32 %v1152_v2, %v298_v51  ;;  %v405_v60 = vmul.f32 1.442695, %v365_v54  ;;  %v268_v54 = vld [vmem:[%s1131_s8 + $0xa8] sm:$0xff] }
  0x44   : > { %809 = vpow2.f32 %v397_v43  ;;  %v366_v61 = vsub.f32 0.0, %v1217_v55  ;;  %v299_v62 = vmul.f32 %v1150_v1, %v260_v52  ;;  %v367_v63 = vsub.f32 0.0, %v1220_v56 }
  0x45   : > { %811 = vpow2.f32 %v399_v44  ;;  %v368_v0 = vsub.f32 0.0, %v1223_v57  ;;  %v369_v3 = vsub.f32 0.0, %v1226_v58  ;;  %v300_v7 = vmul.f32 %v1150_v1, %v261_v59 }
  0x46   : > { %813 = vpow2.f32 %v401_v45  ;;  %v407_v5 = vmul.f32 1.442695, %v366_v61  ;;  %v1236_v6 = vadd.f32 %v1152_v2, %v299_v62  ;;  %v409_v11 = vmul.f32 1.442695, %v367_v63 }
  0x47   : > { %815 = vpow2.f32 %v403_v53  ;;  %v411_v12 = vmul.f32 1.442695, %v368_v0  ;;  %v413_v14 = vmul.f32 1.442695, %v369_v3  ;;  %v1243_v15 = vadd.f32 %v1152_v2, %v300_v7 }
  0x48   : > { %817 = vpow2.f32 %v405_v60  ;;  %v301_v16 = vmul.f32 %v1150_v1, %v262_v4  ;;  %v370_v21 = vsub.f32 0.0, %v1236_v6  ;;  %v302_v22 = vmul.f32 %v1150_v1, %v263_v8 }
  0x49   : > { %819 = vpow2.f32 %v407_v5  ;;  %v303_v26 = vmul.f32 %v1150_v1, %v264_v9  ;;  %v371_v29 = vsub.f32 0.0, %v1243_v15  ;;  %v304_v31 = vmul.f32 %v1150_v1, %v265_v10  ;;  %v269_v5 = vld [vmem:[%s1131_s8 + $0xb0] sm:$0xff] }
  0x4a   : > { %v802_v17 = vpop.eup %801  ;;  %821 = vpow2.f32 %v409_v11  ;;  %v1252_v34 = vadd.f32 %v1152_v2, %v301_v16  ;;  %v1255_v35 = vadd.f32 %v1152_v2, %v302_v22  ;;  %v1262_v45 = vmul.f32 1.442695, %v370_v21 }
  0x4b   : > { %v804_v27 = vpop.eup %803  ;;  %v453_v28 = vadd.f32 1.0, %v802_v17  ;;  %823 = vpow2.f32 %v411_v12  ;;  %v1258_v38 = vadd.f32 %v1152_v2, %v303_v26  ;;  %v1265_v46 = vadd.f32 %v1152_v2, %v304_v31 }
  0x4c   : > { %v806_v32 = vpop.eup %805  ;;  %v454_v33 = vadd.f32 1.0, %v804_v27  ;;  %825 = vpow2.f32 %v413_v14  ;;  %v372_v41 = vsub.f32 0.0, %v1252_v34  ;;  %v373_v42 = vsub.f32 0.0, %v1255_v35 }
  0x4d   : > { %v808_v36 = vpop.eup %807  ;;  %827 = vrcp.f32 %v453_v28  ;;  %v455_v37 = vadd.f32 1.0, %v806_v32  ;;  %v1269_v52 = vmul.f32 1.442695, %v371_v29  ;;  %v374_v53 = vsub.f32 0.0, %v1258_v38 }
  0x4e   : > { %v810_v39 = vpop.eup %809  ;;  %829 = vrcp.f32 %v454_v33  ;;  %v456_v40 = vadd.f32 1.0, %v808_v36  ;;  %v1273_v61 = vmul.f32 1.442695, %v372_v41  ;;  %v1275_v62 = vmul.f32 1.442695, %v373_v42 }
  0x4f   : > { %v812_v43 = vpop.eup %811  ;;  %831 = vrcp.f32 %v455_v37  ;;  %v457_v44 = vadd.f32 1.0, %v810_v39  ;;  %v305_v3 = vmul.f32 %v1150_v1, %v266_v48  ;;  %v306_v4 = vmul.f32 %v1150_v1, %v267_v49  ;;  %v270_v39 = vld [vmem:[%s1131_s8 + $0xb8] sm:$0xff]  ;;  %v272_v48 = vld [vmem:[%s1131_s8 + $0xc8] sm:$0xff] }
  0x50   : > { %v814_v50 = vpop.eup %813  ;;  %833 = vrcp.f32 %v456_v40  ;;  %v458_v51 = vadd.f32 1.0, %v812_v43  ;;  %v375_v9 = vsub.f32 0.0, %v1265_v46  ;;  %v307_v10 = vmul.f32 %v1150_v1, %v268_v54  ;;  %v271_v40 = vld [vmem:[%s1131_s8 + $0xc0] sm:$0xff] }
  0x51   : > { %v816_v59 = vpop.eup %815  ;;  %835 = vrcp.f32 %v457_v44  ;;  %v459_v60 = vadd.f32 1.0, %v814_v50  ;;  %v1284_v14 = vadd.f32 %v1152_v2, %v305_v3  ;;  %v1287_v16 = vadd.f32 %v1152_v2, %v306_v4 }
  0x52   : > { %v818_v63 = vpop.eup %817  ;;  %837 = vrcp.f32 %v458_v51  ;;  %v460_v0 = vadd.f32 1.0, %v816_v59  ;;  %v1290_v22 = vadd.f32 %v1152_v2, %v307_v10  ;;  %v308_v26 = vmul.f32 %v1150_v1, %v269_v5 }
  0x53   : > { %v820_v7 = vpop.eup %819  ;;  %839 = vrcp.f32 %v459_v60  ;;  %v461_v8 = vadd.f32 1.0, %v818_v63  ;;  %v376_v29 = vsub.f32 0.0, %v1284_v14  ;;  %v377_v31 = vsub.f32 0.0, %v1287_v16 }
  0x54   : > { %v822_v11 = vpop.eup %821  ;;  %841 = vrcp.f32 %v460_v0  ;;  %v462_v12 = vadd.f32 1.0, %v820_v7  ;;  %v423_v36 = vmul.f32 1.442695, %v374_v53  ;;  %v1301_v37 = vadd.f32 %v1152_v2, %v308_v26 }
  0x55   : > { %v824_v17 = vpop.eup %823  ;;  %843 = vrcp.f32 %v461_v8  ;;  %v463_v21 = vadd.f32 1.0, %v822_v11  ;;  %v425_v43 = vmul.f32 1.442695, %v375_v9  ;;  %v378_v44 = vsub.f32 0.0, %v1290_v22 }
  0x56   : > { %v826_v27 = vpop.eup %825  ;;  %845 = vrcp.f32 %v462_v12  ;;  %v464_v28 = vadd.f32 1.0, %v824_v17  ;;  %v427_v51 = vmul.f32 1.442695, %v376_v29  ;;  %v429_v53 = vmul.f32 1.442695, %v377_v31 }
  0x57   : > { %v828_v32 = vpop.eup %827  ;;  %847 = vrcp.f32 %v463_v21  ;;  %v465_v33 = vadd.f32 1.0, %v826_v27  ;;  %v310_v60 = vmul.f32 %v1150_v1, %v271_v40  ;;  %v379_v0 = vsub.f32 0.0, %v1301_v37 }
  0x58   : > { %v830_v41 = vpop.eup %829  ;;  %v549_v42 = vmul.f32 %v828_v32, %v1165_v13  ;;  %849 = vrcp.f32 %v464_v28  ;;  %v309_v13 = vmul.f32 %v1150_v1, %v270_v39  ;;  %v311_v3 = vmul.f32 %v1150_v1, %v272_v48  ;;  %v273_v28 = vld [vmem:[%s1131_s8 + $0xd0] sm:$0xff]  ;;  %v274_v32 = vld [vmem:[%s1131_s8 + $0xd8] sm:$0xff] }
  0x59   : > { %v832_v49 = vpop.eup %831  ;;  %v550_v50 = vmul.f32 %v830_v41, %v1172_v18  ;;  %851 = vrcp.f32 %v465_v33  ;;  %v431_v7 = vmul.f32 1.442695, %v378_v44  ;;  %v276_v41 = vld [vmem:[%s1131_s8 + $0xe8] sm:$0xff]  ;;  %v277_v44 = vld [vmem:[%s1131_s8 + $0xf0] sm:$0xff] }
  0x5a   : > { %v834_v54 = vpop.eup %833  ;;  %582 = vst.msk [vmem:[%s1298_s12] sm:$0xff] %vm581_vm0, %v549_v42  ;;  %v551_v59 = vmul.f32 %v832_v49, %v1175_v19  ;;  %853 = vpow2.f32 %v1262_v45  ;;  %v1326_v4 = vadd.f32 %v1152_v2, %v309_v13 }
  0x5b   : > { %v836_v63 = vpop.eup %835  ;;  %583 = vst.msk [vmem:[%s1298_s12 + $0x8] sm:$0xff] %vm581_vm0, %v550_v50  ;;  %v552_v18 = vmul.f32 %v834_v54, %v1178_v20  ;;  %855 = vpow2.f32 %v1269_v52  ;;  %v1329_v20 = vadd.f32 %v1152_v2, %v310_v60  ;;  %v278_v54 = vld [vmem:[%s1131_s8 + $0xf8] sm:$0xff] }
  0x5c   : > { %v838_v19 = vpop.eup %837  ;;  %584 = vst.msk [vmem:[%s1298_s12 + $0x10] sm:$0xff] %vm581_vm0, %v551_v59  ;;  %v553_v45 = vmul.f32 %v836_v63, %v1183_v23  ;;  %857 = vpow2.f32 %v1273_v61  ;;  %v1336_v23 = vadd.f32 %v1152_v2, %v311_v3  ;;  %v380_v9 = vsub.f32 0.0, %v1326_v4 }
  0x5d   : > { %v840_v52 = vpop.eup %839  ;;  %585 = vst.msk [vmem:[%s1298_s12 + $0x18] sm:$0xff] %vm581_vm0, %v552_v18  ;;  %v554_v5 = vmul.f32 %v838_v19, %v1186_v24  ;;  %859 = vpow2.f32 %v1275_v62  ;;  %v381_v10 = vsub.f32 0.0, %v1329_v20  ;;  %v433_v62 = vmul.f32 1.442695, %v379_v0 }
  0x5e   : > { %v842_v61 = vpop.eup %841  ;;  %586 = vst.msk [vmem:[%s1298_s12 + $0x20] sm:$0xff] %vm581_vm0, %v553_v45  ;;  %v555_v8 = vmul.f32 %v840_v52, %v1189_v25  ;;  %861 = vpow2.f32 %v423_v36  ;;  %v382_v12 = vsub.f32 0.0, %v1336_v23  ;;  %v435_v21 = vmul.f32 1.442695, %v380_v9  ;;  %v275_v36 = vld [vmem:[%s1131_s8 + $0xe0] sm:$0xff] }
  0x5f   : > { %v844_v11 = vpop.eup %843  ;;  %587 = vst.msk [vmem:[%s1298_s12 + $0x28] sm:$0xff] %vm581_vm0, %v554_v5  ;;  %v556_v24 = vmul.f32 %v842_v61, %v1196_v30  ;;  %863 = vpow2.f32 %v425_v43  ;;  %v437_v27 = vmul.f32 1.442695, %v381_v10  ;;  %v316_v63 = vmul.f32 %v1150_v1, %v277_v44 }
  0x60   : > { %v846_v17 = vpop.eup %845  ;;  %588 = vst.msk [vmem:[%s1298_s12 + $0x30] sm:$0xff] %vm581_vm0, %v555_v8  ;;  %v557_v25 = vmul.f32 %v844_v11, %v1208_v47  ;;  %865 = vpow2.f32 %v427_v51  ;;  %v439_v47 = vmul.f32 1.442695, %v382_v12  ;;  %v317_v5 = vmul.f32 %v1150_v1, %v278_v54 }
  0x61   : > { %v848_v26 = vpop.eup %847  ;;  %589 = vst.msk [vmem:[%s1298_s12 + $0x38] sm:$0xff] %vm581_vm0, %v556_v24  ;;  %v558_v30 = vmul.f32 %v846_v17, %v1217_v55  ;;  %867 = vpow2.f32 %v429_v53  ;;  %v315_v53 = vmul.f32 %v1150_v1, %v276_v41  ;;  %v1392_v24 = vadd.f32 %v1152_v2, %v316_v63 }
  0x62   : > { %v850_v29 = vpop.eup %849  ;;  %590 = vst.msk [vmem:[%s1298_s12 + $0x40] sm:$0xff] %vm581_vm0, %v557_v25  ;;  %v559_v31 = vmul.f32 %v848_v26, %v1220_v56  ;;  %869 = vpow2.f32 %v431_v7  ;;  %v312_v56 = vmul.f32 %v1150_v1, %v273_v28 }
  0x63   : > { %v852_v33 = vpop.eup %851  ;;  %591 = vst.msk [vmem:[%s1298_s12 + $0x48] sm:$0xff] %vm581_vm0, %v558_v30  ;;  %v560_v55 = vmul.f32 %v850_v29, %v1223_v57  ;;  %871 = vpow2.f32 %v433_v62  ;;  %v313_v57 = vmul.f32 %v1150_v1, %v274_v32  ;;  %v1388_v8 = vadd.f32 %v1152_v2, %v315_v53 }
  0x64   : > { %v854_v39 = vpop.eup %853  ;;  %592 = vst.msk [vmem:[%s1298_s12 + $0x50] sm:$0xff] %vm581_vm0, %v559_v31  ;;  %v561_v40 = vmul.f32 %v852_v33, %v1226_v58  ;;  %873 = vpow2.f32 %v435_v21  ;;  %v314_v58 = vmul.f32 %v1150_v1, %v275_v36  ;;  %v1377_v60 = vadd.f32 %v1152_v2, %v312_v56 }
  0x65   : > { %v856_v42 = vpop.eup %855  ;;  %593 = vst.msk [vmem:[%s1298_s12 + $0x58] sm:$0xff] %vm581_vm0, %v560_v55  ;;  %v466_v43 = vadd.f32 1.0, %v854_v39  ;;  %875 = vpow2.f32 %v437_v27  ;;  %v1381_v3 = vadd.f32 %v1152_v2, %v313_v57  ;;  %v1396_v1 = vadd.f32 %v1152_v2, %v317_v5 }
  0x66   : > { %v858_v48 = vpop.eup %857  ;;  %594 = vst.msk [vmem:[%s1298_s12 + $0x60] sm:$0xff] %vm581_vm0, %v561_v40  ;;  %v467_v49 = vadd.f32 1.0, %v856_v42  ;;  %877 = vpow2.f32 %v439_v47  ;;  %v1384_v52 = vadd.f32 %v1152_v2, %v314_v58  ;;  %v383_v11 = vsub.f32 0.0, %v1377_v60 }
  0x67   : > { %v860_v50 = vpop.eup %859  ;;  %879 = vrcp.f32 %v466_v43  ;;  %v468_v51 = vadd.f32 1.0, %v858_v48  ;;  %v384_v17 = vsub.f32 0.0, %v1381_v3  ;;  %v386_v28 = vsub.f32 0.0, %v1388_v8 }
  0x68   : > { %v862_v59 = vpop.eup %861  ;;  %881 = vrcp.f32 %v467_v49  ;;  %v469_v13 = vadd.f32 1.0, %v860_v50  ;;  %v385_v26 = vsub.f32 0.0, %v1384_v52  ;;  %v441_v47 = vmul.f32 1.442695, %v383_v11 }
  0x69   : > { %v864_v18 = vpop.eup %863  ;;  %883 = vrcp.f32 %v468_v51  ;;  %v470_v0 = vadd.f32 1.0, %v862_v59  ;;  %v387_v32 = vsub.f32 0.0, %v1392_v24  ;;  %v443_v55 = vmul.f32 1.442695, %v384_v17 }
  0x6a   : > { %v866_v19 = vpop.eup %865  ;;  %885 = vrcp.f32 %v469_v13  ;;  %v471_v45 = vadd.f32 1.0, %v864_v18  ;;  %v388_v36 = vsub.f32 0.0, %v1396_v1  ;;  %v445_v56 = vmul.f32 1.442695, %v385_v26 }
  0x6b   : > { %v868_v7 = vpop.eup %867  ;;  %887 = vrcp.f32 %v470_v0  ;;  %v472_v61 = vadd.f32 1.0, %v866_v19  ;;  %v447_v43 = vmul.f32 1.442695, %v386_v28  ;;  %v449_v48 = vmul.f32 1.442695, %v387_v32 }
  0x6c   : > { %v870_v9 = vpop.eup %869  ;;  %889 = vrcp.f32 %v471_v45  ;;  %v473_v10 = vadd.f32 1.0, %v868_v7  ;;  %v451_v58 = vmul.f32 1.442695, %v388_v36 }
  0x6d   : > { %v872_v62 = vpop.eup %871  ;;  %891 = vrcp.f32 %v472_v61  ;;  %v474_v12 = vadd.f32 1.0, %v870_v9 }
  0x6e   : > { %v874_v25 = vpop.eup %873  ;;  %893 = vrcp.f32 %v473_v10  ;;  %v475_v21 = vadd.f32 1.0, %v872_v62 }
  0x6f   : > { %v876_v30 = vpop.eup %875  ;;  %895 = vrcp.f32 %v474_v12  ;;  %v476_v27 = vadd.f32 1.0, %v874_v25 }
  0x70   : > { %v878_v29 = vpop.eup %877  ;;  %897 = vrcp.f32 %v475_v21  ;;  %v477_v31 = vadd.f32 1.0, %v876_v30 }
  0x71   : > { %v880_v33 = vpop.eup %879  ;;  %899 = vrcp.f32 %v476_v27  ;;  %v478_v2 = vadd.f32 1.0, %v878_v29 }
  0x72   : > { %v882_v39 = vpop.eup %881  ;;  %v562_v40 = vmul.f32 %v880_v33, %v1236_v6  ;;  %901 = vrcp.f32 %v477_v31 }
  0x73   : > { %v884_v41 = vpop.eup %883  ;;  %v563_v42 = vmul.f32 %v882_v39, %v1243_v15  ;;  %903 = vrcp.f32 %v478_v2 }
  0x74   : > { %v886_v57 = vpop.eup %885  ;;  %595 = vst.msk [vmem:[%s1298_s12 + $0x68] sm:$0xff] %vm581_vm0, %v562_v40  ;;  %v564_v44 = vmul.f32 %v884_v41, %v1252_v34  ;;  %905 = vpow2.f32 %v441_v47 }
  0x75   : > { %v888_v49 = vpop.eup %887  ;;  %596 = vst.msk [vmem:[%s1298_s12 + $0x70] sm:$0xff] %vm581_vm0, %v563_v42  ;;  %v565_v6 = vmul.f32 %v886_v57, %v1255_v35  ;;  %907 = vpow2.f32 %v443_v55 }
  0x76   : > { %v890_v15 = vpop.eup %889  ;;  %597 = vst.msk [vmem:[%s1298_s12 + $0x78] sm:$0xff] %vm581_vm0, %v564_v44  ;;  %v566_v50 = vmul.f32 %v888_v49, %v1258_v38  ;;  %909 = vpow2.f32 %v445_v56 }
  0x77   : > { %v892_v51 = vpop.eup %891  ;;  %598 = vst.msk [vmem:[%s1298_s12 + $0x80] sm:$0xff] %vm581_vm0, %v565_v6  ;;  %v567_v34 = vmul.f32 %v890_v15, %v1265_v46  ;;  %911 = vpow2.f32 %v447_v43 }
  0x78   : > { %v894_v53 = vpop.eup %893  ;;  %599 = vst.msk [vmem:[%s1298_s12 + $0x88] sm:$0xff] %vm581_vm0, %v566_v50  ;;  %v568_v35 = vmul.f32 %v892_v51, %v1284_v14  ;;  %913 = vpow2.f32 %v449_v48 }
  0x79   : > { %v896_v54 = vpop.eup %895  ;;  %600 = vst.msk [vmem:[%s1298_s12 + $0x90] sm:$0xff] %vm581_vm0, %v567_v34  ;;  %v569_v38 = vmul.f32 %v894_v53, %v1287_v16  ;;  %915 = vpow2.f32 %v451_v58 }
  0x7a   : > { %v898_v59 = vpop.eup %897  ;;  %601 = vst.msk [vmem:[%s1298_s12 + $0x98] sm:$0xff] %vm581_vm0, %v568_v35  ;;  %v570_v46 = vmul.f32 %v896_v54, %v1290_v22 }
  0x7b   : > { %v900_v13 = vpop.eup %899  ;;  %602 = vst.msk [vmem:[%s1298_s12 + $0xa0] sm:$0xff] %vm581_vm0, %v569_v38  ;;  %v571_v14 = vmul.f32 %v898_v59, %v1301_v37 }
  0x7c   : > { %v902_v63 = vpop.eup %901  ;;  %603 = vst.msk [vmem:[%s1298_s12 + $0xa8] sm:$0xff] %vm581_vm0, %v570_v46  ;;  %v572_v18 = vmul.f32 %v900_v13, %v1326_v4 }
  0x7d   : > { %v904_v0 = vpop.eup %903  ;;  %604 = vst.msk [vmem:[%s1298_s12 + $0xb0] sm:$0xff] %vm581_vm0, %v571_v14  ;;  %v573_v16 = vmul.f32 %v902_v63, %v1329_v20 }
  0x7e   : > { %v906_v19 = vpop.eup %905  ;;  %605 = vst.msk [vmem:[%s1298_s12 + $0xb8] sm:$0xff] %vm581_vm0, %v572_v18  ;;  %v574_v22 = vmul.f32 %v904_v0, %v1336_v23 }
  0x7f   : > { %v908_v45 = vpop.eup %907  ;;  %606 = vst.msk [vmem:[%s1298_s12 + $0xc0] sm:$0xff] %vm581_vm0, %v573_v16  ;;  %v479_v5 = vadd.f32 1.0, %v906_v19 }
  0x80   : > { %v910_v37 = vpop.eup %909  ;;  %607 = vst.msk [vmem:[%s1298_s12 + $0xc8] sm:$0xff] %vm581_vm0, %v574_v22  ;;  %v480_v7 = vadd.f32 1.0, %v908_v45 }
  0x81   : > { %v912_v61 = vpop.eup %911  ;;  %917 = vrcp.f32 %v479_v5  ;;  %v481_v4 = vadd.f32 1.0, %v910_v37 }
  0x82   : > { %v914_v9 = vpop.eup %913  ;;  %919 = vrcp.f32 %v480_v7  ;;  %v482_v20 = vadd.f32 1.0, %v912_v61 }
  0x83   : > { %v916_v10 = vpop.eup %915  ;;  %921 = vrcp.f32 %v481_v4  ;;  %v483_v11 = vadd.f32 1.0, %v914_v9 }
  0x84   : > { %923 = vrcp.f32 %v482_v20  ;;  %v484_v23 = vadd.f32 1.0, %v916_v10 }
  0x85   : > { %925 = vrcp.f32 %v483_v11 }
  0x86   : > { %927 = vrcp.f32 %v484_v23 }
  0x8b   : > { %v918_v62 = vpop.eup %917 }
  0x8c   : > { %v920_v12 = vpop.eup %919  ;;  %v575_v17 = vmul.f32 %v918_v62, %v1377_v60 }
  0x8d   : > { %v922_v25 = vpop.eup %921  ;;  %v576_v21 = vmul.f32 %v920_v12, %v1381_v3 }
  0x8e   : > { %v924_v26 = vpop.eup %923  ;;  %608 = vst.msk [vmem:[%s1298_s12 + $0xd0] sm:$0xff] %vm581_vm0, %v575_v17  ;;  %v577_v30 = vmul.f32 %v922_v25, %v1384_v52 }
  0x8f   : > { %v926_v27 = vpop.eup %925  ;;  %609 = vst.msk [vmem:[%s1298_s12 + $0xd8] sm:$0xff] %vm581_vm0, %v576_v21  ;;  %v578_v28 = vmul.f32 %v924_v26, %v1388_v8 }
  0x90   : > { %v928_v29 = vpop.eup %927  ;;  %610 = vst.msk [vmem:[%s1298_s12 + $0xe0] sm:$0xff] %vm581_vm0, %v577_v30  ;;  %v579_v31 = vmul.f32 %v926_v27, %v1392_v24 }
  0x91   : > { %611 = vst.msk [vmem:[%s1298_s12 + $0xe8] sm:$0xff] %vm581_vm0, %v578_v28  ;;  %v580_v60 = vmul.f32 %v928_v29, %v1396_v1 }
  0x92   : > { %612 = vst.msk [vmem:[%s1298_s12 + $0xf0] sm:$0xff] %vm581_vm0, %v579_v31 }
  0x93   : > { %613 = vst.msk [vmem:[%s1298_s12 + $0xf8] sm:$0xff] %vm581_vm0, %v580_v60 }
  0x94 PF: > { %s16_s17 = sadd.s32 1, %s1009_s17   ;;  %s1484_s12 = smov %s993_s13 }
  0x95   : > { %p13_p7 = scmp.ge.s32.totalorder %s16_s17, 4   ;;  %s1485_s13 = smov %s997_s14 }
  0x96   : > { %s1486_s14 = smov %s1083_s24  ;;  %s1487_s15 = smov %s1005_s16 }
  0x97   : > { %s1488_s16 = smov %s1490_s19  ;;  %15 = sbr.rel (!%p13_p7) target bundleno = 4 (0x4), region = 78 }
  0x9e   :  { %644 = vsyncpa [#allocation3], 1 }
  0x9f   :  { %646 = vsyncpa [#allocation3 + $0x1], 1 }

// kernel: down_encoder_block2d_forward.8
= control target key start
LH: loop header
LB: loop body
LE: loop exit
PB: predicated region body
PF: predicated region fallthrough
CT: control target
= control target key end

     0   :  { %6 = vsyncpa [#allocation3], 0  ;;  %s970_s0 = inlined_call_operand.hbm [shape: f32[2,256,32], index: 0, kind: input, shape index: {}]   ;;  %s971_s1 = inlined_call_operand.vmem [shape: f32[2,2,32], index: 1, kind: output, shape index: {}]  }
   0x1   :  { %8 = vsyncpa [#allocation3 + $0x1], 0  ;;  %s741_s6 = smov 0   ;;  %s743_s7 = smov 0  }
   0x2   :  { %s745_s8 = smov 0   ;;  %s747_s9 = smov 0  }
   0x3   :  { %s749_s10 = smov 0   ;;  %s751_s11 = smov 0  }
   0x4 LB: > { %s574_s12 = sadd.s32 4294967295, %s725_s11   ;;  %s26_s13 = sadd.s32 1, %s721_s10  ;;  %s725_s11 = sphi %s751_s11, %s14_s11   ;;  %s721_s10 = sphi %s749_s10, %s979_s10   ;;  %s717_s9 = sphi %s747_s9, %s978_s9   ;;  %s713_s8 = sphi %s745_s8, %s977_s8   ;;  %s709_s7 = sphi %s743_s7, %s976_s7   ;;  %s705_s6 = sphi %s741_s6, %s975_s6  }
   0x5   : > { %p28_p0 = scmp.ge.s32.totalorder %s26_s13, 2  ;;  %s35_s14 = sadd.s32 1, %s713_s8 }
   0x6   : > { %p42_p1 = scmp.ne.s32.totalorder %s713_s8, %s709_s7  ;;  %p43_p2 = scmp.eq.s32.totalorder %s725_s11, 0 }
   0x7   : > { %s981_s13 = smov (%p28_p0, %s26_s13), 0  ;;  %p48_p4 = scmp.ne.s32.totalorder %s709_s7, %s705_s6 }
   0x8   : > { %p777_p3 = por %p43_p2, %p42_p1  ;;  %s30_s16 = ssub.s32 %s721_s10, %s981_s13 }
   0x9   : > { %p49_p5 = scmp.eq.s32.totalorder %s574_s12, 0  ;;  %p33_p6 = scmp.eq.s32.totalorder %s30_s16, 0 }
   0xa   : > { %p593_p8 = scmp.lt.s32.totalorder %s725_s11, 2  ;;  %s98_s19 = sand.u32 1, %s713_s8  }
   0xb   : > { %p784_p7 = por %p49_p5, %p48_p4  ;;  %s586_s20 = sshll.u32 %s721_s10, 12 }
   0xc   : > { %s790_s18 = scalar_select %p33_p6, %s713_s8, %s35_s14  }
   0xd   : > { %s578_s21 = sshll.u32 %s98_s19, 8  ;;  %s797_s24 = scalar_lea.hbm %s970_s0, %s586_s20 }
   0xe   : > { %s102_s25 = scalar_lea.vmem [#allocation2], %s578_s21  ;;  %p801_p9 = pnand %p593_p8, %p777_p3 }
   0xf   : > { %s111_s26 = sshll.u32 %s102_s25, 4  ;;  %s807_s28 = scalar_lea.sflag [#allocation3], %s98_s19  ;;  %s805_s26 = int_to_ptr.vmem [resolvable:$true] %s111_s26 }
  0x10   : > { %s645_s29 = scalar_lea.hbm %s797_s24, 4096  ;;  %p647_p11 = pneg %p801_p9 }
  0x11   : > { %p646_p10 = scmp.ne.s32.totalorder %s797_s24, %s645_s29  ;;  %s650_s3 = scalar_lea.hbm %s970_s0, 8192 }
  0x12   : > { %p651_p0 = scmp.lt.u32.totalorder %s797_s24, %s970_s0  ;;  %p652_p1 = scmp.lt.u32.totalorder %s650_s3, %s645_s29 }
  0x13   : > { %p648_p12 = pnand %p647_p11, %p646_p10  ;;  %p654_p3 = scmp.lt.u32.totalorder %s645_s29, %s797_s24 }
  0x14   : > { %p653_p2 = por %p652_p1, %p651_p0 }
  0x15   : > { %p649_p13 = pneg %p648_p12 }
  0x16   : > { %p655_p4 = por %p654_p3, %p653_p2 }
  0x18   : > { %p656_p5 = pnand %p655_p4, %p649_p13 }
  0x1a   : > { %659 = shalt.err (!%p656_p5)
}
  0x1b   : > { %s660_s6 = scalar_lea.vmem %s805_s26, 4096  ;;  %s727_s12 = smov [#allocation2]  }
  0x1c   : > { %p661_p6 = scmp.ne.s32.totalorder %s805_s26, %s660_s6  ;;  %s665_s14 = sshll.u32 %s727_s12, 4  ;;  %s666_s14 = int_to_ptr.vmem [resolvable:$false] %s665_s14 }
  0x1d   : > { %s667_s15 = scalar_lea.vmem %s666_s14, 8192  ;;  %p668_p12 = scmp.lt.s32.totalorder %s805_s26, %s666_s14 }
  0x1e   : > { %p663_p8 = pnand %p661_p6, %p647_p11  ;;  %p669_p0 = scmp.lt.s32.totalorder %s667_s15, %s660_s6 }
  0x20   : > { %p664_p10 = pneg %p663_p8  ;;  %p670_p1 = por %p669_p0, %p668_p12 }
  0x22   : > { %p671_p2 = pnand %p670_p1, %p664_p10 }
  0x24   : > { %674 = shalt.err (!%p671_p2)
}
  0x25   : > { %s728_s16 = smov 128   ;;  %s729_s19 = smov 8  }
  0x26   : > { %592 = dma.hbm_to_vmem [thread:$0]  (!%p801_p9), %s797_s24, 4096, %s805_s26, %s807_s28, %s728_s16, %s728_s16, %s729_s19  }
  0x27   : > { %p581_p11 = scmp.ge.s32.totalorder %s725_s11, 1  ;;  %p119_p13 = scmp.lt.s32.totalorder %s725_s11, 3 }
  0x29   : > { %p120_p3 = pnand %p581_p11, %p119_p13 }
  0x2a   : > { %s125_s20 = sand.u32 (!%p120_p3), 1, %s709_s7  }
  0x2b   : > { %123 = sbr.rel (%p120_p3) target bundleno = 136 (0x88), region = 24  ;;  %s582_s21 = sshll.u32 (!%p120_p3), %s125_s20, 8 }
  0x2c   : > { %s126_s22 = scalar_lea.sflag (!%p120_p3), [#allocation3], %s125_s20  ;;  %s838_s23 = scalar_lea.vmem (!%p120_p3), [#allocation2], %s582_s21 }
  0x32   : > { %700 = dma.done.wait (%p784_p7), %s126_s22, 4096  }
  0x33   : > { %702 = vsyncadd (%p784_p7), %s126_s22, 4294963200  ;;  %p148_p9 = scmp.lt.s32.totalorder %s717_s9, 1  ;;  %vm156_vm0 = vcmask 254976   ;;  %vm321_vm1 = vcmask 261120   ;;  %v730_v0 = vmov 0.0   ;;  %v158_v1 = vld [vmem:[%s838_s23] sm:$0xff] }
  0x34   : > { %v159_v2 = vld [vmem:[%s838_s23 + $0x8] sm:$0xff]  ;;  %v160_v3 = vld [vmem:[%s838_s23 + $0x10] sm:$0xff]  ;;  %v322_v4 = vsel %vm321_vm1, %v158_v1, 0.0  ;;  %v161_v7 = vld [vmem:[%s838_s23 + $0x18] sm:$0xff]  ;;  %v391_v28 = vmul.f32 %v158_v1, %v158_v1  ;;  %vm493_vm2 = vcmask 1040384  }
  0x35   : > { %s983_s9 = smov (!%p148_p9, %s717_s9), 1  ;;  %v323_v5 = vsel %vm321_vm1, %v159_v2, 0.0  ;;  %v325_v6 = vsel %vm321_vm1, %v160_v3, 0.0  ;;  %v327_v9 = vsel %vm321_vm1, %v161_v7, 0.0  ;;  %v162_v10 = vld [vmem:[%s838_s23 + $0x20] sm:$0xff]  ;;  %v163_v13 = vld [vmem:[%s838_s23 + $0x28] sm:$0xff]  ;;  %v392_v29 = vmul.f32 %v159_v2, %v159_v2 }
  0x36   : > { %s583_s24 = sshll.u32 %s983_s9, 1  ;;  %v324_v8 = vadd.f32 %v323_v5, %v322_v4  ;;  %v329_v12 = vsel %vm321_vm1, %v162_v10, 0.0  ;;  %v331_v15 = vsel %vm321_vm1, %v163_v13, 0.0  ;;  %v164_v16 = vld [vmem:[%s838_s23 + $0x30] sm:$0xff]  ;;  %v165_v19 = vld [vmem:[%s838_s23 + $0x38] sm:$0xff]  ;;  %v166_v22 = vld [vmem:[%s838_s23 + $0x40] sm:$0xff]  ;;  %v393_v30 = vmul.f32 %v160_v3, %v160_v3 }
  0x37   : > { %s849_s27 = scalar_lea.vmem %s971_s1, %s583_s24  ;;  %v333_v18 = vsel %vm321_vm1, %v164_v16, 0.0  ;;  %v335_v21 = vsel %vm321_vm1, %v165_v19, 0.0  ;;  %v337_v24 = vsel %vm321_vm1, %v166_v22, 0.0  ;;  %v167_v25 = vld [vmem:[%s838_s23 + $0x48] sm:$0xff]  ;;  %v168_v31 = vld [vmem:[%s838_s23 + $0x50] sm:$0xff]  ;;  %v169_v33 = vld [vmem:[%s838_s23 + $0x58] sm:$0xff]  ;;  %v394_v35 = vmul.f32 %v161_v7, %v161_v7 }
  0x38   : > { %157 = vst.msk [vmem:[%s849_s27] sm:$0x3] %vm156_vm0, %v730_v0  ;;  %v326_v11 = vadd.f32 %v325_v6, %v324_v8  ;;  %v339_v27 = vsel %vm321_vm1, %v167_v25, 0.0  ;;  %v341_v34 = vsel %vm321_vm1, %v168_v31, 0.0  ;;  %v343_v37 = vsel %vm321_vm1, %v169_v33, 0.0  ;;  %v170_v42 = vld [vmem:[%s838_s23 + $0x60] sm:$0xff] }
  0x39   : > { %v395_v38 = vmul.f32 %v162_v10, %v162_v10  ;;  %v423_v39 = vsel %vm321_vm1, %v391_v28, 0.0  ;;  %v424_v40 = vsel %vm321_vm1, %v392_v29, 0.0  ;;  %v426_v41 = vsel %vm321_vm1, %v393_v30, 0.0  ;;  %v171_v48 = vld [vmem:[%s838_s23 + $0x68] sm:$0xff]  ;;  %v172_v54 = vld [vmem:[%s838_s23 + $0x70] sm:$0xff]  ;;  %v173_v60 = vld [vmem:[%s838_s23 + $0x78] sm:$0xff] }
  0x3a   : > { %v328_v14 = vadd.f32 %v327_v9, %v326_v11  ;;  %v425_v44 = vadd.f32 %v424_v40, %v423_v39  ;;  %v345_v45 = vsel %vm321_vm1, %v170_v42, 0.0  ;;  %v396_v46 = vmul.f32 %v163_v13, %v163_v13  ;;  %v174_v2 = vld [vmem:[%s838_s23 + $0x80] sm:$0xff]  ;;  %v175_v8 = vld [vmem:[%s838_s23 + $0x88] sm:$0xff] }
  0x3b   : > { %v428_v47 = vsel %vm321_vm1, %v394_v35, 0.0  ;;  %v347_v51 = vsel %vm321_vm1, %v171_v48, 0.0  ;;  %v397_v52 = vmul.f32 %v164_v16, %v164_v16  ;;  %v430_v53 = vsel %vm321_vm1, %v395_v38, 0.0  ;;  %v180_v38 = vld [vmem:[%s838_s23 + $0xb0] sm:$0xff] }
  0x3c   : > { %v330_v17 = vadd.f32 %v329_v12, %v328_v14  ;;  %v427_v50 = vadd.f32 %v426_v41, %v425_v44  ;;  %v349_v57 = vsel %vm321_vm1, %v172_v54, 0.0  ;;  %v398_v58 = vmul.f32 %v165_v19, %v165_v19  ;;  %v176_v14 = vld [vmem:[%s838_s23 + $0x90] sm:$0xff]  ;;  %v181_v44 = vld [vmem:[%s838_s23 + $0xb8] sm:$0xff] }
  0x3d   : > { %v432_v59 = vsel %vm321_vm1, %v396_v46, 0.0  ;;  %v351_v63 = vsel %vm321_vm1, %v173_v60, 0.0  ;;  %v399_v0 = vmul.f32 %v166_v22, %v166_v22  ;;  %v434_v1 = vsel %vm321_vm1, %v397_v52, 0.0 }
  0x3e   : > { %v332_v20 = vadd.f32 %v331_v15, %v330_v17  ;;  %v429_v56 = vadd.f32 %v428_v47, %v427_v50  ;;  %v353_v5 = vsel %vm321_vm1, %v174_v2, 0.0  ;;  %v400_v6 = vmul.f32 %v167_v25, %v167_v25  ;;  %v182_v50 = vld [vmem:[%s838_s23 + $0xc0] sm:$0xff] }
  0x3f   : > { %v436_v7 = vsel %vm321_vm1, %v398_v58, 0.0  ;;  %v355_v11 = vsel %vm321_vm1, %v175_v8, 0.0  ;;  %v401_v12 = vmul.f32 %v168_v31, %v168_v31  ;;  %v438_v13 = vsel %vm321_vm1, %v399_v0, 0.0 }
  0x40   : > { %v334_v23 = vadd.f32 %v333_v18, %v332_v20  ;;  %v431_v62 = vadd.f32 %v430_v53, %v429_v56  ;;  %v357_v17 = vsel %vm321_vm1, %v176_v14, 0.0  ;;  %v402_v18 = vmul.f32 %v169_v33, %v169_v33  ;;  %v177_v20 = vld [vmem:[%s838_s23 + $0x98] sm:$0xff]  ;;  %v183_v56 = vld [vmem:[%s838_s23 + $0xc8] sm:$0xff] }
  0x41   : > { %v440_v19 = vsel %vm321_vm1, %v400_v6, 0.0  ;;  %v442_v25 = vsel %vm321_vm1, %v401_v12, 0.0  ;;  %v404_v30 = vmul.f32 %v171_v48, %v171_v48  ;;  %v365_v41 = vsel %vm321_vm1, %v180_v38, 0.0 }
  0x42   : > { %v336_v26 = vadd.f32 %v335_v21, %v334_v23  ;;  %v433_v4 = vadd.f32 %v432_v59, %v431_v62  ;;  %v359_v23 = vsel %vm321_vm1, %v177_v20, 0.0  ;;  %v444_v31 = vsel %vm321_vm1, %v402_v18, 0.0  ;;  %v184_v62 = vld [vmem:[%s838_s23 + $0xd0] sm:$0xff] }
  0x43   : > { %v367_v47 = vsel %vm321_vm1, %v181_v44, 0.0  ;;  %v407_v48 = vmul.f32 %v174_v2, %v174_v2  ;;  %v369_v53 = vsel %vm321_vm1, %v182_v50, 0.0  ;;  %v371_v59 = vsel %vm321_vm1, %v183_v56, 0.0 }
  0x44   : > { %v338_v32 = vadd.f32 %v337_v24, %v336_v26  ;;  %v435_v10 = vadd.f32 %v434_v1, %v433_v4  ;;  %v403_v24 = vmul.f32 %v170_v42, %v170_v42  ;;  %v178_v26 = vld [vmem:[%s838_s23 + $0xa0] sm:$0xff]  ;;  %v406_v42 = vmul.f32 %v173_v60, %v173_v60  ;;  %v185_v4 = vld [vmem:[%s838_s23 + $0xd8] sm:$0xff] }
  0x45   : > { %v361_v29 = vsel %vm321_vm1, %v178_v26, 0.0  ;;  %v409_v60 = vmul.f32 %v176_v14, %v176_v14  ;;  %v373_v1 = vsel %vm321_vm1, %v184_v62, 0.0  ;;  %v410_v2 = vmul.f32 %v177_v20, %v177_v20 }
  0x46   : > { %v340_v36 = vadd.f32 %v339_v27, %v338_v32  ;;  %v437_v16 = vadd.f32 %v436_v7, %v435_v10  ;;  %v179_v32 = vld [vmem:[%s838_s23 + $0xa8] sm:$0xff]  ;;  %v375_v7 = vsel %vm321_vm1, %v185_v4, 0.0  ;;  %v186_v10 = vld [vmem:[%s838_s23 + $0xe0] sm:$0xff]  ;;  %v413_v20 = vmul.f32 %v180_v38, %v180_v38 }
  0x47   : > { %v363_v35 = vsel %vm321_vm1, %v179_v32, 0.0  ;;  %v412_v14 = vmul.f32 %v179_v32, %v179_v32 }
  0x48   : > { %v342_v43 = vadd.f32 %v341_v34, %v340_v36  ;;  %v439_v22 = vadd.f32 %v438_v13, %v437_v16  ;;  %v405_v36 = vmul.f32 %v172_v54, %v172_v54  ;;  %v408_v54 = vmul.f32 %v175_v8, %v175_v8  ;;  %v187_v16 = vld [vmem:[%s838_s23 + $0xe8] sm:$0xff] }
  0x49   : > { %v411_v8 = vmul.f32 %v178_v26, %v178_v26  ;;  %v377_v13 = vsel %vm321_vm1, %v186_v10, 0.0  ;;  %v188_v26 = vld [vmem:[%s838_s23 + $0xf0] sm:$0xff] }
  0x4a   : > { %v344_v49 = vadd.f32 %v343_v37, %v342_v43  ;;  %v441_v28 = vadd.f32 %v440_v19, %v439_v22  ;;  %v446_v37 = vsel %vm321_vm1, %v403_v24, 0.0  ;;  %v448_v43 = vsel %vm321_vm1, %v404_v30, 0.0 }
  0x4b   : > { %v379_v19 = vsel %vm321_vm1, %v187_v16, 0.0  ;;  %v414_v24 = vmul.f32 %v181_v44, %v181_v44  ;;  %v415_v30 = vmul.f32 %v182_v50, %v182_v50 }
  0x4c   : > { %v346_v55 = vadd.f32 %v345_v45, %v344_v49  ;;  %v443_v34 = vadd.f32 %v442_v25, %v441_v28  ;;  %v450_v49 = vsel %vm321_vm1, %v405_v36, 0.0  ;;  %v464_v25 = vsel %vm321_vm1, %v412_v14, 0.0 }
  0x4e   : > { %v348_v61 = vadd.f32 %v347_v51, %v346_v55  ;;  %v445_v40 = vadd.f32 %v444_v31, %v443_v34  ;;  %v452_v55 = vsel %vm321_vm1, %v406_v42, 0.0  ;;  %v466_v31 = vsel %vm321_vm1, %v413_v20, 0.0 }
  0x4f   : > { %v468_v34 = vsel %vm321_vm1, %v414_v24, 0.0  ;;  %v418_v42 = vmul.f32 %v185_v4, %v185_v4 }
  0x50   : > { %v350_v3 = vadd.f32 %v349_v57, %v348_v61  ;;  %v447_v46 = vadd.f32 %v446_v37, %v445_v40  ;;  %v454_v61 = vsel %vm321_vm1, %v407_v48, 0.0  ;;  %v470_v40 = vsel %vm321_vm1, %v415_v30, 0.0 }
  0x51   : > { %v476_v50 = vsel %vm321_vm1, %v418_v42, 0.0 }
  0x52   : > { %v352_v9 = vadd.f32 %v351_v63, %v350_v3  ;;  %v449_v52 = vadd.f32 %v448_v43, %v447_v46  ;;  %v456_v3 = vsel %vm321_vm1, %v408_v54, 0.0  ;;  %v419_v46 = vmul.f32 %v186_v10, %v186_v10 }
  0x54   : > { %v354_v15 = vadd.f32 %v353_v5, %v352_v9  ;;  %v451_v58 = vadd.f32 %v450_v49, %v449_v52  ;;  %v458_v9 = vsel %vm321_vm1, %v409_v60, 0.0  ;;  %v420_v49 = vmul.f32 %v187_v16, %v187_v16 }
  0x55   : > { %v478_v54 = vsel %vm321_vm1, %v419_v46, 0.0 }
  0x56   : > { %v356_v21 = vadd.f32 %v355_v11, %v354_v15  ;;  %v453_v0 = vadd.f32 %v452_v55, %v451_v58  ;;  %v460_v15 = vsel %vm321_vm1, %v410_v2, 0.0 }
  0x58   : > { %v358_v27 = vadd.f32 %v357_v17, %v356_v21  ;;  %v455_v6 = vadd.f32 %v454_v61, %v453_v0  ;;  %v462_v21 = vsel %vm321_vm1, %v411_v8, 0.0 }
  0x5a   : > { %v360_v33 = vadd.f32 %v359_v23, %v358_v27  ;;  %v457_v12 = vadd.f32 %v456_v3, %v455_v6 }
  0x5c   : > { %v362_v39 = vadd.f32 %v361_v29, %v360_v33  ;;  %v459_v18 = vadd.f32 %v458_v9, %v457_v12  ;;  %v381_v29 = vsel %vm321_vm1, %v188_v26, 0.0  ;;  %v416_v33 = vmul.f32 %v183_v56, %v183_v56 }
  0x5e   : > { %v364_v45 = vadd.f32 %v363_v35, %v362_v39  ;;  %v461_v23 = vadd.f32 %v460_v15, %v459_v18  ;;  %v189_v35 = vld [vmem:[%s838_s23 + $0xf8] sm:$0xff]  ;;  %v417_v39 = vmul.f32 %v184_v62, %v184_v62  ;;  %v472_v43 = vsel %vm321_vm1, %v416_v33, 0.0 }
  0x5f   : > { %v383_v38 = vsel %vm321_vm1, %v189_v35, 0.0  ;;  %v422_v56 = vmul.f32 %v189_v35, %v189_v35 }
  0x60   : > { %v366_v51 = vadd.f32 %v365_v41, %v364_v45  ;;  %v463_v28 = vadd.f32 %v462_v21, %v461_v23 }
  0x61   : > { %v484_v62 = vsel %vm321_vm1, %v422_v56, 0.0 }
  0x62   : > { %v368_v57 = vadd.f32 %v367_v47, %v366_v51  ;;  %v465_v32 = vadd.f32 %v464_v25, %v463_v28  ;;  %v474_v47 = vsel %vm321_vm1, %v417_v39, 0.0 }
  0x64   : > { %v370_v63 = vadd.f32 %v369_v53, %v368_v57  ;;  %v467_v37 = vadd.f32 %v466_v31, %v465_v32  ;;  %v421_v53 = vmul.f32 %v188_v26, %v188_v26  ;;  %v480_v57 = vsel %vm321_vm1, %v420_v49, 0.0 }
  0x66   : > { %v372_v5 = vadd.f32 %v371_v59, %v370_v63  ;;  %v469_v41 = vadd.f32 %v468_v34, %v467_v37  ;;  %v482_v60 = vsel %vm321_vm1, %v421_v53, 0.0 }
  0x68   : > { %v374_v11 = vadd.f32 %v373_v1, %v372_v5  ;;  %v471_v45 = vadd.f32 %v470_v40, %v469_v41 }
  0x6a   : > { %v376_v17 = vadd.f32 %v375_v7, %v374_v11  ;;  %v473_v48 = vadd.f32 %v472_v43, %v471_v45  ;;  %v492_v11 = vld [vmem:[%s849_s27] sm:$0x3] }
  0x6c   : > { %v378_v22 = vadd.f32 %v377_v13, %v376_v17  ;;  %v475_v52 = vadd.f32 %v474_v47, %v473_v48 }
  0x6e   : > { %v380_v27 = vadd.f32 %v379_v19, %v378_v22  ;;  %v477_v55 = vadd.f32 %v476_v50, %v475_v52 }
  0x70   : > { %v382_v36 = vadd.f32 %v381_v29, %v380_v27  ;;  %v479_v59 = vadd.f32 %v478_v54, %v477_v55 }
  0x72   : > { %v384_v44 = vadd.f32 %v383_v38, %v382_v36  ;;  %v481_v61 = vadd.f32 %v480_v57, %v479_v59 }
  0x74   : > { %v385_v51 = vrot.slane %v384_v44, 4  ;;  %v483_v0 = vadd.f32 %v482_v60, %v481_v61 }
  0x76   : > { %v386_v58 = vadd.f32 %v385_v51, %v384_v44  ;;  %v485_v1 = vadd.f32 %v484_v62, %v483_v0 }
  0x78   : > { %v387_v63 = vrot.slane %v386_v58, 2  ;;  %v486_v3 = vrot.slane %v485_v1, 4 }
  0x7a   : > { %v388_v2 = vadd.f32 %v387_v63, %v386_v58  ;;  %v487_v4 = vadd.f32 %v486_v3, %v485_v1 }
  0x7c   : > { %v389_v5 = vrot.slane %v388_v2, 1  ;;  %v488_v6 = vrot.slane %v487_v4, 2 }
  0x7e   : > { %v489_v7 = vadd.f32 %v488_v6, %v487_v4  ;;  %v390_v8 = vadd.f32 %v389_v5, %v388_v2 }
  0x80   : > { %v490_v9 = vrot.slane %v489_v7, 1 }
  0x82   : > { %v491_v10 = vadd.f32 %v490_v9, %v489_v7 }
  0x84   : > { %v494_v12 = vsel %vm493_vm2, %v390_v8, %v491_v10 }
  0x85   : > { %v495_v13 = vadd.f32 %v494_v12, %v492_v11 }
  0x87   : > { %497 = vst.msk [vmem:[%s849_s27] sm:$0x3] %vm156_vm0, %v495_v13 }
  0x88 PF: > { %s14_s11 = sadd.s32 1, %s725_s11   ;;  %s975_s6 = smov %s709_s7 }
  0x89   : > { %p11_p7 = scmp.ge.s32.totalorder %s14_s11, 4   ;;  %s976_s7 = smov %s713_s8 }
  0x8a   : > { %s977_s8 = smov %s790_s18  ;;  %s978_s9 = smov %s721_s10 }
  0x8b   : > { %s979_s10 = smov %s981_s13  ;;  %13 = sbr.rel (!%p11_p7) target bundleno = 4 (0x4), region = 68 }
  0x92   :  { %517 = vsyncpa [#allocation3], 1 }
  0x93   :  { %519 = vsyncpa [#allocation3 + $0x1], 1 }

// kernel: squeeze.6
= control target key start
LH: loop header
LB: loop body
LE: loop exit
PB: predicated region body
PF: predicated region fallthrough
CT: control target
= control target key end

     0   :  { %s354_s8 = smov 122   ;;  %s355_s9 = smov 124   ;;  %vm7_vm0 = vcmask 15360   ;;  %s653_s0 = inlined_call_operand.vmem [shape: f32[2,64], index: 0, kind: input, shape index: {}]   ;;  %s654_s1 = inlined_call_operand.vmem [shape: f32[2,32,2], index: 1, kind: output, shape index: {}]  }
   0x1   :  { %v4_v0 = vld [vmem:[%s653_s0] sm:$0x3]  ;;  %s353_s0 = smov 126   ;;  %s356_s10 = smov 120  }
   0x2   :  { %5 = vst [vmem:[#allocation0] sm:$0x3] %v4_v0  ;;  %s357_s11 = smov 118   ;;  %s358_s12 = smov 116  }
   0x3   :  { %s359_s13 = smov 114   ;;  %s360_s14 = smov 112  }
   0x4   :  { %s361_s15 = smov 110   ;;  %s362_s16 = smov 108  }
   0x5   :  { %s363_s17 = smov 106   ;;  %s364_s18 = smov 104  }
   0x6   :  { %s365_s19 = smov 102   ;;  %s366_s20 = smov 100  }
   0x7   :  { %s367_s21 = smov 98   ;;  %s368_s22 = smov 96  }
   0x8   :  { %s369_s23 = smov 94   ;;  %s370_s24 = smov 92  }
   0x9   :  { %v11_v1 = vld [vmem:[#allocation0] sm:$0x3]   ;;  %s371_s25 = smov 90   ;;  %s372_s26 = smov 88  }
   0xa   :  { %v27_v2 = vld [vmem:[#allocation0] sm:$0x3]   ;;  %12 = vrot.lane.b32.xlu0 %v11_v1, %s353_s0  ;;  %s373_s27 = smov 86   ;;  %s374_s28 = smov 84  }
   0xb   :  { %28 = vrot.lane.b32.xlu1 %v27_v2, %s354_s8  ;;  %v19_v3 = vld [vmem:[#allocation0] sm:$0x3]   ;;  %s375_s29 = smov 82   ;;  %s376_s30 = smov 80  }
   0xc   :  { %v35_v4 = vld [vmem:[#allocation0] sm:$0x3]   ;;  %s377_s6 = smov 78   ;;  %s378_s7 = smov 76  }
   0xd   :  { %v43_v5 = vld [vmem:[#allocation0] sm:$0x3]   ;;  %s379_s0 = smov 74   ;;  %s380_s8 = smov 72  }
   0xe   :  { %20 = vrot.lane.b32.xlu0 %v19_v3, %s355_s9  ;;  %v51_v6 = vld [vmem:[#allocation0] sm:$0x3]   ;;  %s381_s9 = smov 70  }
   0xf   :  { %36 = vrot.lane.b32.xlu1 %v35_v4, %s356_s10  ;;  %v59_v7 = vld [vmem:[#allocation0] sm:$0x3]   ;;  %s382_s10 = smov 68  }
  0x10   :  { %v67_v8 = vld [vmem:[#allocation0] sm:$0x3]  }
  0x11   :  { %v75_v9 = vld [vmem:[#allocation0] sm:$0x3]  }
  0x12   :  { %44 = vrot.lane.b32.xlu0 %v43_v5, %s357_s11  ;;  %v83_v10 = vld [vmem:[#allocation0] sm:$0x3]   ;;  %s383_s11 = smov 66  }
  0x13   :  { %52 = vrot.lane.b32.xlu1 %v51_v6, %s358_s12  ;;  %v91_v11 = vld [vmem:[#allocation0] sm:$0x3]  }
  0x14   :  { %v99_v12 = vld [vmem:[#allocation0] sm:$0x3]  }
  0x15   :  { %v107_v13 = vld [vmem:[#allocation0] sm:$0x3]  }
  0x16   :  { %60 = vrot.lane.b32.xlu0 %v59_v7, %s359_s13  ;;  %v115_v14 = vld [vmem:[#allocation0] sm:$0x3]  }
  0x17   :  { %68 = vrot.lane.b32.xlu1 %v67_v8, %s360_s14  ;;  %v123_v15 = vld [vmem:[#allocation0] sm:$0x3]  }
  0x18   :  { %v131_v16 = vld [vmem:[#allocation0] sm:$0x3]  }
  0x19   :  { %v139_v17 = vld [vmem:[#allocation0] sm:$0x3]  }
  0x1a   :  { %76 = vrot.lane.b32.xlu0 %v75_v9, %s361_s15  ;;  %v147_v18 = vld [vmem:[#allocation0] sm:$0x3]  }
  0x1b   :  { %84 = vrot.lane.b32.xlu1 %v83_v10, %s362_s16  ;;  %v155_v19 = vld [vmem:[#allocation0] sm:$0x3]  }
  0x1c   :  { %v163_v20 = vld [vmem:[#allocation0] sm:$0x3]  }
  0x1d   :  { %v171_v21 = vld [vmem:[#allocation0] sm:$0x3]  }
  0x1e   :  { %92 = vrot.lane.b32.xlu0 %v91_v11, %s363_s17  ;;  %v179_v22 = vld [vmem:[#allocation0] sm:$0x3]  }
  0x1f   :  { %100 = vrot.lane.b32.xlu1 %v99_v12, %s364_s18  ;;  %v187_v23 = vld [vmem:[#allocation0] sm:$0x3]  }
  0x20   :  { %v195_v24 = vld [vmem:[#allocation0] sm:$0x3]  }
  0x21   :  { %v203_v25 = vld [vmem:[#allocation0] sm:$0x3]  }
  0x22   :  { %108 = vrot.lane.b32.xlu0 %v107_v13, %s365_s19  ;;  %v211_v26 = vld [vmem:[#allocation0] sm:$0x3]  }
  0x23   :  { %116 = vrot.lane.b32.xlu1 %v115_v14, %s366_s20  ;;  %v6_v27 = vld [vmem:[#allocation0] sm:$0x3]  }
  0x24   :  { %8 = vst.msk [vmem:[%s654_s1] sm:$0x1] %vm7_vm0, %v6_v27   ;;  %259 = vst.msk [vmem:[%s654_s1 + $0x1f] sm:$0x2] %vm7_vm0, %v6_v27   ;;  %v219_v28 = vld [vmem:[#allocation0] sm:$0x3]  }
  0x25   :  { %v227_v29 = vld [vmem:[#allocation0] sm:$0x3]  }
  0x26   :  { %124 = vrot.lane.b32.xlu0 %v123_v15, %s367_s21  ;;  %v235_v30 = vld [vmem:[#allocation0] sm:$0x3]  }
  0x27   :  { %132 = vrot.lane.b32.xlu1 %v131_v16, %s368_s22  ;;  %v243_v31 = vld [vmem:[#allocation0] sm:$0x3]  }
  0x28   :  { %v251_v32 = vld [vmem:[#allocation0] sm:$0x3]  }
  0x2a   :  { %140 = vrot.lane.b32.xlu0 %v139_v17, %s369_s23 }
  0x2b   :  { %148 = vrot.lane.b32.xlu1 %v147_v18, %s370_s24 }
  0x2e   :  { %156 = vrot.lane.b32.xlu0 %v155_v19, %s371_s25 }
  0x2f   :  { %164 = vrot.lane.b32.xlu1 %v163_v20, %s372_s26 }
  0x32   :  { %172 = vrot.lane.b32.xlu0 %v171_v21, %s373_s27 }
  0x33   :  { %180 = vrot.lane.b32.xlu1 %v179_v22, %s374_s28 }
  0x36   :  { %188 = vrot.lane.b32.xlu0 %v187_v23, %s375_s29 }
  0x37   :  { %196 = vrot.lane.b32.xlu1 %v195_v24, %s376_s30 }
  0x3a   :  { %204 = vrot.lane.b32.xlu0 %v203_v25, %s377_s6 }
  0x3b   :  { %212 = vrot.lane.b32.xlu1 %v211_v26, %s378_s7 }
  0x3e   :  { %220 = vrot.lane.b32.xlu0 %v219_v28, %s379_s0 }
  0x3f   :  { %228 = vrot.lane.b32.xlu1 %v227_v29, %s380_s8 }
  0x42   :  { %236 = vrot.lane.b32.xlu0 %v235_v30, %s381_s9 }
  0x43   :  { %244 = vrot.lane.b32.xlu1 %v243_v31, %s382_s10 }
  0x46   :  { %252 = vrot.lane.b32.xlu0 %v251_v32, %s383_s11 }
  0x7c   :  { %v13_v33 = vpop.permute.xlu0 %12  }
  0x7d   :  { %v29_v34 = vpop.permute.xlu1 %28   ;;  %260 = vst.msk [vmem:[%s654_s1 + $0x1] sm:$0x1] %vm7_vm0, %v13_v33   ;;  %261 = vst.msk [vmem:[%s654_s1 + $0x20] sm:$0x2] %vm7_vm0, %v13_v33  }
  0x7e   :  { %264 = vst.msk [vmem:[%s654_s1 + $0x3] sm:$0x1] %vm7_vm0, %v29_v34   ;;  %265 = vst.msk [vmem:[%s654_s1 + $0x22] sm:$0x2] %vm7_vm0, %v29_v34  }
  0x80   :  { %v21_v35 = vpop.permute.xlu0 %20  }
  0x81   :  { %v37_v36 = vpop.permute.xlu1 %36   ;;  %262 = vst.msk [vmem:[%s654_s1 + $0x2] sm:$0x1] %vm7_vm0, %v21_v35   ;;  %263 = vst.msk [vmem:[%s654_s1 + $0x21] sm:$0x2] %vm7_vm0, %v21_v35  }
  0x82   :  { %266 = vst.msk [vmem:[%s654_s1 + $0x4] sm:$0x1] %vm7_vm0, %v37_v36   ;;  %267 = vst.msk [vmem:[%s654_s1 + $0x23] sm:$0x2] %vm7_vm0, %v37_v36  }
  0x84   :  { %v45_v37 = vpop.permute.xlu0 %44  }
  0x85   :  { %v53_v38 = vpop.permute.xlu1 %52   ;;  %268 = vst.msk [vmem:[%s654_s1 + $0x5] sm:$0x1] %vm7_vm0, %v45_v37   ;;  %269 = vst.msk [vmem:[%s654_s1 + $0x24] sm:$0x2] %vm7_vm0, %v45_v37  }
  0x86   :  { %270 = vst.msk [vmem:[%s654_s1 + $0x6] sm:$0x1] %vm7_vm0, %v53_v38   ;;  %271 = vst.msk [vmem:[%s654_s1 + $0x25] sm:$0x2] %vm7_vm0, %v53_v38  }
  0x88   :  { %v61_v39 = vpop.permute.xlu0 %60  }
  0x89   :  { %v69_v40 = vpop.permute.xlu1 %68   ;;  %272 = vst.msk [vmem:[%s654_s1 + $0x7] sm:$0x1] %vm7_vm0, %v61_v39   ;;  %273 = vst.msk [vmem:[%s654_s1 + $0x26] sm:$0x2] %vm7_vm0, %v61_v39  }
  0x8a   :  { %274 = vst.msk [vmem:[%s654_s1 + $0x8] sm:$0x1] %vm7_vm0, %v69_v40   ;;  %275 = vst.msk [vmem:[%s654_s1 + $0x27] sm:$0x2] %vm7_vm0, %v69_v40  }
  0x8c   :  { %v77_v41 = vpop.permute.xlu0 %76  }
  0x8d   :  { %v85_v42 = vpop.permute.xlu1 %84   ;;  %276 = vst.msk [vmem:[%s654_s1 + $0x9] sm:$0x1] %vm7_vm0, %v77_v41   ;;  %277 = vst.msk [vmem:[%s654_s1 + $0x28] sm:$0x2] %vm7_vm0, %v77_v41  }
  0x8e   :  { %278 = vst.msk [vmem:[%s654_s1 + $0xa] sm:$0x1] %vm7_vm0, %v85_v42   ;;  %279 = vst.msk [vmem:[%s654_s1 + $0x29] sm:$0x2] %vm7_vm0, %v85_v42  }
  0x90   :  { %v93_v43 = vpop.permute.xlu0 %92  }
  0x91   :  { %v101_v44 = vpop.permute.xlu1 %100   ;;  %280 = vst.msk [vmem:[%s654_s1 + $0xb] sm:$0x1] %vm7_vm0, %v93_v43   ;;  %281 = vst.msk [vmem:[%s654_s1 + $0x2a] sm:$0x2] %vm7_vm0, %v93_v43  }
  0x92   :  { %282 = vst.msk [vmem:[%s654_s1 + $0xc] sm:$0x1] %vm7_vm0, %v101_v44   ;;  %283 = vst.msk [vmem:[%s654_s1 + $0x2b] sm:$0x2] %vm7_vm0, %v101_v44  }
  0x94   :  { %v109_v45 = vpop.permute.xlu0 %108  }
  0x95   :  { %v117_v46 = vpop.permute.xlu1 %116   ;;  %284 = vst.msk [vmem:[%s654_s1 + $0xd] sm:$0x1] %vm7_vm0, %v109_v45   ;;  %285 = vst.msk [vmem:[%s654_s1 + $0x2c] sm:$0x2] %vm7_vm0, %v109_v45  }
  0x96   :  { %286 = vst.msk [vmem:[%s654_s1 + $0xe] sm:$0x1] %vm7_vm0, %v117_v46   ;;  %287 = vst.msk [vmem:[%s654_s1 + $0x2d] sm:$0x2] %vm7_vm0, %v117_v46  }
  0x98   :  { %v125_v47 = vpop.permute.xlu0 %124  }
  0x99   :  { %v133_v48 = vpop.permute.xlu1 %132   ;;  %288 = vst.msk [vmem:[%s654_s1 + $0xf] sm:$0x1] %vm7_vm0, %v125_v47   ;;  %289 = vst.msk [vmem:[%s654_s1 + $0x2e] sm:$0x2] %vm7_vm0, %v125_v47  }
  0x9a   :  { %290 = vst.msk [vmem:[%s654_s1 + $0x10] sm:$0x1] %vm7_vm0, %v133_v48   ;;  %291 = vst.msk [vmem:[%s654_s1 + $0x2f] sm:$0x2] %vm7_vm0, %v133_v48  }
  0x9c   :  { %v141_v49 = vpop.permute.xlu0 %140  }
  0x9d   :  { %v149_v50 = vpop.permute.xlu1 %148   ;;  %292 = vst.msk [vmem:[%s654_s1 + $0x11] sm:$0x1] %vm7_vm0, %v141_v49   ;;  %293 = vst.msk [vmem:[%s654_s1 + $0x30] sm:$0x2] %vm7_vm0, %v141_v49  }
  0x9e   :  { %294 = vst.msk [vmem:[%s654_s1 + $0x12] sm:$0x1] %vm7_vm0, %v149_v50   ;;  %295 = vst.msk [vmem:[%s654_s1 + $0x31] sm:$0x2] %vm7_vm0, %v149_v50  }
  0xa0   :  { %v157_v51 = vpop.permute.xlu0 %156  }
  0xa1   :  { %v165_v52 = vpop.permute.xlu1 %164   ;;  %296 = vst.msk [vmem:[%s654_s1 + $0x13] sm:$0x1] %vm7_vm0, %v157_v51   ;;  %297 = vst.msk [vmem:[%s654_s1 + $0x32] sm:$0x2] %vm7_vm0, %v157_v51  }
  0xa2   :  { %298 = vst.msk [vmem:[%s654_s1 + $0x14] sm:$0x1] %vm7_vm0, %v165_v52   ;;  %299 = vst.msk [vmem:[%s654_s1 + $0x33] sm:$0x2] %vm7_vm0, %v165_v52  }
  0xa4   :  { %v173_v53 = vpop.permute.xlu0 %172  }
  0xa5   :  { %v181_v54 = vpop.permute.xlu1 %180   ;;  %300 = vst.msk [vmem:[%s654_s1 + $0x15] sm:$0x1] %vm7_vm0, %v173_v53   ;;  %301 = vst.msk [vmem:[%s654_s1 + $0x34] sm:$0x2] %vm7_vm0, %v173_v53  }
  0xa6   :  { %302 = vst.msk [vmem:[%s654_s1 + $0x16] sm:$0x1] %vm7_vm0, %v181_v54   ;;  %303 = vst.msk [vmem:[%s654_s1 + $0x35] sm:$0x2] %vm7_vm0, %v181_v54  }
  0xa8   :  { %v189_v55 = vpop.permute.xlu0 %188  }
  0xa9   :  { %v197_v56 = vpop.permute.xlu1 %196   ;;  %304 = vst.msk [vmem:[%s654_s1 + $0x17] sm:$0x1] %vm7_vm0, %v189_v55   ;;  %305 = vst.msk [vmem:[%s654_s1 + $0x36] sm:$0x2] %vm7_vm0, %v189_v55  }
  0xaa   :  { %306 = vst.msk [vmem:[%s654_s1 + $0x18] sm:$0x1] %vm7_vm0, %v197_v56   ;;  %307 = vst.msk [vmem:[%s654_s1 + $0x37] sm:$0x2] %vm7_vm0, %v197_v56  }
  0xac   :  { %v205_v57 = vpop.permute.xlu0 %204  }
  0xad   :  { %v213_v58 = vpop.permute.xlu1 %212   ;;  %308 = vst.msk [vmem:[%s654_s1 + $0x19] sm:$0x1] %vm7_vm0, %v205_v57   ;;  %309 = vst.msk [vmem:[%s654_s1 + $0x38] sm:$0x2] %vm7_vm0, %v205_v57  }
  0xae   :  { %310 = vst.msk [vmem:[%s654_s1 + $0x1a] sm:$0x1] %vm7_vm0, %v213_v58   ;;  %311 = vst.msk [vmem:[%s654_s1 + $0x39] sm:$0x2] %vm7_vm0, %v213_v58  }
  0xb0   :  { %v221_v59 = vpop.permute.xlu0 %220  }
  0xb1   :  { %v229_v60 = vpop.permute.xlu1 %228   ;;  %312 = vst.msk [vmem:[%s654_s1 + $0x1b] sm:$0x1] %vm7_vm0, %v221_v59   ;;  %313 = vst.msk [vmem:[%s654_s1 + $0x3a] sm:$0x2] %vm7_vm0, %v221_v59  }
  0xb2   :  { %314 = vst.msk [vmem:[%s654_s1 + $0x1c] sm:$0x1] %vm7_vm0, %v229_v60   ;;  %315 = vst.msk [vmem:[%s654_s1 + $0x3b] sm:$0x2] %vm7_vm0, %v229_v60  }
  0xb4   :  { %v237_v61 = vpop.permute.xlu0 %236  }
  0xb5   :  { %v245_v62 = vpop.permute.xlu1 %244   ;;  %316 = vst.msk [vmem:[%s654_s1 + $0x1d] sm:$0x1] %vm7_vm0, %v237_v61   ;;  %317 = vst.msk [vmem:[%s654_s1 + $0x3c] sm:$0x2] %vm7_vm0, %v237_v61  }
  0xb6   :  { %318 = vst.msk [vmem:[%s654_s1 + $0x1e] sm:$0x1] %vm7_vm0, %v245_v62   ;;  %319 = vst.msk [vmem:[%s654_s1 + $0x3d] sm:$0x2] %vm7_vm0, %v245_v62  }
  0xb8   :  { %v253_v63 = vpop.permute.xlu0 %252  }
  0xb9   :  { %320 = vst.msk [vmem:[%s654_s1 + $0x1f] sm:$0x1] %vm7_vm0, %v253_v63   ;;  %321 = vst.msk [vmem:[%s654_s1 + $0x3e] sm:$0x2] %vm7_vm0, %v253_v63  }

// kernel: down_encoder_block2d_forward.11
= control target key start
LH: loop header
LB: loop body
LE: loop exit
PB: predicated region body
PF: predicated region fallthrough
CT: control target
= control target key end

     0   :  { %s627_s6 = smov 0   ;;  %s629_s7 = smov 0   ;;  %s765_s0 = inlined_call_operand.vmem [shape: f32[2,256,64], index: 0, kind: input, shape index: {}]   ;;  %s766_s1 = inlined_call_operand.vmem [shape: f32[2,2,64], index: 1, kind: output, shape index: {}]  }
   0x1   :  { %s631_s8 = smov 0  }
   0x2 LB: > { %s23_s9 = sadd.s32 1, %s610_s7  ;;  %p560_p0 = scmp.ge.s32.totalorder %s614_s8, 1  ;;  %s614_s8 = sphi %s631_s8, %s11_s8   ;;  %s610_s7 = sphi %s629_s7, %s768_s7   ;;  %s606_s6 = sphi %s627_s6, %s767_s6  }
   0x3   : > { %p25_p1 = scmp.ge.s32.totalorder %s23_s9, 2  ;;  %p106_p2 = scmp.lt.s32.totalorder %s614_s8, 3 }
   0x5   : > { %s770_s9 = smov (%p25_p1, %s23_s9), 0  ;;  %p107_p3 = pnand %p560_p0, %p106_p2 }
   0x6   : > { %p130_p4 = scmp.lt.s32.totalorder (!%p107_p3), %s606_s6, 1  ;;  %vm147_vm0 = vcmask (!%p107_p3), 517120   ;;  %vm312_vm1 = vcmask (!%p107_p3), 523264   ;;  %v616_v0 = vmov (!%p107_p3), 0.0   ;;  %vm484_vm2 = vcmask (!%p107_p3), 1040384  }
   0x7   : > { %110 = sbr.rel (%p107_p3) target bundleno = 102 (0x66), region = 24 }
   0xe   : > { %s772_s6 = smov (!%p130_p4, %s606_s6), 1 }
   0xf   : > { %s566_s10 = sshll.u32 %s772_s6, 8  ;;  %s563_s11 = sshll.u32 %s772_s6, 1 }
  0x10   : > { %s648_s14 = scalar_lea.vmem %s765_s0, %s566_s10  ;;  %s653_s17 = scalar_lea.vmem %s766_s1, %s563_s11 }
  0x11   : > { %148 = vst.msk [vmem:[%s653_s17] sm:$0x3] %vm147_vm0, %v616_v0  ;;  %v149_v1 = vld [vmem:[%s648_s14] sm:$0xff]  ;;  %v150_v2 = vld [vmem:[%s648_s14 + $0x8] sm:$0xff]  ;;  %v151_v3 = vld [vmem:[%s648_s14 + $0x10] sm:$0xff] }
  0x12   : > { %v313_v4 = vsel %vm312_vm1, %v149_v1, 0.0  ;;  %v314_v5 = vsel %vm312_vm1, %v150_v2, 0.0  ;;  %v316_v6 = vsel %vm312_vm1, %v151_v3, 0.0  ;;  %v152_v7 = vld [vmem:[%s648_s14 + $0x18] sm:$0xff]  ;;  %v153_v10 = vld [vmem:[%s648_s14 + $0x20] sm:$0xff]  ;;  %v154_v13 = vld [vmem:[%s648_s14 + $0x28] sm:$0xff]  ;;  %v382_v28 = vmul.f32 %v149_v1, %v149_v1 }
  0x13   : > { %v315_v8 = vadd.f32 %v314_v5, %v313_v4  ;;  %v318_v9 = vsel %vm312_vm1, %v152_v7, 0.0  ;;  %v320_v12 = vsel %vm312_vm1, %v153_v10, 0.0  ;;  %v322_v15 = vsel %vm312_vm1, %v154_v13, 0.0  ;;  %v155_v16 = vld [vmem:[%s648_s14 + $0x30] sm:$0xff]  ;;  %v156_v19 = vld [vmem:[%s648_s14 + $0x38] sm:$0xff]  ;;  %v157_v22 = vld [vmem:[%s648_s14 + $0x40] sm:$0xff] }
  0x14   : > { %v324_v18 = vsel %vm312_vm1, %v155_v16, 0.0  ;;  %v326_v21 = vsel %vm312_vm1, %v156_v19, 0.0  ;;  %v328_v24 = vsel %vm312_vm1, %v157_v22, 0.0  ;;  %v158_v25 = vld [vmem:[%s648_s14 + $0x48] sm:$0xff]  ;;  %v383_v29 = vmul.f32 %v150_v2, %v150_v2  ;;  %v159_v31 = vld [vmem:[%s648_s14 + $0x50] sm:$0xff]  ;;  %v160_v33 = vld [vmem:[%s648_s14 + $0x58] sm:$0xff] }
  0x15   : > { %v317_v11 = vadd.f32 %v316_v6, %v315_v8  ;;  %v330_v27 = vsel %vm312_vm1, %v158_v25, 0.0  ;;  %v384_v30 = vmul.f32 %v151_v3, %v151_v3  ;;  %v332_v34 = vsel %vm312_vm1, %v159_v31, 0.0  ;;  %v161_v42 = vld [vmem:[%s648_s14 + $0x60] sm:$0xff]  ;;  %v162_v48 = vld [vmem:[%s648_s14 + $0x68] sm:$0xff]  ;;  %v163_v54 = vld [vmem:[%s648_s14 + $0x70] sm:$0xff] }
  0x16   : > { %v385_v35 = vmul.f32 %v152_v7, %v152_v7  ;;  %v334_v37 = vsel %vm312_vm1, %v160_v33, 0.0  ;;  %v386_v38 = vmul.f32 %v153_v10, %v153_v10  ;;  %v414_v39 = vsel %vm312_vm1, %v382_v28, 0.0  ;;  %v164_v60 = vld [vmem:[%s648_s14 + $0x78] sm:$0xff]  ;;  %v165_v2 = vld [vmem:[%s648_s14 + $0x80] sm:$0xff]  ;;  %v166_v8 = vld [vmem:[%s648_s14 + $0x88] sm:$0xff] }
  0x17   : > { %v319_v14 = vadd.f32 %v318_v9, %v317_v11  ;;  %v415_v40 = vsel %vm312_vm1, %v383_v29, 0.0  ;;  %v417_v41 = vsel %vm312_vm1, %v384_v30, 0.0  ;;  %v336_v45 = vsel %vm312_vm1, %v161_v42, 0.0 }
  0x18   : > { %v416_v44 = vadd.f32 %v415_v40, %v414_v39  ;;  %v387_v46 = vmul.f32 %v154_v13, %v154_v13  ;;  %v419_v47 = vsel %vm312_vm1, %v385_v35, 0.0  ;;  %v338_v51 = vsel %vm312_vm1, %v162_v48, 0.0 }
  0x19   : > { %v321_v17 = vadd.f32 %v320_v12, %v319_v14  ;;  %v388_v52 = vmul.f32 %v155_v16, %v155_v16  ;;  %v421_v53 = vsel %vm312_vm1, %v386_v38, 0.0  ;;  %v340_v57 = vsel %vm312_vm1, %v163_v54, 0.0  ;;  %v167_v14 = vld [vmem:[%s648_s14 + $0x90] sm:$0xff] }
  0x1a   : > { %v418_v50 = vadd.f32 %v417_v41, %v416_v44  ;;  %v389_v58 = vmul.f32 %v156_v19, %v156_v19  ;;  %v423_v59 = vsel %vm312_vm1, %v387_v46, 0.0  ;;  %v342_v63 = vsel %vm312_vm1, %v164_v60, 0.0  ;;  %v171_v38 = vld [vmem:[%s648_s14 + $0xb0] sm:$0xff]  ;;  %v172_v44 = vld [vmem:[%s648_s14 + $0xb8] sm:$0xff] }
  0x1b   : > { %v323_v20 = vadd.f32 %v322_v15, %v321_v17  ;;  %v390_v0 = vmul.f32 %v157_v22, %v157_v22  ;;  %v425_v1 = vsel %vm312_vm1, %v388_v52, 0.0  ;;  %v344_v5 = vsel %vm312_vm1, %v165_v2, 0.0 }
  0x1c   : > { %v420_v56 = vadd.f32 %v419_v47, %v418_v50  ;;  %v391_v6 = vmul.f32 %v158_v25, %v158_v25  ;;  %v427_v7 = vsel %vm312_vm1, %v389_v58, 0.0  ;;  %v346_v11 = vsel %vm312_vm1, %v166_v8, 0.0  ;;  %v173_v50 = vld [vmem:[%s648_s14 + $0xc0] sm:$0xff] }
  0x1d   : > { %v325_v23 = vadd.f32 %v324_v18, %v323_v20  ;;  %v392_v12 = vmul.f32 %v159_v31, %v159_v31  ;;  %v429_v13 = vsel %vm312_vm1, %v390_v0, 0.0  ;;  %v348_v17 = vsel %vm312_vm1, %v167_v14, 0.0  ;;  %v168_v20 = vld [vmem:[%s648_s14 + $0x98] sm:$0xff] }
  0x1e   : > { %v422_v62 = vadd.f32 %v421_v53, %v420_v56  ;;  %v393_v18 = vmul.f32 %v160_v33, %v160_v33  ;;  %v431_v19 = vsel %vm312_vm1, %v391_v6, 0.0  ;;  %v395_v30 = vmul.f32 %v162_v48, %v162_v48  ;;  %v174_v56 = vld [vmem:[%s648_s14 + $0xc8] sm:$0xff] }
  0x1f   : > { %v327_v26 = vadd.f32 %v326_v21, %v325_v23  ;;  %v350_v23 = vsel %vm312_vm1, %v168_v20, 0.0  ;;  %v433_v25 = vsel %vm312_vm1, %v392_v12, 0.0  ;;  %v356_v41 = vsel %vm312_vm1, %v171_v38, 0.0 }
  0x20   : > { %v424_v4 = vadd.f32 %v423_v59, %v422_v62  ;;  %v435_v31 = vsel %vm312_vm1, %v393_v18, 0.0  ;;  %v358_v47 = vsel %vm312_vm1, %v172_v44, 0.0  ;;  %v398_v48 = vmul.f32 %v165_v2, %v165_v2  ;;  %v175_v62 = vld [vmem:[%s648_s14 + $0xd0] sm:$0xff] }
  0x21   : > { %v329_v32 = vadd.f32 %v328_v24, %v327_v26  ;;  %v394_v24 = vmul.f32 %v161_v42, %v161_v42  ;;  %v169_v26 = vld [vmem:[%s648_s14 + $0xa0] sm:$0xff]  ;;  %v397_v42 = vmul.f32 %v164_v60, %v164_v60  ;;  %v360_v53 = vsel %vm312_vm1, %v173_v50, 0.0 }
  0x22   : > { %v426_v10 = vadd.f32 %v425_v1, %v424_v4  ;;  %v352_v29 = vsel %vm312_vm1, %v169_v26, 0.0  ;;  %v362_v59 = vsel %vm312_vm1, %v174_v56, 0.0  ;;  %v400_v60 = vmul.f32 %v167_v14, %v167_v14  ;;  %v176_v4 = vld [vmem:[%s648_s14 + $0xd8] sm:$0xff] }
  0x23   : > { %v331_v36 = vadd.f32 %v330_v27, %v329_v32  ;;  %v170_v32 = vld [vmem:[%s648_s14 + $0xa8] sm:$0xff]  ;;  %v364_v1 = vsel %vm312_vm1, %v175_v62, 0.0  ;;  %v401_v2 = vmul.f32 %v168_v20, %v168_v20  ;;  %v404_v20 = vmul.f32 %v171_v38, %v171_v38 }
  0x24   : > { %v428_v16 = vadd.f32 %v427_v7, %v426_v10  ;;  %v354_v35 = vsel %vm312_vm1, %v170_v32, 0.0  ;;  %v366_v7 = vsel %vm312_vm1, %v176_v4, 0.0  ;;  %v177_v10 = vld [vmem:[%s648_s14 + $0xe0] sm:$0xff]  ;;  %v403_v14 = vmul.f32 %v170_v32, %v170_v32 }
  0x25   : > { %v333_v43 = vadd.f32 %v332_v34, %v331_v36  ;;  %v396_v36 = vmul.f32 %v163_v54, %v163_v54  ;;  %v399_v54 = vmul.f32 %v166_v8, %v166_v8  ;;  %v402_v8 = vmul.f32 %v169_v26, %v169_v26  ;;  %v179_v26 = vld [vmem:[%s648_s14 + $0xf0] sm:$0xff] }
  0x26   : > { %v430_v22 = vadd.f32 %v429_v13, %v428_v16  ;;  %v368_v13 = vsel %vm312_vm1, %v177_v10, 0.0  ;;  %v178_v16 = vld [vmem:[%s648_s14 + $0xe8] sm:$0xff] }
  0x27   : > { %v335_v49 = vadd.f32 %v334_v37, %v333_v43  ;;  %v437_v37 = vsel %vm312_vm1, %v394_v24, 0.0  ;;  %v439_v43 = vsel %vm312_vm1, %v395_v30, 0.0  ;;  %v405_v24 = vmul.f32 %v172_v44, %v172_v44 }
  0x28   : > { %v432_v28 = vadd.f32 %v431_v19, %v430_v22  ;;  %v370_v19 = vsel %vm312_vm1, %v178_v16, 0.0  ;;  %v406_v30 = vmul.f32 %v173_v50, %v173_v50 }
  0x29   : > { %v337_v55 = vadd.f32 %v336_v45, %v335_v49  ;;  %v441_v49 = vsel %vm312_vm1, %v396_v36, 0.0 }
  0x2a   : > { %v434_v34 = vadd.f32 %v433_v25, %v432_v28  ;;  %v455_v25 = vsel %vm312_vm1, %v403_v14, 0.0 }
  0x2b   : > { %v339_v61 = vadd.f32 %v338_v51, %v337_v55  ;;  %v443_v55 = vsel %vm312_vm1, %v397_v42, 0.0  ;;  %v409_v42 = vmul.f32 %v176_v4, %v176_v4 }
  0x2c   : > { %v436_v40 = vadd.f32 %v435_v31, %v434_v34  ;;  %v457_v31 = vsel %vm312_vm1, %v404_v20, 0.0  ;;  %v459_v34 = vsel %vm312_vm1, %v405_v24, 0.0 }
  0x2d   : > { %v341_v3 = vadd.f32 %v340_v57, %v339_v61  ;;  %v445_v61 = vsel %vm312_vm1, %v398_v48, 0.0  ;;  %v467_v50 = vsel %vm312_vm1, %v409_v42, 0.0 }
  0x2e   : > { %v438_v46 = vadd.f32 %v437_v37, %v436_v40  ;;  %v461_v40 = vsel %vm312_vm1, %v406_v30, 0.0 }
  0x2f   : > { %v343_v9 = vadd.f32 %v342_v63, %v341_v3  ;;  %v447_v3 = vsel %vm312_vm1, %v399_v54, 0.0 }
  0x30   : > { %v440_v52 = vadd.f32 %v439_v43, %v438_v46  ;;  %v410_v46 = vmul.f32 %v177_v10, %v177_v10 }
  0x31   : > { %v345_v15 = vadd.f32 %v344_v5, %v343_v9  ;;  %v449_v9 = vsel %vm312_vm1, %v400_v60, 0.0 }
  0x32   : > { %v442_v58 = vadd.f32 %v441_v49, %v440_v52  ;;  %v411_v49 = vmul.f32 %v178_v16, %v178_v16  ;;  %v469_v54 = vsel %vm312_vm1, %v410_v46, 0.0 }
  0x33   : > { %v347_v21 = vadd.f32 %v346_v11, %v345_v15  ;;  %v451_v15 = vsel %vm312_vm1, %v401_v2, 0.0 }
  0x34   : > { %v444_v0 = vadd.f32 %v443_v55, %v442_v58 }
  0x35   : > { %v349_v27 = vadd.f32 %v348_v17, %v347_v21  ;;  %v453_v21 = vsel %vm312_vm1, %v402_v8, 0.0 }
  0x36   : > { %v446_v6 = vadd.f32 %v445_v61, %v444_v0 }
  0x37   : > { %v351_v33 = vadd.f32 %v350_v23, %v349_v27 }
  0x38   : > { %v448_v12 = vadd.f32 %v447_v3, %v446_v6 }
  0x39   : > { %v353_v39 = vadd.f32 %v352_v29, %v351_v33  ;;  %v372_v29 = vsel %vm312_vm1, %v179_v26, 0.0  ;;  %v407_v33 = vmul.f32 %v174_v56, %v174_v56 }
  0x3a   : > { %v450_v18 = vadd.f32 %v449_v9, %v448_v12 }
  0x3b   : > { %v355_v45 = vadd.f32 %v354_v35, %v353_v39  ;;  %v180_v35 = vld [vmem:[%s648_s14 + $0xf8] sm:$0xff]  ;;  %v408_v39 = vmul.f32 %v175_v62, %v175_v62  ;;  %v463_v43 = vsel %vm312_vm1, %v407_v33, 0.0 }
  0x3c   : > { %v452_v23 = vadd.f32 %v451_v15, %v450_v18  ;;  %v374_v38 = vsel %vm312_vm1, %v180_v35, 0.0  ;;  %v413_v56 = vmul.f32 %v180_v35, %v180_v35 }
  0x3d   : > { %v357_v51 = vadd.f32 %v356_v41, %v355_v45 }
  0x3e   : > { %v454_v28 = vadd.f32 %v453_v21, %v452_v23  ;;  %v475_v62 = vsel %vm312_vm1, %v413_v56, 0.0 }
  0x3f   : > { %v359_v57 = vadd.f32 %v358_v47, %v357_v51  ;;  %v465_v47 = vsel %vm312_vm1, %v408_v39, 0.0 }
  0x40   : > { %v456_v32 = vadd.f32 %v455_v25, %v454_v28 }
  0x41   : > { %v361_v63 = vadd.f32 %v360_v53, %v359_v57  ;;  %v412_v53 = vmul.f32 %v179_v26, %v179_v26  ;;  %v471_v57 = vsel %vm312_vm1, %v411_v49, 0.0 }
  0x42   : > { %v458_v37 = vadd.f32 %v457_v31, %v456_v32 }
  0x43   : > { %v363_v5 = vadd.f32 %v362_v59, %v361_v63  ;;  %v473_v60 = vsel %vm312_vm1, %v412_v53, 0.0 }
  0x44   : > { %v460_v41 = vadd.f32 %v459_v34, %v458_v37 }
  0x45   : > { %v365_v11 = vadd.f32 %v364_v1, %v363_v5 }
  0x46   : > { %v462_v45 = vadd.f32 %v461_v40, %v460_v41 }
  0x47   : > { %v367_v17 = vadd.f32 %v366_v7, %v365_v11  ;;  %v483_v11 = vld [vmem:[%s653_s17] sm:$0x3] }
  0x48   : > { %v464_v48 = vadd.f32 %v463_v43, %v462_v45 }
  0x49   : > { %v369_v22 = vadd.f32 %v368_v13, %v367_v17 }
  0x4a   : > { %v466_v52 = vadd.f32 %v465_v47, %v464_v48 }
  0x4b   : > { %v371_v27 = vadd.f32 %v370_v19, %v369_v22 }
  0x4c   : > { %v468_v55 = vadd.f32 %v467_v50, %v466_v52 }
  0x4d   : > { %v373_v36 = vadd.f32 %v372_v29, %v371_v27 }
  0x4e   : > { %v470_v59 = vadd.f32 %v469_v54, %v468_v55 }
  0x4f   : > { %v375_v44 = vadd.f32 %v374_v38, %v373_v36 }
  0x50   : > { %v472_v61 = vadd.f32 %v471_v57, %v470_v59 }
  0x51   : > { %v376_v51 = vrot.slane %v375_v44, 4 }
  0x52   : > { %v474_v0 = vadd.f32 %v473_v60, %v472_v61 }
  0x53   : > { %v377_v58 = vadd.f32 %v376_v51, %v375_v44 }
  0x54   : > { %v476_v1 = vadd.f32 %v475_v62, %v474_v0 }
  0x55   : > { %v378_v63 = vrot.slane %v377_v58, 2 }
  0x56   : > { %v477_v3 = vrot.slane %v476_v1, 4 }
  0x57   : > { %v379_v2 = vadd.f32 %v378_v63, %v377_v58 }
  0x58   : > { %v478_v4 = vadd.f32 %v477_v3, %v476_v1 }
  0x59   : > { %v380_v5 = vrot.slane %v379_v2, 1 }
  0x5a   : > { %v479_v6 = vrot.slane %v478_v4, 2 }
  0x5b   : > { %v381_v8 = vadd.f32 %v380_v5, %v379_v2 }
  0x5c   : > { %v480_v7 = vadd.f32 %v479_v6, %v478_v4 }
  0x5e   : > { %v481_v9 = vrot.slane %v480_v7, 1 }
  0x60   : > { %v482_v10 = vadd.f32 %v481_v9, %v480_v7 }
  0x62   : > { %v485_v12 = vsel %vm484_vm2, %v381_v8, %v482_v10 }
  0x63   : > { %v486_v13 = vadd.f32 %v485_v12, %v483_v11 }
  0x65   : > { %488 = vst.msk [vmem:[%s653_s17] sm:$0x3] %vm147_vm0, %v486_v13 }
  0x66 PF: > { %s11_s8 = sadd.s32 1, %s614_s8   ;;  %s767_s6 = smov %s610_s7 }
  0x67   : > { %p8_p5 = scmp.ge.s32.totalorder %s11_s8, 4   ;;  %s768_s7 = smov %s770_s9 }
  0x69   :  { %10 = sbr.rel (!%p8_p5) target bundleno = 2 (0x2), region = 58 }

// kernel: down_encoder_block2d_forward.10
= control target key start
LH: loop header
LB: loop body
LE: loop exit
PB: predicated region body
PF: predicated region fallthrough
CT: control target
= control target key end

     0   :  { %v1606_v0 = vmov 0.0|0.0   ;;  %vm249_vm0 = vcmask 261120   ;;  %s2785_s1 = inlined_call_operand.vmem [shape: f32[288,128], index: 1, kind: input, shape index: {}]   ;;  %s2786_s0 = inlined_call_operand.vmem [shape: f32[512,288], index: 0, kind: input, shape index: {}]   ;;  %s2787_s2 = inlined_call_operand.vmem [shape: f32[1,128], index: 2, kind: input, shape index: {}]   ;;  %s2788_s3 = inlined_call_operand.vmem [shape: f32[512,128], index: 3, kind: output, shape index: {}]  }
   0x1   :  { %1517 = vmatprep.subr.bf16.mxu0 %v1606_v0  ;;  %1573 = vmatprep.subr.bf16.mxu1 %v1606_v0  ;;  %v206_v1 = vld [vmem:[%s2785_s1] sm:$0xff]  ;;  %v207_v2 = vld [vmem:[%s2785_s1 + $0x8] sm:$0xff]  ;;  %v208_v3 = vld [vmem:[%s2785_s1 + $0x10] sm:$0xff] }
   0x2   :  { %v1518_v4 = vpack.c.bf16 %v207_v2, %v206_v1  ;;  %v209_v5 = vld [vmem:[%s2785_s1 + $0x18] sm:$0xff]  ;;  %v210_v7 = vld [vmem:[%s2785_s1 + $0x20] sm:$0xff]  ;;  %v211_v8 = vld [vmem:[%s2785_s1 + $0x28] sm:$0xff] }
   0x3   :  { %v1521_v6 = vpack.c.bf16 %v209_v5, %v208_v3  ;;  %v1524_v9 = vpack.c.bf16 %v211_v8, %v210_v7  ;;  %v212_v10 = vld [vmem:[%s2785_s1 + $0x30] sm:$0xff]  ;;  %v213_v11 = vld [vmem:[%s2785_s1 + $0x38] sm:$0xff]  ;;  %v15_v12 = vld [vmem:[%s2786_s0 + $0x8] sm:$0xff] }
   0x4   :  { %1519 = vmatpush1.bf16.msra.mxu0 %v1518_v4  ;;  %1589 = vmatpush1.bf16.msra.mxu1 %v1518_v4  ;;  %v1527_v13 = vpack.c.bf16 %v213_v11, %v212_v10  ;;  %v159_v14 = vld [vmem:[%s2786_s0 + $0x488] sm:$0xff]  ;;  %v214_v15 = vld [vmem:[%s2785_s1 + $0x40] sm:$0xff]  ;;  %v216_v18 = vld [vmem:[%s2785_s1 + $0x50] sm:$0xff] }
   0x5   :  { %1520 = vmatprep.subr.bf16.mxu0 %v1606_v0  ;;  %1574 = vmatprep.subr.bf16.mxu1 %v1606_v0  ;;  %v215_v16 = vld [vmem:[%s2785_s1 + $0x48] sm:$0xff]  ;;  %v217_v19 = vld [vmem:[%s2785_s1 + $0x58] sm:$0xff]  ;;  %v218_v21 = vld [vmem:[%s2785_s1 + $0x60] sm:$0xff] }
   0x6   :  { %506 = vmatprep.mubr.f32.mxu0 %v15_v12  ;;  %746 = vmatprep.mubr.f32.mxu1 %v159_v14  ;;  %v1530_v17 = vpack.c.bf16 %v215_v16, %v214_v15  ;;  %v1533_v20 = vpack.c.bf16 %v217_v19, %v216_v18  ;;  %v219_v22 = vld [vmem:[%s2785_s1 + $0x68] sm:$0xff]  ;;  %v220_v24 = vld [vmem:[%s2785_s1 + $0x70] sm:$0xff]  ;;  %v221_v25 = vld [vmem:[%s2785_s1 + $0x78] sm:$0xff] }
   0x7   :  { %v1536_v23 = vpack.c.bf16 %v219_v22, %v218_v21  ;;  %v1539_v26 = vpack.c.bf16 %v221_v25, %v220_v24  ;;  %v222_v27 = vld [vmem:[%s2785_s1 + $0x80] sm:$0xff]  ;;  %v223_v28 = vld [vmem:[%s2785_s1 + $0x88] sm:$0xff]  ;;  %v224_v30 = vld [vmem:[%s2785_s1 + $0x90] sm:$0xff] }
   0x8   :  { %1522 = vmatpush1.bf16.msra.mxu0 %v1521_v6  ;;  %1590 = vmatpush1.bf16.msra.mxu1 %v1521_v6  ;;  %v1542_v29 = vpack.c.bf16 %v223_v28, %v222_v27  ;;  %v225_v31 = vld [vmem:[%s2785_s1 + $0x98] sm:$0xff]  ;;  %v226_v33 = vld [vmem:[%s2785_s1 + $0xa0] sm:$0xff]  ;;  %v227_v34 = vld [vmem:[%s2785_s1 + $0xa8] sm:$0xff] }
   0x9   :  { %1523 = vmatprep.subr.bf16.mxu0 %v1606_v0  ;;  %1575 = vmatprep.subr.bf16.mxu1 %v1606_v0  ;;  %v1545_v32 = vpack.c.bf16 %v225_v31, %v224_v30  ;;  %v1548_v35 = vpack.c.bf16 %v227_v34, %v226_v33  ;;  %v228_v36 = vld [vmem:[%s2785_s1 + $0xb0] sm:$0xff]  ;;  %v229_v37 = vld [vmem:[%s2785_s1 + $0xb8] sm:$0xff]  ;;  %v230_v39 = vld [vmem:[%s2785_s1 + $0xc0] sm:$0xff] }
   0xa   :  { %v1551_v38 = vpack.c.bf16 %v229_v37, %v228_v36  ;;  %v231_v40 = vld [vmem:[%s2785_s1 + $0xc8] sm:$0xff]  ;;  %v232_v42 = vld [vmem:[%s2785_s1 + $0xd0] sm:$0xff]  ;;  %v233_v43 = vld [vmem:[%s2785_s1 + $0xd8] sm:$0xff] }
   0xb   :  { %v1554_v41 = vpack.c.bf16 %v231_v40, %v230_v39  ;;  %v1557_v44 = vpack.c.bf16 %v233_v43, %v232_v42  ;;  %v234_v45 = vld [vmem:[%s2785_s1 + $0xe0] sm:$0xff]  ;;  %v235_v46 = vld [vmem:[%s2785_s1 + $0xe8] sm:$0xff]  ;;  %v236_v48 = vld [vmem:[%s2785_s1 + $0xf0] sm:$0xff] }
   0xc   :  { %1525 = vmatpush1.bf16.msra.mxu0 %v1524_v9  ;;  %1591 = vmatpush1.bf16.msra.mxu1 %v1524_v9  ;;  %v1560_v47 = vpack.c.bf16 %v235_v46, %v234_v45  ;;  %v237_v49 = vld [vmem:[%s2785_s1 + $0xf8] sm:$0xff]  ;;  %v238_v50 = vld [vmem:[%s2785_s1 + $0x100] sm:$0xff]  ;;  %v239_v51 = vld [vmem:[%s2785_s1 + $0x108] sm:$0xff] }
   0xd   :  { %1526 = vmatprep.subr.bf16.mxu0 %v1606_v0  ;;  %1576 = vmatprep.subr.bf16.mxu1 %v1606_v0  ;;  %v1563_v52 = vpack.c.bf16 %v237_v49, %v236_v48  ;;  %v1565_v53 = vpack.c.bf16 %v239_v51, %v238_v50  ;;  %v240_v54 = vld [vmem:[%s2785_s1 + $0x110] sm:$0xff]  ;;  %v241_v55 = vld [vmem:[%s2785_s1 + $0x118] sm:$0xff]  ;;  %v14_v56 = vld [vmem:[%s2786_s0] sm:$0xff] }
   0xe   :  { %v158_v57 = vld [vmem:[%s2786_s0 + $0x480] sm:$0xff]  ;;  %v1569_v59 = vpack.c.bf16 %v241_v55, %v240_v54  ;;  %v17_v61 = vld [vmem:[%s2786_s0 + $0x18] sm:$0xff]  ;;  %v20_v1 = vld [vmem:[%s2786_s0 + $0x30] sm:$0xff] }
   0xf   :  { %v18_v58 = vld [vmem:[%s2786_s0 + $0x20] sm:$0xff]  ;;  %v161_v62 = vld [vmem:[%s2786_s0 + $0x498] sm:$0xff]  ;;  %v164_v2 = vld [vmem:[%s2786_s0 + $0x4b0] sm:$0xff] }
  0x10   :  { %1528 = vmatpush1.bf16.msra.mxu0 %v1527_v13  ;;  %1592 = vmatpush1.bf16.msra.mxu1 %v1527_v13  ;;  %v162_v60 = vld [vmem:[%s2786_s0 + $0x4a0] sm:$0xff]  ;;  %v21_v63 = vld [vmem:[%s2786_s0 + $0x38] sm:$0xff]  ;;  %v24_v3 = vld [vmem:[%s2786_s0 + $0x50] sm:$0xff] }
  0x11   :  { %1529 = vmatprep.subr.bf16.mxu0 %v1606_v0  ;;  %1577 = vmatprep.subr.bf16.mxu1 %v1606_v0  ;;  %v168_v4 = vld [vmem:[%s2786_s0 + $0x4d0] sm:$0xff]  ;;  %v23_v5 = vld [vmem:[%s2786_s0 + $0x48] sm:$0xff]  ;;  %v26_v9 = vld [vmem:[%s2786_s0 + $0x60] sm:$0xff] }
  0x12   :  { %v167_v6 = vld [vmem:[%s2786_s0 + $0x4c8] sm:$0xff]  ;;  %v170_v10 = vld [vmem:[%s2786_s0 + $0x4e0] sm:$0xff]  ;;  %v29_v13 = vld [vmem:[%s2786_s0 + $0x78] sm:$0xff] }
  0x13   :  { %v27_v7 = vld [vmem:[%s2786_s0 + $0x68] sm:$0xff]  ;;  %v30_v11 = vld [vmem:[%s2786_s0 + $0x80] sm:$0xff]  ;;  %v173_v14 = vld [vmem:[%s2786_s0 + $0x4f8] sm:$0xff] }
  0x14   :  { %1531 = vmatpush1.bf16.msra.mxu0 %v1530_v17  ;;  %1593 = vmatpush1.bf16.msra.mxu1 %v1530_v17  ;;  %v171_v8 = vld [vmem:[%s2786_s0 + $0x4e8] sm:$0xff]  ;;  %v174_v12 = vld [vmem:[%s2786_s0 + $0x500] sm:$0xff]  ;;  %v33_v15 = vld [vmem:[%s2786_s0 + $0x98] sm:$0xff] }
  0x15   :  { %1532 = vmatprep.subr.bf16.mxu0 %v1606_v0  ;;  %1578 = vmatprep.subr.bf16.mxu1 %v1606_v0  ;;  %v177_v16 = vld [vmem:[%s2786_s0 + $0x518] sm:$0xff]  ;;  %v32_v17 = vld [vmem:[%s2786_s0 + $0x90] sm:$0xff]  ;;  %v35_v21 = vld [vmem:[%s2786_s0 + $0xa8] sm:$0xff] }
  0x16   :  { %v176_v18 = vld [vmem:[%s2786_s0 + $0x510] sm:$0xff]  ;;  %v179_v22 = vld [vmem:[%s2786_s0 + $0x528] sm:$0xff]  ;;  %v38_v25 = vld [vmem:[%s2786_s0 + $0xc0] sm:$0xff] }
  0x17   :  { %v36_v19 = vld [vmem:[%s2786_s0 + $0xb0] sm:$0xff]  ;;  %v183_v24 = vld [vmem:[%s2786_s0 + $0x548] sm:$0xff]  ;;  %v42_v27 = vld [vmem:[%s2786_s0 + $0xe0] sm:$0xff] }
  0x18   :  { %1534 = vmatpush1.bf16.msra.mxu0 %v1533_v20  ;;  %1594 = vmatpush1.bf16.msra.mxu1 %v1533_v20  ;;  %v180_v20 = vld [vmem:[%s2786_s0 + $0x530] sm:$0xff]  ;;  %v186_v28 = vld [vmem:[%s2786_s0 + $0x560] sm:$0xff]  ;;  %v185_v30 = vld [vmem:[%s2786_s0 + $0x558] sm:$0xff] }
  0x19   :  { %1535 = vmatprep.subr.bf16.mxu0 %v1606_v0  ;;  %1579 = vmatprep.subr.bf16.mxu1 %v1606_v0  ;;  %v45_v31 = vld [vmem:[%s2786_s0 + $0xf8] sm:$0xff]  ;;  %v44_v33 = vld [vmem:[%s2786_s0 + $0xf0] sm:$0xff]  ;;  %v47_v37 = vld [vmem:[%s2786_s0 + $0x108] sm:$0xff] }
  0x1a   :  { %v188_v34 = vld [vmem:[%s2786_s0 + $0x570] sm:$0xff]  ;;  %v51_v39 = vld [vmem:[%s2786_s0 + $0x128] sm:$0xff]  ;;  %v194_v42 = vld [vmem:[%s2786_s0 + $0x5a0] sm:$0xff] }
  0x1b   :  { %v192_v36 = vld [vmem:[%s2786_s0 + $0x590] sm:$0xff]  ;;  %v195_v40 = vld [vmem:[%s2786_s0 + $0x5a8] sm:$0xff]  ;;  %v54_v43 = vld [vmem:[%s2786_s0 + $0x140] sm:$0xff] }
  0x1c   :  { %1537 = vmatpush1.bf16.msra.mxu0 %v1536_v23  ;;  %1595 = vmatpush1.bf16.msra.mxu1 %v1536_v23  ;;  %v39_v23 = vld [vmem:[%s2786_s0 + $0xc8] sm:$0xff]  ;;  %v53_v45 = vld [vmem:[%s2786_s0 + $0x138] sm:$0xff]  ;;  %v56_v49 = vld [vmem:[%s2786_s0 + $0x150] sm:$0xff] }
  0x1d   :  { %1538 = vmatprep.subr.bf16.mxu0 %v1606_v0  ;;  %1580 = vmatprep.subr.bf16.mxu1 %v1606_v0  ;;  %v197_v46 = vld [vmem:[%s2786_s0 + $0x5b8] sm:$0xff]  ;;  %v200_v50 = vld [vmem:[%s2786_s0 + $0x5d0] sm:$0xff]  ;;  %v203_v54 = vld [vmem:[%s2786_s0 + $0x5e8] sm:$0xff] }
  0x1e   :  { %v201_v48 = vld [vmem:[%s2786_s0 + $0x5d8] sm:$0xff]  ;;  %v60_v51 = vld [vmem:[%s2786_s0 + $0x170] sm:$0xff]  ;;  %v63_v55 = vld [vmem:[%s2786_s0 + $0x188] sm:$0xff] }
  0x20   :  { %1540 = vmatpush1.bf16.msra.mxu0 %v1539_v26  ;;  %1596 = vmatpush1.bf16.msra.mxu1 %v1539_v26  ;;  %v182_v26 = vld [vmem:[%s2786_s0 + $0x540] sm:$0xff] }
  0x21   :  { %1541 = vmatprep.subr.bf16.mxu0 %v1606_v0  ;;  %1581 = vmatprep.subr.bf16.mxu1 %v1606_v0 }
  0x24   :  { %1543 = vmatpush1.bf16.msra.mxu0 %v1542_v29  ;;  %1597 = vmatpush1.bf16.msra.mxu1 %v1542_v29  ;;  %v41_v29 = vld [vmem:[%s2786_s0 + $0xd8] sm:$0xff] }
  0x25   :  { %1544 = vmatprep.subr.bf16.mxu0 %v1606_v0  ;;  %1582 = vmatprep.subr.bf16.mxu1 %v1606_v0 }
  0x28   :  { %1546 = vmatpush1.bf16.msra.mxu0 %v1545_v32  ;;  %1598 = vmatpush1.bf16.msra.mxu1 %v1545_v32  ;;  %v189_v32 = vld [vmem:[%s2786_s0 + $0x578] sm:$0xff] }
  0x29   :  { %1547 = vmatprep.subr.bf16.mxu0 %v1606_v0  ;;  %1583 = vmatprep.subr.bf16.mxu1 %v1606_v0 }
  0x2c   :  { %1549 = vmatpush1.bf16.msra.mxu0 %v1548_v35  ;;  %1599 = vmatpush1.bf16.msra.mxu1 %v1548_v35  ;;  %v48_v35 = vld [vmem:[%s2786_s0 + $0x110] sm:$0xff] }
  0x2d   :  { %1550 = vmatprep.subr.bf16.mxu0 %v1606_v0  ;;  %1584 = vmatprep.subr.bf16.mxu1 %v1606_v0 }
  0x30   :  { %1552 = vmatpush1.bf16.msra.mxu0 %v1551_v38  ;;  %1600 = vmatpush1.bf16.msra.mxu1 %v1551_v38  ;;  %v191_v38 = vld [vmem:[%s2786_s0 + $0x588] sm:$0xff] }
  0x31   :  { %1553 = vmatprep.subr.bf16.mxu0 %v1606_v0  ;;  %1585 = vmatprep.subr.bf16.mxu1 %v1606_v0 }
  0x34   :  { %1555 = vmatpush1.bf16.msra.mxu0 %v1554_v41  ;;  %1601 = vmatpush1.bf16.msra.mxu1 %v1554_v41  ;;  %v50_v41 = vld [vmem:[%s2786_s0 + $0x120] sm:$0xff] }
  0x35   :  { %1556 = vmatprep.subr.bf16.mxu0 %v1606_v0  ;;  %1586 = vmatprep.subr.bf16.mxu1 %v1606_v0 }
  0x38   :  { %1558 = vmatpush1.bf16.msra.mxu0 %v1557_v44  ;;  %1602 = vmatpush1.bf16.msra.mxu1 %v1557_v44  ;;  %v198_v44 = vld [vmem:[%s2786_s0 + $0x5c0] sm:$0xff] }
  0x39   :  { %1559 = vmatprep.subr.bf16.mxu0 %v1606_v0  ;;  %1587 = vmatprep.subr.bf16.mxu1 %v1606_v0 }
  0x3c   :  { %1561 = vmatpush1.bf16.msra.mxu0 %v1560_v47  ;;  %1603 = vmatpush1.bf16.msra.mxu1 %v1560_v47  ;;  %v57_v47 = vld [vmem:[%s2786_s0 + $0x158] sm:$0xff] }
  0x3d   :  { %1562 = vmatprep.subr.bf16.mxu0 %v1606_v0  ;;  %1588 = vmatprep.subr.bf16.mxu1 %v1606_v0  ;;  %v165_v0 = vld [vmem:[%s2786_s0 + $0x4b8] sm:$0xff] }
  0x40   :  { %1564 = vmatpush1.bf16.msra.mxu0 %v1563_v52  ;;  %1604 = vmatpush1.bf16.msra.mxu1 %v1563_v52  ;;  %v204_v52 = vld [vmem:[%s2786_s0 + $0x5f0] sm:$0xff] }
  0x41   :  { %1566 = vmatprep.subr.bf16.mxu1 %v1565_v53 }
  0x43   :  { %507 = vmatmul.mubr.f32.vlgmr.msra.gmra.mrb[0].mxu0 %v14_v56  ;;  %747 = vmatmul.mubr.f32.vlgmr.msra.gmra.mrb[0].mxu1 %v158_v57  ;;  %v16_v56 = vld [vmem:[%s2786_s0 + $0x10] sm:$0xff]  ;;  %v62_v57 = vld [vmem:[%s2786_s0 + $0x180] sm:$0xff] }
  0x44   :  { %1568 = vmatpush3.bf16.msra.mxu1 %v1565_v53  ;;  %511 = vmatprep.mubr.f32.mxu0 %v18_v58  ;;  %v59_v53 = vld [vmem:[%s2786_s0 + $0x168] sm:$0xff] }
  0x45   :  { %751 = vmatprep.mubr.f32.mxu1 %v162_v60  ;;  %1570 = vmatprep.subr.bf16.mxu1 %v1569_v59  ;;  %v19_v58 = vld [vmem:[%s2786_s0 + $0x28] sm:$0xff]  ;;  %v22_v60 = vld [vmem:[%s2786_s0 + $0x40] sm:$0xff] }
  0x47   :  { %512 = vmatmul.mubr.f32.gmra.mrb[2].mxu0 %v17_v61  ;;  %752 = vmatmul.mubr.f32.gmra.mrb[2].mxu1 %v161_v62  ;;  %v65_v61 = vld [vmem:[%s2786_s0 + $0x198] sm:$0xff] }
  0x48   :  { %516 = vmatprep.mubr.f32.mxu0 %v21_v63  ;;  %756 = vmatprep.mubr.f32.mxu1 %v165_v0  ;;  %v25_v62 = vld [vmem:[%s2786_s0 + $0x58] sm:$0xff]  ;;  %v28_v0 = vld [vmem:[%s2786_s0 + $0x70] sm:$0xff] }
  0x49   :  { %1572 = vmatpush3.bf16.msra.mxu1 %v1569_v59  ;;  %v66_v59 = vld [vmem:[%s2786_s0 + $0x1a0] sm:$0xff]  ;;  %v69_v63 = vld [vmem:[%s2786_s0 + $0x1b8] sm:$0xff] }
  0x4b   :  { %517 = vmatmul.mubr.f32.gmra.mrb[4].mxu0 %v20_v1  ;;  %757 = vmatmul.mubr.f32.gmra.mrb[4].mxu1 %v164_v2  ;;  %v68_v1 = vld [vmem:[%s2786_s0 + $0x1b0] sm:$0xff]  ;;  %v31_v2 = vld [vmem:[%s2786_s0 + $0x88] sm:$0xff] }
  0x4c   :  { %521 = vmatprep.mubr.f32.mxu0 %v24_v3  ;;  %761 = vmatprep.mubr.f32.mxu1 %v168_v4  ;;  %v72_v3 = vld [vmem:[%s2786_s0 + $0x1d0] sm:$0xff]  ;;  %v34_v4 = vld [vmem:[%s2786_s0 + $0xa0] sm:$0xff] }
  0x4f   :  { %522 = vmatmul.mubr.f32.gmra.mrb[6].mxu0 %v23_v5  ;;  %762 = vmatmul.mubr.f32.gmra.mrb[6].mxu1 %v167_v6  ;;  %v71_v5 = vld [vmem:[%s2786_s0 + $0x1c8] sm:$0xff]  ;;  %v37_v6 = vld [vmem:[%s2786_s0 + $0xb8] sm:$0xff] }
  0x50   :  { %526 = vmatprep.mubr.f32.mxu0 %v27_v7  ;;  %766 = vmatprep.mubr.f32.mxu1 %v171_v8  ;;  %v75_v7 = vld [vmem:[%s2786_s0 + $0x1e8] sm:$0xff]  ;;  %v40_v8 = vld [vmem:[%s2786_s0 + $0xd0] sm:$0xff] }
  0x53   :  { %527 = vmatmul.mubr.f32.gmra.mrb[8].mxu0 %v26_v9  ;;  %767 = vmatmul.mubr.f32.gmra.mrb[8].mxu1 %v170_v10  ;;  %v74_v9 = vld [vmem:[%s2786_s0 + $0x1e0] sm:$0xff]  ;;  %v43_v10 = vld [vmem:[%s2786_s0 + $0xe8] sm:$0xff] }
  0x54   :  { %531 = vmatprep.mubr.f32.mxu0 %v30_v11  ;;  %771 = vmatprep.mubr.f32.mxu1 %v174_v12  ;;  %v78_v11 = vld [vmem:[%s2786_s0 + $0x200] sm:$0xff] }
  0x55   :  { %v46_v12 = vld [vmem:[%s2786_s0 + $0x100] sm:$0xff] }
  0x57   :  { %532 = vmatmul.mubr.f32.gmra.mrb[10].mxu0 %v29_v13  ;;  %772 = vmatmul.mubr.f32.gmra.mrb[10].mxu1 %v173_v14  ;;  %v77_v13 = vld [vmem:[%s2786_s0 + $0x1f8] sm:$0xff] }
  0x58   :  { %536 = vmatprep.mubr.f32.mxu0 %v33_v15  ;;  %776 = vmatprep.mubr.f32.mxu1 %v177_v16  ;;  %v49_v14 = vld [vmem:[%s2786_s0 + $0x118] sm:$0xff]  ;;  %v52_v16 = vld [vmem:[%s2786_s0 + $0x130] sm:$0xff] }
  0x59   :  { %v81_v15 = vld [vmem:[%s2786_s0 + $0x218] sm:$0xff] }
  0x5b   :  { %537 = vmatmul.mubr.f32.gmra.mrb[12].mxu0 %v32_v17  ;;  %777 = vmatmul.mubr.f32.gmra.mrb[12].mxu1 %v176_v18  ;;  %v80_v17 = vld [vmem:[%s2786_s0 + $0x210] sm:$0xff]  ;;  %v55_v18 = vld [vmem:[%s2786_s0 + $0x148] sm:$0xff] }
  0x5c   :  { %541 = vmatprep.mubr.f32.mxu0 %v36_v19  ;;  %781 = vmatprep.mubr.f32.mxu1 %v180_v20  ;;  %v84_v19 = vld [vmem:[%s2786_s0 + $0x230] sm:$0xff]  ;;  %v58_v20 = vld [vmem:[%s2786_s0 + $0x160] sm:$0xff] }
  0x5f   :  { %542 = vmatmul.mubr.f32.gmra.mrb[14].mxu0 %v35_v21  ;;  %782 = vmatmul.mubr.f32.gmra.mrb[14].mxu1 %v179_v22  ;;  %v83_v21 = vld [vmem:[%s2786_s0 + $0x228] sm:$0xff]  ;;  %v61_v22 = vld [vmem:[%s2786_s0 + $0x178] sm:$0xff] }
  0x60   :  { %546 = vmatprep.mubr.f32.mxu0 %v39_v23  ;;  %786 = vmatprep.mubr.f32.mxu1 %v183_v24  ;;  %v87_v23 = vld [vmem:[%s2786_s0 + $0x248] sm:$0xff]  ;;  %v64_v24 = vld [vmem:[%s2786_s0 + $0x190] sm:$0xff] }
  0x63   :  { %547 = vmatmul.mubr.f32.gmra.mrb[16].mxu0 %v38_v25  ;;  %787 = vmatmul.mubr.f32.gmra.mrb[16].mxu1 %v182_v26  ;;  %v86_v25 = vld [vmem:[%s2786_s0 + $0x240] sm:$0xff]  ;;  %v67_v26 = vld [vmem:[%s2786_s0 + $0x1a8] sm:$0xff] }
  0x64   :  { %551 = vmatprep.mubr.f32.mxu0 %v42_v27  ;;  %791 = vmatprep.mubr.f32.mxu1 %v186_v28  ;;  %v90_v27 = vld [vmem:[%s2786_s0 + $0x260] sm:$0xff] }
  0x65   :  { %v70_v28 = vld [vmem:[%s2786_s0 + $0x1c0] sm:$0xff] }
  0x67   :  { %552 = vmatmul.mubr.f32.gmra.mrb[18].mxu0 %v41_v29  ;;  %792 = vmatmul.mubr.f32.gmra.mrb[18].mxu1 %v185_v30  ;;  %v89_v29 = vld [vmem:[%s2786_s0 + $0x258] sm:$0xff] }
  0x68   :  { %556 = vmatprep.mubr.f32.mxu0 %v45_v31  ;;  %796 = vmatprep.mubr.f32.mxu1 %v189_v32  ;;  %v73_v30 = vld [vmem:[%s2786_s0 + $0x1d8] sm:$0xff]  ;;  %v76_v32 = vld [vmem:[%s2786_s0 + $0x1f0] sm:$0xff] }
  0x69   :  { %v93_v31 = vld [vmem:[%s2786_s0 + $0x278] sm:$0xff] }
  0x6b   :  { %557 = vmatmul.mubr.f32.gmra.mrb[20].mxu0 %v44_v33  ;;  %797 = vmatmul.mubr.f32.gmra.mrb[20].mxu1 %v188_v34  ;;  %v92_v33 = vld [vmem:[%s2786_s0 + $0x270] sm:$0xff]  ;;  %v79_v34 = vld [vmem:[%s2786_s0 + $0x208] sm:$0xff] }
  0x6c   :  { %561 = vmatprep.mubr.f32.mxu0 %v48_v35  ;;  %801 = vmatprep.mubr.f32.mxu1 %v192_v36  ;;  %v96_v35 = vld [vmem:[%s2786_s0 + $0x290] sm:$0xff]  ;;  %v82_v36 = vld [vmem:[%s2786_s0 + $0x220] sm:$0xff] }
  0x6f   :  { %562 = vmatmul.mubr.f32.gmra.mrb[22].mxu0 %v47_v37  ;;  %802 = vmatmul.mubr.f32.gmra.mrb[22].mxu1 %v191_v38  ;;  %v95_v37 = vld [vmem:[%s2786_s0 + $0x288] sm:$0xff]  ;;  %v85_v38 = vld [vmem:[%s2786_s0 + $0x238] sm:$0xff] }
  0x70   :  { %566 = vmatprep.mubr.f32.mxu0 %v51_v39  ;;  %806 = vmatprep.mubr.f32.mxu1 %v195_v40  ;;  %v99_v39 = vld [vmem:[%s2786_s0 + $0x2a8] sm:$0xff]  ;;  %v88_v40 = vld [vmem:[%s2786_s0 + $0x250] sm:$0xff] }
  0x73   :  { %567 = vmatmul.mubr.f32.gmra.mrb[24].mxu0 %v50_v41  ;;  %807 = vmatmul.mubr.f32.gmra.mrb[24].mxu1 %v194_v42  ;;  %v98_v41 = vld [vmem:[%s2786_s0 + $0x2a0] sm:$0xff]  ;;  %v91_v42 = vld [vmem:[%s2786_s0 + $0x268] sm:$0xff] }
  0x74   :  { %571 = vmatprep.mubr.f32.mxu0 %v54_v43  ;;  %811 = vmatprep.mubr.f32.mxu1 %v198_v44  ;;  %v102_v43 = vld [vmem:[%s2786_s0 + $0x2c0] sm:$0xff] }
  0x75   :  { %v94_v44 = vld [vmem:[%s2786_s0 + $0x280] sm:$0xff] }
  0x77   :  { %572 = vmatmul.mubr.f32.gmra.mrb[26].mxu0 %v53_v45  ;;  %812 = vmatmul.mubr.f32.gmra.mrb[26].mxu1 %v197_v46  ;;  %v101_v45 = vld [vmem:[%s2786_s0 + $0x2b8] sm:$0xff] }
  0x78   :  { %576 = vmatprep.mubr.f32.mxu0 %v57_v47  ;;  %816 = vmatprep.mubr.f32.mxu1 %v201_v48  ;;  %v97_v46 = vld [vmem:[%s2786_s0 + $0x298] sm:$0xff]  ;;  %v100_v48 = vld [vmem:[%s2786_s0 + $0x2b0] sm:$0xff] }
  0x79   :  { %v105_v47 = vld [vmem:[%s2786_s0 + $0x2d8] sm:$0xff] }
  0x7b   :  { %577 = vmatmul.mubr.f32.gmra.mrb[28].mxu0 %v56_v49  ;;  %817 = vmatmul.mubr.f32.gmra.mrb[28].mxu1 %v200_v50  ;;  %v104_v49 = vld [vmem:[%s2786_s0 + $0x2d0] sm:$0xff]  ;;  %v103_v50 = vld [vmem:[%s2786_s0 + $0x2c8] sm:$0xff] }
  0x7c   :  { %581 = vmatprep.mubr.f32.mxu0 %v60_v51  ;;  %821 = vmatprep.mubr.f32.mxu1 %v204_v52  ;;  %v108_v51 = vld [vmem:[%s2786_s0 + $0x2f0] sm:$0xff]  ;;  %v106_v52 = vld [vmem:[%s2786_s0 + $0x2e0] sm:$0xff] }
  0x7f   :  { %582 = vmatmul.mubr.f32.gmra.mrb[30].mxu0 %v59_v53  ;;  %822 = vmatmul.mubr.f32.gmra.mrb[30].mxu1 %v203_v54  ;;  %v107_v53 = vld [vmem:[%s2786_s0 + $0x2e8] sm:$0xff]  ;;  %v109_v54 = vld [vmem:[%s2786_s0 + $0x2f8] sm:$0xff] }
  0x80   :  { %586 = vmatprep.mubr.f32.mxu0 %v63_v55  ;;  %1421 = vmatprep.mubr.msk.f32.mxu1 %vm249_vm0, %v16_v56  ;;  %v111_v55 = vld [vmem:[%s2786_s0 + $0x308] sm:$0xff]  ;;  %v112_v56 = vld [vmem:[%s2786_s0 + $0x310] sm:$0xff] }
  0x83   :  { %587 = vmatmul.mubr.f32.gmra.mrb[32].mxu0 %v62_v57  ;;  %1422 = vmatmul.mubr.msk.f32.vlgmr.msra.gmra.mrb[32].mxu1 %vm249_vm0, %v19_v58  ;;  %v110_v57 = vld [vmem:[%s2786_s0 + $0x300] sm:$0xff]  ;;  %v115_v58 = vld [vmem:[%s2786_s0 + $0x328] sm:$0xff] }
  0x84   :  { %591 = vmatprep.mubr.f32.mxu0 %v66_v59  ;;  %1424 = vmatprep.mubr.msk.f32.mxu1 %vm249_vm0, %v22_v60  ;;  %v114_v59 = vld [vmem:[%s2786_s0 + $0x320] sm:$0xff] }
  0x85   :  { %v118_v60 = vld [vmem:[%s2786_s0 + $0x340] sm:$0xff] }
  0x87   :  { %592 = vmatmul.mubr.f32.gmra.mrb[34].mxu0 %v65_v61  ;;  %1425 = vmatmul.mubr.msk.f32.gmra.mrb[34].mxu1 %vm249_vm0, %v25_v62  ;;  %v113_v61 = vld [vmem:[%s2786_s0 + $0x318] sm:$0xff] }
  0x88   :  { %596 = vmatprep.mubr.f32.mxu0 %v69_v63  ;;  %1427 = vmatprep.mubr.msk.f32.mxu1 %vm249_vm0, %v28_v0  ;;  %v121_v62 = vld [vmem:[%s2786_s0 + $0x358] sm:$0xff]  ;;  %v124_v0 = vld [vmem:[%s2786_s0 + $0x370] sm:$0xff] }
  0x89   :  { %v117_v63 = vld [vmem:[%s2786_s0 + $0x338] sm:$0xff] }
  0x8b   :  { %597 = vmatmul.mubr.f32.gmra.mrb[36].mxu0 %v68_v1  ;;  %1428 = vmatmul.mubr.msk.f32.gmra.mrb[36].mxu1 %vm249_vm0, %v31_v2  ;;  %v116_v1 = vld [vmem:[%s2786_s0 + $0x330] sm:$0xff]  ;;  %v127_v2 = vld [vmem:[%s2786_s0 + $0x388] sm:$0xff] }
  0x8c   :  { %601 = vmatprep.mubr.f32.mxu0 %v72_v3  ;;  %1430 = vmatprep.mubr.msk.f32.mxu1 %vm249_vm0, %v34_v4  ;;  %v120_v3 = vld [vmem:[%s2786_s0 + $0x350] sm:$0xff]  ;;  %v130_v4 = vld [vmem:[%s2786_s0 + $0x3a0] sm:$0xff] }
  0x8f   :  { %602 = vmatmul.mubr.f32.gmra.mrb[38].mxu0 %v71_v5  ;;  %1431 = vmatmul.mubr.msk.f32.gmra.mrb[38].mxu1 %vm249_vm0, %v37_v6  ;;  %v119_v5 = vld [vmem:[%s2786_s0 + $0x348] sm:$0xff]  ;;  %v133_v6 = vld [vmem:[%s2786_s0 + $0x3b8] sm:$0xff] }
  0x90   :  { %606 = vmatprep.mubr.f32.mxu0 %v75_v7  ;;  %1433 = vmatprep.mubr.msk.f32.mxu1 %vm249_vm0, %v40_v8  ;;  %v123_v7 = vld [vmem:[%s2786_s0 + $0x368] sm:$0xff]  ;;  %v136_v8 = vld [vmem:[%s2786_s0 + $0x3d0] sm:$0xff] }
  0x93   :  { %607 = vmatmul.mubr.f32.gmra.mrb[40].mxu0 %v74_v9  ;;  %1434 = vmatmul.mubr.msk.f32.gmra.mrb[40].mxu1 %vm249_vm0, %v43_v10  ;;  %v122_v9 = vld [vmem:[%s2786_s0 + $0x360] sm:$0xff]  ;;  %v139_v10 = vld [vmem:[%s2786_s0 + $0x3e8] sm:$0xff] }
  0x94   :  { %611 = vmatprep.mubr.f32.mxu0 %v78_v11  ;;  %1436 = vmatprep.mubr.msk.f32.mxu1 %vm249_vm0, %v46_v12  ;;  %v126_v11 = vld [vmem:[%s2786_s0 + $0x380] sm:$0xff] }
  0x95   :  { %v142_v12 = vld [vmem:[%s2786_s0 + $0x400] sm:$0xff] }
  0x97   :  { %612 = vmatmul.mubr.f32.gmra.mrb[42].mxu0 %v77_v13  ;;  %1437 = vmatmul.mubr.msk.f32.gmra.mrb[42].mxu1 %vm249_vm0, %v49_v14  ;;  %v125_v13 = vld [vmem:[%s2786_s0 + $0x378] sm:$0xff] }
  0x98   :  { %616 = vmatprep.mubr.f32.mxu0 %v81_v15  ;;  %1439 = vmatprep.mubr.msk.f32.mxu1 %vm249_vm0, %v52_v16  ;;  %v145_v14 = vld [vmem:[%s2786_s0 + $0x418] sm:$0xff]  ;;  %v148_v16 = vld [vmem:[%s2786_s0 + $0x430] sm:$0xff] }
  0x99   :  { %v129_v15 = vld [vmem:[%s2786_s0 + $0x398] sm:$0xff] }
  0x9b   :  { %617 = vmatmul.mubr.f32.gmra.mrb[44].mxu0 %v80_v17  ;;  %1440 = vmatmul.mubr.msk.f32.gmra.mrb[44].mxu1 %vm249_vm0, %v55_v18  ;;  %v128_v17 = vld [vmem:[%s2786_s0 + $0x390] sm:$0xff]  ;;  %v151_v18 = vld [vmem:[%s2786_s0 + $0x448] sm:$0xff] }
  0x9c   :  { %621 = vmatprep.mubr.f32.mxu0 %v84_v19  ;;  %1442 = vmatprep.mubr.msk.f32.mxu1 %vm249_vm0, %v58_v20  ;;  %v132_v19 = vld [vmem:[%s2786_s0 + $0x3b0] sm:$0xff]  ;;  %v154_v20 = vld [vmem:[%s2786_s0 + $0x460] sm:$0xff] }
  0x9f   :  { %622 = vmatmul.mubr.f32.gmra.mrb[46].mxu0 %v83_v21  ;;  %1443 = vmatmul.mubr.msk.f32.gmra.mrb[46].mxu1 %vm249_vm0, %v61_v22  ;;  %v131_v21 = vld [vmem:[%s2786_s0 + $0x3a8] sm:$0xff]  ;;  %v157_v22 = vld [vmem:[%s2786_s0 + $0x478] sm:$0xff] }
  0xa0   :  { %626 = vmatprep.mubr.f32.mxu0 %v87_v23  ;;  %1445 = vmatprep.mubr.msk.f32.mxu1 %vm249_vm0, %v64_v24  ;;  %v135_v23 = vld [vmem:[%s2786_s0 + $0x3c8] sm:$0xff]  ;;  %v160_v24 = vld [vmem:[%s2786_s0 + $0x490] sm:$0xff] }
  0xa3   :  { %627 = vmatmul.mubr.f32.gmra.mrb[48].mxu0 %v86_v25  ;;  %1446 = vmatmul.mubr.msk.f32.gmra.mrb[48].mxu1 %vm249_vm0, %v67_v26  ;;  %v134_v25 = vld [vmem:[%s2786_s0 + $0x3c0] sm:$0xff]  ;;  %v163_v26 = vld [vmem:[%s2786_s0 + $0x4a8] sm:$0xff] }
  0xa4   :  { %631 = vmatprep.mubr.f32.mxu0 %v90_v27  ;;  %1448 = vmatprep.mubr.msk.f32.mxu1 %vm249_vm0, %v70_v28  ;;  %v138_v27 = vld [vmem:[%s2786_s0 + $0x3e0] sm:$0xff] }
  0xa5   :  { %v166_v28 = vld [vmem:[%s2786_s0 + $0x4c0] sm:$0xff] }
  0xa7   :  { %632 = vmatmul.mubr.f32.gmra.mrb[50].mxu0 %v89_v29  ;;  %1449 = vmatmul.mubr.msk.f32.gmra.mrb[50].mxu1 %vm249_vm0, %v73_v30  ;;  %v137_v29 = vld [vmem:[%s2786_s0 + $0x3d8] sm:$0xff] }
  0xa8   :  { %636 = vmatprep.mubr.f32.mxu0 %v93_v31  ;;  %1451 = vmatprep.mubr.msk.f32.mxu1 %vm249_vm0, %v76_v32  ;;  %v169_v30 = vld [vmem:[%s2786_s0 + $0x4d8] sm:$0xff]  ;;  %v172_v32 = vld [vmem:[%s2786_s0 + $0x4f0] sm:$0xff] }
  0xa9   :  { %v141_v31 = vld [vmem:[%s2786_s0 + $0x3f8] sm:$0xff] }
  0xab   :  { %637 = vmatmul.mubr.f32.gmra.mrb[52].mxu0 %v92_v33  ;;  %1452 = vmatmul.mubr.msk.f32.gmra.mrb[52].mxu1 %vm249_vm0, %v79_v34  ;;  %v140_v33 = vld [vmem:[%s2786_s0 + $0x3f0] sm:$0xff]  ;;  %v175_v34 = vld [vmem:[%s2786_s0 + $0x508] sm:$0xff] }
  0xac   :  { %641 = vmatprep.mubr.f32.mxu0 %v96_v35  ;;  %1454 = vmatprep.mubr.msk.f32.mxu1 %vm249_vm0, %v82_v36  ;;  %v144_v35 = vld [vmem:[%s2786_s0 + $0x410] sm:$0xff]  ;;  %v178_v36 = vld [vmem:[%s2786_s0 + $0x520] sm:$0xff] }
  0xaf   :  { %642 = vmatmul.mubr.f32.gmra.mrb[54].mxu0 %v95_v37  ;;  %1455 = vmatmul.mubr.msk.f32.gmra.mrb[54].mxu1 %vm249_vm0, %v85_v38  ;;  %v143_v37 = vld [vmem:[%s2786_s0 + $0x408] sm:$0xff]  ;;  %v181_v38 = vld [vmem:[%s2786_s0 + $0x538] sm:$0xff] }
  0xb0   :  { %646 = vmatprep.mubr.f32.mxu0 %v99_v39  ;;  %1457 = vmatprep.mubr.msk.f32.mxu1 %vm249_vm0, %v88_v40  ;;  %v147_v39 = vld [vmem:[%s2786_s0 + $0x428] sm:$0xff]  ;;  %v184_v40 = vld [vmem:[%s2786_s0 + $0x550] sm:$0xff] }
  0xb3   :  { %647 = vmatmul.mubr.f32.gmra.mrb[56].mxu0 %v98_v41  ;;  %1458 = vmatmul.mubr.msk.f32.gmra.mrb[56].mxu1 %vm249_vm0, %v91_v42  ;;  %v146_v41 = vld [vmem:[%s2786_s0 + $0x420] sm:$0xff]  ;;  %v187_v42 = vld [vmem:[%s2786_s0 + $0x568] sm:$0xff] }
  0xb4   :  { %651 = vmatprep.mubr.f32.mxu0 %v102_v43  ;;  %1460 = vmatprep.mubr.msk.f32.mxu1 %vm249_vm0, %v94_v44  ;;  %v150_v43 = vld [vmem:[%s2786_s0 + $0x440] sm:$0xff] }
  0xb5   :  { %v190_v44 = vld [vmem:[%s2786_s0 + $0x580] sm:$0xff] }
  0xb7   :  { %652 = vmatmul.mubr.f32.gmra.mrb[58].mxu0 %v101_v45  ;;  %1461 = vmatmul.mubr.msk.f32.gmra.mrb[58].mxu1 %vm249_vm0, %v97_v46  ;;  %v149_v45 = vld [vmem:[%s2786_s0 + $0x438] sm:$0xff] }
  0xb8   :  { %656 = vmatprep.mubr.f32.mxu0 %v105_v47  ;;  %1463 = vmatprep.mubr.msk.f32.mxu1 %vm249_vm0, %v100_v48  ;;  %v193_v46 = vld [vmem:[%s2786_s0 + $0x598] sm:$0xff]  ;;  %v196_v48 = vld [vmem:[%s2786_s0 + $0x5b0] sm:$0xff] }
  0xb9   :  { %v153_v47 = vld [vmem:[%s2786_s0 + $0x458] sm:$0xff] }
  0xbb   :  { %657 = vmatmul.mubr.f32.gmra.mrb[60].mxu0 %v104_v49  ;;  %1464 = vmatmul.mubr.msk.f32.gmra.mrb[60].mxu1 %vm249_vm0, %v103_v50  ;;  %v152_v49 = vld [vmem:[%s2786_s0 + $0x450] sm:$0xff]  ;;  %v199_v50 = vld [vmem:[%s2786_s0 + $0x5c8] sm:$0xff] }
  0xbc   :  { %661 = vmatprep.mubr.f32.mxu0 %v108_v51  ;;  %1466 = vmatprep.mubr.msk.f32.mxu1 %vm249_vm0, %v106_v52  ;;  %v156_v51 = vld [vmem:[%s2786_s0 + $0x470] sm:$0xff]  ;;  %v202_v52 = vld [vmem:[%s2786_s0 + $0x5e0] sm:$0xff] }
  0xbf   :  { %662 = vmatmul.mubr.f32.gmra.mrb[62].mxu0 %v107_v53  ;;  %1467 = vmatmul.mubr.msk.f32.gmra.mrb[62].mxu1 %vm249_vm0, %v109_v54  ;;  %v155_v53 = vld [vmem:[%s2786_s0 + $0x468] sm:$0xff]  ;;  %v205_v54 = vld [vmem:[%s2786_s0 + $0x5f8] sm:$0xff] }
  0xc0   :  { %666 = vmatprep.mubr.f32.mxu0 %v111_v55  ;;  %1469 = vmatprep.mubr.msk.f32.mxu1 %vm249_vm0, %v112_v56 }
  0xc3   :  { %667 = vmatmul.mubr.f32.gmra.mrb[64].mxu0 %v110_v57  ;;  %1470 = vmatmul.mubr.msk.f32.gmra.mrb[64].mxu1 %vm249_vm0, %v115_v58 }
  0xc4   :  { %671 = vmatprep.mubr.f32.mxu0 %v114_v59  ;;  %1472 = vmatprep.mubr.msk.f32.mxu1 %vm249_vm0, %v118_v60 }
  0xc7   :  { %672 = vmatmul.mubr.f32.gmra.mrb[66].mxu0 %v113_v61  ;;  %1473 = vmatmul.mubr.msk.f32.gmra.mrb[66].mxu1 %vm249_vm0, %v121_v62 }
  0xc8   :  { %676 = vmatprep.mubr.f32.mxu0 %v117_v63  ;;  %1475 = vmatprep.mubr.msk.f32.mxu1 %vm249_vm0, %v124_v0 }
  0xcb   :  { %677 = vmatmul.mubr.f32.gmra.mrb[68].mxu0 %v116_v1  ;;  %1476 = vmatmul.mubr.msk.f32.gmra.mrb[68].mxu1 %vm249_vm0, %v127_v2 }
  0xcc   :  { %681 = vmatprep.mubr.f32.mxu0 %v120_v3  ;;  %1478 = vmatprep.mubr.msk.f32.mxu1 %vm249_vm0, %v130_v4 }
  0xcf   :  { %682 = vmatmul.mubr.f32.gmra.mrb[70].mxu0 %v119_v5  ;;  %1479 = vmatmul.mubr.msk.f32.gmra.mrb[70].mxu1 %vm249_vm0, %v133_v6 }
  0xd0   :  { %686 = vmatprep.mubr.f32.mxu0 %v123_v7  ;;  %1481 = vmatprep.mubr.msk.f32.mxu1 %vm249_vm0, %v136_v8 }
  0xd3   :  { %687 = vmatmul.mubr.f32.gmra.mrb[72].mxu0 %v122_v9  ;;  %1482 = vmatmul.mubr.msk.f32.gmra.mrb[72].mxu1 %vm249_vm0, %v139_v10 }
  0xd4   :  { %691 = vmatprep.mubr.f32.mxu0 %v126_v11  ;;  %1484 = vmatprep.mubr.msk.f32.mxu1 %vm249_vm0, %v142_v12 }
  0xd7   :  { %692 = vmatmul.mubr.f32.gmra.mrb[74].mxu0 %v125_v13  ;;  %1485 = vmatmul.mubr.msk.f32.gmra.mrb[74].mxu1 %vm249_vm0, %v145_v14 }
  0xd8   :  { %696 = vmatprep.mubr.f32.mxu0 %v129_v15  ;;  %1487 = vmatprep.mubr.msk.f32.mxu1 %vm249_vm0, %v148_v16 }
  0xdb   :  { %697 = vmatmul.mubr.f32.gmra.mrb[76].mxu0 %v128_v17  ;;  %1488 = vmatmul.mubr.msk.f32.gmra.mrb[76].mxu1 %vm249_vm0, %v151_v18 }
  0xdc   :  { %701 = vmatprep.mubr.f32.mxu0 %v132_v19  ;;  %1490 = vmatprep.mubr.msk.f32.mxu1 %vm249_vm0, %v154_v20 }
  0xdf   :  { %702 = vmatmul.mubr.f32.gmra.mrb[78].mxu0 %v131_v21  ;;  %1491 = vmatmul.mubr.msk.f32.gmra.mrb[78].mxu1 %vm249_vm0, %v157_v22 }
  0xe0   :  { %706 = vmatprep.mubr.f32.mxu0 %v135_v23  ;;  %1493 = vmatprep.mubr.msk.f32.mxu1 %vm249_vm0, %v160_v24 }
  0xe3   :  { %707 = vmatmul.mubr.f32.gmra.mrb[80].mxu0 %v134_v25  ;;  %1494 = vmatmul.mubr.msk.f32.gmra.mrb[80].mxu1 %vm249_vm0, %v163_v26 }
  0xe4   :  { %711 = vmatprep.mubr.f32.mxu0 %v138_v27  ;;  %1496 = vmatprep.mubr.msk.f32.mxu1 %vm249_vm0, %v166_v28 }
  0xe7   :  { %712 = vmatmul.mubr.f32.gmra.mrb[82].mxu0 %v137_v29  ;;  %1497 = vmatmul.mubr.msk.f32.gmra.mrb[82].mxu1 %vm249_vm0, %v169_v30 }
  0xe8   :  { %716 = vmatprep.mubr.f32.mxu0 %v141_v31  ;;  %1499 = vmatprep.mubr.msk.f32.mxu1 %vm249_vm0, %v172_v32 }
  0xeb   :  { %717 = vmatmul.mubr.f32.gmra.mrb[84].mxu0 %v140_v33  ;;  %1500 = vmatmul.mubr.msk.f32.gmra.mrb[84].mxu1 %vm249_vm0, %v175_v34 }
  0xec   :  { %721 = vmatprep.mubr.f32.mxu0 %v144_v35  ;;  %1502 = vmatprep.mubr.msk.f32.mxu1 %vm249_vm0, %v178_v36 }
  0xef   :  { %722 = vmatmul.mubr.f32.gmra.mrb[86].mxu0 %v143_v37  ;;  %1503 = vmatmul.mubr.msk.f32.gmra.mrb[86].mxu1 %vm249_vm0, %v181_v38 }
  0xf0   :  { %726 = vmatprep.mubr.f32.mxu0 %v147_v39  ;;  %1505 = vmatprep.mubr.msk.f32.mxu1 %vm249_vm0, %v184_v40 }
  0xf3   :  { %727 = vmatmul.mubr.f32.gmra.mrb[88].mxu0 %v146_v41  ;;  %1506 = vmatmul.mubr.msk.f32.gmra.mrb[88].mxu1 %vm249_vm0, %v187_v42 }
  0xf4   :  { %731 = vmatprep.mubr.f32.mxu0 %v150_v43  ;;  %1508 = vmatprep.mubr.msk.f32.mxu1 %vm249_vm0, %v190_v44 }
  0xf7   :  { %732 = vmatmul.mubr.f32.gmra.mrb[90].mxu0 %v149_v45  ;;  %1509 = vmatmul.mubr.msk.f32.gmra.mrb[90].mxu1 %vm249_vm0, %v193_v46 }
  0xf8   :  { %736 = vmatprep.mubr.f32.mxu0 %v153_v47  ;;  %1511 = vmatprep.mubr.msk.f32.mxu1 %vm249_vm0, %v196_v48 }
  0xfb   :  { %737 = vmatmul.mubr.f32.gmra.mrb[92].mxu0 %v152_v49  ;;  %1512 = vmatmul.mubr.msk.f32.gmra.mrb[92].mxu1 %vm249_vm0, %v199_v50 }
  0xfc   :  { %741 = vmatprep.mubr.f32.mxu0 %v156_v51  ;;  %1514 = vmatprep.mubr.msk.f32.mxu1 %vm249_vm0, %v202_v52 }
  0xff   :  { %742 = vmatmul.mubr.f32.gmra.mrb[94].mxu0 %v155_v53  ;;  %1515 = vmatmul.mubr.msk.f32.gmra.mrb[94].mxu1 %vm249_vm0, %v205_v54  ;;  %v2472_v53 = vld [vmem:[%s2787_s2] ss:$0 sm:$0xff] }
 0x116   :  { %v2407_v55 = vpop.f32.mrb[0].mxu0  ;;  %v2409_v56 = vpop.f32.mrb[0].mxu1 }
 0x117   :  { %v510_v57 = vpop.f32.mrb[1].mxu0  ;;  %v750_v58 = vpop.f32.mrb[1].mxu1 }
 0x11a   :  { %v513_v59 = vpop.f32.mrb[2].mxu0  ;;  %v2411_v60 = vpop.f32.mrb[2].mxu1 }
 0x11b   :  { %v515_v61 = vpop.f32.mrb[3].mxu0  ;;  %v755_v62 = vpop.f32.mrb[3].mxu1  ;;  %v514_v58 = vadd.f32 %v2472_v53, %v513_v59 }
 0x11c   :  { %v509_v61 = vadd.f32 %v2472_v53, %v2407_v55 }
 0x11e   :  { %v2413_v63 = vpop.f32.mrb[4].mxu0  ;;  %v2415_v0 = vpop.f32.mrb[4].mxu1 }
 0x11f   :  { %v520_v1 = vpop.f32.mrb[5].mxu0  ;;  %v760_v2 = vpop.f32.mrb[5].mxu1  ;;  %v519_v59 = vadd.f32 %v2472_v53, %v2413_v63 }
 0x122   :  { %v2417_v3 = vpop.f32.mrb[6].mxu0  ;;  %v2419_v4 = vpop.f32.mrb[6].mxu1 }
 0x123   :  { %v525_v5 = vpop.f32.mrb[7].mxu0  ;;  %v765_v6 = vpop.f32.mrb[7].mxu1 }
 0x126   :  { %v2421_v7 = vpop.f32.mrb[8].mxu0  ;;  %v2423_v8 = vpop.f32.mrb[8].mxu1 }
 0x127   :  { %v530_v9 = vpop.f32.mrb[9].mxu0  ;;  %v770_v10 = vpop.f32.mrb[9].mxu1  ;;  %v529_v63 = vadd.f32 %v2472_v53, %v2421_v7 }
 0x128   :  { %v524_v10 = vadd.f32 %v2472_v53, %v2417_v3 }
 0x12a   :  { %v2425_v11 = vpop.f32.mrb[10].mxu0  ;;  %v2427_v12 = vpop.f32.mrb[10].mxu1 }
 0x12b   :  { %v535_v13 = vpop.f32.mrb[11].mxu0  ;;  %v775_v14 = vpop.f32.mrb[11].mxu1  ;;  %v534_v3 = vadd.f32 %v2472_v53, %v2425_v11 }
 0x12e   :  { %v2429_v15 = vpop.f32.mrb[12].mxu0  ;;  %v2431_v16 = vpop.f32.mrb[12].mxu1 }
 0x12f   :  { %v540_v17 = vpop.f32.mrb[13].mxu0  ;;  %v780_v18 = vpop.f32.mrb[13].mxu1  ;;  %v539_v7 = vadd.f32 %v2472_v53, %v2429_v15 }
 0x132   :  { %v2433_v19 = vpop.f32.mrb[14].mxu0  ;;  %v2435_v20 = vpop.f32.mrb[14].mxu1 }
 0x133   :  { %v545_v21 = vpop.f32.mrb[15].mxu0  ;;  %v785_v22 = vpop.f32.mrb[15].mxu1  ;;  %v544_v11 = vadd.f32 %v2472_v53, %v2433_v19 }
 0x136   :  { %v2437_v23 = vpop.f32.mrb[16].mxu0  ;;  %v2439_v24 = vpop.f32.mrb[16].mxu1 }
 0x137   :  { %v550_v25 = vpop.f32.mrb[17].mxu0  ;;  %v790_v26 = vpop.f32.mrb[17].mxu1  ;;  %v549_v15 = vadd.f32 %v2472_v53, %v2437_v23 }
 0x13a   :  { %v2441_v27 = vpop.f32.mrb[18].mxu0  ;;  %v2443_v28 = vpop.f32.mrb[18].mxu1 }
 0x13b   :  { %v555_v29 = vpop.f32.mrb[19].mxu0  ;;  %v795_v30 = vpop.f32.mrb[19].mxu1  ;;  %v554_v19 = vadd.f32 %v2472_v53, %v2441_v27 }
 0x13e   :  { %v2445_v31 = vpop.f32.mrb[20].mxu0  ;;  %v2447_v32 = vpop.f32.mrb[20].mxu1 }
 0x13f   :  { %v560_v33 = vpop.f32.mrb[21].mxu0  ;;  %v800_v34 = vpop.f32.mrb[21].mxu1  ;;  %v559_v23 = vadd.f32 %v2472_v53, %v2445_v31 }
 0x142   :  { %v2449_v35 = vpop.f32.mrb[22].mxu0  ;;  %v2451_v36 = vpop.f32.mrb[22].mxu1 }
 0x143   :  { %v565_v37 = vpop.f32.mrb[23].mxu0  ;;  %v805_v38 = vpop.f32.mrb[23].mxu1  ;;  %v564_v27 = vadd.f32 %v2472_v53, %v2449_v35 }
 0x146   :  { %v2453_v39 = vpop.f32.mrb[24].mxu0  ;;  %v2455_v40 = vpop.f32.mrb[24].mxu1 }
 0x147   :  { %v570_v41 = vpop.f32.mrb[25].mxu0  ;;  %v810_v42 = vpop.f32.mrb[25].mxu1  ;;  %v569_v31 = vadd.f32 %v2472_v53, %v2453_v39 }
 0x14a   :  { %v2457_v43 = vpop.f32.mrb[26].mxu0  ;;  %v2459_v44 = vpop.f32.mrb[26].mxu1 }
 0x14b   :  { %v575_v45 = vpop.f32.mrb[27].mxu0  ;;  %v815_v46 = vpop.f32.mrb[27].mxu1  ;;  %v574_v35 = vadd.f32 %v2472_v53, %v2457_v43 }
 0x14e   :  { %v2461_v47 = vpop.f32.mrb[28].mxu0  ;;  %v2463_v48 = vpop.f32.mrb[28].mxu1 }
 0x14f   :  { %v580_v49 = vpop.f32.mrb[29].mxu0  ;;  %v820_v50 = vpop.f32.mrb[29].mxu1  ;;  %v579_v39 = vadd.f32 %v2472_v53, %v2461_v47 }
 0x152   :  { %v2465_v51 = vpop.f32.mrb[30].mxu0  ;;  %v2467_v52 = vpop.f32.mrb[30].mxu1 }
 0x153   :  { %v585_v54 = vpop.f32.mrb[31].mxu0  ;;  %v825_v57 = vpop.f32.mrb[31].mxu1  ;;  %v584_v43 = vadd.f32 %v2472_v53, %v2465_v51 }
 0x156   :  { %v2477_v62 = vpop.f32.mrb[32].mxu0  ;;  %v1423_v1 = vpop.f32.mrb[32].mxu1 }
 0x157   :  { %v899_v2 = vadd.f32 %v1423_v1, %v514_v58  ;;  %v590_v5 = vpop.f32.mrb[33].mxu0  ;;  %v893_v6 = vpop.f32.mrb[33].mxu1  ;;  %v589_v47 = vadd.f32 %v2472_v53, %v2477_v62 }
 0x158   :  { %v894_v9 = vadd.f32 %v893_v6, %v509_v61 }
 0x159   :  { %1213 = vst [vmem:[%s2788_s3 + $0x8] sm:$0xff] %v899_v2 }
 0x15a   :  { %1212 = vst [vmem:[%s2788_s3] sm:$0xff] %v894_v9  ;;  %v2489_v55 = vpop.f32.mrb[34].mxu0  ;;  %v1426_v13 = vpop.f32.mrb[34].mxu1 }
 0x15b   :  { %v909_v14 = vadd.f32 %v1426_v13, %v524_v10  ;;  %v595_v17 = vpop.f32.mrb[35].mxu0  ;;  %v903_v18 = vpop.f32.mrb[35].mxu1  ;;  %v594_v51 = vadd.f32 %v2472_v53, %v2489_v55 }
 0x15c   :  { %v904_v21 = vadd.f32 %v903_v18, %v519_v59 }
 0x15d   :  { %1215 = vst [vmem:[%s2788_s3 + $0x18] sm:$0xff] %v909_v14 }
 0x15e   :  { %1214 = vst [vmem:[%s2788_s3 + $0x10] sm:$0xff] %v904_v21  ;;  %v2501_v22 = vpop.f32.mrb[36].mxu0  ;;  %v1429_v25 = vpop.f32.mrb[36].mxu1 }
 0x15f   :  { %v919_v26 = vadd.f32 %v1429_v25, %v534_v3  ;;  %v600_v29 = vpop.f32.mrb[37].mxu0  ;;  %v913_v30 = vpop.f32.mrb[37].mxu1  ;;  %v599_v55 = vadd.f32 %v2472_v53, %v2501_v22 }
 0x160   :  { %v914_v33 = vadd.f32 %v913_v30, %v529_v63 }
 0x161   :  { %1217 = vst [vmem:[%s2788_s3 + $0x28] sm:$0xff] %v919_v26 }
 0x162   :  { %1216 = vst [vmem:[%s2788_s3 + $0x20] sm:$0xff] %v914_v33  ;;  %v603_v34 = vpop.f32.mrb[38].mxu0  ;;  %v1432_v37 = vpop.f32.mrb[38].mxu1 }
 0x163   :  { %v929_v38 = vadd.f32 %v1432_v37, %v544_v11  ;;  %v605_v41 = vpop.f32.mrb[39].mxu0  ;;  %v923_v42 = vpop.f32.mrb[39].mxu1 }
 0x164   :  { %v924_v45 = vadd.f32 %v923_v42, %v539_v7  ;;  %v604_v41 = vadd.f32 %v2472_v53, %v603_v34 }
 0x165   :  { %1219 = vst [vmem:[%s2788_s3 + $0x38] sm:$0xff] %v929_v38 }
 0x166   :  { %1218 = vst [vmem:[%s2788_s3 + $0x30] sm:$0xff] %v924_v45  ;;  %v608_v46 = vpop.f32.mrb[40].mxu0  ;;  %v1435_v49 = vpop.f32.mrb[40].mxu1 }
 0x167   :  { %v939_v50 = vadd.f32 %v1435_v49, %v554_v19  ;;  %v610_v54 = vpop.f32.mrb[41].mxu0  ;;  %v933_v57 = vpop.f32.mrb[41].mxu1  ;;  %v609_v34 = vadd.f32 %v2472_v53, %v608_v46 }
 0x168   :  { %v934_v58 = vadd.f32 %v933_v57, %v549_v15 }
 0x169   :  { %1221 = vst [vmem:[%s2788_s3 + $0x48] sm:$0xff] %v939_v50 }
 0x16a   :  { %1220 = vst [vmem:[%s2788_s3 + $0x40] sm:$0xff] %v934_v58  ;;  %v613_v61 = vpop.f32.mrb[42].mxu0  ;;  %v1438_v1 = vpop.f32.mrb[42].mxu1 }
 0x16b   :  { %v949_v2 = vadd.f32 %v1438_v1, %v564_v27  ;;  %v615_v5 = vpop.f32.mrb[43].mxu0  ;;  %v943_v6 = vpop.f32.mrb[43].mxu1  ;;  %v614_v50 = vadd.f32 %v2472_v53, %v613_v61 }
 0x16c   :  { %v944_v9 = vadd.f32 %v943_v6, %v559_v23 }
 0x16d   :  { %1223 = vst [vmem:[%s2788_s3 + $0x58] sm:$0xff] %v949_v2 }
 0x16e   :  { %1222 = vst [vmem:[%s2788_s3 + $0x50] sm:$0xff] %v944_v9  ;;  %v618_v10 = vpop.f32.mrb[44].mxu0  ;;  %v1441_v59 = vpop.f32.mrb[44].mxu1 }
 0x16f   :  { %v959_v13 = vadd.f32 %v1441_v59, %v574_v35  ;;  %v620_v14 = vpop.f32.mrb[45].mxu0  ;;  %v953_v17 = vpop.f32.mrb[45].mxu1  ;;  %v619_v61 = vadd.f32 %v2472_v53, %v618_v10 }
 0x170   :  { %v954_v18 = vadd.f32 %v953_v17, %v569_v31 }
 0x171   :  { %1225 = vst [vmem:[%s2788_s3 + $0x68] sm:$0xff] %v959_v13 }
 0x172   :  { %1224 = vst [vmem:[%s2788_s3 + $0x60] sm:$0xff] %v954_v18  ;;  %v623_v21 = vpop.f32.mrb[46].mxu0  ;;  %v1444_v3 = vpop.f32.mrb[46].mxu1 }
 0x173   :  { %v969_v63 = vadd.f32 %v1444_v3, %v584_v43  ;;  %v625_v25 = vpop.f32.mrb[47].mxu0  ;;  %v963_v26 = vpop.f32.mrb[47].mxu1  ;;  %v624_v1 = vadd.f32 %v2472_v53, %v623_v21 }
 0x174   :  { %v964_v29 = vadd.f32 %v963_v26, %v579_v39 }
 0x175   :  { %1227 = vst [vmem:[%s2788_s3 + $0x78] sm:$0xff] %v969_v63 }
 0x176   :  { %1226 = vst [vmem:[%s2788_s3 + $0x70] sm:$0xff] %v964_v29  ;;  %v628_v30 = vpop.f32.mrb[48].mxu0  ;;  %v1447_v33 = vpop.f32.mrb[48].mxu1 }
 0x177   :  { %v979_v11 = vadd.f32 %v1447_v33, %v594_v51  ;;  %v630_v7 = vpop.f32.mrb[49].mxu0  ;;  %v973_v37 = vpop.f32.mrb[49].mxu1  ;;  %v629_v59 = vadd.f32 %v2472_v53, %v628_v30 }
 0x178   :  { %v974_v38 = vadd.f32 %v973_v37, %v589_v47 }
 0x179   :  { %1229 = vst [vmem:[%s2788_s3 + $0x88] sm:$0xff] %v979_v11 }
 0x17a   :  { %1228 = vst [vmem:[%s2788_s3 + $0x80] sm:$0xff] %v974_v38  ;;  %v633_v62 = vpop.f32.mrb[50].mxu0  ;;  %v1450_v42 = vpop.f32.mrb[50].mxu1 }
 0x17b   :  { %v989_v45 = vadd.f32 %v1450_v42, %v604_v41  ;;  %v635_v19 = vpop.f32.mrb[51].mxu0  ;;  %v983_v15 = vpop.f32.mrb[51].mxu1  ;;  %v634_v31 = vadd.f32 %v2472_v53, %v633_v62 }
 0x17c   :  { %v984_v49 = vadd.f32 %v983_v15, %v599_v55 }
 0x17d   :  { %1231 = vst [vmem:[%s2788_s3 + $0x98] sm:$0xff] %v989_v45 }
 0x17e   :  { %1230 = vst [vmem:[%s2788_s3 + $0x90] sm:$0xff] %v984_v49  ;;  %v638_v22 = vpop.f32.mrb[52].mxu0  ;;  %v1453_v54 = vpop.f32.mrb[52].mxu1 }
 0x17f   :  { %v999_v57 = vadd.f32 %v1453_v54, %v614_v50  ;;  %v640_v58 = vpop.f32.mrb[53].mxu0  ;;  %v993_v27 = vpop.f32.mrb[53].mxu1  ;;  %v639_v21 = vadd.f32 %v2472_v53, %v638_v22 }
 0x180   :  { %v994_v23 = vadd.f32 %v993_v27, %v609_v34 }
 0x181   :  { %1233 = vst [vmem:[%s2788_s3 + $0xa8] sm:$0xff] %v999_v57 }
 0x182   :  { %1232 = vst [vmem:[%s2788_s3 + $0xa0] sm:$0xff] %v994_v23  ;;  %v643_v46 = vpop.f32.mrb[54].mxu0  ;;  %v1456_v2 = vpop.f32.mrb[54].mxu1 }
 0x183   :  { %v1009_v5 = vadd.f32 %v1456_v2, %v624_v1  ;;  %v645_v6 = vpop.f32.mrb[55].mxu0  ;;  %v1003_v9 = vpop.f32.mrb[55].mxu1  ;;  %v644_v39 = vadd.f32 %v2472_v53, %v643_v46 }
 0x184   :  { %v1004_v35 = vadd.f32 %v1003_v9, %v619_v61 }
 0x185   :  { %1235 = vst [vmem:[%s2788_s3 + $0xb8] sm:$0xff] %v1009_v5 }
 0x186   :  { %1234 = vst [vmem:[%s2788_s3 + $0xb0] sm:$0xff] %v1004_v35  ;;  %v648_v10 = vpop.f32.mrb[56].mxu0  ;;  %v1459_v13 = vpop.f32.mrb[56].mxu1 }
 0x187   :  { %v1019_v14 = vadd.f32 %v1459_v13, %v634_v31  ;;  %v650_v17 = vpop.f32.mrb[57].mxu0  ;;  %v1013_v18 = vpop.f32.mrb[57].mxu1  ;;  %v649_v30 = vadd.f32 %v2472_v53, %v648_v10 }
 0x188   :  { %v1014_v43 = vadd.f32 %v1013_v18, %v629_v59 }
 0x189   :  { %1237 = vst [vmem:[%s2788_s3 + $0xc8] sm:$0xff] %v1019_v14 }
 0x18a   :  { %1236 = vst [vmem:[%s2788_s3 + $0xc0] sm:$0xff] %v1014_v43  ;;  %v653_v3 = vpop.f32.mrb[58].mxu0  ;;  %v1462_v63 = vpop.f32.mrb[58].mxu1 }
 0x18b   :  { %v1029_v25 = vadd.f32 %v1462_v63, %v644_v39  ;;  %v655_v26 = vpop.f32.mrb[59].mxu0  ;;  %v1023_v29 = vpop.f32.mrb[59].mxu1  ;;  %v654_v47 = vadd.f32 %v2472_v53, %v653_v3 }
 0x18c   :  { %v1024_v51 = vadd.f32 %v1023_v29, %v639_v21 }
 0x18d   :  { %1239 = vst [vmem:[%s2788_s3 + $0xd8] sm:$0xff] %v1029_v25 }
 0x18e   :  { %1238 = vst [vmem:[%s2788_s3 + $0xd0] sm:$0xff] %v1024_v51  ;;  %v658_v33 = vpop.f32.mrb[60].mxu0  ;;  %v1465_v11 = vpop.f32.mrb[60].mxu1 }
 0x18f   :  { %v1039_v7 = vadd.f32 %v1465_v11, %v654_v47  ;;  %v660_v37 = vpop.f32.mrb[61].mxu0  ;;  %v1033_v38 = vpop.f32.mrb[61].mxu1  ;;  %v659_v55 = vadd.f32 %v2472_v53, %v658_v33 }
 0x190   :  { %v1034_v41 = vadd.f32 %v1033_v38, %v649_v30 }
 0x191   :  { %1241 = vst [vmem:[%s2788_s3 + $0xe8] sm:$0xff] %v1039_v7 }
 0x192   :  { %1240 = vst [vmem:[%s2788_s3 + $0xe0] sm:$0xff] %v1034_v41  ;;  %v663_v62 = vpop.f32.mrb[62].mxu0  ;;  %v1468_v42 = vpop.f32.mrb[62].mxu1 }
 0x193   :  { %v664_v45 = vadd.f32 %v2472_v53, %v663_v62  ;;  %v665_v19 = vpop.f32.mrb[63].mxu0  ;;  %v1043_v15 = vpop.f32.mrb[63].mxu1 }
 0x194   :  { %v1044_v49 = vadd.f32 %v1043_v15, %v659_v55 }
 0x195   :  { %v1049_v50 = vadd.f32 %v1468_v42, %v664_v45 }
 0x196   :  { %1242 = vst [vmem:[%s2788_s3 + $0xf0] sm:$0xff] %v1044_v49  ;;  %v668_v34 = vpop.f32.mrb[64].mxu0  ;;  %v1471_v22 = vpop.f32.mrb[64].mxu1 }
 0x197   :  { %1243 = vst [vmem:[%s2788_s3 + $0xf8] sm:$0xff] %v1049_v50  ;;  %v669_v54 = vadd.f32 %v2472_v53, %v668_v34  ;;  %v670_v57 = vpop.f32.mrb[65].mxu0  ;;  %v1053_v58 = vpop.f32.mrb[65].mxu1  ;;  %v754_v34 = vadd.f32 %v2472_v53, %v2411_v60 }
 0x199   :  { %v1054_v27 = vadd.f32 %v1053_v58, %v669_v54  ;;  %v749_v54 = vadd.f32 %v2472_v53, %v2409_v56  ;;  %v759_v56 = vadd.f32 %v2472_v53, %v2415_v0 }
 0x19a   :  { %v673_v23 = vpop.f32.mrb[66].mxu0  ;;  %v1474_v1 = vpop.f32.mrb[66].mxu1 }
 0x19b   :  { %1244 = vst [vmem:[%s2788_s3 + $0x100] sm:$0xff] %v1054_v27  ;;  %v674_v61 = vadd.f32 %v2472_v53, %v673_v23  ;;  %v675_v46 = vpop.f32.mrb[67].mxu0  ;;  %v1063_v2 = vpop.f32.mrb[67].mxu1 }
 0x19d   :  { %v1059_v5 = vadd.f32 %v1471_v22, %v674_v61 }
 0x19e   :  { %v678_v6 = vpop.f32.mrb[68].mxu0  ;;  %v1477_v9 = vpop.f32.mrb[68].mxu1 }
 0x19f   :  { %1245 = vst [vmem:[%s2788_s3 + $0x108] sm:$0xff] %v1059_v5  ;;  %v679_v35 = vadd.f32 %v2472_v53, %v678_v6  ;;  %v680_v31 = vpop.f32.mrb[69].mxu0  ;;  %v1073_v59 = vpop.f32.mrb[69].mxu1 }
 0x1a1   :  { %v1064_v10 = vadd.f32 %v1063_v2, %v679_v35  ;;  %v764_v2 = vadd.f32 %v2472_v53, %v2419_v4 }
 0x1a2   :  { %v683_v13 = vpop.f32.mrb[70].mxu0  ;;  %v1480_v14 = vpop.f32.mrb[70].mxu1 }
 0x1a3   :  { %1246 = vst [vmem:[%s2788_s3 + $0x110] sm:$0xff] %v1064_v10  ;;  %v684_v17 = vadd.f32 %v2472_v53, %v683_v13  ;;  %v685_v18 = vpop.f32.mrb[71].mxu0  ;;  %v1083_v43 = vpop.f32.mrb[71].mxu1  ;;  %v774_v10 = vadd.f32 %v2472_v53, %v2427_v12  ;;  %v769_v13 = vadd.f32 %v2472_v53, %v2423_v8 }
 0x1a5   :  { %v1069_v39 = vadd.f32 %v1474_v1, %v684_v17 }
 0x1a6   :  { %v688_v21 = vpop.f32.mrb[72].mxu0  ;;  %v1483_v3 = vpop.f32.mrb[72].mxu1 }
 0x1a7   :  { %1247 = vst [vmem:[%s2788_s3 + $0x118] sm:$0xff] %v1069_v39  ;;  %v689_v63 = vadd.f32 %v2472_v53, %v688_v21  ;;  %v690_v25 = vpop.f32.mrb[73].mxu0  ;;  %v1093_v26 = vpop.f32.mrb[73].mxu1 }
 0x1a9   :  { %v1074_v29 = vadd.f32 %v1073_v59, %v689_v63  ;;  %v779_v63 = vadd.f32 %v2472_v53, %v2431_v16 }
 0x1aa   :  { %v693_v51 = vpop.f32.mrb[74].mxu0  ;;  %v2643_v47 = vpop.f32.mrb[74].mxu1 }
 0x1ab   :  { %1248 = vst [vmem:[%s2788_s3 + $0x120] sm:$0xff] %v1074_v29  ;;  %v694_v30 = vadd.f32 %v2472_v53, %v693_v51  ;;  %v695_v33 = vpop.f32.mrb[75].mxu0  ;;  %v1103_v11 = vpop.f32.mrb[75].mxu1 }
 0x1ad   :  { %v1079_v7 = vadd.f32 %v1477_v9, %v694_v30 }
 0x1ae   :  { %v698_v37 = vpop.f32.mrb[76].mxu0  ;;  %v2649_v38 = vpop.f32.mrb[76].mxu1 }
 0x1af   :  { %1249 = vst [vmem:[%s2788_s3 + $0x128] sm:$0xff] %v1079_v7  ;;  %v699_v41 = vadd.f32 %v2472_v53, %v698_v37  ;;  %v700_v55 = vpop.f32.mrb[77].mxu0  ;;  %v2655_v62 = vpop.f32.mrb[77].mxu1  ;;  %v789_v7 = vadd.f32 %v2472_v53, %v2439_v24 }
 0x1b1   :  { %v1084_v42 = vadd.f32 %v1083_v43, %v699_v41 }
 0x1b2   :  { %v703_v45 = vpop.f32.mrb[78].mxu0  ;;  %v2657_v19 = vpop.f32.mrb[78].mxu1 }
 0x1b3   :  { %1250 = vst [vmem:[%s2788_s3 + $0x130] sm:$0xff] %v1084_v42  ;;  %v704_v15 = vadd.f32 %v2472_v53, %v703_v45  ;;  %v705_v49 = vpop.f32.mrb[79].mxu0  ;;  %v2663_v50 = vpop.f32.mrb[79].mxu1 }
 0x1b4   :  { %v799_v49 = vadd.f32 %v2472_v53, %v2447_v32 }
 0x1b5   :  { %v1089_v22 = vadd.f32 %v1480_v14, %v704_v15  ;;  %v804_v15 = vadd.f32 %v2472_v53, %v2451_v36 }
 0x1b6   :  { %v708_v57 = vpop.f32.mrb[80].mxu0  ;;  %v1495_v58 = vpop.f32.mrb[80].mxu1 }
 0x1b7   :  { %1251 = vst [vmem:[%s2788_s3 + $0x138] sm:$0xff] %v1089_v22  ;;  %v709_v27 = vadd.f32 %v2472_v53, %v708_v57  ;;  %v1139_v23 = vadd.f32 %v1495_v58, %v754_v34  ;;  %v710_v1 = vpop.f32.mrb[81].mxu0  ;;  %v1133_v61 = vpop.f32.mrb[81].mxu1 }
 0x1b8   :  { %v1134_v46 = vadd.f32 %v1133_v61, %v749_v54 }
 0x1b9   :  { %v1094_v60 = vadd.f32 %v1093_v26, %v709_v27  ;;  %1261 = vst [vmem:[%s2788_s3 + $0x188] sm:$0xff] %v1139_v23  ;;  %v814_v27 = vadd.f32 %v2472_v53, %v2459_v44  ;;  %v809_v23 = vadd.f32 %v2472_v53, %v2455_v40 }
 0x1ba   :  { %1260 = vst [vmem:[%s2788_s3 + $0x180] sm:$0xff] %v1134_v46  ;;  %v713_v5 = vpop.f32.mrb[82].mxu0  ;;  %v1498_v6 = vpop.f32.mrb[82].mxu1 }
 0x1bb   :  { %1252 = vst [vmem:[%s2788_s3 + $0x140] sm:$0xff] %v1094_v60  ;;  %v714_v4 = vadd.f32 %v2472_v53, %v713_v5  ;;  %v1149_v9 = vadd.f32 %v1498_v6, %v764_v2  ;;  %v715_v35 = vpop.f32.mrb[83].mxu0  ;;  %v1143_v31 = vpop.f32.mrb[83].mxu1  ;;  %v819_v5 = vadd.f32 %v2472_v53, %v2463_v48 }
 0x1bc   :  { %v1144_v59 = vadd.f32 %v1143_v31, %v759_v56  ;;  %v824_v56 = vadd.f32 %v2472_v53, %v2467_v52 }
 0x1bd   :  { %v1099_v0 = vadd.f32 %v1483_v3, %v714_v4  ;;  %1263 = vst [vmem:[%s2788_s3 + $0x198] sm:$0xff] %v1149_v9  ;;  %v784_v3 = vadd.f32 %v2472_v53, %v2435_v20 }
 0x1be   :  { %1262 = vst [vmem:[%s2788_s3 + $0x190] sm:$0xff] %v1144_v59  ;;  %v718_v14 = vpop.f32.mrb[84].mxu0  ;;  %v1501_v17 = vpop.f32.mrb[84].mxu1 }
 0x1bf   :  { %1253 = vst [vmem:[%s2788_s3 + $0x148] sm:$0xff] %v1099_v0  ;;  %v719_v12 = vadd.f32 %v2472_v53, %v718_v14  ;;  %v1159_v18 = vadd.f32 %v1501_v17, %v774_v10  ;;  %v720_v43 = vpop.f32.mrb[85].mxu0  ;;  %v1153_v39 = vpop.f32.mrb[85].mxu1 }
 0x1c0   :  { %v1154_v21 = vadd.f32 %v1153_v39, %v769_v13 }
 0x1c1   :  { %v1104_v8 = vadd.f32 %v1103_v11, %v719_v12  ;;  %1265 = vst [vmem:[%s2788_s3 + $0x1a8] sm:$0xff] %v1159_v18  ;;  %v794_v11 = vadd.f32 %v2472_v53, %v2443_v28 }
 0x1c2   :  { %1264 = vst [vmem:[%s2788_s3 + $0x1a0] sm:$0xff] %v1154_v21  ;;  %v723_v25 = vpop.f32.mrb[86].mxu0  ;;  %v1504_v26 = vpop.f32.mrb[86].mxu1 }
 0x1c3   :  { %1254 = vst [vmem:[%s2788_s3 + $0x150] sm:$0xff] %v1104_v8  ;;  %v724_v20 = vadd.f32 %v2472_v53, %v723_v25  ;;  %v1169_v29 = vadd.f32 %v1504_v26, %v784_v3  ;;  %v725_v51 = vpop.f32.mrb[87].mxu0  ;;  %v1163_v30 = vpop.f32.mrb[87].mxu1 }
 0x1c4   :  { %v1164_v33 = vadd.f32 %v1163_v30, %v779_v63 }
 0x1c5   :  { %v1109_v16 = vadd.f32 %v2643_v47, %v724_v20  ;;  %1267 = vst [vmem:[%s2788_s3 + $0x1b8] sm:$0xff] %v1169_v29 }
 0x1c6   :  { %1266 = vst [vmem:[%s2788_s3 + $0x1b0] sm:$0xff] %v1164_v33  ;;  %v728_v37 = vpop.f32.mrb[88].mxu0  ;;  %v1507_v41 = vpop.f32.mrb[88].mxu1 }
 0x1c7   :  { %1255 = vst [vmem:[%s2788_s3 + $0x158] sm:$0xff] %v1109_v16  ;;  %v729_v28 = vadd.f32 %v2472_v53, %v728_v37  ;;  %v1179_v47 = vadd.f32 %v1507_v41, %v794_v11  ;;  %v730_v55 = vpop.f32.mrb[89].mxu0  ;;  %v1173_v42 = vpop.f32.mrb[89].mxu1 }
 0x1c8   :  { %v1174_v45 = vadd.f32 %v1173_v42, %v789_v7 }
 0x1c9   :  { %v1114_v24 = vadd.f32 %v2655_v62, %v729_v28  ;;  %1269 = vst [vmem:[%s2788_s3 + $0x1c8] sm:$0xff] %v1179_v47 }
 0x1ca   :  { %1268 = vst [vmem:[%s2788_s3 + $0x1c0] sm:$0xff] %v1174_v45  ;;  %v733_v34 = vpop.f32.mrb[90].mxu0  ;;  %v1510_v22 = vpop.f32.mrb[90].mxu1 }
 0x1cb   :  { %1256 = vst [vmem:[%s2788_s3 + $0x160] sm:$0xff] %v1114_v24  ;;  %v734_v36 = vadd.f32 %v2472_v53, %v733_v34  ;;  %v1189_v62 = vadd.f32 %v1510_v22, %v804_v15  ;;  %v735_v54 = vpop.f32.mrb[91].mxu0  ;;  %v1183_v57 = vpop.f32.mrb[91].mxu1 }
 0x1cc   :  { %v1184_v58 = vadd.f32 %v1183_v57, %v799_v49 }
 0x1cd   :  { %v1119_v32 = vadd.f32 %v2649_v38, %v734_v36  ;;  %1271 = vst [vmem:[%s2788_s3 + $0x1d8] sm:$0xff] %v1189_v62 }
 0x1ce   :  { %1270 = vst [vmem:[%s2788_s3 + $0x1d0] sm:$0xff] %v1184_v58  ;;  %v738_v1 = vpop.f32.mrb[92].mxu0  ;;  %v1513_v61 = vpop.f32.mrb[92].mxu1 }
 0x1cf   :  { %1257 = vst [vmem:[%s2788_s3 + $0x168] sm:$0xff] %v1119_v32  ;;  %v739_v44 = vadd.f32 %v2472_v53, %v738_v1  ;;  %v1199_v38 = vadd.f32 %v1513_v61, %v814_v27  ;;  %v740_v46 = vpop.f32.mrb[93].mxu0  ;;  %v1193_v2 = vpop.f32.mrb[93].mxu1 }
 0x1d0   :  { %v1194_v60 = vadd.f32 %v1193_v2, %v809_v23 }
 0x1d1   :  { %v1124_v40 = vadd.f32 %v2663_v50, %v739_v44  ;;  %1273 = vst [vmem:[%s2788_s3 + $0x1e8] sm:$0xff] %v1199_v38 }
 0x1d2   :  { %1272 = vst [vmem:[%s2788_s3 + $0x1e0] sm:$0xff] %v1194_v60  ;;  %v743_v6 = vpop.f32.mrb[94].mxu0  ;;  %v1516_v4 = vpop.f32.mrb[94].mxu1 }
 0x1d3   :  { %1258 = vst [vmem:[%s2788_s3 + $0x170] sm:$0xff] %v1124_v40  ;;  %v744_v52 = vadd.f32 %v2472_v53, %v743_v6  ;;  %v1209_v50 = vadd.f32 %v1516_v4, %v824_v56  ;;  %v745_v9 = vpop.f32.mrb[95].mxu0  ;;  %v1203_v35 = vpop.f32.mrb[95].mxu1 }
 0x1d4   :  { %v1204_v31 = vadd.f32 %v1203_v35, %v819_v5 }
 0x1d5   :  { %v1129_v59 = vadd.f32 %v2657_v19, %v744_v52  ;;  %1275 = vst [vmem:[%s2788_s3 + $0x1f8] sm:$0xff] %v1209_v50 }
 0x1d6   :  { %1274 = vst [vmem:[%s2788_s3 + $0x1f0] sm:$0xff] %v1204_v31 }
 0x1d7   :  { %1259 = vst [vmem:[%s2788_s3 + $0x178] sm:$0xff] %v1129_v59 }

// kernel: down_encoder_block2d_forward.12
= control target key start
LH: loop header
LB: loop body
LE: loop exit
PB: predicated region body
PF: predicated region fallthrough
CT: control target
= control target key end

     0   :  { %s921_s12 = smov 0   ;;  %s923_s13 = smov 0   ;;  %s1277_s0 = inlined_call_operand.vmem [shape: f32[2,256,64], index: 0, kind: input, shape index: {}]   ;;  %s1278_s1 = inlined_call_operand.vmem [shape: f32[2,1,64], index: 1, kind: input, shape index: {}]   ;;  %s1279_s2 = inlined_call_operand.vmem [shape: f32[2,1,64], index: 2, kind: input, shape index: {}]   ;;  %s1280_s3 = inlined_call_operand.vmem [shape: f32[2,256,64], index: 3, kind: output, shape index: {}]  }
   0x1   :  { %s925_s14 = smov 0  }
   0x2 LB: > { %s25_s15 = sadd.s32 1, %s895_s13  ;;  %p714_p0 = scmp.ge.s32.totalorder %s899_s14, 1  ;;  %s899_s14 = sphi %s925_s14, %s13_s14   ;;  %s895_s13 = sphi %s923_s13, %s1282_s13   ;;  %s891_s12 = sphi %s921_s12, %s1281_s12  }
   0x3   : > { %p27_p1 = scmp.ge.s32.totalorder %s25_s15, 2  ;;  %p174_p2 = scmp.lt.s32.totalorder %s899_s14, 3 }
   0x5   : > { %s1284_s15 = smov (%p27_p1, %s25_s15), 0  ;;  %p175_p3 = pnand %p714_p0, %p174_p2 }
   0x6   : > { %p213_p4 = scmp.lt.s32.totalorder (!%p175_p3), %s891_s12, 1  ;;  %vm572_vm0 = vcmask (!%p175_p3), 523264  }
   0x7   : > { %178 = sbr.rel (%p175_p3) target bundleno = 110 (0x6e), region = 32 }
   0xe   : > { %s1286_s12 = smov (!%p213_p4, %s891_s12), 1 }
   0xf   : > { %s723_s16 = sshll.u32 %s1286_s12, 8  ;;  %s224_s19 = scalar_lea.vmem %s1278_s1, %s1286_s12 }
  0x10   : > { %s951_s22 = scalar_lea.vmem %s1277_s0, %s723_s16  ;;  %s227_s25 = scalar_lea.vmem %s1279_s2, %s1286_s12  ;;  %v957_v0 = vld [vmem:[%s224_s19] ss:$0 sm:$0xff] }
  0x11   : > { %v238_v1 = vld [vmem:[%s951_s22] sm:$0xff]  ;;  %v239_v3 = vld [vmem:[%s951_s22 + $0x8] sm:$0xff]  ;;  %v240_v6 = vld [vmem:[%s951_s22 + $0x10] sm:$0xff]  ;;  %s1108_s28 = scalar_lea.vmem %s1280_s3, %s723_s16 }
  0x12   : > { %v960_v2 = vld [vmem:[%s227_s25] ss:$0 sm:$0xff]  ;;  %v277_v4 = vmul.f32 %v957_v0, %v238_v1  ;;  %v278_v5 = vmul.f32 %v957_v0, %v239_v3  ;;  %v241_v7 = vld [vmem:[%s951_s22 + $0x18] sm:$0xff]  ;;  %v279_v9 = vmul.f32 %v957_v0, %v240_v6  ;;  %v243_v12 = vld [vmem:[%s951_s22 + $0x28] sm:$0xff] }
  0x13   : > { %v242_v8 = vld [vmem:[%s951_s22 + $0x20] sm:$0xff]  ;;  %v280_v10 = vmul.f32 %v957_v0, %v241_v7  ;;  %v244_v13 = vld [vmem:[%s951_s22 + $0x30] sm:$0xff]  ;;  %v245_v14 = vld [vmem:[%s951_s22 + $0x38] sm:$0xff]  ;;  %v282_v17 = vmul.f32 %v957_v0, %v243_v12 }
  0x14   : > { %v281_v11 = vmul.f32 %v957_v0, %v242_v8  ;;  %v975_v15 = vadd.f32 %v960_v2, %v277_v4  ;;  %v978_v16 = vadd.f32 %v960_v2, %v278_v5  ;;  %v283_v18 = vmul.f32 %v957_v0, %v244_v13  ;;  %v246_v27 = vld [vmem:[%s951_s22 + $0x40] sm:$0xff]  ;;  %v247_v28 = vld [vmem:[%s951_s22 + $0x48] sm:$0xff]  ;;  %v248_v33 = vld [vmem:[%s951_s22 + $0x50] sm:$0xff] }
  0x15   : > { %v983_v19 = vadd.f32 %v960_v2, %v279_v9  ;;  %v986_v20 = vadd.f32 %v960_v2, %v280_v10  ;;  %v284_v22 = vmul.f32 %v957_v0, %v245_v14  ;;  %v995_v25 = vadd.f32 %v960_v2, %v282_v17  ;;  %v249_v34 = vld [vmem:[%s951_s22 + $0x58] sm:$0xff]  ;;  %v250_v35 = vld [vmem:[%s951_s22 + $0x60] sm:$0xff]  ;;  %v251_v50 = vld [vmem:[%s951_s22 + $0x68] sm:$0xff] }
  0x16   : > { %v989_v21 = vadd.f32 %v960_v2, %v281_v11  ;;  %v348_v23 = vsub.f32 0.0, %v975_v15  ;;  %v349_v24 = vsub.f32 0.0, %v978_v16  ;;  %v998_v26 = vadd.f32 %v960_v2, %v283_v18  ;;  %v252_v60 = vld [vmem:[%s951_s22 + $0x70] sm:$0xff]  ;;  %v253_v5 = vld [vmem:[%s951_s22 + $0x78] sm:$0xff]  ;;  %v254_v6 = vld [vmem:[%s951_s22 + $0x80] sm:$0xff] }
  0x17   : > { %v350_v29 = vsub.f32 0.0, %v983_v19  ;;  %v351_v30 = vsub.f32 0.0, %v986_v20  ;;  %v1006_v32 = vadd.f32 %v960_v2, %v284_v22  ;;  %v353_v38 = vsub.f32 0.0, %v995_v25  ;;  %v255_v10 = vld [vmem:[%s951_s22 + $0x88] sm:$0xff]  ;;  %v256_v11 = vld [vmem:[%s951_s22 + $0x90] sm:$0xff] }
  0x18   : > { %v352_v31 = vsub.f32 0.0, %v989_v21  ;;  %v380_v36 = vmul.f32 1.442695, %v348_v23  ;;  %v382_v37 = vmul.f32 1.442695, %v349_v24  ;;  %v354_v39 = vsub.f32 0.0, %v998_v26 }
  0x19   : > { %v384_v40 = vmul.f32 1.442695, %v350_v29  ;;  %v386_v41 = vmul.f32 1.442695, %v351_v30  ;;  %v285_v43 = vmul.f32 %v957_v0, %v246_v27  ;;  %v390_v44 = vmul.f32 1.442695, %v353_v38 }
  0x1a   : > { %v388_v42 = vmul.f32 1.442695, %v352_v31  ;;  %749 = vpow2.f32 %v380_v36  ;;  %v392_v45 = vmul.f32 1.442695, %v354_v39  ;;  %v355_v46 = vsub.f32 0.0, %v1006_v32 }
  0x1b   : > { %751 = vpow2.f32 %v382_v37  ;;  %v1016_v47 = vadd.f32 %v960_v2, %v285_v43  ;;  %v286_v48 = vmul.f32 %v957_v0, %v247_v28  ;;  %v287_v49 = vmul.f32 %v957_v0, %v248_v33 }
  0x1c   : > { %753 = vpow2.f32 %v384_v40  ;;  %v394_v51 = vmul.f32 1.442695, %v355_v46  ;;  %v288_v52 = vmul.f32 %v957_v0, %v249_v34  ;;  %v289_v53 = vmul.f32 %v957_v0, %v250_v35 }
  0x1d   : > { %755 = vpow2.f32 %v386_v41  ;;  %v356_v54 = vsub.f32 0.0, %v1016_v47  ;;  %v1025_v55 = vadd.f32 %v960_v2, %v286_v48  ;;  %v1028_v56 = vadd.f32 %v960_v2, %v287_v49 }
  0x1e   : > { %757 = vpow2.f32 %v388_v42  ;;  %v1031_v57 = vadd.f32 %v960_v2, %v288_v52  ;;  %v1034_v58 = vadd.f32 %v960_v2, %v289_v53  ;;  %v290_v59 = vmul.f32 %v957_v0, %v251_v50  ;;  %v258_v50 = vld [vmem:[%s951_s22 + $0xa0] sm:$0xff] }
  0x1f   : > { %759 = vpow2.f32 %v390_v44  ;;  %v396_v61 = vmul.f32 1.442695, %v356_v54  ;;  %v357_v62 = vsub.f32 0.0, %v1025_v55  ;;  %v358_v63 = vsub.f32 0.0, %v1028_v56  ;;  %v257_v44 = vld [vmem:[%s951_s22 + $0x98] sm:$0xff] }
  0x20   : > { %761 = vpow2.f32 %v392_v45  ;;  %v359_v1 = vsub.f32 0.0, %v1031_v57  ;;  %v360_v3 = vsub.f32 0.0, %v1034_v58  ;;  %v1043_v4 = vadd.f32 %v960_v2, %v290_v59 }
  0x21   : > { %763 = vpow2.f32 %v394_v51  ;;  %v398_v7 = vmul.f32 1.442695, %v357_v62  ;;  %v400_v8 = vmul.f32 1.442695, %v358_v63  ;;  %v291_v9 = vmul.f32 %v957_v0, %v252_v60  ;;  %v259_v51 = vld [vmem:[%s951_s22 + $0xa8] sm:$0xff] }
  0x22   : > { %765 = vpow2.f32 %v396_v61  ;;  %v402_v12 = vmul.f32 1.442695, %v359_v1  ;;  %v404_v13 = vmul.f32 1.442695, %v360_v3  ;;  %v292_v17 = vmul.f32 %v957_v0, %v253_v5 }
  0x23   : > { %767 = vpow2.f32 %v398_v7  ;;  %v1051_v14 = vadd.f32 %v960_v2, %v291_v9  ;;  %v293_v18 = vmul.f32 %v957_v0, %v254_v6  ;;  %v361_v23 = vsub.f32 0.0, %v1043_v4  ;;  %v260_v7 = vld [vmem:[%s951_s22 + $0xb0] sm:$0xff] }
  0x24   : > { %v750_v22 = vpop.eup %749  ;;  %769 = vpow2.f32 %v400_v8  ;;  %v294_v24 = vmul.f32 %v957_v0, %v255_v10  ;;  %v295_v27 = vmul.f32 %v957_v0, %v256_v11  ;;  %v1060_v31 = vadd.f32 %v960_v2, %v292_v17 }
  0x25   : > { %v752_v28 = vpop.eup %751  ;;  %v444_v29 = vadd.f32 1.0, %v750_v22  ;;  %771 = vpow2.f32 %v402_v12  ;;  %v362_v30 = vsub.f32 0.0, %v1051_v14  ;;  %v1063_v35 = vadd.f32 %v960_v2, %v293_v18 }
  0x26   : > { %v754_v33 = vpop.eup %753  ;;  %v445_v34 = vadd.f32 1.0, %v752_v28  ;;  %773 = vpow2.f32 %v404_v13  ;;  %v1066_v36 = vadd.f32 %v960_v2, %v294_v24  ;;  %v363_v39 = vsub.f32 0.0, %v1060_v31 }
  0x27   : > { %v756_v37 = vpop.eup %755  ;;  %775 = vrcp.f32 %v444_v29  ;;  %v446_v38 = vadd.f32 1.0, %v754_v33  ;;  %v1069_v42 = vmul.f32 1.442695, %v361_v23  ;;  %v364_v43 = vsub.f32 0.0, %v1063_v35 }
  0x28   : > { %v758_v40 = vpop.eup %757  ;;  %777 = vrcp.f32 %v445_v34  ;;  %v447_v41 = vadd.f32 1.0, %v756_v37  ;;  %v1073_v48 = vmul.f32 1.442695, %v362_v30  ;;  %v1076_v49 = vadd.f32 %v960_v2, %v295_v27  ;;  %v261_v34 = vld [vmem:[%s951_s22 + $0xb8] sm:$0xff] }
  0x29   : > { %v760_v45 = vpop.eup %759  ;;  %779 = vrcp.f32 %v446_v38  ;;  %v448_v46 = vadd.f32 1.0, %v758_v40  ;;  %v1080_v54 = vmul.f32 1.442695, %v363_v39  ;;  %v365_v59 = vsub.f32 0.0, %v1066_v36 }
  0x2a   : > { %v762_v52 = vpop.eup %761  ;;  %781 = vrcp.f32 %v447_v41  ;;  %v449_v53 = vadd.f32 1.0, %v760_v45  ;;  %v1083_v62 = vmul.f32 1.442695, %v364_v43  ;;  %v296_v63 = vmul.f32 %v957_v0, %v257_v44  ;;  %v262_v41 = vld [vmem:[%s951_s22 + $0xc0] sm:$0xff]  ;;  %v263_v43 = vld [vmem:[%s951_s22 + $0xc8] sm:$0xff] }
  0x2b   : > { %v764_v60 = vpop.eup %763  ;;  %783 = vrcp.f32 %v448_v46  ;;  %v450_v61 = vadd.f32 1.0, %v762_v52  ;;  %v297_v5 = vmul.f32 %v957_v0, %v258_v50  ;;  %v298_v6 = vmul.f32 %v957_v0, %v259_v51 }
  0x2c   : > { %v766_v1 = vpop.eup %765  ;;  %785 = vrcp.f32 %v449_v53  ;;  %v451_v3 = vadd.f32 1.0, %v764_v60  ;;  %v366_v10 = vsub.f32 0.0, %v1076_v49  ;;  %v1091_v11 = vadd.f32 %v960_v2, %v296_v63 }
  0x2d   : > { %v768_v8 = vpop.eup %767  ;;  %787 = vrcp.f32 %v450_v61  ;;  %v452_v9 = vadd.f32 1.0, %v766_v1  ;;  %v1094_v17 = vadd.f32 %v960_v2, %v297_v5  ;;  %v1097_v18 = vadd.f32 %v960_v2, %v298_v6 }
  0x2e   : > { %v770_v12 = vpop.eup %769  ;;  %789 = vrcp.f32 %v451_v3  ;;  %v453_v13 = vadd.f32 1.0, %v768_v8  ;;  %v367_v24 = vsub.f32 0.0, %v1091_v11  ;;  %v299_v27 = vmul.f32 %v957_v0, %v260_v7 }
  0x2f   : > { %v772_v22 = vpop.eup %771  ;;  %791 = vrcp.f32 %v452_v9  ;;  %v454_v23 = vadd.f32 1.0, %v770_v12  ;;  %v414_v30 = vmul.f32 1.442695, %v365_v59  ;;  %v368_v33 = vsub.f32 0.0, %v1094_v17 }
  0x30   : > { %v774_v28 = vpop.eup %773  ;;  %793 = vrcp.f32 %v453_v13  ;;  %v455_v29 = vadd.f32 1.0, %v772_v22  ;;  %v416_v39 = vmul.f32 1.442695, %v366_v10  ;;  %v1111_v40 = vadd.f32 %v960_v2, %v299_v27 }
  0x31   : > { %v776_v37 = vpop.eup %775  ;;  %795 = vrcp.f32 %v454_v23  ;;  %v456_v38 = vadd.f32 1.0, %v774_v28  ;;  %v418_v46 = vmul.f32 1.442695, %v367_v24  ;;  %v369_v50 = vsub.f32 0.0, %v1097_v18  ;;  %v264_v28 = vld [vmem:[%s951_s22 + $0xd0] sm:$0xff] }
  0x32   : > { %v778_v44 = vpop.eup %777  ;;  %v540_v45 = vmul.f32 %v776_v37, %v975_v15  ;;  %797 = vrcp.f32 %v455_v29  ;;  %v420_v53 = vmul.f32 1.442695, %v368_v33  ;;  %v300_v59 = vmul.f32 %v957_v0, %v261_v34  ;;  %v265_v33 = vld [vmem:[%s951_s22 + $0xd8] sm:$0xff]  ;;  %v266_v37 = vld [vmem:[%s951_s22 + $0xe0] sm:$0xff] }
  0x33   : > { %v780_v51 = vpop.eup %779  ;;  %v541_v52 = vmul.f32 %v778_v44, %v978_v16  ;;  %799 = vrcp.f32 %v456_v38  ;;  %v301_v15 = vmul.f32 %v957_v0, %v262_v41  ;;  %v302_v63 = vmul.f32 %v957_v0, %v263_v43  ;;  %v267_v41 = vld [vmem:[%s951_s22 + $0xe8] sm:$0xff] }
  0x34   : > { %v782_v60 = vpop.eup %781  ;;  %573 = vst.msk [vmem:[%s1108_s28] sm:$0xff] %vm572_vm0, %v540_v45  ;;  %v542_v61 = vmul.f32 %v780_v51, %v983_v19  ;;  %801 = vpow2.f32 %v1069_v42  ;;  %v370_v3 = vsub.f32 0.0, %v1111_v40  ;;  %v1131_v5 = vadd.f32 %v960_v2, %v300_v59  ;;  %v268_v45 = vld [vmem:[%s951_s22 + $0xf0] sm:$0xff] }
  0x35   : > { %v784_v1 = vpop.eup %783  ;;  %574 = vst.msk [vmem:[%s1108_s28 + $0x8] sm:$0xff] %vm572_vm0, %v541_v52  ;;  %v543_v16 = vmul.f32 %v782_v60, %v986_v20  ;;  %803 = vpow2.f32 %v1073_v48  ;;  %v1138_v6 = vadd.f32 %v960_v2, %v301_v15  ;;  %v1141_v20 = vadd.f32 %v960_v2, %v302_v63 }
  0x36   : > { %v786_v19 = vpop.eup %785  ;;  %575 = vst.msk [vmem:[%s1108_s28 + $0x10] sm:$0xff] %vm572_vm0, %v542_v61  ;;  %v544_v42 = vmul.f32 %v784_v1, %v989_v21  ;;  %805 = vpow2.f32 %v1080_v54  ;;  %v422_v8 = vmul.f32 1.442695, %v369_v50  ;;  %v371_v21 = vsub.f32 0.0, %v1131_v5 }
  0x37   : > { %v788_v48 = vpop.eup %787  ;;  %576 = vst.msk [vmem:[%s1108_s28 + $0x18] sm:$0xff] %vm572_vm0, %v543_v16  ;;  %v545_v7 = vmul.f32 %v786_v19, %v995_v25  ;;  %807 = vpow2.f32 %v1083_v62  ;;  %v372_v10 = vsub.f32 0.0, %v1138_v6  ;;  %v373_v12 = vsub.f32 0.0, %v1141_v20 }
  0x38   : > { %v790_v9 = vpop.eup %789  ;;  %577 = vst.msk [vmem:[%s1108_s28 + $0x20] sm:$0xff] %vm572_vm0, %v544_v42  ;;  %v546_v54 = vmul.f32 %v788_v48, %v998_v26  ;;  %809 = vpow2.f32 %v414_v30  ;;  %v424_v62 = vmul.f32 1.442695, %v370_v3  ;;  %v426_v23 = vmul.f32 1.442695, %v371_v21 }
  0x39   : > { %v792_v13 = vpop.eup %791  ;;  %578 = vst.msk [vmem:[%s1108_s28 + $0x28] sm:$0xff] %vm572_vm0, %v545_v7  ;;  %v547_v25 = vmul.f32 %v790_v9, %v1006_v32  ;;  %811 = vpow2.f32 %v416_v39  ;;  %v428_v32 = vmul.f32 1.442695, %v372_v10  ;;  %v305_v51 = vmul.f32 %v957_v0, %v266_v37 }
  0x3a   : > { %v794_v22 = vpop.eup %793  ;;  %579 = vst.msk [vmem:[%s1108_s28 + $0x30] sm:$0xff] %vm572_vm0, %v546_v54  ;;  %v548_v26 = vmul.f32 %v792_v13, %v1016_v47  ;;  %813 = vpow2.f32 %v418_v46  ;;  %v430_v47 = vmul.f32 1.442695, %v373_v12  ;;  %v306_v59 = vmul.f32 %v957_v0, %v267_v41 }
  0x3b   : > { %v796_v24 = vpop.eup %795  ;;  %580 = vst.msk [vmem:[%s1108_s28 + $0x38] sm:$0xff] %vm572_vm0, %v547_v25  ;;  %v549_v27 = vmul.f32 %v794_v22, %v1025_v55  ;;  %815 = vpow2.f32 %v420_v53  ;;  %v307_v63 = vmul.f32 %v957_v0, %v268_v45  ;;  %v1194_v7 = vadd.f32 %v960_v2, %v305_v51 }
  0x3c   : > { %v798_v29 = vpop.eup %797  ;;  %581 = vst.msk [vmem:[%s1108_s28 + $0x40] sm:$0xff] %vm572_vm0, %v548_v26  ;;  %v550_v30 = vmul.f32 %v796_v24, %v1028_v56  ;;  %817 = vpow2.f32 %v422_v8  ;;  %v303_v56 = vmul.f32 %v957_v0, %v264_v28  ;;  %v1197_v9 = vadd.f32 %v960_v2, %v306_v59 }
  0x3d   : > { %v800_v34 = vpop.eup %799  ;;  %582 = vst.msk [vmem:[%s1108_s28 + $0x48] sm:$0xff] %vm572_vm0, %v549_v27  ;;  %v551_v55 = vmul.f32 %v798_v29, %v1031_v57  ;;  %819 = vpow2.f32 %v424_v62  ;;  %v304_v57 = vmul.f32 %v957_v0, %v265_v33  ;;  %v1201_v13 = vadd.f32 %v960_v2, %v307_v63 }
  0x3e   : > { %v802_v38 = vpop.eup %801  ;;  %583 = vst.msk [vmem:[%s1108_s28 + $0x50] sm:$0xff] %vm572_vm0, %v550_v30  ;;  %v552_v39 = vmul.f32 %v800_v34, %v1034_v58  ;;  %821 = vpow2.f32 %v426_v23  ;;  %v269_v58 = vld [vmem:[%s951_s22 + $0xf8] sm:$0xff]  ;;  %v1186_v15 = vadd.f32 %v960_v2, %v303_v56  ;;  %v376_v24 = vsub.f32 0.0, %v1194_v7 }
  0x3f   : > { %v804_v43 = vpop.eup %803  ;;  %584 = vst.msk [vmem:[%s1108_s28 + $0x58] sm:$0xff] %vm572_vm0, %v551_v55  ;;  %v457_v44 = vadd.f32 1.0, %v802_v38  ;;  %823 = vpow2.f32 %v428_v32  ;;  %v1190_v3 = vadd.f32 %v960_v2, %v304_v57  ;;  %v308_v19 = vmul.f32 %v957_v0, %v269_v58 }
  0x40   : > { %v806_v46 = vpop.eup %805  ;;  %585 = vst.msk [vmem:[%s1108_s28 + $0x60] sm:$0xff] %vm572_vm0, %v552_v39  ;;  %v458_v50 = vadd.f32 1.0, %v804_v43  ;;  %825 = vpow2.f32 %v430_v47  ;;  %v374_v12 = vsub.f32 0.0, %v1186_v15  ;;  %v377_v28 = vsub.f32 0.0, %v1197_v9 }
  0x41   : > { %v808_v52 = vpop.eup %807  ;;  %827 = vrcp.f32 %v457_v44  ;;  %v459_v53 = vadd.f32 1.0, %v806_v46  ;;  %v375_v62 = vsub.f32 0.0, %v1190_v3  ;;  %v1205_v22 = vadd.f32 %v960_v2, %v308_v19 }
  0x42   : > { %v810_v60 = vpop.eup %809  ;;  %829 = vrcp.f32 %v458_v50  ;;  %v460_v61 = vadd.f32 1.0, %v808_v52  ;;  %v432_v47 = vmul.f32 1.442695, %v374_v12  ;;  %v378_v33 = vsub.f32 0.0, %v1201_v13 }
  0x43   : > { %v812_v1 = vpop.eup %811  ;;  %831 = vrcp.f32 %v459_v53  ;;  %v461_v16 = vadd.f32 1.0, %v810_v60  ;;  %v434_v55 = vmul.f32 1.442695, %v375_v62  ;;  %v379_v37 = vsub.f32 0.0, %v1205_v22 }
  0x44   : > { %v814_v42 = vpop.eup %813  ;;  %833 = vrcp.f32 %v460_v61  ;;  %v462_v48 = vadd.f32 1.0, %v812_v1  ;;  %v436_v56 = vmul.f32 1.442695, %v376_v24  ;;  %v438_v44 = vmul.f32 1.442695, %v377_v28 }
  0x45   : > { %v816_v8 = vpop.eup %815  ;;  %835 = vrcp.f32 %v461_v16  ;;  %v463_v21 = vadd.f32 1.0, %v814_v42  ;;  %v440_v46 = vmul.f32 1.442695, %v378_v33  ;;  %v442_v51 = vmul.f32 1.442695, %v379_v37 }
  0x46   : > { %v818_v54 = vpop.eup %817  ;;  %837 = vrcp.f32 %v462_v48  ;;  %v464_v10 = vadd.f32 1.0, %v816_v8 }
  0x47   : > { %v820_v0 = vpop.eup %819  ;;  %839 = vrcp.f32 %v463_v21  ;;  %v465_v25 = vadd.f32 1.0, %v818_v54 }
  0x48   : > { %v822_v26 = vpop.eup %821  ;;  %841 = vrcp.f32 %v464_v10  ;;  %v466_v23 = vadd.f32 1.0, %v820_v0 }
  0x49   : > { %v824_v27 = vpop.eup %823  ;;  %843 = vrcp.f32 %v465_v25  ;;  %v467_v32 = vadd.f32 1.0, %v822_v26 }
  0x4a   : > { %v826_v29 = vpop.eup %825  ;;  %845 = vrcp.f32 %v466_v23  ;;  %v468_v30 = vadd.f32 1.0, %v824_v27 }
  0x4b   : > { %v828_v34 = vpop.eup %827  ;;  %847 = vrcp.f32 %v467_v32  ;;  %v469_v2 = vadd.f32 1.0, %v826_v29 }
  0x4c   : > { %v830_v38 = vpop.eup %829  ;;  %v553_v39 = vmul.f32 %v828_v34, %v1043_v4  ;;  %849 = vrcp.f32 %v468_v30 }
  0x4d   : > { %v832_v41 = vpop.eup %831  ;;  %v554_v43 = vmul.f32 %v830_v38, %v1051_v14  ;;  %851 = vrcp.f32 %v469_v2 }
  0x4e   : > { %v834_v57 = vpop.eup %833  ;;  %586 = vst.msk [vmem:[%s1108_s28 + $0x68] sm:$0xff] %vm572_vm0, %v553_v39  ;;  %v555_v45 = vmul.f32 %v832_v41, %v1060_v31  ;;  %853 = vpow2.f32 %v432_v47 }
  0x4f   : > { %v836_v50 = vpop.eup %835  ;;  %587 = vst.msk [vmem:[%s1108_s28 + $0x70] sm:$0xff] %vm572_vm0, %v554_v43  ;;  %v556_v4 = vmul.f32 %v834_v57, %v1063_v35  ;;  %855 = vpow2.f32 %v434_v55 }
  0x50   : > { %v838_v14 = vpop.eup %837  ;;  %588 = vst.msk [vmem:[%s1108_s28 + $0x78] sm:$0xff] %vm572_vm0, %v555_v45  ;;  %v557_v58 = vmul.f32 %v836_v50, %v1066_v36  ;;  %857 = vpow2.f32 %v436_v56 }
  0x51   : > { %v840_v52 = vpop.eup %839  ;;  %589 = vst.msk [vmem:[%s1108_s28 + $0x80] sm:$0xff] %vm572_vm0, %v556_v4  ;;  %v558_v31 = vmul.f32 %v838_v14, %v1076_v49  ;;  %859 = vpow2.f32 %v438_v44 }
  0x52   : > { %v842_v53 = vpop.eup %841  ;;  %590 = vst.msk [vmem:[%s1108_s28 + $0x88] sm:$0xff] %vm572_vm0, %v557_v58  ;;  %v559_v35 = vmul.f32 %v840_v52, %v1091_v11  ;;  %861 = vpow2.f32 %v440_v46 }
  0x53   : > { %v844_v59 = vpop.eup %843  ;;  %591 = vst.msk [vmem:[%s1108_s28 + $0x90] sm:$0xff] %vm572_vm0, %v558_v31  ;;  %v560_v36 = vmul.f32 %v842_v53, %v1094_v17  ;;  %863 = vpow2.f32 %v442_v51 }
  0x54   : > { %v846_v60 = vpop.eup %845  ;;  %592 = vst.msk [vmem:[%s1108_s28 + $0x98] sm:$0xff] %vm572_vm0, %v559_v35  ;;  %v561_v49 = vmul.f32 %v844_v59, %v1097_v18 }
  0x55   : > { %v848_v61 = vpop.eup %847  ;;  %593 = vst.msk [vmem:[%s1108_s28 + $0xa0] sm:$0xff] %vm572_vm0, %v560_v36  ;;  %v562_v11 = vmul.f32 %v846_v60, %v1111_v40 }
  0x56   : > { %v850_v63 = vpop.eup %849  ;;  %594 = vst.msk [vmem:[%s1108_s28 + $0xa8] sm:$0xff] %vm572_vm0, %v561_v49  ;;  %v563_v1 = vmul.f32 %v848_v61, %v1131_v5 }
  0x57   : > { %v852_v16 = vpop.eup %851  ;;  %595 = vst.msk [vmem:[%s1108_s28 + $0xb0] sm:$0xff] %vm572_vm0, %v562_v11  ;;  %v564_v17 = vmul.f32 %v850_v63, %v1138_v6 }
  0x58   : > { %v854_v19 = vpop.eup %853  ;;  %596 = vst.msk [vmem:[%s1108_s28 + $0xb8] sm:$0xff] %vm572_vm0, %v563_v1  ;;  %v565_v18 = vmul.f32 %v852_v16, %v1141_v20 }
  0x59   : > { %v856_v42 = vpop.eup %855  ;;  %597 = vst.msk [vmem:[%s1108_s28 + $0xc0] sm:$0xff] %vm572_vm0, %v564_v17  ;;  %v470_v48 = vadd.f32 1.0, %v854_v19 }
  0x5a   : > { %v858_v40 = vpop.eup %857  ;;  %598 = vst.msk [vmem:[%s1108_s28 + $0xc8] sm:$0xff] %vm572_vm0, %v565_v18  ;;  %v471_v8 = vadd.f32 1.0, %v856_v42 }
  0x5b   : > { %v860_v21 = vpop.eup %859  ;;  %865 = vrcp.f32 %v470_v48  ;;  %v472_v5 = vadd.f32 1.0, %v858_v40 }
  0x5c   : > { %v862_v54 = vpop.eup %861  ;;  %867 = vrcp.f32 %v471_v8  ;;  %v473_v6 = vadd.f32 1.0, %v860_v21 }
  0x5d   : > { %v864_v10 = vpop.eup %863  ;;  %869 = vrcp.f32 %v472_v5  ;;  %v474_v12 = vadd.f32 1.0, %v862_v54 }
  0x5e   : > { %871 = vrcp.f32 %v473_v6  ;;  %v475_v20 = vadd.f32 1.0, %v864_v10 }
  0x5f   : > { %873 = vrcp.f32 %v474_v12 }
  0x60   : > { %875 = vrcp.f32 %v475_v20 }
  0x65   : > { %v866_v0 = vpop.eup %865 }
  0x66   : > { %v868_v25 = vpop.eup %867  ;;  %v566_v62 = vmul.f32 %v866_v0, %v1186_v15 }
  0x67   : > { %v870_v26 = vpop.eup %869  ;;  %v567_v23 = vmul.f32 %v868_v25, %v1190_v3 }
  0x68   : > { %v872_v24 = vpop.eup %871  ;;  %599 = vst.msk [vmem:[%s1108_s28 + $0xd0] sm:$0xff] %vm572_vm0, %v566_v62  ;;  %v568_v27 = vmul.f32 %v870_v26, %v1194_v7 }
  0x69   : > { %v874_v32 = vpop.eup %873  ;;  %600 = vst.msk [vmem:[%s1108_s28 + $0xd8] sm:$0xff] %vm572_vm0, %v567_v23  ;;  %v569_v28 = vmul.f32 %v872_v24, %v1197_v9 }
  0x6a   : > { %v876_v29 = vpop.eup %875  ;;  %601 = vst.msk [vmem:[%s1108_s28 + $0xe0] sm:$0xff] %vm572_vm0, %v568_v27  ;;  %v570_v30 = vmul.f32 %v874_v32, %v1201_v13 }
  0x6b   : > { %602 = vst.msk [vmem:[%s1108_s28 + $0xe8] sm:$0xff] %vm572_vm0, %v569_v28  ;;  %v571_v15 = vmul.f32 %v876_v29, %v1205_v22 }
  0x6c   : > { %603 = vst.msk [vmem:[%s1108_s28 + $0xf0] sm:$0xff] %vm572_vm0, %v570_v30 }
  0x6d   : > { %604 = vst.msk [vmem:[%s1108_s28 + $0xf8] sm:$0xff] %vm572_vm0, %v571_v15 }
  0x6e PF: > { %s13_s14 = sadd.s32 1, %s899_s14   ;;  %s1281_s12 = smov %s895_s13 }
  0x6f   : > { %p10_p5 = scmp.ge.s32.totalorder %s13_s14, 4   ;;  %s1282_s13 = smov %s1284_s15 }
  0x71   :  { %12 = sbr.rel (!%p10_p5) target bundleno = 2 (0x2), region = 68 }

// kernel: down_encoder_block2d_forward.13
= control target key start
LH: loop header
LB: loop body
LE: loop exit
PB: predicated region body
PF: predicated region fallthrough
CT: control target
= control target key end

     0   :  { %vm89_vm0 = vcmask 261120   ;;  %s1533_s1 = inlined_call_operand.vmem [shape: f32[32,128], index: 1, kind: input, shape index: {}]   ;;  %s1534_s0 = inlined_call_operand.vmem [shape: f32[512,32], index: 0, kind: input, shape index: {}]   ;;  %s1535_s2 = inlined_call_operand.vmem [shape: f32[1,128], index: 2, kind: input, shape index: {}]   ;;  %s1536_s3 = inlined_call_operand.vmem [shape: f32[512,128], index: 3, kind: output, shape index: {}]  }
   0x1   :  { %v78_v0 = vld [vmem:[%s1533_s1] sm:$0xff]  ;;  %v79_v1 = vld [vmem:[%s1533_s1 + $0x8] sm:$0xff]  ;;  %v80_v2 = vld [vmem:[%s1533_s1 + $0x10] sm:$0xff] }
   0x2   :  { %v972_v3 = vpack.c.bf16 %v79_v1, %v78_v0  ;;  %v81_v4 = vld [vmem:[%s1533_s1 + $0x18] sm:$0xff]  ;;  %v14_v5 = vld [vmem:[%s1534_s0] sm:$0xff]  ;;  %v15_v8 = vld [vmem:[%s1534_s0 + $0x8] sm:$0xff] }
   0x3   :  { %v46_v6 = vld [vmem:[%s1534_s0 + $0x100] sm:$0xff]  ;;  %v976_v7 = vpack.c.bf16 %v81_v4, %v80_v2  ;;  %876 = vmatprep.mubr.msk.f32.mxu0 %vm89_vm0, %v14_v5  ;;  %v47_v9 = vld [vmem:[%s1534_s0 + $0x108] sm:$0xff]  ;;  %v16_v10 = vld [vmem:[%s1534_s0 + $0x10] sm:$0xff] }
   0x4   :  { %924 = vmatprep.mubr.msk.f32.mxu1 %vm89_vm0, %v46_v6  ;;  %973 = vmatprep.subr.bf16.mxu0 %v972_v3  ;;  %v48_v11 = vld [vmem:[%s1534_s0 + $0x110] sm:$0xff]  ;;  %v17_v12 = vld [vmem:[%s1534_s0 + $0x18] sm:$0xff]  ;;  %v18_v14 = vld [vmem:[%s1534_s0 + $0x20] sm:$0xff] }
   0x5   :  { %980 = vmatprep.subr.bf16.mxu1 %v972_v3  ;;  %975 = vmatpush3.bf16.msra.mxu0 %v972_v3  ;;  %v49_v13 = vld [vmem:[%s1534_s0 + $0x118] sm:$0xff]  ;;  %v50_v15 = vld [vmem:[%s1534_s0 + $0x120] sm:$0xff]  ;;  %v19_v16 = vld [vmem:[%s1534_s0 + $0x28] sm:$0xff] }
   0x6   :  { %982 = vmatpush3.bf16.msra.mxu1 %v972_v3  ;;  %977 = vmatprep.subr.bf16.mxu0 %v976_v7  ;;  %v51_v17 = vld [vmem:[%s1534_s0 + $0x128] sm:$0xff]  ;;  %v20_v18 = vld [vmem:[%s1534_s0 + $0x30] sm:$0xff]  ;;  %v21_v20 = vld [vmem:[%s1534_s0 + $0x38] sm:$0xff] }
   0x7   :  { %981 = vmatprep.subr.bf16.mxu1 %v976_v7  ;;  %v52_v19 = vld [vmem:[%s1534_s0 + $0x130] sm:$0xff]  ;;  %v53_v21 = vld [vmem:[%s1534_s0 + $0x138] sm:$0xff]  ;;  %v22_v22 = vld [vmem:[%s1534_s0 + $0x40] sm:$0xff] }
   0x8   :  { %v54_v23 = vld [vmem:[%s1534_s0 + $0x140] sm:$0xff]  ;;  %v23_v24 = vld [vmem:[%s1534_s0 + $0x48] sm:$0xff]  ;;  %v24_v26 = vld [vmem:[%s1534_s0 + $0x50] sm:$0xff] }
   0x9   :  { %979 = vmatpush3.bf16.msra.mxu0 %v976_v7  ;;  %v55_v25 = vld [vmem:[%s1534_s0 + $0x148] sm:$0xff]  ;;  %v56_v27 = vld [vmem:[%s1534_s0 + $0x150] sm:$0xff]  ;;  %v25_v28 = vld [vmem:[%s1534_s0 + $0x58] sm:$0xff] }
   0xa   :  { %983 = vmatpush3.bf16.msra.mxu1 %v976_v7  ;;  %v57_v29 = vld [vmem:[%s1534_s0 + $0x158] sm:$0xff]  ;;  %v26_v30 = vld [vmem:[%s1534_s0 + $0x60] sm:$0xff]  ;;  %v27_v32 = vld [vmem:[%s1534_s0 + $0x68] sm:$0xff] }
   0xb   :  { %v58_v31 = vld [vmem:[%s1534_s0 + $0x160] sm:$0xff]  ;;  %v59_v33 = vld [vmem:[%s1534_s0 + $0x168] sm:$0xff]  ;;  %v28_v34 = vld [vmem:[%s1534_s0 + $0x70] sm:$0xff] }
   0xc   :  { %877 = vmatmul.mubr.msk.f32.vlgmr.msra.gmra.mrb[0].mxu0 %vm89_vm0, %v15_v8  ;;  %v60_v35 = vld [vmem:[%s1534_s0 + $0x170] sm:$0xff]  ;;  %v29_v36 = vld [vmem:[%s1534_s0 + $0x78] sm:$0xff]  ;;  %v30_v38 = vld [vmem:[%s1534_s0 + $0x80] sm:$0xff] }
   0xd   :  { %925 = vmatmul.mubr.msk.f32.vlgmr.msra.gmra.mrb[0].mxu1 %vm89_vm0, %v47_v9  ;;  %879 = vmatprep.mubr.msk.f32.mxu0 %vm89_vm0, %v16_v10  ;;  %v61_v37 = vld [vmem:[%s1534_s0 + $0x178] sm:$0xff]  ;;  %v62_v39 = vld [vmem:[%s1534_s0 + $0x180] sm:$0xff]  ;;  %v31_v40 = vld [vmem:[%s1534_s0 + $0x88] sm:$0xff] }
   0xe   :  { %927 = vmatprep.mubr.msk.f32.mxu1 %vm89_vm0, %v48_v11  ;;  %v63_v41 = vld [vmem:[%s1534_s0 + $0x188] sm:$0xff]  ;;  %v32_v42 = vld [vmem:[%s1534_s0 + $0x90] sm:$0xff]  ;;  %v33_v44 = vld [vmem:[%s1534_s0 + $0x98] sm:$0xff] }
   0xf   :  { %v64_v43 = vld [vmem:[%s1534_s0 + $0x190] sm:$0xff]  ;;  %v65_v45 = vld [vmem:[%s1534_s0 + $0x198] sm:$0xff]  ;;  %v34_v46 = vld [vmem:[%s1534_s0 + $0xa0] sm:$0xff] }
  0x10   :  { %880 = vmatmul.mubr.msk.f32.gmra.mrb[2].mxu0 %vm89_vm0, %v17_v12  ;;  %v66_v47 = vld [vmem:[%s1534_s0 + $0x1a0] sm:$0xff]  ;;  %v35_v48 = vld [vmem:[%s1534_s0 + $0xa8] sm:$0xff]  ;;  %v36_v50 = vld [vmem:[%s1534_s0 + $0xb0] sm:$0xff] }
  0x11   :  { %928 = vmatmul.mubr.msk.f32.gmra.mrb[2].mxu1 %vm89_vm0, %v49_v13  ;;  %882 = vmatprep.mubr.msk.f32.mxu0 %vm89_vm0, %v18_v14  ;;  %v67_v49 = vld [vmem:[%s1534_s0 + $0x1a8] sm:$0xff]  ;;  %v68_v51 = vld [vmem:[%s1534_s0 + $0x1b0] sm:$0xff]  ;;  %v37_v52 = vld [vmem:[%s1534_s0 + $0xb8] sm:$0xff] }
  0x12   :  { %930 = vmatprep.mubr.msk.f32.mxu1 %vm89_vm0, %v50_v15  ;;  %v69_v53 = vld [vmem:[%s1534_s0 + $0x1b8] sm:$0xff]  ;;  %v38_v54 = vld [vmem:[%s1534_s0 + $0xc0] sm:$0xff]  ;;  %v39_v56 = vld [vmem:[%s1534_s0 + $0xc8] sm:$0xff] }
  0x13   :  { %v70_v55 = vld [vmem:[%s1534_s0 + $0x1c0] sm:$0xff]  ;;  %v71_v57 = vld [vmem:[%s1534_s0 + $0x1c8] sm:$0xff]  ;;  %v40_v58 = vld [vmem:[%s1534_s0 + $0xd0] sm:$0xff] }
  0x14   :  { %883 = vmatmul.mubr.msk.f32.gmra.mrb[4].mxu0 %vm89_vm0, %v19_v16  ;;  %v72_v59 = vld [vmem:[%s1534_s0 + $0x1d0] sm:$0xff]  ;;  %v41_v60 = vld [vmem:[%s1534_s0 + $0xd8] sm:$0xff]  ;;  %v42_v62 = vld [vmem:[%s1534_s0 + $0xe0] sm:$0xff] }
  0x15   :  { %931 = vmatmul.mubr.msk.f32.gmra.mrb[4].mxu1 %vm89_vm0, %v51_v17  ;;  %885 = vmatprep.mubr.msk.f32.mxu0 %vm89_vm0, %v20_v18  ;;  %v73_v61 = vld [vmem:[%s1534_s0 + $0x1d8] sm:$0xff]  ;;  %v74_v63 = vld [vmem:[%s1534_s0 + $0x1e0] sm:$0xff]  ;;  %v43_v0 = vld [vmem:[%s1534_s0 + $0xe8] sm:$0xff] }
  0x16   :  { %933 = vmatprep.mubr.msk.f32.mxu1 %vm89_vm0, %v52_v19  ;;  %v75_v1 = vld [vmem:[%s1534_s0 + $0x1e8] sm:$0xff]  ;;  %v44_v2 = vld [vmem:[%s1534_s0 + $0xf0] sm:$0xff]  ;;  %v45_v4 = vld [vmem:[%s1534_s0 + $0xf8] sm:$0xff] }
  0x17   :  { %v76_v3 = vld [vmem:[%s1534_s0 + $0x1f0] sm:$0xff]  ;;  %v77_v5 = vld [vmem:[%s1534_s0 + $0x1f8] sm:$0xff]  ;;  %v1275_v6 = vld [vmem:[%s1535_s2] ss:$0 sm:$0xff] }
  0x18   :  { %886 = vmatmul.mubr.msk.f32.gmra.mrb[6].mxu0 %vm89_vm0, %v21_v20 }
  0x19   :  { %934 = vmatmul.mubr.msk.f32.gmra.mrb[6].mxu1 %vm89_vm0, %v53_v21  ;;  %888 = vmatprep.mubr.msk.f32.mxu0 %vm89_vm0, %v22_v22 }
  0x1a   :  { %936 = vmatprep.mubr.msk.f32.mxu1 %vm89_vm0, %v54_v23 }
  0x1c   :  { %889 = vmatmul.mubr.msk.f32.gmra.mrb[8].mxu0 %vm89_vm0, %v23_v24 }
  0x1d   :  { %937 = vmatmul.mubr.msk.f32.gmra.mrb[8].mxu1 %vm89_vm0, %v55_v25  ;;  %891 = vmatprep.mubr.msk.f32.mxu0 %vm89_vm0, %v24_v26 }
  0x1e   :  { %939 = vmatprep.mubr.msk.f32.mxu1 %vm89_vm0, %v56_v27 }
  0x20   :  { %892 = vmatmul.mubr.msk.f32.gmra.mrb[10].mxu0 %vm89_vm0, %v25_v28 }
  0x21   :  { %940 = vmatmul.mubr.msk.f32.gmra.mrb[10].mxu1 %vm89_vm0, %v57_v29  ;;  %894 = vmatprep.mubr.msk.f32.mxu0 %vm89_vm0, %v26_v30 }
  0x22   :  { %942 = vmatprep.mubr.msk.f32.mxu1 %vm89_vm0, %v58_v31 }
  0x24   :  { %895 = vmatmul.mubr.msk.f32.gmra.mrb[12].mxu0 %vm89_vm0, %v27_v32 }
  0x25   :  { %943 = vmatmul.mubr.msk.f32.gmra.mrb[12].mxu1 %vm89_vm0, %v59_v33  ;;  %897 = vmatprep.mubr.msk.f32.mxu0 %vm89_vm0, %v28_v34 }
  0x26   :  { %945 = vmatprep.mubr.msk.f32.mxu1 %vm89_vm0, %v60_v35 }
  0x28   :  { %898 = vmatmul.mubr.msk.f32.gmra.mrb[14].mxu0 %vm89_vm0, %v29_v36 }
  0x29   :  { %946 = vmatmul.mubr.msk.f32.gmra.mrb[14].mxu1 %vm89_vm0, %v61_v37  ;;  %900 = vmatprep.mubr.msk.f32.mxu0 %vm89_vm0, %v30_v38 }
  0x2a   :  { %948 = vmatprep.mubr.msk.f32.mxu1 %vm89_vm0, %v62_v39 }
  0x2c   :  { %901 = vmatmul.mubr.msk.f32.gmra.mrb[16].mxu0 %vm89_vm0, %v31_v40 }
  0x2d   :  { %949 = vmatmul.mubr.msk.f32.gmra.mrb[16].mxu1 %vm89_vm0, %v63_v41  ;;  %903 = vmatprep.mubr.msk.f32.mxu0 %vm89_vm0, %v32_v42 }
  0x2e   :  { %951 = vmatprep.mubr.msk.f32.mxu1 %vm89_vm0, %v64_v43 }
  0x30   :  { %904 = vmatmul.mubr.msk.f32.gmra.mrb[18].mxu0 %vm89_vm0, %v33_v44 }
  0x31   :  { %952 = vmatmul.mubr.msk.f32.gmra.mrb[18].mxu1 %vm89_vm0, %v65_v45  ;;  %906 = vmatprep.mubr.msk.f32.mxu0 %vm89_vm0, %v34_v46 }
  0x32   :  { %954 = vmatprep.mubr.msk.f32.mxu1 %vm89_vm0, %v66_v47 }
  0x34   :  { %907 = vmatmul.mubr.msk.f32.gmra.mrb[20].mxu0 %vm89_vm0, %v35_v48 }
  0x35   :  { %955 = vmatmul.mubr.msk.f32.gmra.mrb[20].mxu1 %vm89_vm0, %v67_v49  ;;  %909 = vmatprep.mubr.msk.f32.mxu0 %vm89_vm0, %v36_v50 }
  0x36   :  { %957 = vmatprep.mubr.msk.f32.mxu1 %vm89_vm0, %v68_v51 }
  0x38   :  { %910 = vmatmul.mubr.msk.f32.gmra.mrb[22].mxu0 %vm89_vm0, %v37_v52 }
  0x39   :  { %958 = vmatmul.mubr.msk.f32.gmra.mrb[22].mxu1 %vm89_vm0, %v69_v53  ;;  %912 = vmatprep.mubr.msk.f32.mxu0 %vm89_vm0, %v38_v54 }
  0x3a   :  { %960 = vmatprep.mubr.msk.f32.mxu1 %vm89_vm0, %v70_v55 }
  0x3c   :  { %913 = vmatmul.mubr.msk.f32.gmra.mrb[24].mxu0 %vm89_vm0, %v39_v56 }
  0x3d   :  { %961 = vmatmul.mubr.msk.f32.gmra.mrb[24].mxu1 %vm89_vm0, %v71_v57  ;;  %915 = vmatprep.mubr.msk.f32.mxu0 %vm89_vm0, %v40_v58 }
  0x3e   :  { %963 = vmatprep.mubr.msk.f32.mxu1 %vm89_vm0, %v72_v59 }
  0x40   :  { %916 = vmatmul.mubr.msk.f32.gmra.mrb[26].mxu0 %vm89_vm0, %v41_v60 }
  0x41   :  { %964 = vmatmul.mubr.msk.f32.gmra.mrb[26].mxu1 %vm89_vm0, %v73_v61  ;;  %918 = vmatprep.mubr.msk.f32.mxu0 %vm89_vm0, %v42_v62 }
  0x42   :  { %966 = vmatprep.mubr.msk.f32.mxu1 %vm89_vm0, %v74_v63 }
  0x44   :  { %919 = vmatmul.mubr.msk.f32.gmra.mrb[28].mxu0 %vm89_vm0, %v43_v0 }
  0x45   :  { %967 = vmatmul.mubr.msk.f32.gmra.mrb[28].mxu1 %vm89_vm0, %v75_v1  ;;  %921 = vmatprep.mubr.msk.f32.mxu0 %vm89_vm0, %v44_v2 }
  0x46   :  { %969 = vmatprep.mubr.msk.f32.mxu1 %vm89_vm0, %v76_v3 }
  0x48   :  { %922 = vmatmul.mubr.msk.f32.gmra.mrb[30].mxu0 %vm89_vm0, %v45_v4 }
  0x49   :  { %970 = vmatmul.mubr.msk.f32.gmra.mrb[30].mxu1 %vm89_vm0, %v77_v5 }
  0xdf   :  { %v878_v7 = vpop.f32.mrb[0].mxu0 }
  0xe0   :  { %v926_v8 = vpop.f32.mrb[0].mxu1  ;;  %v354_v9 = vadd.f32 %v878_v7, %v1275_v6  ;;  %v348_v11 = vpop.f32.mrb[1].mxu0 }
  0xe1   :  { %v514_v10 = vadd.f32 %v926_v8, %v1275_v6  ;;  %v508_v12 = vpop.f32.mrb[1].mxu1  ;;  %v349_v13 = vadd.f32 %v1275_v6, %v348_v11 }
  0xe2   :  { %v509_v14 = vadd.f32 %v1275_v6, %v508_v12  ;;  %668 = vst [vmem:[%s1536_s3 + $0x8] sm:$0xff] %v354_v9 }
  0xe3   :  { %700 = vst [vmem:[%s1536_s3 + $0x108] sm:$0xff] %v514_v10  ;;  %667 = vst [vmem:[%s1536_s3] sm:$0xff] %v349_v13  ;;  %v881_v15 = vpop.f32.mrb[2].mxu0 }
  0xe4   :  { %699 = vst [vmem:[%s1536_s3 + $0x100] sm:$0xff] %v509_v14  ;;  %v929_v16 = vpop.f32.mrb[2].mxu1  ;;  %v364_v17 = vadd.f32 %v881_v15, %v1275_v6  ;;  %v358_v19 = vpop.f32.mrb[3].mxu0 }
  0xe5   :  { %v524_v18 = vadd.f32 %v929_v16, %v1275_v6  ;;  %v518_v20 = vpop.f32.mrb[3].mxu1  ;;  %v359_v21 = vadd.f32 %v1275_v6, %v358_v19 }
  0xe6   :  { %v519_v22 = vadd.f32 %v1275_v6, %v518_v20  ;;  %670 = vst [vmem:[%s1536_s3 + $0x18] sm:$0xff] %v364_v17 }
  0xe7   :  { %702 = vst [vmem:[%s1536_s3 + $0x118] sm:$0xff] %v524_v18  ;;  %669 = vst [vmem:[%s1536_s3 + $0x10] sm:$0xff] %v359_v21  ;;  %v884_v23 = vpop.f32.mrb[4].mxu0 }
  0xe8   :  { %701 = vst [vmem:[%s1536_s3 + $0x110] sm:$0xff] %v519_v22  ;;  %v932_v24 = vpop.f32.mrb[4].mxu1  ;;  %v374_v25 = vadd.f32 %v884_v23, %v1275_v6  ;;  %v368_v27 = vpop.f32.mrb[5].mxu0 }
  0xe9   :  { %v534_v26 = vadd.f32 %v932_v24, %v1275_v6  ;;  %v528_v28 = vpop.f32.mrb[5].mxu1  ;;  %v369_v29 = vadd.f32 %v1275_v6, %v368_v27 }
  0xea   :  { %v529_v30 = vadd.f32 %v1275_v6, %v528_v28  ;;  %672 = vst [vmem:[%s1536_s3 + $0x28] sm:$0xff] %v374_v25 }
  0xeb   :  { %704 = vst [vmem:[%s1536_s3 + $0x128] sm:$0xff] %v534_v26  ;;  %671 = vst [vmem:[%s1536_s3 + $0x20] sm:$0xff] %v369_v29  ;;  %v887_v31 = vpop.f32.mrb[6].mxu0 }
  0xec   :  { %703 = vst [vmem:[%s1536_s3 + $0x120] sm:$0xff] %v529_v30  ;;  %v935_v32 = vpop.f32.mrb[6].mxu1  ;;  %v384_v33 = vadd.f32 %v887_v31, %v1275_v6  ;;  %v378_v35 = vpop.f32.mrb[7].mxu0 }
  0xed   :  { %v544_v34 = vadd.f32 %v935_v32, %v1275_v6  ;;  %v538_v36 = vpop.f32.mrb[7].mxu1  ;;  %v379_v37 = vadd.f32 %v1275_v6, %v378_v35 }
  0xee   :  { %v539_v38 = vadd.f32 %v1275_v6, %v538_v36  ;;  %674 = vst [vmem:[%s1536_s3 + $0x38] sm:$0xff] %v384_v33 }
  0xef   :  { %706 = vst [vmem:[%s1536_s3 + $0x138] sm:$0xff] %v544_v34  ;;  %673 = vst [vmem:[%s1536_s3 + $0x30] sm:$0xff] %v379_v37  ;;  %v890_v39 = vpop.f32.mrb[8].mxu0 }
  0xf0   :  { %705 = vst [vmem:[%s1536_s3 + $0x130] sm:$0xff] %v539_v38  ;;  %v938_v40 = vpop.f32.mrb[8].mxu1  ;;  %v394_v41 = vadd.f32 %v890_v39, %v1275_v6  ;;  %v388_v43 = vpop.f32.mrb[9].mxu0 }
  0xf1   :  { %v554_v42 = vadd.f32 %v938_v40, %v1275_v6  ;;  %v548_v44 = vpop.f32.mrb[9].mxu1  ;;  %v389_v45 = vadd.f32 %v1275_v6, %v388_v43 }
  0xf2   :  { %v549_v46 = vadd.f32 %v1275_v6, %v548_v44  ;;  %676 = vst [vmem:[%s1536_s3 + $0x48] sm:$0xff] %v394_v41 }
  0xf3   :  { %708 = vst [vmem:[%s1536_s3 + $0x148] sm:$0xff] %v554_v42  ;;  %675 = vst [vmem:[%s1536_s3 + $0x40] sm:$0xff] %v389_v45  ;;  %v893_v47 = vpop.f32.mrb[10].mxu0 }
  0xf4   :  { %707 = vst [vmem:[%s1536_s3 + $0x140] sm:$0xff] %v549_v46  ;;  %v941_v48 = vpop.f32.mrb[10].mxu1  ;;  %v404_v49 = vadd.f32 %v893_v47, %v1275_v6  ;;  %v398_v51 = vpop.f32.mrb[11].mxu0 }
  0xf5   :  { %v564_v50 = vadd.f32 %v941_v48, %v1275_v6  ;;  %v558_v52 = vpop.f32.mrb[11].mxu1  ;;  %v399_v53 = vadd.f32 %v1275_v6, %v398_v51 }
  0xf6   :  { %v559_v54 = vadd.f32 %v1275_v6, %v558_v52  ;;  %678 = vst [vmem:[%s1536_s3 + $0x58] sm:$0xff] %v404_v49 }
  0xf7   :  { %710 = vst [vmem:[%s1536_s3 + $0x158] sm:$0xff] %v564_v50  ;;  %677 = vst [vmem:[%s1536_s3 + $0x50] sm:$0xff] %v399_v53  ;;  %v896_v55 = vpop.f32.mrb[12].mxu0 }
  0xf8   :  { %709 = vst [vmem:[%s1536_s3 + $0x150] sm:$0xff] %v559_v54  ;;  %v944_v56 = vpop.f32.mrb[12].mxu1  ;;  %v414_v57 = vadd.f32 %v896_v55, %v1275_v6  ;;  %v408_v59 = vpop.f32.mrb[13].mxu0 }
  0xf9   :  { %v574_v58 = vadd.f32 %v944_v56, %v1275_v6  ;;  %v568_v60 = vpop.f32.mrb[13].mxu1  ;;  %v409_v61 = vadd.f32 %v1275_v6, %v408_v59 }
  0xfa   :  { %v569_v62 = vadd.f32 %v1275_v6, %v568_v60  ;;  %680 = vst [vmem:[%s1536_s3 + $0x68] sm:$0xff] %v414_v57 }
  0xfb   :  { %712 = vst [vmem:[%s1536_s3 + $0x168] sm:$0xff] %v574_v58  ;;  %679 = vst [vmem:[%s1536_s3 + $0x60] sm:$0xff] %v409_v61  ;;  %v899_v63 = vpop.f32.mrb[14].mxu0 }
  0xfc   :  { %711 = vst [vmem:[%s1536_s3 + $0x160] sm:$0xff] %v569_v62  ;;  %v947_v0 = vpop.f32.mrb[14].mxu1  ;;  %v424_v1 = vadd.f32 %v899_v63, %v1275_v6  ;;  %v418_v3 = vpop.f32.mrb[15].mxu0 }
  0xfd   :  { %v584_v2 = vadd.f32 %v947_v0, %v1275_v6  ;;  %v578_v4 = vpop.f32.mrb[15].mxu1  ;;  %v419_v5 = vadd.f32 %v1275_v6, %v418_v3 }
  0xfe   :  { %v579_v7 = vadd.f32 %v1275_v6, %v578_v4  ;;  %682 = vst [vmem:[%s1536_s3 + $0x78] sm:$0xff] %v424_v1 }
  0xff   :  { %714 = vst [vmem:[%s1536_s3 + $0x178] sm:$0xff] %v584_v2  ;;  %681 = vst [vmem:[%s1536_s3 + $0x70] sm:$0xff] %v419_v5  ;;  %v902_v8 = vpop.f32.mrb[16].mxu0 }
 0x100   :  { %713 = vst [vmem:[%s1536_s3 + $0x170] sm:$0xff] %v579_v7  ;;  %v950_v9 = vpop.f32.mrb[16].mxu1  ;;  %v434_v10 = vadd.f32 %v902_v8, %v1275_v6  ;;  %v428_v12 = vpop.f32.mrb[17].mxu0 }
 0x101   :  { %v594_v11 = vadd.f32 %v950_v9, %v1275_v6  ;;  %v588_v13 = vpop.f32.mrb[17].mxu1  ;;  %v429_v14 = vadd.f32 %v1275_v6, %v428_v12 }
 0x102   :  { %v589_v15 = vadd.f32 %v1275_v6, %v588_v13  ;;  %684 = vst [vmem:[%s1536_s3 + $0x88] sm:$0xff] %v434_v10 }
 0x103   :  { %716 = vst [vmem:[%s1536_s3 + $0x188] sm:$0xff] %v594_v11  ;;  %683 = vst [vmem:[%s1536_s3 + $0x80] sm:$0xff] %v429_v14  ;;  %v905_v16 = vpop.f32.mrb[18].mxu0 }
 0x104   :  { %715 = vst [vmem:[%s1536_s3 + $0x180] sm:$0xff] %v589_v15  ;;  %v953_v17 = vpop.f32.mrb[18].mxu1  ;;  %v444_v18 = vadd.f32 %v905_v16, %v1275_v6  ;;  %v438_v20 = vpop.f32.mrb[19].mxu0 }
 0x105   :  { %v604_v19 = vadd.f32 %v953_v17, %v1275_v6  ;;  %v598_v21 = vpop.f32.mrb[19].mxu1  ;;  %v439_v22 = vadd.f32 %v1275_v6, %v438_v20 }
 0x106   :  { %v599_v23 = vadd.f32 %v1275_v6, %v598_v21  ;;  %686 = vst [vmem:[%s1536_s3 + $0x98] sm:$0xff] %v444_v18 }
 0x107   :  { %718 = vst [vmem:[%s1536_s3 + $0x198] sm:$0xff] %v604_v19  ;;  %685 = vst [vmem:[%s1536_s3 + $0x90] sm:$0xff] %v439_v22  ;;  %v908_v24 = vpop.f32.mrb[20].mxu0 }
 0x108   :  { %717 = vst [vmem:[%s1536_s3 + $0x190] sm:$0xff] %v599_v23  ;;  %v956_v25 = vpop.f32.mrb[20].mxu1  ;;  %v454_v26 = vadd.f32 %v908_v24, %v1275_v6  ;;  %v448_v28 = vpop.f32.mrb[21].mxu0 }
 0x109   :  { %v614_v27 = vadd.f32 %v956_v25, %v1275_v6  ;;  %v608_v29 = vpop.f32.mrb[21].mxu1  ;;  %v449_v30 = vadd.f32 %v1275_v6, %v448_v28 }
 0x10a   :  { %v609_v31 = vadd.f32 %v1275_v6, %v608_v29  ;;  %688 = vst [vmem:[%s1536_s3 + $0xa8] sm:$0xff] %v454_v26 }
 0x10b   :  { %720 = vst [vmem:[%s1536_s3 + $0x1a8] sm:$0xff] %v614_v27  ;;  %687 = vst [vmem:[%s1536_s3 + $0xa0] sm:$0xff] %v449_v30  ;;  %v911_v32 = vpop.f32.mrb[22].mxu0 }
 0x10c   :  { %719 = vst [vmem:[%s1536_s3 + $0x1a0] sm:$0xff] %v609_v31  ;;  %v959_v33 = vpop.f32.mrb[22].mxu1  ;;  %v464_v34 = vadd.f32 %v911_v32, %v1275_v6  ;;  %v458_v36 = vpop.f32.mrb[23].mxu0 }
 0x10d   :  { %v624_v35 = vadd.f32 %v959_v33, %v1275_v6  ;;  %v618_v37 = vpop.f32.mrb[23].mxu1  ;;  %v459_v38 = vadd.f32 %v1275_v6, %v458_v36 }
 0x10e   :  { %v619_v39 = vadd.f32 %v1275_v6, %v618_v37  ;;  %690 = vst [vmem:[%s1536_s3 + $0xb8] sm:$0xff] %v464_v34 }
 0x10f   :  { %722 = vst [vmem:[%s1536_s3 + $0x1b8] sm:$0xff] %v624_v35  ;;  %689 = vst [vmem:[%s1536_s3 + $0xb0] sm:$0xff] %v459_v38  ;;  %v914_v40 = vpop.f32.mrb[24].mxu0 }
 0x110   :  { %721 = vst [vmem:[%s1536_s3 + $0x1b0] sm:$0xff] %v619_v39  ;;  %v962_v41 = vpop.f32.mrb[24].mxu1  ;;  %v474_v42 = vadd.f32 %v914_v40, %v1275_v6  ;;  %v468_v44 = vpop.f32.mrb[25].mxu0 }
 0x111   :  { %v634_v43 = vadd.f32 %v962_v41, %v1275_v6  ;;  %v628_v45 = vpop.f32.mrb[25].mxu1  ;;  %v469_v46 = vadd.f32 %v1275_v6, %v468_v44 }
 0x112   :  { %v629_v47 = vadd.f32 %v1275_v6, %v628_v45  ;;  %692 = vst [vmem:[%s1536_s3 + $0xc8] sm:$0xff] %v474_v42 }
 0x113   :  { %724 = vst [vmem:[%s1536_s3 + $0x1c8] sm:$0xff] %v634_v43  ;;  %691 = vst [vmem:[%s1536_s3 + $0xc0] sm:$0xff] %v469_v46  ;;  %v917_v48 = vpop.f32.mrb[26].mxu0 }
 0x114   :  { %723 = vst [vmem:[%s1536_s3 + $0x1c0] sm:$0xff] %v629_v47  ;;  %v965_v49 = vpop.f32.mrb[26].mxu1  ;;  %v484_v50 = vadd.f32 %v917_v48, %v1275_v6  ;;  %v478_v52 = vpop.f32.mrb[27].mxu0 }
 0x115   :  { %v644_v51 = vadd.f32 %v965_v49, %v1275_v6  ;;  %v638_v53 = vpop.f32.mrb[27].mxu1  ;;  %v479_v54 = vadd.f32 %v1275_v6, %v478_v52 }
 0x116   :  { %v639_v55 = vadd.f32 %v1275_v6, %v638_v53  ;;  %694 = vst [vmem:[%s1536_s3 + $0xd8] sm:$0xff] %v484_v50 }
 0x117   :  { %726 = vst [vmem:[%s1536_s3 + $0x1d8] sm:$0xff] %v644_v51  ;;  %693 = vst [vmem:[%s1536_s3 + $0xd0] sm:$0xff] %v479_v54  ;;  %v920_v56 = vpop.f32.mrb[28].mxu0 }
 0x118   :  { %725 = vst [vmem:[%s1536_s3 + $0x1d0] sm:$0xff] %v639_v55  ;;  %v968_v57 = vpop.f32.mrb[28].mxu1  ;;  %v494_v58 = vadd.f32 %v920_v56, %v1275_v6  ;;  %v488_v60 = vpop.f32.mrb[29].mxu0 }
 0x119   :  { %v654_v59 = vadd.f32 %v968_v57, %v1275_v6  ;;  %v648_v61 = vpop.f32.mrb[29].mxu1  ;;  %v489_v62 = vadd.f32 %v1275_v6, %v488_v60 }
 0x11a   :  { %v649_v63 = vadd.f32 %v1275_v6, %v648_v61  ;;  %696 = vst [vmem:[%s1536_s3 + $0xe8] sm:$0xff] %v494_v58 }
 0x11b   :  { %728 = vst [vmem:[%s1536_s3 + $0x1e8] sm:$0xff] %v654_v59  ;;  %695 = vst [vmem:[%s1536_s3 + $0xe0] sm:$0xff] %v489_v62  ;;  %v923_v0 = vpop.f32.mrb[30].mxu0 }
 0x11c   :  { %727 = vst [vmem:[%s1536_s3 + $0x1e0] sm:$0xff] %v649_v63  ;;  %v971_v1 = vpop.f32.mrb[30].mxu1  ;;  %v504_v2 = vadd.f32 %v923_v0, %v1275_v6  ;;  %v498_v4 = vpop.f32.mrb[31].mxu0 }
 0x11d   :  { %v664_v3 = vadd.f32 %v971_v1, %v1275_v6  ;;  %v658_v5 = vpop.f32.mrb[31].mxu1  ;;  %v499_v7 = vadd.f32 %v1275_v6, %v498_v4 }
 0x11e   :  { %v659_v8 = vadd.f32 %v1275_v6, %v658_v5  ;;  %698 = vst [vmem:[%s1536_s3 + $0xf8] sm:$0xff] %v504_v2 }
 0x11f   :  { %730 = vst [vmem:[%s1536_s3 + $0x1f8] sm:$0xff] %v664_v3  ;;  %697 = vst [vmem:[%s1536_s3 + $0xf0] sm:$0xff] %v499_v7 }
 0x120   :  { %729 = vst [vmem:[%s1536_s3 + $0x1f0] sm:$0xff] %v659_v8 }

// kernel: down_encoder_block2d_forward.14
= control target key start
LH: loop header
LB: loop body
LE: loop exit
PB: predicated region body
PF: predicated region fallthrough
CT: control target
= control target key end

     0   :  { %v2499_v0 = vmov 0.0|0.0   ;;  %vm416_vm0 = vcmask 523264   ;;  %s4575_s1 = inlined_call_operand.vmem [shape: f32[576,128], index: 1, kind: input, shape index: {}]   ;;  %s4576_s0 = inlined_call_operand.vmem [shape: f32[512,576], index: 0, kind: input, shape index: {}]   ;;  %s4577_s2 = inlined_call_operand.vmem [shape: f32[1,128], index: 2, kind: input, shape index: {}]   ;;  %s4578_s3 = inlined_call_operand.vmem [shape: f32[512,128], index: 3, kind: input, shape index: {}]   ;;  %s4579_s4 = inlined_call_operand.vmem [shape: f32[512,128], index: 4, kind: output, shape index: {}]  }
   0x1   :  { %2209 = vmatprep.subr.bf16.mxu0 %v2499_v0  ;;  %2321 = vmatprep.subr.bf16.mxu1 %v2499_v0  ;;  %v337_v1 = vld [vmem:[%s4575_s1] sm:$0xff]  ;;  %v338_v2 = vld [vmem:[%s4575_s1 + $0x8] sm:$0xff]  ;;  %v339_v3 = vld [vmem:[%s4575_s1 + $0x10] sm:$0xff] }
   0x2   :  { %v2210_v4 = vpack.c.bf16 %v338_v2, %v337_v1  ;;  %v340_v5 = vld [vmem:[%s4575_s1 + $0x18] sm:$0xff]  ;;  %v341_v7 = vld [vmem:[%s4575_s1 + $0x20] sm:$0xff]  ;;  %v342_v8 = vld [vmem:[%s4575_s1 + $0x28] sm:$0xff] }
   0x3   :  { %v2213_v6 = vpack.c.bf16 %v340_v5, %v339_v3  ;;  %v2216_v9 = vpack.c.bf16 %v342_v8, %v341_v7  ;;  %v343_v10 = vld [vmem:[%s4575_s1 + $0x30] sm:$0xff]  ;;  %v344_v11 = vld [vmem:[%s4575_s1 + $0x38] sm:$0xff]  ;;  %v18_v12 = vld [vmem:[%s4576_s0 + $0x8] sm:$0xff] }
   0x4   :  { %2211 = vmatpush1.bf16.msra.mxu0 %v2210_v4  ;;  %2337 = vmatpush1.bf16.msra.mxu1 %v2210_v4  ;;  %v2219_v13 = vpack.c.bf16 %v344_v11, %v343_v10  ;;  %v98_v14 = vld [vmem:[%s4576_s0 + $0x288] sm:$0xff]  ;;  %v345_v15 = vld [vmem:[%s4575_s1 + $0x40] sm:$0xff]  ;;  %v347_v18 = vld [vmem:[%s4575_s1 + $0x50] sm:$0xff] }
   0x5   :  { %2212 = vmatprep.subr.bf16.mxu0 %v2499_v0  ;;  %2322 = vmatprep.subr.bf16.mxu1 %v2499_v0  ;;  %v346_v16 = vld [vmem:[%s4575_s1 + $0x48] sm:$0xff]  ;;  %v348_v19 = vld [vmem:[%s4575_s1 + $0x58] sm:$0xff]  ;;  %v349_v21 = vld [vmem:[%s4575_s1 + $0x60] sm:$0xff] }
   0x6   :  { %673 = vmatprep.mubr.f32.mxu0 %v18_v12  ;;  %753 = vmatprep.mubr.f32.mxu1 %v98_v14  ;;  %v2222_v17 = vpack.c.bf16 %v346_v16, %v345_v15  ;;  %v2225_v20 = vpack.c.bf16 %v348_v19, %v347_v18  ;;  %v350_v22 = vld [vmem:[%s4575_s1 + $0x68] sm:$0xff]  ;;  %v351_v24 = vld [vmem:[%s4575_s1 + $0x70] sm:$0xff]  ;;  %v352_v25 = vld [vmem:[%s4575_s1 + $0x78] sm:$0xff] }
   0x7   :  { %v2228_v23 = vpack.c.bf16 %v350_v22, %v349_v21  ;;  %v2231_v26 = vpack.c.bf16 %v352_v25, %v351_v24  ;;  %v353_v27 = vld [vmem:[%s4575_s1 + $0x80] sm:$0xff]  ;;  %v354_v28 = vld [vmem:[%s4575_s1 + $0x88] sm:$0xff]  ;;  %v355_v30 = vld [vmem:[%s4575_s1 + $0x90] sm:$0xff] }
   0x8   :  { %2214 = vmatpush1.bf16.msra.mxu0 %v2213_v6  ;;  %2338 = vmatpush1.bf16.msra.mxu1 %v2213_v6  ;;  %v2234_v29 = vpack.c.bf16 %v354_v28, %v353_v27  ;;  %v356_v31 = vld [vmem:[%s4575_s1 + $0x98] sm:$0xff]  ;;  %v357_v33 = vld [vmem:[%s4575_s1 + $0xa0] sm:$0xff]  ;;  %v358_v34 = vld [vmem:[%s4575_s1 + $0xa8] sm:$0xff] }
   0x9   :  { %2215 = vmatprep.subr.bf16.mxu0 %v2499_v0  ;;  %2323 = vmatprep.subr.bf16.mxu1 %v2499_v0  ;;  %v2237_v32 = vpack.c.bf16 %v356_v31, %v355_v30  ;;  %v2240_v35 = vpack.c.bf16 %v358_v34, %v357_v33  ;;  %v359_v36 = vld [vmem:[%s4575_s1 + $0xb0] sm:$0xff]  ;;  %v360_v37 = vld [vmem:[%s4575_s1 + $0xb8] sm:$0xff]  ;;  %v361_v39 = vld [vmem:[%s4575_s1 + $0xc0] sm:$0xff] }
   0xa   :  { %v2243_v38 = vpack.c.bf16 %v360_v37, %v359_v36  ;;  %v362_v40 = vld [vmem:[%s4575_s1 + $0xc8] sm:$0xff]  ;;  %v363_v42 = vld [vmem:[%s4575_s1 + $0xd0] sm:$0xff]  ;;  %v364_v43 = vld [vmem:[%s4575_s1 + $0xd8] sm:$0xff] }
   0xb   :  { %v2246_v41 = vpack.c.bf16 %v362_v40, %v361_v39  ;;  %v2249_v44 = vpack.c.bf16 %v364_v43, %v363_v42  ;;  %v365_v45 = vld [vmem:[%s4575_s1 + $0xe0] sm:$0xff]  ;;  %v366_v46 = vld [vmem:[%s4575_s1 + $0xe8] sm:$0xff]  ;;  %v367_v48 = vld [vmem:[%s4575_s1 + $0xf0] sm:$0xff] }
   0xc   :  { %2217 = vmatpush1.bf16.msra.mxu0 %v2216_v9  ;;  %2339 = vmatpush1.bf16.msra.mxu1 %v2216_v9  ;;  %v2252_v47 = vpack.c.bf16 %v366_v46, %v365_v45  ;;  %v368_v49 = vld [vmem:[%s4575_s1 + $0xf8] sm:$0xff]  ;;  %v401_v50 = vld [vmem:[%s4575_s1 + $0x200] sm:$0xff]  ;;  %v402_v51 = vld [vmem:[%s4575_s1 + $0x208] sm:$0xff] }
   0xd   :  { %2218 = vmatprep.subr.bf16.mxu0 %v2499_v0  ;;  %2324 = vmatprep.subr.bf16.mxu1 %v2499_v0  ;;  %v2255_v52 = vpack.c.bf16 %v368_v49, %v367_v48  ;;  %v369_v53 = vld [vmem:[%s4575_s1 + $0x100] sm:$0xff]  ;;  %v370_v54 = vld [vmem:[%s4575_s1 + $0x108] sm:$0xff]  ;;  %v2305_v55 = vpack.c.bf16 %v402_v51, %v401_v50  ;;  %v403_v56 = vld [vmem:[%s4575_s1 + $0x210] sm:$0xff] }
   0xe   :  { %v404_v57 = vld [vmem:[%s4575_s1 + $0x218] sm:$0xff]  ;;  %v17_v58 = vld [vmem:[%s4576_s0] sm:$0xff]  ;;  %v2258_v60 = vpack.c.bf16 %v370_v54, %v369_v53  ;;  %v371_v61 = vld [vmem:[%s4575_s1 + $0x110] sm:$0xff] }
   0xf   :  { %v97_v59 = vld [vmem:[%s4576_s0 + $0x280] sm:$0xff]  ;;  %v372_v62 = vld [vmem:[%s4575_s1 + $0x118] sm:$0xff]  ;;  %v23_v63 = vld [vmem:[%s4576_s0 + $0x30] sm:$0xff]  ;;  %v2309_v2 = vpack.c.bf16 %v404_v57, %v403_v56 }
  0x10   :  { %2220 = vmatpush1.bf16.msra.mxu0 %v2219_v13  ;;  %2340 = vmatpush1.bf16.msra.mxu1 %v2219_v13  ;;  %v103_v1 = vld [vmem:[%s4576_s0 + $0x2b0] sm:$0xff]  ;;  %v22_v3 = vld [vmem:[%s4576_s0 + $0x28] sm:$0xff]  ;;  %v2261_v5 = vpack.c.bf16 %v372_v62, %v371_v61  ;;  %v28_v6 = vld [vmem:[%s4576_s0 + $0x58] sm:$0xff] }
  0x11   :  { %2221 = vmatprep.subr.bf16.mxu0 %v2499_v0  ;;  %2325 = vmatprep.subr.bf16.mxu1 %v2499_v0  ;;  %v102_v4 = vld [vmem:[%s4576_s0 + $0x2a8] sm:$0xff]  ;;  %v373_v7 = vld [vmem:[%s4575_s1 + $0x120] sm:$0xff]  ;;  %v108_v9 = vld [vmem:[%s4576_s0 + $0x2d8] sm:$0xff] }
  0x12   :  { %v374_v8 = vld [vmem:[%s4575_s1 + $0x128] sm:$0xff]  ;;  %v405_v10 = vld [vmem:[%s4575_s1 + $0x220] sm:$0xff]  ;;  %v27_v12 = vld [vmem:[%s4576_s0 + $0x50] sm:$0xff] }
  0x13   :  { %v406_v11 = vld [vmem:[%s4575_s1 + $0x228] sm:$0xff]  ;;  %v107_v13 = vld [vmem:[%s4576_s0 + $0x2d0] sm:$0xff]  ;;  %v2264_v14 = vpack.c.bf16 %v374_v8, %v373_v7  ;;  %v33_v15 = vld [vmem:[%s4576_s0 + $0x80] sm:$0xff] }
  0x14   :  { %2223 = vmatpush1.bf16.msra.mxu0 %v2222_v17  ;;  %2341 = vmatpush1.bf16.msra.mxu1 %v2222_v17  ;;  %v375_v16 = vld [vmem:[%s4575_s1 + $0x130] sm:$0xff]  ;;  %v376_v17 = vld [vmem:[%s4575_s1 + $0x138] sm:$0xff]  ;;  %v113_v18 = vld [vmem:[%s4576_s0 + $0x300] sm:$0xff]  ;;  %v2313_v19 = vpack.c.bf16 %v406_v11, %v405_v10 }
  0x15   :  { %2224 = vmatprep.subr.bf16.mxu0 %v2499_v0  ;;  %2326 = vmatprep.subr.bf16.mxu1 %v2499_v0  ;;  %v112_v21 = vld [vmem:[%s4576_s0 + $0x2f8] sm:$0xff]  ;;  %v2267_v22 = vpack.c.bf16 %v376_v17, %v375_v16  ;;  %v377_v24 = vld [vmem:[%s4575_s1 + $0x140] sm:$0xff]  ;;  %v378_v25 = vld [vmem:[%s4575_s1 + $0x148] sm:$0xff] }
  0x16   :  { %v37_v27 = vld [vmem:[%s4576_s0 + $0xa0] sm:$0xff]  ;;  %v43_v30 = vld [vmem:[%s4576_s0 + $0xd0] sm:$0xff]  ;;  %v42_v36 = vld [vmem:[%s4576_s0 + $0xc8] sm:$0xff] }
  0x17   :  { %v117_v28 = vld [vmem:[%s4576_s0 + $0x320] sm:$0xff]  ;;  %v379_v31 = vld [vmem:[%s4575_s1 + $0x150] sm:$0xff]  ;;  %v122_v37 = vld [vmem:[%s4576_s0 + $0x348] sm:$0xff] }
  0x18   :  { %2226 = vmatpush1.bf16.msra.mxu0 %v2225_v20  ;;  %2342 = vmatpush1.bf16.msra.mxu1 %v2225_v20  ;;  %v32_v20 = vld [vmem:[%s4576_s0 + $0x78] sm:$0xff]  ;;  %v123_v33 = vld [vmem:[%s4576_s0 + $0x350] sm:$0xff]  ;;  %v382_v42 = vld [vmem:[%s4575_s1 + $0x168] sm:$0xff] }
  0x19   :  { %2227 = vmatprep.subr.bf16.mxu0 %v2499_v0  ;;  %2327 = vmatprep.subr.bf16.mxu1 %v2499_v0  ;;  %v407_v34 = vld [vmem:[%s4575_s1 + $0x230] sm:$0xff]  ;;  %v48_v40 = vld [vmem:[%s4576_s0 + $0xf8] sm:$0xff]  ;;  %v133_v50 = vld [vmem:[%s4576_s0 + $0x3a0] sm:$0xff] }
  0x1a   :  { %v128_v43 = vld [vmem:[%s4576_s0 + $0x378] sm:$0xff]  ;;  %v127_v45 = vld [vmem:[%s4576_s0 + $0x370] sm:$0xff]  ;;  %v58_v54 = vld [vmem:[%s4576_s0 + $0x148] sm:$0xff] }
  0x1b   :  { %v383_v48 = vld [vmem:[%s4575_s1 + $0x170] sm:$0xff]  ;;  %v384_v49 = vld [vmem:[%s4575_s1 + $0x178] sm:$0xff]  ;;  %v386_v56 = vld [vmem:[%s4575_s1 + $0x188] sm:$0xff] }
  0x1c   :  { %2229 = vmatpush1.bf16.msra.mxu0 %v2228_v23  ;;  %2343 = vmatpush1.bf16.msra.mxu1 %v2228_v23  ;;  %v38_v23 = vld [vmem:[%s4576_s0 + $0xa8] sm:$0xff]  ;;  %v52_v51 = vld [vmem:[%s4576_s0 + $0x118] sm:$0xff]  ;;  %v2279_v53 = vpack.c.bf16 %v384_v49, %v383_v48  ;;  %v63_v61 = vld [vmem:[%s4576_s0 + $0x170] sm:$0xff] }
  0x1d   :  { %2230 = vmatprep.subr.bf16.mxu0 %v2499_v0  ;;  %2328 = vmatprep.subr.bf16.mxu1 %v2499_v0  ;;  %v138_v57 = vld [vmem:[%s4576_s0 + $0x3c8] sm:$0xff]  ;;  %v387_v62 = vld [vmem:[%s4575_s1 + $0x190] sm:$0xff]  ;;  %v148_v8 = vld [vmem:[%s4576_s0 + $0x418] sm:$0xff] }
  0x1e   :  { %v390_v7 = vld [vmem:[%s4575_s1 + $0x1a8] sm:$0xff]  ;;  %v147_v10 = vld [vmem:[%s4576_s0 + $0x410] sm:$0xff]  ;;  %v72_v16 = vld [vmem:[%s4576_s0 + $0x1b8] sm:$0xff] }
  0x1f   :  { %v152_v17 = vld [vmem:[%s4576_s0 + $0x438] sm:$0xff]  ;;  %v177_v49 = vld [vmem:[%s4576_s0 + $0x500] sm:$0xff] }
  0x20   :  { %2232 = vmatpush1.bf16.msra.mxu0 %v2231_v26  ;;  %2344 = vmatpush1.bf16.msra.mxu1 %v2231_v26  ;;  %v118_v26 = vld [vmem:[%s4576_s0 + $0x328] sm:$0xff]  ;;  %v20_v48 = vld [vmem:[%s4576_s0 + $0x18] sm:$0xff] }
  0x21   :  { %2233 = vmatprep.subr.bf16.mxu0 %v2499_v0  ;;  %2329 = vmatprep.subr.bf16.mxu1 %v2499_v0 }
  0x24   :  { %2235 = vmatpush1.bf16.msra.mxu0 %v2234_v29  ;;  %2345 = vmatpush1.bf16.msra.mxu1 %v2234_v29  ;;  %v2270_v29 = vpack.c.bf16 %v378_v25, %v377_v24  ;;  %v157_v24 = vld [vmem:[%s4576_s0 + $0x460] sm:$0xff] }
  0x25   :  { %2236 = vmatprep.subr.bf16.mxu0 %v2499_v0  ;;  %2330 = vmatprep.subr.bf16.mxu1 %v2499_v0 }
  0x28   :  { %2238 = vmatpush1.bf16.msra.mxu0 %v2237_v32  ;;  %2346 = vmatpush1.bf16.msra.mxu1 %v2237_v32  ;;  %v380_v32 = vld [vmem:[%s4575_s1 + $0x158] sm:$0xff] }
  0x29   :  { %2239 = vmatprep.subr.bf16.mxu0 %v2499_v0  ;;  %2331 = vmatprep.subr.bf16.mxu1 %v2499_v0 }
  0x2c   :  { %2241 = vmatpush1.bf16.msra.mxu0 %v2240_v35  ;;  %2347 = vmatpush1.bf16.msra.mxu1 %v2240_v35  ;;  %v408_v35 = vld [vmem:[%s4575_s1 + $0x238] sm:$0xff] }
  0x2d   :  { %2242 = vmatprep.subr.bf16.mxu0 %v2499_v0  ;;  %2332 = vmatprep.subr.bf16.mxu1 %v2499_v0  ;;  %v2317_v39 = vpack.c.bf16 %v408_v35, %v407_v34  ;;  %v397_v34 = vld [vmem:[%s4575_s1 + $0x1e0] sm:$0xff]  ;;  %v398_v35 = vld [vmem:[%s4575_s1 + $0x1e8] sm:$0xff] }
  0x30   :  { %2244 = vmatpush1.bf16.msra.mxu0 %v2243_v38  ;;  %2348 = vmatpush1.bf16.msra.mxu1 %v2243_v38  ;;  %v2273_v38 = vpack.c.bf16 %v380_v32, %v379_v31  ;;  %v162_v31 = vld [vmem:[%s4576_s0 + $0x488] sm:$0xff] }
  0x31   :  { %2245 = vmatprep.subr.bf16.mxu0 %v2499_v0  ;;  %2333 = vmatprep.subr.bf16.mxu1 %v2499_v0 }
  0x34   :  { %2247 = vmatpush1.bf16.msra.mxu0 %v2246_v41  ;;  %2349 = vmatpush1.bf16.msra.mxu1 %v2246_v41  ;;  %v381_v41 = vld [vmem:[%s4575_s1 + $0x160] sm:$0xff] }
  0x35   :  { %2248 = vmatprep.subr.bf16.mxu0 %v2499_v0  ;;  %2334 = vmatprep.subr.bf16.mxu1 %v2499_v0  ;;  %v2276_v46 = vpack.c.bf16 %v382_v42, %v381_v41  ;;  %v399_v41 = vld [vmem:[%s4575_s1 + $0x1f0] sm:$0xff]  ;;  %v400_v42 = vld [vmem:[%s4575_s1 + $0x1f8] sm:$0xff] }
  0x38   :  { %2250 = vmatpush1.bf16.msra.mxu0 %v2249_v44  ;;  %2350 = vmatpush1.bf16.msra.mxu1 %v2249_v44  ;;  %v47_v44 = vld [vmem:[%s4576_s0 + $0xf0] sm:$0xff] }
  0x39   :  { %2251 = vmatprep.subr.bf16.mxu0 %v2499_v0  ;;  %2335 = vmatprep.subr.bf16.mxu1 %v2499_v0 }
  0x3c   :  { %2253 = vmatpush1.bf16.msra.mxu0 %v2252_v47  ;;  %2351 = vmatpush1.bf16.msra.mxu1 %v2252_v47  ;;  %v53_v47 = vld [vmem:[%s4576_s0 + $0x120] sm:$0xff] }
  0x3d   :  { %2254 = vmatprep.subr.bf16.mxu0 %v2499_v0  ;;  %2336 = vmatprep.subr.bf16.mxu1 %v2499_v0 }
  0x40   :  { %2256 = vmatpush1.bf16.msra.mxu0 %v2255_v52  ;;  %2352 = vmatpush1.bf16.msra.mxu1 %v2255_v52  ;;  %v132_v52 = vld [vmem:[%s4576_s0 + $0x398] sm:$0xff] }
  0x41   :  { %2257 = vmatprep.subr.bf16.mxu0 %v2499_v0  ;;  %2306 = vmatprep.subr.bf16.mxu1 %v2305_v55 }
  0x43   :  { %674 = vmatmul.mubr.f32.vlgmr.msra.gmra.mrb[0].mxu0 %v17_v58  ;;  %754 = vmatmul.mubr.f32.vlgmr.msra.gmra.mrb[0].mxu1 %v97_v59  ;;  %v57_v58 = vld [vmem:[%s4576_s0 + $0x140] sm:$0xff] }
  0x44   :  { %2259 = vmatpush1.bf16.msra.mxu0 %v2258_v60  ;;  %2308 = vmatpush3.bf16.msra.mxu1 %v2305_v55  ;;  %v385_v55 = vld [vmem:[%s4575_s1 + $0x180] sm:$0xff] }
  0x45   :  { %678 = vmatprep.mubr.f32.mxu0 %v23_v63  ;;  %758 = vmatprep.mubr.f32.mxu1 %v103_v1  ;;  %v137_v59 = vld [vmem:[%s4576_s0 + $0x3c0] sm:$0xff]  ;;  %v2282_v60 = vpack.c.bf16 %v386_v56, %v385_v55  ;;  %v388_v63 = vld [vmem:[%s4575_s1 + $0x198] sm:$0xff]  ;;  %v143_v1 = vld [vmem:[%s4576_s0 + $0x3f0] sm:$0xff] }
  0x46   :  { %2260 = vmatprep.subr.bf16.mxu0 %v2499_v0  ;;  %2310 = vmatprep.subr.bf16.mxu1 %v2309_v2  ;;  %v30_v55 = vld [vmem:[%s4576_s0 + $0x68] sm:$0xff]  ;;  %v187_v56 = vld [vmem:[%s4576_s0 + $0x550] sm:$0xff] }
  0x47   :  { %679 = vmatmul.mubr.f32.gmra.mrb[2].mxu0 %v22_v3  ;;  %759 = vmatmul.mubr.f32.gmra.mrb[2].mxu1 %v102_v4  ;;  %v142_v3 = vld [vmem:[%s4576_s0 + $0x3e8] sm:$0xff]  ;;  %v2285_v4 = vpack.c.bf16 %v388_v63, %v387_v62  ;;  %v40_v63 = vld [vmem:[%s4576_s0 + $0xb8] sm:$0xff] }
  0x48   :  { %2262 = vmatpush1.bf16.msra.mxu0 %v2261_v5  ;;  %683 = vmatprep.mubr.f32.mxu0 %v28_v6  ;;  %v68_v5 = vld [vmem:[%s4576_s0 + $0x198] sm:$0xff]  ;;  %v389_v6 = vld [vmem:[%s4575_s1 + $0x1a0] sm:$0xff]  ;;  %v198_v62 = vld [vmem:[%s4576_s0 + $0x5a8] sm:$0xff] }
  0x49   :  { %763 = vmatprep.mubr.f32.mxu1 %v108_v9  ;;  %2263 = vmatprep.subr.bf16.mxu0 %v2499_v0  ;;  %v67_v9 = vld [vmem:[%s4576_s0 + $0x190] sm:$0xff]  ;;  %v2288_v11 = vpack.c.bf16 %v390_v7, %v389_v6  ;;  %v44_v6 = vld [vmem:[%s4576_s0 + $0xd8] sm:$0xff] }
  0x4a   :  { %2312 = vmatpush3.bf16.msra.mxu1 %v2309_v2  ;;  %v62_v2 = vld [vmem:[%s4576_s0 + $0x168] sm:$0xff]  ;;  %v208_v7 = vld [vmem:[%s4576_s0 + $0x5f8] sm:$0xff] }
  0x4b   :  { %684 = vmatmul.mubr.f32.gmra.mrb[4].mxu0 %v27_v12  ;;  %764 = vmatmul.mubr.f32.gmra.mrb[4].mxu1 %v107_v13  ;;  %v73_v12 = vld [vmem:[%s4576_s0 + $0x1c0] sm:$0xff]  ;;  %v391_v13 = vld [vmem:[%s4575_s1 + $0x1b0] sm:$0xff] }
  0x4c   :  { %2265 = vmatpush1.bf16.msra.mxu0 %v2264_v14  ;;  %688 = vmatprep.mubr.f32.mxu0 %v33_v15  ;;  %v392_v14 = vld [vmem:[%s4575_s1 + $0x1b8] sm:$0xff]  ;;  %v153_v15 = vld [vmem:[%s4576_s0 + $0x440] sm:$0xff] }
  0x4d   :  { %768 = vmatprep.mubr.f32.mxu1 %v113_v18  ;;  %2266 = vmatprep.subr.bf16.mxu0 %v2499_v0  ;;  %v2291_v18 = vpack.c.bf16 %v392_v14, %v391_v13  ;;  %v212_v13 = vld [vmem:[%s4576_s0 + $0x618] sm:$0xff]  ;;  %v54_v14 = vld [vmem:[%s4576_s0 + $0x128] sm:$0xff] }
  0x4e   :  { %2314 = vmatprep.subr.bf16.mxu1 %v2313_v19 }
  0x4f   :  { %689 = vmatmul.mubr.f32.gmra.mrb[6].mxu0 %v32_v20  ;;  %769 = vmatmul.mubr.f32.gmra.mrb[6].mxu1 %v112_v21  ;;  %v393_v20 = vld [vmem:[%s4575_s1 + $0x1c0] sm:$0xff]  ;;  %v394_v21 = vld [vmem:[%s4575_s1 + $0x1c8] sm:$0xff] }
  0x50   :  { %2268 = vmatpush1.bf16.msra.mxu0 %v2267_v22  ;;  %693 = vmatprep.mubr.f32.mxu0 %v38_v23  ;;  %v158_v22 = vld [vmem:[%s4576_s0 + $0x468] sm:$0xff]  ;;  %v77_v23 = vld [vmem:[%s4576_s0 + $0x1e0] sm:$0xff]  ;;  %v2294_v25 = vpack.c.bf16 %v394_v21, %v393_v20 }
  0x51   :  { %773 = vmatprep.mubr.f32.mxu1 %v118_v26  ;;  %2269 = vmatprep.subr.bf16.mxu0 %v2499_v0  ;;  %v83_v26 = vld [vmem:[%s4576_s0 + $0x210] sm:$0xff]  ;;  %v65_v20 = vld [vmem:[%s4576_s0 + $0x180] sm:$0xff]  ;;  %v222_v21 = vld [vmem:[%s4576_s0 + $0x668] sm:$0xff] }
  0x52   :  { %2316 = vmatpush3.bf16.msra.mxu1 %v2313_v19  ;;  %v78_v19 = vld [vmem:[%s4576_s0 + $0x1e8] sm:$0xff] }
  0x53   :  { %694 = vmatmul.mubr.f32.gmra.mrb[8].mxu0 %v37_v27  ;;  %774 = vmatmul.mubr.f32.gmra.mrb[8].mxu1 %v117_v28  ;;  %v395_v27 = vld [vmem:[%s4575_s1 + $0x1d0] sm:$0xff]  ;;  %v396_v28 = vld [vmem:[%s4575_s1 + $0x1d8] sm:$0xff] }
  0x54   :  { %2271 = vmatpush1.bf16.msra.mxu0 %v2270_v29  ;;  %698 = vmatprep.mubr.f32.mxu0 %v43_v30  ;;  %v163_v29 = vld [vmem:[%s4576_s0 + $0x490] sm:$0xff]  ;;  %v82_v30 = vld [vmem:[%s4576_s0 + $0x208] sm:$0xff]  ;;  %v2297_v32 = vpack.c.bf16 %v396_v28, %v395_v27  ;;  %v233_v27 = vld [vmem:[%s4576_s0 + $0x6c0] sm:$0xff] }
  0x55   :  { %778 = vmatprep.mubr.f32.mxu1 %v123_v33  ;;  %2272 = vmatprep.subr.bf16.mxu0 %v2499_v0  ;;  %v88_v33 = vld [vmem:[%s4576_s0 + $0x238] sm:$0xff]  ;;  %v75_v28 = vld [vmem:[%s4576_s0 + $0x1d0] sm:$0xff] }
  0x56   :  { %2318 = vmatprep.subr.bf16.mxu1 %v2317_v39 }
  0x57   :  { %699 = vmatmul.mubr.f32.gmra.mrb[10].mxu0 %v42_v36  ;;  %779 = vmatmul.mubr.f32.gmra.mrb[10].mxu1 %v122_v37  ;;  %v168_v36 = vld [vmem:[%s4576_s0 + $0x4b8] sm:$0xff]  ;;  %v87_v37 = vld [vmem:[%s4576_s0 + $0x230] sm:$0xff] }
  0x58   :  { %2274 = vmatpush1.bf16.msra.mxu0 %v2273_v38  ;;  %703 = vmatprep.mubr.f32.mxu0 %v48_v40  ;;  %v167_v38 = vld [vmem:[%s4576_s0 + $0x4b0] sm:$0xff]  ;;  %v93_v40 = vld [vmem:[%s4576_s0 + $0x260] sm:$0xff] }
  0x59   :  { %783 = vmatprep.mubr.f32.mxu1 %v128_v43  ;;  %2275 = vmatprep.subr.bf16.mxu0 %v2499_v0  ;;  %v173_v43 = vld [vmem:[%s4576_s0 + $0x4e0] sm:$0xff] }
  0x5a   :  { %2320 = vmatpush3.bf16.msra.mxu1 %v2317_v39  ;;  %v2300_v39 = vpack.c.bf16 %v398_v35, %v397_v34  ;;  %v79_v34 = vld [vmem:[%s4576_s0 + $0x1f0] sm:$0xff] }
  0x5b   :  { %704 = vmatmul.mubr.f32.gmra.mrb[12].mxu0 %v47_v44  ;;  %784 = vmatmul.mubr.f32.gmra.mrb[12].mxu1 %v127_v45  ;;  %v92_v44 = vld [vmem:[%s4576_s0 + $0x258] sm:$0xff]  ;;  %v243_v35 = vld [vmem:[%s4576_s0 + $0x710] sm:$0xff] }
  0x5c   :  { %2277 = vmatpush1.bf16.msra.mxu0 %v2276_v46  ;;  %708 = vmatprep.mubr.f32.mxu0 %v53_v47  ;;  %v172_v45 = vld [vmem:[%s4576_s0 + $0x4d8] sm:$0xff]  ;;  %v2303_v46 = vpack.c.bf16 %v400_v42, %v399_v41  ;;  %v178_v47 = vld [vmem:[%s4576_s0 + $0x508] sm:$0xff]  ;;  %v247_v41 = vld [vmem:[%s4576_s0 + $0x730] sm:$0xff] }
  0x5d   :  { %788 = vmatprep.mubr.f32.mxu1 %v133_v50  ;;  %2278 = vmatprep.subr.bf16.mxu0 %v2499_v0  ;;  %v183_v50 = vld [vmem:[%s4576_s0 + $0x530] sm:$0xff]  ;;  %v89_v42 = vld [vmem:[%s4576_s0 + $0x240] sm:$0xff] }
  0x5f   :  { %709 = vmatmul.mubr.f32.gmra.mrb[14].mxu0 %v52_v51  ;;  %789 = vmatmul.mubr.f32.gmra.mrb[14].mxu1 %v132_v52  ;;  %v25_v51 = vld [vmem:[%s4576_s0 + $0x40] sm:$0xff]  ;;  %v182_v52 = vld [vmem:[%s4576_s0 + $0x528] sm:$0xff] }
  0x60   :  { %2280 = vmatpush1.bf16.msra.mxu0 %v2279_v53  ;;  %713 = vmatprep.mubr.f32.mxu0 %v58_v54  ;;  %v24_v53 = vld [vmem:[%s4576_s0 + $0x38] sm:$0xff] }
  0x61   :  { %793 = vmatprep.mubr.f32.mxu1 %v138_v57  ;;  %2281 = vmatprep.subr.bf16.mxu0 %v2499_v0  ;;  %v188_v54 = vld [vmem:[%s4576_s0 + $0x558] sm:$0xff]  ;;  %v29_v57 = vld [vmem:[%s4576_s0 + $0x60] sm:$0xff] }
  0x63   :  { %714 = vmatmul.mubr.f32.gmra.mrb[16].mxu0 %v57_v58  ;;  %794 = vmatmul.mubr.f32.gmra.mrb[16].mxu1 %v137_v59  ;;  %v193_v58 = vld [vmem:[%s4576_s0 + $0x580] sm:$0xff]  ;;  %v35_v59 = vld [vmem:[%s4576_s0 + $0x90] sm:$0xff] }
  0x64   :  { %2283 = vmatpush1.bf16.msra.mxu0 %v2282_v60  ;;  %718 = vmatprep.mubr.f32.mxu0 %v63_v61  ;;  %v192_v60 = vld [vmem:[%s4576_s0 + $0x578] sm:$0xff]  ;;  %v34_v61 = vld [vmem:[%s4576_s0 + $0x88] sm:$0xff] }
  0x65   :  { %798 = vmatprep.mubr.f32.mxu1 %v143_v1  ;;  %2284 = vmatprep.subr.bf16.mxu0 %v2499_v0  ;;  %v197_v1 = vld [vmem:[%s4576_s0 + $0x5a0] sm:$0xff] }
  0x67   :  { %719 = vmatmul.mubr.f32.gmra.mrb[18].mxu0 %v62_v2  ;;  %799 = vmatmul.mubr.f32.gmra.mrb[18].mxu1 %v142_v3  ;;  %v39_v2 = vld [vmem:[%s4576_s0 + $0xb0] sm:$0xff] }
  0x68   :  { %2286 = vmatpush1.bf16.msra.mxu0 %v2285_v4  ;;  %723 = vmatprep.mubr.f32.mxu0 %v68_v5  ;;  %v203_v3 = vld [vmem:[%s4576_s0 + $0x5d0] sm:$0xff]  ;;  %v45_v4 = vld [vmem:[%s4576_s0 + $0xe0] sm:$0xff]  ;;  %v202_v5 = vld [vmem:[%s4576_s0 + $0x5c8] sm:$0xff] }
  0x69   :  { %803 = vmatprep.mubr.f32.mxu1 %v148_v8  ;;  %2287 = vmatprep.subr.bf16.mxu0 %v2499_v0  ;;  %v50_v8 = vld [vmem:[%s4576_s0 + $0x108] sm:$0xff] }
  0x6b   :  { %724 = vmatmul.mubr.f32.gmra.mrb[20].mxu0 %v67_v9  ;;  %804 = vmatmul.mubr.f32.gmra.mrb[20].mxu1 %v147_v10  ;;  %v207_v9 = vld [vmem:[%s4576_s0 + $0x5f0] sm:$0xff]  ;;  %v49_v10 = vld [vmem:[%s4576_s0 + $0x100] sm:$0xff] }
  0x6c   :  { %2289 = vmatpush1.bf16.msra.mxu0 %v2288_v11  ;;  %728 = vmatprep.mubr.f32.mxu0 %v73_v12  ;;  %v213_v11 = vld [vmem:[%s4576_s0 + $0x620] sm:$0xff]  ;;  %v55_v12 = vld [vmem:[%s4576_s0 + $0x130] sm:$0xff] }
  0x6d   :  { %808 = vmatprep.mubr.f32.mxu1 %v153_v15  ;;  %2290 = vmatprep.subr.bf16.mxu0 %v2499_v0  ;;  %v218_v15 = vld [vmem:[%s4576_s0 + $0x648] sm:$0xff] }
  0x6f   :  { %729 = vmatmul.mubr.f32.gmra.mrb[22].mxu0 %v72_v16  ;;  %809 = vmatmul.mubr.f32.gmra.mrb[22].mxu1 %v152_v17  ;;  %v60_v16 = vld [vmem:[%s4576_s0 + $0x158] sm:$0xff]  ;;  %v217_v17 = vld [vmem:[%s4576_s0 + $0x640] sm:$0xff] }
  0x70   :  { %2292 = vmatpush1.bf16.msra.mxu0 %v2291_v18  ;;  %733 = vmatprep.mubr.f32.mxu0 %v78_v19  ;;  %v59_v18 = vld [vmem:[%s4576_s0 + $0x150] sm:$0xff] }
  0x71   :  { %813 = vmatprep.mubr.f32.mxu1 %v158_v22  ;;  %2293 = vmatprep.subr.bf16.mxu0 %v2499_v0  ;;  %v223_v19 = vld [vmem:[%s4576_s0 + $0x670] sm:$0xff]  ;;  %v64_v22 = vld [vmem:[%s4576_s0 + $0x178] sm:$0xff] }
  0x73   :  { %734 = vmatmul.mubr.f32.gmra.mrb[24].mxu0 %v77_v23  ;;  %814 = vmatmul.mubr.f32.gmra.mrb[24].mxu1 %v157_v24  ;;  %v228_v23 = vld [vmem:[%s4576_s0 + $0x698] sm:$0xff]  ;;  %v70_v24 = vld [vmem:[%s4576_s0 + $0x1a8] sm:$0xff] }
  0x74   :  { %2295 = vmatpush1.bf16.msra.mxu0 %v2294_v25  ;;  %738 = vmatprep.mubr.f32.mxu0 %v83_v26  ;;  %v227_v25 = vld [vmem:[%s4576_s0 + $0x690] sm:$0xff]  ;;  %v69_v26 = vld [vmem:[%s4576_s0 + $0x1a0] sm:$0xff] }
  0x75   :  { %818 = vmatprep.mubr.f32.mxu1 %v163_v29  ;;  %2296 = vmatprep.subr.bf16.mxu0 %v2499_v0  ;;  %v232_v29 = vld [vmem:[%s4576_s0 + $0x6b8] sm:$0xff] }
  0x77   :  { %739 = vmatmul.mubr.f32.gmra.mrb[26].mxu0 %v82_v30  ;;  %819 = vmatmul.mubr.f32.gmra.mrb[26].mxu1 %v162_v31  ;;  %v74_v30 = vld [vmem:[%s4576_s0 + $0x1c8] sm:$0xff] }
  0x78   :  { %2298 = vmatpush1.bf16.msra.mxu0 %v2297_v32  ;;  %743 = vmatprep.mubr.f32.mxu0 %v88_v33  ;;  %v238_v31 = vld [vmem:[%s4576_s0 + $0x6e8] sm:$0xff]  ;;  %v80_v32 = vld [vmem:[%s4576_s0 + $0x1f8] sm:$0xff]  ;;  %v237_v33 = vld [vmem:[%s4576_s0 + $0x6e0] sm:$0xff] }
  0x79   :  { %823 = vmatprep.mubr.f32.mxu1 %v168_v36  ;;  %2299 = vmatprep.subr.bf16.mxu0 %v2499_v0  ;;  %v85_v36 = vld [vmem:[%s4576_s0 + $0x220] sm:$0xff] }
  0x7b   :  { %744 = vmatmul.mubr.f32.gmra.mrb[28].mxu0 %v87_v37  ;;  %824 = vmatmul.mubr.f32.gmra.mrb[28].mxu1 %v167_v38  ;;  %v242_v37 = vld [vmem:[%s4576_s0 + $0x708] sm:$0xff]  ;;  %v84_v38 = vld [vmem:[%s4576_s0 + $0x218] sm:$0xff] }
  0x7c   :  { %2301 = vmatpush1.bf16.msra.mxu0 %v2300_v39  ;;  %748 = vmatprep.mubr.f32.mxu0 %v93_v40  ;;  %v248_v39 = vld [vmem:[%s4576_s0 + $0x738] sm:$0xff]  ;;  %v90_v40 = vld [vmem:[%s4576_s0 + $0x248] sm:$0xff] }
  0x7d   :  { %828 = vmatprep.mubr.f32.mxu1 %v173_v43  ;;  %2302 = vmatprep.subr.bf16.mxu0 %v2499_v0  ;;  %v19_v0 = vld [vmem:[%s4576_s0 + $0x10] sm:$0xff]  ;;  %v253_v43 = vld [vmem:[%s4576_s0 + $0x760] sm:$0xff] }
  0x7f   :  { %749 = vmatmul.mubr.f32.gmra.mrb[30].mxu0 %v92_v44  ;;  %829 = vmatmul.mubr.f32.gmra.mrb[30].mxu1 %v172_v45  ;;  %v95_v44 = vld [vmem:[%s4576_s0 + $0x270] sm:$0xff]  ;;  %v252_v45 = vld [vmem:[%s4576_s0 + $0x758] sm:$0xff] }
  0x80   :  { %2304 = vmatpush1.bf16.msra.mxu0 %v2303_v46  ;;  %833 = vmatprep.mubr.f32.mxu1 %v178_v47  ;;  %v94_v46 = vld [vmem:[%s4576_s0 + $0x268] sm:$0xff] }
  0x81   :  { %1058 = vmatprep.mubr.f32.mxu0 %v20_v48  ;;  %v258_v47 = vld [vmem:[%s4576_s0 + $0x788] sm:$0xff]  ;;  %v100_v48 = vld [vmem:[%s4576_s0 + $0x298] sm:$0xff] }
  0x83   :  { %834 = vmatmul.mubr.f32.gmra.mrb[32].mxu1 %v177_v49  ;;  %1059 = vmatmul.mubr.f32.vlgmr.msra.gmra.mrb[0].mxu0 %v19_v0  ;;  %v257_v49 = vld [vmem:[%s4576_s0 + $0x780] sm:$0xff]  ;;  %v99_v0 = vld [vmem:[%s4576_s0 + $0x290] sm:$0xff] }
  0x84   :  { %838 = vmatprep.mubr.f32.mxu1 %v183_v50  ;;  %1063 = vmatprep.mubr.f32.mxu0 %v25_v51  ;;  %v263_v50 = vld [vmem:[%s4576_s0 + $0x7b0] sm:$0xff]  ;;  %v105_v51 = vld [vmem:[%s4576_s0 + $0x2c0] sm:$0xff] }
  0x87   :  { %839 = vmatmul.mubr.f32.gmra.mrb[34].mxu1 %v182_v52  ;;  %1064 = vmatmul.mubr.f32.gmra.mrb[2].mxu0 %v24_v53  ;;  %v262_v52 = vld [vmem:[%s4576_s0 + $0x7a8] sm:$0xff]  ;;  %v104_v53 = vld [vmem:[%s4576_s0 + $0x2b8] sm:$0xff] }
  0x88   :  { %843 = vmatprep.mubr.f32.mxu1 %v188_v54  ;;  %1068 = vmatprep.mubr.f32.mxu0 %v30_v55  ;;  %v268_v54 = vld [vmem:[%s4576_s0 + $0x7d8] sm:$0xff]  ;;  %v110_v55 = vld [vmem:[%s4576_s0 + $0x2e8] sm:$0xff] }
  0x8b   :  { %844 = vmatmul.mubr.f32.gmra.mrb[36].mxu1 %v187_v56  ;;  %1069 = vmatmul.mubr.f32.gmra.mrb[4].mxu0 %v29_v57  ;;  %v267_v56 = vld [vmem:[%s4576_s0 + $0x7d0] sm:$0xff]  ;;  %v109_v57 = vld [vmem:[%s4576_s0 + $0x2e0] sm:$0xff] }
  0x8c   :  { %848 = vmatprep.mubr.f32.mxu1 %v193_v58  ;;  %1073 = vmatprep.mubr.f32.mxu0 %v35_v59  ;;  %v273_v58 = vld [vmem:[%s4576_s0 + $0x800] sm:$0xff]  ;;  %v115_v59 = vld [vmem:[%s4576_s0 + $0x310] sm:$0xff] }
  0x8f   :  { %849 = vmatmul.mubr.f32.gmra.mrb[38].mxu1 %v192_v60  ;;  %1074 = vmatmul.mubr.f32.gmra.mrb[6].mxu0 %v34_v61  ;;  %v272_v60 = vld [vmem:[%s4576_s0 + $0x7f8] sm:$0xff]  ;;  %v114_v61 = vld [vmem:[%s4576_s0 + $0x308] sm:$0xff] }
  0x90   :  { %853 = vmatprep.mubr.f32.mxu1 %v198_v62  ;;  %1078 = vmatprep.mubr.f32.mxu0 %v40_v63  ;;  %v278_v62 = vld [vmem:[%s4576_s0 + $0x828] sm:$0xff]  ;;  %v120_v63 = vld [vmem:[%s4576_s0 + $0x338] sm:$0xff] }
  0x93   :  { %854 = vmatmul.mubr.f32.gmra.mrb[40].mxu1 %v197_v1  ;;  %1079 = vmatmul.mubr.f32.gmra.mrb[8].mxu0 %v39_v2  ;;  %v277_v1 = vld [vmem:[%s4576_s0 + $0x820] sm:$0xff]  ;;  %v119_v2 = vld [vmem:[%s4576_s0 + $0x330] sm:$0xff] }
  0x94   :  { %858 = vmatprep.mubr.f32.mxu1 %v203_v3  ;;  %1083 = vmatprep.mubr.f32.mxu0 %v45_v4  ;;  %v283_v3 = vld [vmem:[%s4576_s0 + $0x850] sm:$0xff]  ;;  %v125_v4 = vld [vmem:[%s4576_s0 + $0x360] sm:$0xff] }
  0x97   :  { %859 = vmatmul.mubr.f32.gmra.mrb[42].mxu1 %v202_v5  ;;  %1084 = vmatmul.mubr.f32.gmra.mrb[10].mxu0 %v44_v6  ;;  %v282_v5 = vld [vmem:[%s4576_s0 + $0x848] sm:$0xff]  ;;  %v124_v6 = vld [vmem:[%s4576_s0 + $0x358] sm:$0xff] }
  0x98   :  { %863 = vmatprep.mubr.f32.mxu1 %v208_v7  ;;  %1088 = vmatprep.mubr.f32.mxu0 %v50_v8  ;;  %v288_v7 = vld [vmem:[%s4576_s0 + $0x878] sm:$0xff]  ;;  %v130_v8 = vld [vmem:[%s4576_s0 + $0x388] sm:$0xff] }
  0x9b   :  { %864 = vmatmul.mubr.f32.gmra.mrb[44].mxu1 %v207_v9  ;;  %1089 = vmatmul.mubr.f32.gmra.mrb[12].mxu0 %v49_v10  ;;  %v287_v9 = vld [vmem:[%s4576_s0 + $0x870] sm:$0xff]  ;;  %v129_v10 = vld [vmem:[%s4576_s0 + $0x380] sm:$0xff] }
  0x9c   :  { %868 = vmatprep.mubr.f32.mxu1 %v213_v11  ;;  %1093 = vmatprep.mubr.f32.mxu0 %v55_v12  ;;  %v293_v11 = vld [vmem:[%s4576_s0 + $0x8a0] sm:$0xff]  ;;  %v135_v12 = vld [vmem:[%s4576_s0 + $0x3b0] sm:$0xff] }
  0x9f   :  { %869 = vmatmul.mubr.f32.gmra.mrb[46].mxu1 %v212_v13  ;;  %1094 = vmatmul.mubr.f32.gmra.mrb[14].mxu0 %v54_v14  ;;  %v292_v13 = vld [vmem:[%s4576_s0 + $0x898] sm:$0xff]  ;;  %v134_v14 = vld [vmem:[%s4576_s0 + $0x3a8] sm:$0xff] }
  0xa0   :  { %873 = vmatprep.mubr.f32.mxu1 %v218_v15  ;;  %1098 = vmatprep.mubr.f32.mxu0 %v60_v16  ;;  %v298_v15 = vld [vmem:[%s4576_s0 + $0x8c8] sm:$0xff]  ;;  %v140_v16 = vld [vmem:[%s4576_s0 + $0x3d8] sm:$0xff] }
  0xa3   :  { %874 = vmatmul.mubr.f32.gmra.mrb[48].mxu1 %v217_v17  ;;  %1099 = vmatmul.mubr.f32.gmra.mrb[16].mxu0 %v59_v18  ;;  %v297_v17 = vld [vmem:[%s4576_s0 + $0x8c0] sm:$0xff]  ;;  %v139_v18 = vld [vmem:[%s4576_s0 + $0x3d0] sm:$0xff] }
  0xa4   :  { %878 = vmatprep.mubr.f32.mxu1 %v223_v19  ;;  %1103 = vmatprep.mubr.f32.mxu0 %v65_v20  ;;  %v303_v19 = vld [vmem:[%s4576_s0 + $0x8f0] sm:$0xff]  ;;  %v145_v20 = vld [vmem:[%s4576_s0 + $0x400] sm:$0xff] }
  0xa7   :  { %879 = vmatmul.mubr.f32.gmra.mrb[50].mxu1 %v222_v21  ;;  %1104 = vmatmul.mubr.f32.gmra.mrb[18].mxu0 %v64_v22  ;;  %v302_v21 = vld [vmem:[%s4576_s0 + $0x8e8] sm:$0xff]  ;;  %v144_v22 = vld [vmem:[%s4576_s0 + $0x3f8] sm:$0xff] }
  0xa8   :  { %883 = vmatprep.mubr.f32.mxu1 %v228_v23  ;;  %1108 = vmatprep.mubr.f32.mxu0 %v70_v24  ;;  %v308_v23 = vld [vmem:[%s4576_s0 + $0x918] sm:$0xff]  ;;  %v150_v24 = vld [vmem:[%s4576_s0 + $0x428] sm:$0xff] }
  0xab   :  { %884 = vmatmul.mubr.f32.gmra.mrb[52].mxu1 %v227_v25  ;;  %1109 = vmatmul.mubr.f32.gmra.mrb[20].mxu0 %v69_v26  ;;  %v307_v25 = vld [vmem:[%s4576_s0 + $0x910] sm:$0xff]  ;;  %v149_v26 = vld [vmem:[%s4576_s0 + $0x420] sm:$0xff] }
  0xac   :  { %888 = vmatprep.mubr.f32.mxu1 %v233_v27  ;;  %1113 = vmatprep.mubr.f32.mxu0 %v75_v28  ;;  %v313_v27 = vld [vmem:[%s4576_s0 + $0x940] sm:$0xff]  ;;  %v155_v28 = vld [vmem:[%s4576_s0 + $0x450] sm:$0xff] }
  0xaf   :  { %889 = vmatmul.mubr.f32.gmra.mrb[54].mxu1 %v232_v29  ;;  %1114 = vmatmul.mubr.f32.gmra.mrb[22].mxu0 %v74_v30  ;;  %v312_v29 = vld [vmem:[%s4576_s0 + $0x938] sm:$0xff]  ;;  %v154_v30 = vld [vmem:[%s4576_s0 + $0x448] sm:$0xff] }
  0xb0   :  { %893 = vmatprep.mubr.f32.mxu1 %v238_v31  ;;  %1118 = vmatprep.mubr.f32.mxu0 %v80_v32  ;;  %v318_v31 = vld [vmem:[%s4576_s0 + $0x968] sm:$0xff]  ;;  %v160_v32 = vld [vmem:[%s4576_s0 + $0x478] sm:$0xff] }
  0xb3   :  { %894 = vmatmul.mubr.f32.gmra.mrb[56].mxu1 %v237_v33  ;;  %1119 = vmatmul.mubr.f32.gmra.mrb[24].mxu0 %v79_v34  ;;  %v317_v33 = vld [vmem:[%s4576_s0 + $0x960] sm:$0xff]  ;;  %v159_v34 = vld [vmem:[%s4576_s0 + $0x470] sm:$0xff] }
  0xb4   :  { %898 = vmatprep.mubr.f32.mxu1 %v243_v35  ;;  %1123 = vmatprep.mubr.f32.mxu0 %v85_v36  ;;  %v323_v35 = vld [vmem:[%s4576_s0 + $0x990] sm:$0xff]  ;;  %v165_v36 = vld [vmem:[%s4576_s0 + $0x4a0] sm:$0xff] }
  0xb7   :  { %899 = vmatmul.mubr.f32.gmra.mrb[58].mxu1 %v242_v37  ;;  %1124 = vmatmul.mubr.f32.gmra.mrb[26].mxu0 %v84_v38  ;;  %v322_v37 = vld [vmem:[%s4576_s0 + $0x988] sm:$0xff]  ;;  %v164_v38 = vld [vmem:[%s4576_s0 + $0x498] sm:$0xff] }
  0xb8   :  { %903 = vmatprep.mubr.f32.mxu1 %v248_v39  ;;  %1128 = vmatprep.mubr.f32.mxu0 %v90_v40  ;;  %v328_v39 = vld [vmem:[%s4576_s0 + $0x9b8] sm:$0xff]  ;;  %v170_v40 = vld [vmem:[%s4576_s0 + $0x4c8] sm:$0xff] }
  0xbb   :  { %904 = vmatmul.mubr.f32.gmra.mrb[60].mxu1 %v247_v41  ;;  %1129 = vmatmul.mubr.f32.gmra.mrb[28].mxu0 %v89_v42  ;;  %v327_v41 = vld [vmem:[%s4576_s0 + $0x9b0] sm:$0xff]  ;;  %v169_v42 = vld [vmem:[%s4576_s0 + $0x4c0] sm:$0xff] }
  0xbc   :  { %908 = vmatprep.mubr.f32.mxu1 %v253_v43  ;;  %1133 = vmatprep.mubr.f32.mxu0 %v95_v44  ;;  %v333_v43 = vld [vmem:[%s4576_s0 + $0x9e0] sm:$0xff]  ;;  %v175_v44 = vld [vmem:[%s4576_s0 + $0x4f0] sm:$0xff] }
  0xbf   :  { %909 = vmatmul.mubr.f32.gmra.mrb[62].mxu1 %v252_v45  ;;  %1134 = vmatmul.mubr.f32.gmra.mrb[30].mxu0 %v94_v46  ;;  %v332_v45 = vld [vmem:[%s4576_s0 + $0x9d8] sm:$0xff]  ;;  %v174_v46 = vld [vmem:[%s4576_s0 + $0x4e8] sm:$0xff] }
  0xc0   :  { %913 = vmatprep.mubr.f32.mxu1 %v258_v47  ;;  %1138 = vmatprep.mubr.f32.mxu0 %v100_v48  ;;  %v180_v47 = vld [vmem:[%s4576_s0 + $0x518] sm:$0xff]  ;;  %v21_v48 = vld [vmem:[%s4576_s0 + $0x20] sm:$0xff] }
  0xc3   :  { %914 = vmatmul.mubr.f32.gmra.mrb[64].mxu1 %v257_v49  ;;  %1139 = vmatmul.mubr.f32.gmra.mrb[32].mxu0 %v99_v0  ;;  %v179_v49 = vld [vmem:[%s4576_s0 + $0x510] sm:$0xff]  ;;  %v26_v0 = vld [vmem:[%s4576_s0 + $0x48] sm:$0xff] }
  0xc4   :  { %918 = vmatprep.mubr.f32.mxu1 %v263_v50  ;;  %1143 = vmatprep.mubr.f32.mxu0 %v105_v51  ;;  %v185_v50 = vld [vmem:[%s4576_s0 + $0x540] sm:$0xff]  ;;  %v31_v51 = vld [vmem:[%s4576_s0 + $0x70] sm:$0xff] }
  0xc7   :  { %919 = vmatmul.mubr.f32.gmra.mrb[66].mxu1 %v262_v52  ;;  %1144 = vmatmul.mubr.f32.gmra.mrb[34].mxu0 %v104_v53  ;;  %v184_v52 = vld [vmem:[%s4576_s0 + $0x538] sm:$0xff] }
  0xc8   :  { %923 = vmatprep.mubr.f32.mxu1 %v268_v54  ;;  %1148 = vmatprep.mubr.f32.mxu0 %v110_v55  ;;  %v36_v53 = vld [vmem:[%s4576_s0 + $0x98] sm:$0xff]  ;;  %v190_v54 = vld [vmem:[%s4576_s0 + $0x568] sm:$0xff]  ;;  %v41_v55 = vld [vmem:[%s4576_s0 + $0xc0] sm:$0xff] }
  0xcb   :  { %924 = vmatmul.mubr.f32.gmra.mrb[68].mxu1 %v267_v56  ;;  %1149 = vmatmul.mubr.f32.gmra.mrb[36].mxu0 %v109_v57  ;;  %v189_v56 = vld [vmem:[%s4576_s0 + $0x560] sm:$0xff]  ;;  %v46_v57 = vld [vmem:[%s4576_s0 + $0xe8] sm:$0xff] }
  0xcc   :  { %928 = vmatprep.mubr.f32.mxu1 %v273_v58  ;;  %1153 = vmatprep.mubr.f32.mxu0 %v115_v59  ;;  %v195_v58 = vld [vmem:[%s4576_s0 + $0x590] sm:$0xff] }
  0xcd   :  { %v51_v59 = vld [vmem:[%s4576_s0 + $0x110] sm:$0xff] }
  0xcf   :  { %929 = vmatmul.mubr.f32.gmra.mrb[70].mxu1 %v272_v60  ;;  %1154 = vmatmul.mubr.f32.gmra.mrb[38].mxu0 %v114_v61  ;;  %v194_v60 = vld [vmem:[%s4576_s0 + $0x588] sm:$0xff]  ;;  %v56_v61 = vld [vmem:[%s4576_s0 + $0x138] sm:$0xff] }
  0xd0   :  { %933 = vmatprep.mubr.f32.mxu1 %v278_v62  ;;  %1158 = vmatprep.mubr.f32.mxu0 %v120_v63  ;;  %v200_v62 = vld [vmem:[%s4576_s0 + $0x5b8] sm:$0xff]  ;;  %v61_v63 = vld [vmem:[%s4576_s0 + $0x160] sm:$0xff] }
  0xd3   :  { %934 = vmatmul.mubr.f32.gmra.mrb[72].mxu1 %v277_v1  ;;  %1159 = vmatmul.mubr.f32.gmra.mrb[40].mxu0 %v119_v2  ;;  %v199_v1 = vld [vmem:[%s4576_s0 + $0x5b0] sm:$0xff]  ;;  %v66_v2 = vld [vmem:[%s4576_s0 + $0x188] sm:$0xff] }
  0xd4   :  { %938 = vmatprep.mubr.f32.mxu1 %v283_v3  ;;  %1163 = vmatprep.mubr.f32.mxu0 %v125_v4  ;;  %v205_v3 = vld [vmem:[%s4576_s0 + $0x5e0] sm:$0xff]  ;;  %v71_v4 = vld [vmem:[%s4576_s0 + $0x1b0] sm:$0xff] }
  0xd7   :  { %939 = vmatmul.mubr.f32.gmra.mrb[74].mxu1 %v282_v5  ;;  %1164 = vmatmul.mubr.f32.gmra.mrb[42].mxu0 %v124_v6  ;;  %v204_v5 = vld [vmem:[%s4576_s0 + $0x5d8] sm:$0xff] }
  0xd8   :  { %943 = vmatprep.mubr.f32.mxu1 %v288_v7  ;;  %1168 = vmatprep.mubr.f32.mxu0 %v130_v8  ;;  %v76_v6 = vld [vmem:[%s4576_s0 + $0x1d8] sm:$0xff]  ;;  %v210_v7 = vld [vmem:[%s4576_s0 + $0x608] sm:$0xff]  ;;  %v81_v8 = vld [vmem:[%s4576_s0 + $0x200] sm:$0xff] }
  0xdb   :  { %944 = vmatmul.mubr.f32.gmra.mrb[76].mxu1 %v287_v9  ;;  %1169 = vmatmul.mubr.f32.gmra.mrb[44].mxu0 %v129_v10 }
  0xdc   :  { %948 = vmatprep.mubr.f32.mxu1 %v293_v11  ;;  %1173 = vmatprep.mubr.f32.mxu0 %v135_v12  ;;  %v209_v11 = vld [vmem:[%s4576_s0 + $0x600] sm:$0xff]  ;;  %v86_v12 = vld [vmem:[%s4576_s0 + $0x228] sm:$0xff] }
  0xdf   :  { %949 = vmatmul.mubr.f32.gmra.mrb[78].mxu1 %v292_v13  ;;  %1174 = vmatmul.mubr.f32.gmra.mrb[46].mxu0 %v134_v14  ;;  %v215_v13 = vld [vmem:[%s4576_s0 + $0x630] sm:$0xff] }
  0xe0   :  { %953 = vmatprep.mubr.f32.mxu1 %v298_v15  ;;  %1178 = vmatprep.mubr.f32.mxu0 %v140_v16  ;;  %v91_v14 = vld [vmem:[%s4576_s0 + $0x250] sm:$0xff] }
  0xe3   :  { %954 = vmatmul.mubr.f32.gmra.mrb[80].mxu1 %v297_v17  ;;  %1179 = vmatmul.mubr.f32.gmra.mrb[48].mxu0 %v139_v18  ;;  %v214_v17 = vld [vmem:[%s4576_s0 + $0x628] sm:$0xff]  ;;  %v96_v18 = vld [vmem:[%s4576_s0 + $0x278] sm:$0xff] }
  0xe4   :  { %958 = vmatprep.mubr.f32.mxu1 %v303_v19  ;;  %1183 = vmatprep.mubr.f32.mxu0 %v145_v20  ;;  %v220_v19 = vld [vmem:[%s4576_s0 + $0x658] sm:$0xff]  ;;  %v101_v20 = vld [vmem:[%s4576_s0 + $0x2a0] sm:$0xff] }
  0xe7   :  { %959 = vmatmul.mubr.f32.gmra.mrb[82].mxu1 %v302_v21  ;;  %1184 = vmatmul.mubr.f32.gmra.mrb[50].mxu0 %v144_v22 }
  0xe8   :  { %963 = vmatprep.mubr.f32.mxu1 %v308_v23  ;;  %1188 = vmatprep.mubr.f32.mxu0 %v150_v24  ;;  %v219_v23 = vld [vmem:[%s4576_s0 + $0x650] sm:$0xff]  ;;  %v106_v24 = vld [vmem:[%s4576_s0 + $0x2c8] sm:$0xff] }
  0xeb   :  { %964 = vmatmul.mubr.f32.gmra.mrb[84].mxu1 %v307_v25  ;;  %1189 = vmatmul.mubr.f32.gmra.mrb[52].mxu0 %v149_v26  ;;  %v225_v25 = vld [vmem:[%s4576_s0 + $0x680] sm:$0xff]  ;;  %v111_v26 = vld [vmem:[%s4576_s0 + $0x2f0] sm:$0xff] }
  0xec   :  { %968 = vmatprep.mubr.f32.mxu1 %v313_v27  ;;  %1193 = vmatprep.mubr.f32.mxu0 %v155_v28 }
  0xef   :  { %969 = vmatmul.mubr.f32.gmra.mrb[86].mxu1 %v312_v29  ;;  %1194 = vmatmul.mubr.f32.gmra.mrb[54].mxu0 %v154_v30  ;;  %v224_v29 = vld [vmem:[%s4576_s0 + $0x678] sm:$0xff] }
  0xf0   :  { %973 = vmatprep.mubr.f32.mxu1 %v318_v31  ;;  %1198 = vmatprep.mubr.f32.mxu0 %v160_v32  ;;  %v116_v30 = vld [vmem:[%s4576_s0 + $0x318] sm:$0xff]  ;;  %v230_v31 = vld [vmem:[%s4576_s0 + $0x6a8] sm:$0xff]  ;;  %v121_v32 = vld [vmem:[%s4576_s0 + $0x340] sm:$0xff] }
  0xf3   :  { %974 = vmatmul.mubr.f32.gmra.mrb[88].mxu1 %v317_v33  ;;  %1199 = vmatmul.mubr.f32.gmra.mrb[56].mxu0 %v159_v34 }
  0xf4   :  { %978 = vmatprep.mubr.f32.mxu1 %v323_v35  ;;  %1203 = vmatprep.mubr.f32.mxu0 %v165_v36  ;;  %v229_v35 = vld [vmem:[%s4576_s0 + $0x6a0] sm:$0xff]  ;;  %v126_v36 = vld [vmem:[%s4576_s0 + $0x368] sm:$0xff] }
  0xf7   :  { %979 = vmatmul.mubr.f32.gmra.mrb[90].mxu1 %v322_v37  ;;  %1204 = vmatmul.mubr.f32.gmra.mrb[58].mxu0 %v164_v38  ;;  %v235_v37 = vld [vmem:[%s4576_s0 + $0x6d0] sm:$0xff] }
  0xf8   :  { %983 = vmatprep.mubr.f32.mxu1 %v328_v39  ;;  %1208 = vmatprep.mubr.f32.mxu0 %v170_v40  ;;  %v131_v38 = vld [vmem:[%s4576_s0 + $0x390] sm:$0xff] }
  0xfb   :  { %984 = vmatmul.mubr.f32.gmra.mrb[92].mxu1 %v327_v41  ;;  %1209 = vmatmul.mubr.f32.gmra.mrb[60].mxu0 %v169_v42  ;;  %v234_v41 = vld [vmem:[%s4576_s0 + $0x6c8] sm:$0xff]  ;;  %v136_v42 = vld [vmem:[%s4576_s0 + $0x3b8] sm:$0xff] }
  0xfc   :  { %988 = vmatprep.mubr.f32.mxu1 %v333_v43  ;;  %1213 = vmatprep.mubr.f32.mxu0 %v175_v44  ;;  %v240_v43 = vld [vmem:[%s4576_s0 + $0x6f8] sm:$0xff]  ;;  %v141_v44 = vld [vmem:[%s4576_s0 + $0x3e0] sm:$0xff] }
  0xff   :  { %989 = vmatmul.mubr.f32.gmra.mrb[94].mxu1 %v332_v45  ;;  %1214 = vmatmul.mubr.f32.gmra.mrb[62].mxu0 %v174_v46 }
 0x100   :  { %1218 = vmatprep.mubr.f32.mxu0 %v180_v47  ;;  %2113 = vmatprep.mubr.msk.f32.mxu1 %vm416_vm0, %v21_v48  ;;  %v239_v47 = vld [vmem:[%s4576_s0 + $0x6f0] sm:$0xff]  ;;  %v146_v48 = vld [vmem:[%s4576_s0 + $0x408] sm:$0xff] }
 0x103   :  { %1219 = vmatmul.mubr.f32.gmra.mrb[64].mxu0 %v179_v49  ;;  %2114 = vmatmul.mubr.msk.f32.vlgmr.msra.gmra.mrb[96].mxu1 %vm416_vm0, %v26_v0  ;;  %v245_v49 = vld [vmem:[%s4576_s0 + $0x720] sm:$0xff]  ;;  %v151_v0 = vld [vmem:[%s4576_s0 + $0x430] sm:$0xff] }
 0x104   :  { %1223 = vmatprep.mubr.f32.mxu0 %v185_v50  ;;  %2116 = vmatprep.mubr.msk.f32.mxu1 %vm416_vm0, %v31_v51 }
 0x107   :  { %1224 = vmatmul.mubr.f32.gmra.mrb[66].mxu0 %v184_v52  ;;  %2117 = vmatmul.mubr.msk.f32.gmra.mrb[98].mxu1 %vm416_vm0, %v36_v53  ;;  %v244_v52 = vld [vmem:[%s4576_s0 + $0x718] sm:$0xff] }
 0x108   :  { %1228 = vmatprep.mubr.f32.mxu0 %v190_v54  ;;  %2119 = vmatprep.mubr.msk.f32.mxu1 %vm416_vm0, %v41_v55  ;;  %v156_v53 = vld [vmem:[%s4576_s0 + $0x458] sm:$0xff]  ;;  %v250_v54 = vld [vmem:[%s4576_s0 + $0x748] sm:$0xff]  ;;  %v161_v55 = vld [vmem:[%s4576_s0 + $0x480] sm:$0xff] }
 0x10b   :  { %1229 = vmatmul.mubr.f32.gmra.mrb[68].mxu0 %v189_v56  ;;  %2120 = vmatmul.mubr.msk.f32.gmra.mrb[100].mxu1 %vm416_vm0, %v46_v57 }
 0x10c   :  { %1233 = vmatprep.mubr.f32.mxu0 %v195_v58  ;;  %2122 = vmatprep.mubr.msk.f32.mxu1 %vm416_vm0, %v51_v59  ;;  %v249_v58 = vld [vmem:[%s4576_s0 + $0x740] sm:$0xff]  ;;  %v166_v59 = vld [vmem:[%s4576_s0 + $0x4a8] sm:$0xff] }
 0x10f   :  { %1234 = vmatmul.mubr.f32.gmra.mrb[70].mxu0 %v194_v60  ;;  %2123 = vmatmul.mubr.msk.f32.gmra.mrb[102].mxu1 %vm416_vm0, %v56_v61  ;;  %v255_v60 = vld [vmem:[%s4576_s0 + $0x770] sm:$0xff] }
 0x110   :  { %1238 = vmatprep.mubr.f32.mxu0 %v200_v62  ;;  %2125 = vmatprep.mubr.msk.f32.mxu1 %vm416_vm0, %v61_v63  ;;  %v171_v61 = vld [vmem:[%s4576_s0 + $0x4d0] sm:$0xff] }
 0x113   :  { %1239 = vmatmul.mubr.f32.gmra.mrb[72].mxu0 %v199_v1  ;;  %2126 = vmatmul.mubr.msk.f32.gmra.mrb[104].mxu1 %vm416_vm0, %v66_v2  ;;  %v254_v1 = vld [vmem:[%s4576_s0 + $0x768] sm:$0xff]  ;;  %v176_v2 = vld [vmem:[%s4576_s0 + $0x4f8] sm:$0xff] }
 0x114   :  { %1243 = vmatprep.mubr.f32.mxu0 %v205_v3  ;;  %2128 = vmatprep.mubr.msk.f32.mxu1 %vm416_vm0, %v71_v4  ;;  %v260_v3 = vld [vmem:[%s4576_s0 + $0x798] sm:$0xff]  ;;  %v181_v4 = vld [vmem:[%s4576_s0 + $0x520] sm:$0xff] }
 0x116   :  { %v3454_v9 = vpop.f32.mrb[0].mxu1 }
 0x117   :  { %1244 = vmatmul.mubr.f32.gmra.mrb[74].mxu0 %v204_v5  ;;  %2129 = vmatmul.mubr.msk.f32.gmra.mrb[106].mxu1 %vm416_vm0, %v76_v6  ;;  %v757_v10 = vpop.f32.mrb[1].mxu1 }
 0x118   :  { %1248 = vmatprep.mubr.f32.mxu0 %v210_v7  ;;  %2131 = vmatprep.mubr.msk.f32.mxu1 %vm416_vm0, %v81_v8  ;;  %v259_v7 = vld [vmem:[%s4576_s0 + $0x790] sm:$0xff]  ;;  %v186_v8 = vld [vmem:[%s4576_s0 + $0x548] sm:$0xff]  ;;  %v265_v10 = vld [vmem:[%s4576_s0 + $0x7c0] sm:$0xff] }
 0x11a   :  { %v3470_v15 = vpop.f32.mrb[2].mxu1 }
 0x11b   :  { %1249 = vmatmul.mubr.f32.gmra.mrb[76].mxu0 %v209_v11  ;;  %2132 = vmatmul.mubr.msk.f32.gmra.mrb[108].mxu1 %vm416_vm0, %v86_v12  ;;  %v762_v16 = vpop.f32.mrb[3].mxu1  ;;  %v191_v11 = vld [vmem:[%s4576_s0 + $0x570] sm:$0xff] }
 0x11c   :  { %1253 = vmatprep.mubr.f32.mxu0 %v215_v13  ;;  %2134 = vmatprep.mubr.msk.f32.mxu1 %vm416_vm0, %v91_v14  ;;  %v264_v14 = vld [vmem:[%s4576_s0 + $0x7b8] sm:$0xff] }
 0x11d   :  { %v196_v16 = vld [vmem:[%s4576_s0 + $0x598] sm:$0xff] }
 0x11e   :  { %v3486_v21 = vpop.f32.mrb[4].mxu1 }
 0x11f   :  { %1254 = vmatmul.mubr.f32.gmra.mrb[78].mxu0 %v214_v17  ;;  %2135 = vmatmul.mubr.msk.f32.gmra.mrb[110].mxu1 %vm416_vm0, %v96_v18  ;;  %v767_v22 = vpop.f32.mrb[5].mxu1  ;;  %v270_v17 = vld [vmem:[%s4576_s0 + $0x7e8] sm:$0xff]  ;;  %v201_v18 = vld [vmem:[%s4576_s0 + $0x5c0] sm:$0xff] }
 0x120   :  { %1258 = vmatprep.mubr.f32.mxu0 %v220_v19  ;;  %2137 = vmatprep.mubr.msk.f32.mxu1 %vm416_vm0, %v101_v20  ;;  %v269_v22 = vld [vmem:[%s4576_s0 + $0x7e0] sm:$0xff] }
 0x122   :  { %v3502_v27 = vpop.f32.mrb[6].mxu1 }
 0x123   :  { %1259 = vmatmul.mubr.f32.gmra.mrb[80].mxu0 %v219_v23  ;;  %2138 = vmatmul.mubr.msk.f32.gmra.mrb[112].mxu1 %vm416_vm0, %v106_v24  ;;  %v772_v28 = vpop.f32.mrb[7].mxu1  ;;  %v206_v23 = vld [vmem:[%s4576_s0 + $0x5e8] sm:$0xff]  ;;  %v275_v24 = vld [vmem:[%s4576_s0 + $0x810] sm:$0xff] }
 0x124   :  { %1263 = vmatprep.mubr.f32.mxu0 %v225_v25  ;;  %2140 = vmatprep.mubr.msk.f32.mxu1 %vm416_vm0, %v111_v26  ;;  %v211_v25 = vld [vmem:[%s4576_s0 + $0x610] sm:$0xff] }
 0x126   :  { %v3518_v33 = vpop.f32.mrb[8].mxu1 }
 0x127   :  { %1264 = vmatmul.mubr.f32.gmra.mrb[82].mxu0 %v224_v29  ;;  %2141 = vmatmul.mubr.msk.f32.gmra.mrb[114].mxu1 %vm416_vm0, %v116_v30  ;;  %v777_v34 = vpop.f32.mrb[9].mxu1  ;;  %v274_v29 = vld [vmem:[%s4576_s0 + $0x808] sm:$0xff]  ;;  %v216_v30 = vld [vmem:[%s4576_s0 + $0x638] sm:$0xff] }
 0x128   :  { %1268 = vmatprep.mubr.f32.mxu0 %v230_v31  ;;  %2143 = vmatprep.mubr.msk.f32.mxu1 %vm416_vm0, %v121_v32  ;;  %v280_v31 = vld [vmem:[%s4576_s0 + $0x838] sm:$0xff]  ;;  %v221_v32 = vld [vmem:[%s4576_s0 + $0x660] sm:$0xff] }
 0x12a   :  { %v3534_v39 = vpop.f32.mrb[10].mxu1 }
 0x12b   :  { %1269 = vmatmul.mubr.f32.gmra.mrb[84].mxu0 %v229_v35  ;;  %2144 = vmatmul.mubr.msk.f32.gmra.mrb[116].mxu1 %vm416_vm0, %v126_v36  ;;  %v782_v40 = vpop.f32.mrb[11].mxu1  ;;  %v279_v36 = vld [vmem:[%s4576_s0 + $0x830] sm:$0xff] }
 0x12c   :  { %1273 = vmatprep.mubr.f32.mxu0 %v235_v37  ;;  %2146 = vmatprep.mubr.msk.f32.mxu1 %vm416_vm0, %v131_v38  ;;  %v226_v37 = vld [vmem:[%s4576_s0 + $0x688] sm:$0xff]  ;;  %v285_v38 = vld [vmem:[%s4576_s0 + $0x860] sm:$0xff]  ;;  %v231_v40 = vld [vmem:[%s4576_s0 + $0x6b0] sm:$0xff] }
 0x12e   :  { %v3550_v45 = vpop.f32.mrb[12].mxu1 }
 0x12f   :  { %1274 = vmatmul.mubr.f32.gmra.mrb[86].mxu0 %v234_v41  ;;  %2147 = vmatmul.mubr.msk.f32.gmra.mrb[118].mxu1 %vm416_vm0, %v136_v42  ;;  %v787_v46 = vpop.f32.mrb[13].mxu1 }
 0x130   :  { %1278 = vmatprep.mubr.f32.mxu0 %v240_v43  ;;  %2149 = vmatprep.mubr.msk.f32.mxu1 %vm416_vm0, %v141_v44  ;;  %v284_v43 = vld [vmem:[%s4576_s0 + $0x858] sm:$0xff]  ;;  %v290_v46 = vld [vmem:[%s4576_s0 + $0x888] sm:$0xff] }
 0x131   :  { %v236_v44 = vld [vmem:[%s4576_s0 + $0x6d8] sm:$0xff] }
 0x132   :  { %v3566_v50 = vpop.f32.mrb[14].mxu1 }
 0x133   :  { %1279 = vmatmul.mubr.f32.gmra.mrb[88].mxu0 %v239_v47  ;;  %2150 = vmatmul.mubr.msk.f32.gmra.mrb[120].mxu1 %vm416_vm0, %v146_v48  ;;  %v792_v51 = vpop.f32.mrb[15].mxu1  ;;  %v241_v47 = vld [vmem:[%s4576_s0 + $0x700] sm:$0xff] }
 0x134   :  { %1283 = vmatprep.mubr.f32.mxu0 %v245_v49  ;;  %2152 = vmatprep.mubr.msk.f32.mxu1 %vm416_vm0, %v151_v0 }
 0x136   :  { %v3582_v56 = vpop.f32.mrb[16].mxu1 }
 0x137   :  { %1284 = vmatmul.mubr.f32.gmra.mrb[90].mxu0 %v244_v52  ;;  %2153 = vmatmul.mubr.msk.f32.gmra.mrb[122].mxu1 %vm416_vm0, %v156_v53  ;;  %v797_v57 = vpop.f32.mrb[17].mxu1  ;;  %v289_v52 = vld [vmem:[%s4576_s0 + $0x880] sm:$0xff]  ;;  %v246_v53 = vld [vmem:[%s4576_s0 + $0x728] sm:$0xff] }
 0x138   :  { %1288 = vmatprep.mubr.f32.mxu0 %v250_v54  ;;  %2155 = vmatprep.mubr.msk.f32.mxu1 %vm416_vm0, %v161_v55  ;;  %v295_v54 = vld [vmem:[%s4576_s0 + $0x8b0] sm:$0xff] }
 0x139   :  { %v251_v55 = vld [vmem:[%s4576_s0 + $0x750] sm:$0xff] }
 0x13a   :  { %v3598_v62 = vpop.f32.mrb[18].mxu1 }
 0x13b   :  { %1289 = vmatmul.mubr.f32.gmra.mrb[92].mxu0 %v249_v58  ;;  %2156 = vmatmul.mubr.msk.f32.gmra.mrb[124].mxu1 %vm416_vm0, %v166_v59  ;;  %v802_v63 = vpop.f32.mrb[19].mxu1 }
 0x13c   :  { %1293 = vmatprep.mubr.f32.mxu0 %v255_v60  ;;  %2158 = vmatprep.mubr.msk.f32.mxu1 %vm416_vm0, %v171_v61  ;;  %v294_v61 = vld [vmem:[%s4576_s0 + $0x8a8] sm:$0xff]  ;;  %v256_v63 = vld [vmem:[%s4576_s0 + $0x778] sm:$0xff] }
 0x13e   :  { %v3614_v5 = vpop.f32.mrb[20].mxu1 }
 0x13f   :  { %1294 = vmatmul.mubr.f32.gmra.mrb[94].mxu0 %v254_v1  ;;  %2159 = vmatmul.mubr.msk.f32.gmra.mrb[126].mxu1 %vm416_vm0, %v176_v2  ;;  %v807_v6 = vpop.f32.mrb[21].mxu1  ;;  %v300_v1 = vld [vmem:[%s4576_s0 + $0x8d8] sm:$0xff]  ;;  %v261_v2 = vld [vmem:[%s4576_s0 + $0x7a0] sm:$0xff] }
 0x140   :  { %1298 = vmatprep.mubr.f32.mxu0 %v260_v3  ;;  %2161 = vmatprep.mubr.msk.f32.mxu1 %vm416_vm0, %v181_v4 }
 0x142   :  { %v3630_v12 = vpop.f32.mrb[22].mxu1 }
 0x143   :  { %1299 = vmatmul.mubr.f32.gmra.mrb[96].mxu0 %v259_v7  ;;  %2162 = vmatmul.mubr.msk.f32.gmra.mrb[128].mxu1 %vm416_vm0, %v186_v8  ;;  %v812_v13 = vpop.f32.mrb[23].mxu1  ;;  %v299_v8 = vld [vmem:[%s4576_s0 + $0x8d0] sm:$0xff] }
 0x144   :  { %1303 = vmatprep.mubr.f32.mxu0 %v265_v10  ;;  %2164 = vmatprep.mubr.msk.f32.mxu1 %vm416_vm0, %v191_v11  ;;  %v266_v10 = vld [vmem:[%s4576_s0 + $0x7c8] sm:$0xff]  ;;  %v305_v11 = vld [vmem:[%s4576_s0 + $0x900] sm:$0xff]  ;;  %v271_v13 = vld [vmem:[%s4576_s0 + $0x7f0] sm:$0xff] }
 0x146   :  { %v3646_v19 = vpop.f32.mrb[24].mxu1 }
 0x147   :  { %1304 = vmatmul.mubr.f32.gmra.mrb[98].mxu0 %v264_v14  ;;  %2165 = vmatmul.mubr.msk.f32.gmra.mrb[130].mxu1 %vm416_vm0, %v196_v16  ;;  %v817_v20 = vpop.f32.mrb[25].mxu1 }
 0x148   :  { %1308 = vmatprep.mubr.f32.mxu0 %v270_v17  ;;  %2167 = vmatprep.mubr.msk.f32.mxu1 %vm416_vm0, %v201_v18  ;;  %v304_v20 = vld [vmem:[%s4576_s0 + $0x8f8] sm:$0xff] }
 0x14a   :  { %v3662_v26 = vpop.f32.mrb[26].mxu1 }
 0x14b   :  { %1309 = vmatmul.mubr.f32.gmra.mrb[100].mxu0 %v269_v22  ;;  %2168 = vmatmul.mubr.msk.f32.gmra.mrb[132].mxu1 %vm416_vm0, %v206_v23  ;;  %v822_v28 = vpop.f32.mrb[27].mxu1  ;;  %v276_v22 = vld [vmem:[%s4576_s0 + $0x818] sm:$0xff]  ;;  %v310_v23 = vld [vmem:[%s4576_s0 + $0x928] sm:$0xff] }
 0x14c   :  { %1313 = vmatprep.mubr.f32.mxu0 %v275_v24  ;;  %2170 = vmatprep.mubr.msk.f32.mxu1 %vm416_vm0, %v211_v25  ;;  %v281_v24 = vld [vmem:[%s4576_s0 + $0x840] sm:$0xff] }
 0x14e   :  { %v3678_v34 = vpop.f32.mrb[28].mxu1 }
 0x14f   :  { %1314 = vmatmul.mubr.f32.gmra.mrb[102].mxu0 %v274_v29  ;;  %2171 = vmatmul.mubr.msk.f32.gmra.mrb[134].mxu1 %vm416_vm0, %v216_v30  ;;  %v827_v35 = vpop.f32.mrb[29].mxu1 }
 0x150   :  { %1318 = vmatprep.mubr.f32.mxu0 %v280_v31  ;;  %2173 = vmatprep.mubr.msk.f32.mxu1 %vm416_vm0, %v221_v32  ;;  %v309_v31 = vld [vmem:[%s4576_s0 + $0x920] sm:$0xff]  ;;  %v286_v32 = vld [vmem:[%s4576_s0 + $0x868] sm:$0xff]  ;;  %v315_v35 = vld [vmem:[%s4576_s0 + $0x950] sm:$0xff] }
 0x152   :  { %v3694_v41 = vpop.f32.mrb[30].mxu1 }
 0x153   :  { %1319 = vmatmul.mubr.f32.gmra.mrb[104].mxu0 %v279_v36  ;;  %2174 = vmatmul.mubr.msk.f32.gmra.mrb[136].mxu1 %vm416_vm0, %v226_v37  ;;  %v832_v42 = vpop.f32.mrb[31].mxu1  ;;  %v291_v36 = vld [vmem:[%s4576_s0 + $0x890] sm:$0xff] }
 0x154   :  { %1323 = vmatprep.mubr.f32.mxu0 %v285_v38  ;;  %2176 = vmatprep.mubr.msk.f32.mxu1 %vm416_vm0, %v231_v40 }
 0x156   :  { %v3710_v48 = vpop.f32.mrb[0].mxu0  ;;  %v3712_v49 = vpop.f32.mrb[32].mxu1 }
 0x157   :  { %v1062_v0 = vpop.f32.mrb[1].mxu0  ;;  %1324 = vmatmul.mubr.f32.gmra.mrb[106].mxu0 %v284_v43  ;;  %2177 = vmatmul.mubr.msk.f32.gmra.mrb[138].mxu1 %vm416_vm0, %v236_v44  ;;  %v837_v51 = vpop.f32.mrb[33].mxu1  ;;  %v314_v43 = vld [vmem:[%s4576_s0 + $0x948] sm:$0xff]  ;;  %v296_v44 = vld [vmem:[%s4576_s0 + $0x8b8] sm:$0xff] }
 0x158   :  { %1328 = vmatprep.mubr.f32.mxu0 %v290_v46  ;;  %2179 = vmatprep.mubr.msk.f32.mxu1 %vm416_vm0, %v241_v47  ;;  %v320_v46 = vld [vmem:[%s4576_s0 + $0x978] sm:$0xff]  ;;  %v301_v47 = vld [vmem:[%s4576_s0 + $0x8e0] sm:$0xff] }
 0x15a   :  { %v3728_v57 = vpop.f32.mrb[2].mxu0  ;;  %v3730_v58 = vpop.f32.mrb[34].mxu1 }
 0x15b   :  { %v1067_v59 = vpop.f32.mrb[3].mxu0  ;;  %1329 = vmatmul.mubr.f32.gmra.mrb[108].mxu0 %v289_v52  ;;  %2180 = vmatmul.mubr.msk.f32.gmra.mrb[140].mxu1 %vm416_vm0, %v246_v53  ;;  %v842_v60 = vpop.f32.mrb[35].mxu1 }
 0x15c   :  { %1333 = vmatprep.mubr.f32.mxu0 %v295_v54  ;;  %2182 = vmatprep.mubr.msk.f32.mxu1 %vm416_vm0, %v251_v55  ;;  %v319_v54 = vld [vmem:[%s4576_s0 + $0x970] sm:$0xff]  ;;  %v306_v55 = vld [vmem:[%s4576_s0 + $0x908] sm:$0xff]  ;;  %v325_v59 = vld [vmem:[%s4576_s0 + $0x9a0] sm:$0xff] }
 0x15d   :  { %v311_v60 = vld [vmem:[%s4576_s0 + $0x930] sm:$0xff] }
 0x15e   :  { %v3746_v3 = vpop.f32.mrb[4].mxu0  ;;  %v3748_v4 = vpop.f32.mrb[36].mxu1 }
 0x15f   :  { %v1072_v6 = vpop.f32.mrb[5].mxu0  ;;  %1334 = vmatmul.mubr.f32.gmra.mrb[110].mxu0 %v294_v61  ;;  %2183 = vmatmul.mubr.msk.f32.gmra.mrb[142].mxu1 %vm416_vm0, %v256_v63  ;;  %v847_v7 = vpop.f32.mrb[37].mxu1 }
 0x160   :  { %1338 = vmatprep.mubr.f32.mxu0 %v300_v1  ;;  %2185 = vmatprep.mubr.msk.f32.mxu1 %vm416_vm0, %v261_v2  ;;  %v324_v6 = vld [vmem:[%s4576_s0 + $0x998] sm:$0xff] }
 0x161   :  { %v316_v7 = vld [vmem:[%s4576_s0 + $0x958] sm:$0xff] }
 0x162   :  { %v3764_v14 = vpop.f32.mrb[6].mxu0  ;;  %v3766_v16 = vpop.f32.mrb[38].mxu1 }
 0x163   :  { %v1077_v17 = vpop.f32.mrb[7].mxu0  ;;  %1339 = vmatmul.mubr.f32.gmra.mrb[112].mxu0 %v299_v8  ;;  %2186 = vmatmul.mubr.msk.f32.gmra.mrb[144].mxu1 %vm416_vm0, %v266_v10  ;;  %v852_v18 = vpop.f32.mrb[39].mxu1  ;;  %v330_v8 = vld [vmem:[%s4576_s0 + $0x9c8] sm:$0xff]  ;;  %v321_v10 = vld [vmem:[%s4576_s0 + $0x980] sm:$0xff] }
 0x164   :  { %1343 = vmatprep.mubr.f32.mxu0 %v305_v11  ;;  %2188 = vmatprep.mubr.msk.f32.mxu1 %vm416_vm0, %v271_v13 }
 0x166   :  { %v3782_v25 = vpop.f32.mrb[8].mxu0  ;;  %v3784_v28 = vpop.f32.mrb[40].mxu1 }
 0x167   :  { %v1082_v29 = vpop.f32.mrb[9].mxu0  ;;  %1344 = vmatmul.mubr.f32.gmra.mrb[114].mxu0 %v304_v20  ;;  %2189 = vmatmul.mubr.msk.f32.gmra.mrb[146].mxu1 %vm416_vm0, %v276_v22  ;;  %v857_v30 = vpop.f32.mrb[41].mxu1  ;;  %v329_v20 = vld [vmem:[%s4576_s0 + $0x9c0] sm:$0xff]  ;;  %v326_v22 = vld [vmem:[%s4576_s0 + $0x9a8] sm:$0xff] }
 0x168   :  { %1348 = vmatprep.mubr.f32.mxu0 %v310_v23  ;;  %2191 = vmatprep.mubr.msk.f32.mxu1 %vm416_vm0, %v281_v24  ;;  %v335_v23 = vld [vmem:[%s4576_s0 + $0x9f0] sm:$0xff] }
 0x169   :  { %v331_v24 = vld [vmem:[%s4576_s0 + $0x9d0] sm:$0xff] }
 0x16a   :  { %v3800_v37 = vpop.f32.mrb[10].mxu0  ;;  %v3802_v38 = vpop.f32.mrb[42].mxu1 }
 0x16b   :  { %v1087_v40 = vpop.f32.mrb[11].mxu0  ;;  %1349 = vmatmul.mubr.f32.gmra.mrb[116].mxu0 %v309_v31  ;;  %2192 = vmatmul.mubr.msk.f32.gmra.mrb[148].mxu1 %vm416_vm0, %v286_v32  ;;  %v862_v42 = vpop.f32.mrb[43].mxu1 }
 0x16c   :  { %1353 = vmatprep.mubr.f32.mxu0 %v315_v35  ;;  %2194 = vmatprep.mubr.msk.f32.mxu1 %vm416_vm0, %v291_v36  ;;  %v334_v35 = vld [vmem:[%s4576_s0 + $0x9e8] sm:$0xff]  ;;  %v336_v36 = vld [vmem:[%s4576_s0 + $0x9f8] sm:$0xff] }
 0x16e   :  { %v3818_v0 = vpop.f32.mrb[12].mxu0  ;;  %v3820_v51 = vpop.f32.mrb[44].mxu1 }
 0x16f   :  { %v1092_v52 = vpop.f32.mrb[13].mxu0  ;;  %1354 = vmatmul.mubr.f32.gmra.mrb[118].mxu0 %v314_v43  ;;  %2195 = vmatmul.mubr.msk.f32.gmra.mrb[150].mxu1 %vm416_vm0, %v296_v44  ;;  %v867_v53 = vpop.f32.mrb[45].mxu1 }
 0x170   :  { %1358 = vmatprep.mubr.f32.mxu0 %v320_v46  ;;  %2197 = vmatprep.mubr.msk.f32.mxu1 %vm416_vm0, %v301_v47 }
 0x172   :  { %v3836_v61 = vpop.f32.mrb[14].mxu0  ;;  %v3838_v63 = vpop.f32.mrb[46].mxu1 }
 0x173   :  { %v1097_v1 = vpop.f32.mrb[15].mxu0  ;;  %1359 = vmatmul.mubr.f32.gmra.mrb[120].mxu0 %v319_v54  ;;  %2198 = vmatmul.mubr.msk.f32.gmra.mrb[152].mxu1 %vm416_vm0, %v306_v55  ;;  %v872_v2 = vpop.f32.mrb[47].mxu1 }
 0x174   :  { %1363 = vmatprep.mubr.f32.mxu0 %v325_v59  ;;  %2200 = vmatprep.mubr.msk.f32.mxu1 %vm416_vm0, %v311_v60 }
 0x176   :  { %v3854_v11 = vpop.f32.mrb[16].mxu0  ;;  %v3856_v13 = vpop.f32.mrb[48].mxu1 }
 0x177   :  { %v1102_v17 = vpop.f32.mrb[17].mxu0  ;;  %1364 = vmatmul.mubr.f32.gmra.mrb[122].mxu0 %v324_v6  ;;  %2201 = vmatmul.mubr.msk.f32.gmra.mrb[154].mxu1 %vm416_vm0, %v316_v7  ;;  %v877_v18 = vpop.f32.mrb[49].mxu1 }
 0x178   :  { %1368 = vmatprep.mubr.f32.mxu0 %v330_v8  ;;  %2203 = vmatprep.mubr.msk.f32.mxu1 %vm416_vm0, %v321_v10 }
 0x17a   :  { %v3872_v29 = vpop.f32.mrb[18].mxu0  ;;  %v3874_v30 = vpop.f32.mrb[50].mxu1 }
 0x17b   :  { %v1107_v31 = vpop.f32.mrb[19].mxu0  ;;  %1369 = vmatmul.mubr.f32.gmra.mrb[124].mxu0 %v329_v20  ;;  %2204 = vmatmul.mubr.msk.f32.gmra.mrb[156].mxu1 %vm416_vm0, %v326_v22  ;;  %v882_v32 = vpop.f32.mrb[51].mxu1  ;;  %v3908_v20 = vld [vmem:[%s4577_s2] ss:$0 sm:$0xff] }
 0x17c   :  { %1373 = vmatprep.mubr.f32.mxu0 %v335_v23  ;;  %2206 = vmatprep.mubr.msk.f32.mxu1 %vm416_vm0, %v331_v24  ;;  %v756_v32 = vadd.f32 %v3908_v20, %v3454_v9  ;;  %v766_v9 = vadd.f32 %v3908_v20, %v3486_v21  ;;  %v776_v21 = vadd.f32 %v3908_v20, %v3518_v33 }
 0x17d   :  { %v786_v33 = vadd.f32 %v3908_v20, %v3550_v45  ;;  %v796_v45 = vadd.f32 %v3908_v20, %v3582_v56  ;;  %v806_v56 = vadd.f32 %v3908_v20, %v3614_v5  ;;  %v816_v5 = vadd.f32 %v3908_v20, %v3646_v19 }
 0x17e   :  { %v3884_v40 = vpop.f32.mrb[20].mxu0  ;;  %v3886_v42 = vpop.f32.mrb[52].mxu1  ;;  %v826_v19 = vadd.f32 %v3908_v20, %v3678_v34  ;;  %v836_v34 = vadd.f32 %v3908_v20, %v3712_v49  ;;  %v1764_v49 = vld [vmem:[%s4578_s3] sm:$0xff] }
 0x17f   :  { %v1112_v43 = vpop.f32.mrb[21].mxu0  ;;  %1374 = vmatmul.mubr.f32.gmra.mrb[126].mxu0 %v334_v35  ;;  %2207 = vmatmul.mubr.msk.f32.gmra.mrb[158].mxu1 %vm416_vm0, %v336_v36  ;;  %v887_v44 = vpop.f32.mrb[53].mxu1 }
 0x182   :  { %v3889_v46 = vpop.f32.mrb[22].mxu0  ;;  %v3891_v47 = vpop.f32.mrb[54].mxu1 }
 0x183   :  { %v1117_v52 = vpop.f32.mrb[23].mxu0  ;;  %v892_v53 = vpop.f32.mrb[55].mxu1 }
 0x184   :  { %v761_v53 = vadd.f32 %v3908_v20, %v3470_v15  ;;  %v771_v15 = vadd.f32 %v3908_v20, %v3502_v27  ;;  %v781_v27 = vadd.f32 %v3908_v20, %v3534_v39  ;;  %v791_v39 = vadd.f32 %v3908_v20, %v3566_v50 }
 0x185   :  { %v801_v50 = vadd.f32 %v3908_v20, %v3598_v62  ;;  %v811_v62 = vadd.f32 %v3908_v20, %v3630_v12  ;;  %v821_v12 = vadd.f32 %v3908_v20, %v3662_v26  ;;  %v831_v26 = vadd.f32 %v3908_v20, %v3694_v41  ;;  %v1765_v41 = vld [vmem:[%s4578_s3 + $0x8] sm:$0xff] }
 0x186   :  { %v3893_v54 = vpop.f32.mrb[24].mxu0  ;;  %v3895_v55 = vpop.f32.mrb[56].mxu1 }
 0x187   :  { %v1122_v59 = vpop.f32.mrb[25].mxu0  ;;  %v897_v60 = vpop.f32.mrb[57].mxu1 }
 0x18a   :  { %v3897_v1 = vpop.f32.mrb[26].mxu0  ;;  %v3899_v2 = vpop.f32.mrb[58].mxu1 }
 0x18b   :  { %v1127_v6 = vpop.f32.mrb[27].mxu0  ;;  %v902_v7 = vpop.f32.mrb[59].mxu1 }
 0x18e   :  { %v3901_v8 = vpop.f32.mrb[28].mxu0  ;;  %v3903_v10 = vpop.f32.mrb[60].mxu1 }
 0x18f   :  { %v1132_v17 = vpop.f32.mrb[29].mxu0  ;;  %v907_v18 = vpop.f32.mrb[61].mxu1 }
 0x192   :  { %v3910_v22 = vpop.f32.mrb[30].mxu0  ;;  %v3912_v23 = vpop.f32.mrb[62].mxu1 }
 0x193   :  { %v1137_v24 = vpop.f32.mrb[31].mxu0  ;;  %v912_v31 = vpop.f32.mrb[63].mxu1 }
 0x196   :  { %v1140_v35 = vpop.f32.mrb[32].mxu0  ;;  %v3916_v36 = vpop.f32.mrb[64].mxu1 }
 0x197   :  { %v3918_v43 = vadd.f32 %v1140_v35, %v756_v32  ;;  %v1142_v44 = vpop.f32.mrb[33].mxu0  ;;  %v917_v52 = vpop.f32.mrb[65].mxu1 }
 0x19a   :  { %v1145_v59 = vpop.f32.mrb[34].mxu0  ;;  %v3922_v60 = vpop.f32.mrb[66].mxu1 }
 0x19b   :  { %4580 = vst [vmem:[#allocation2_spill] sm:$0xff] %v3922_v60  ;;  %v3924_v6 = vadd.f32 %v1145_v59, %v761_v53  ;;  %v1147_v7 = vpop.f32.mrb[35].mxu0  ;;  %v922_v17 = vpop.f32.mrb[67].mxu1 }
 0x19e   :  { %v1150_v18 = vpop.f32.mrb[36].mxu0  ;;  %v3928_v24 = vpop.f32.mrb[68].mxu1 }
 0x19f   :  { %4581 = vst [vmem:[#allocation3_spill] sm:$0xff] %v3928_v24  ;;  %v3930_v31 = vadd.f32 %v1150_v18, %v766_v9  ;;  %v1152_v32 = vpop.f32.mrb[37].mxu0  ;;  %v927_v35 = vpop.f32.mrb[69].mxu1 }
 0x1a2   :  { %v1155_v44 = vpop.f32.mrb[38].mxu0  ;;  %v3934_v52 = vpop.f32.mrb[70].mxu1 }
 0x1a3   :  { %4582 = vst [vmem:[#allocation4_spill] sm:$0xff] %v3934_v52  ;;  %v3936_v53 = vadd.f32 %v1155_v44, %v771_v15  ;;  %v1157_v59 = vpop.f32.mrb[39].mxu0  ;;  %v932_v7 = vpop.f32.mrb[71].mxu1 }
 0x1a6   :  { %v1160_v17 = vpop.f32.mrb[40].mxu0  ;;  %v3940_v60 = vpop.f32.mrb[72].mxu1 }
 0x1a7   :  { %4583 = vst [vmem:[#allocation5_spill] sm:$0xff] %v3940_v60  ;;  %v3942_v9 = vadd.f32 %v1160_v17, %v776_v21  ;;  %v1162_v18 = vpop.f32.mrb[41].mxu0  ;;  %v937_v32 = vpop.f32.mrb[73].mxu1 }
 0x1aa   :  { %v1165_v35 = vpop.f32.mrb[42].mxu0  ;;  %v3946_v24 = vpop.f32.mrb[74].mxu1 }
 0x1ab   :  { %4584 = vst [vmem:[#allocation6_spill] sm:$0xff] %v3946_v24  ;;  %v3948_v15 = vadd.f32 %v1165_v35, %v781_v27  ;;  %v1167_v44 = vpop.f32.mrb[43].mxu0  ;;  %v942_v59 = vpop.f32.mrb[75].mxu1 }
 0x1ae   :  { %v1170_v7 = vpop.f32.mrb[44].mxu0  ;;  %v3952_v52 = vpop.f32.mrb[76].mxu1 }
 0x1af   :  { %4585 = vst [vmem:[#allocation7_spill] sm:$0xff] %v3952_v52  ;;  %v3954_v21 = vadd.f32 %v1170_v7, %v786_v33  ;;  %v1172_v17 = vpop.f32.mrb[45].mxu0  ;;  %v947_v18 = vpop.f32.mrb[77].mxu1 }
 0x1b2   :  { %v1175_v32 = vpop.f32.mrb[46].mxu0  ;;  %v3958_v60 = vpop.f32.mrb[78].mxu1 }
 0x1b3   :  { %4586 = vst [vmem:[#allocation8_spill] sm:$0xff] %v3958_v60  ;;  %v3960_v27 = vadd.f32 %v1175_v32, %v791_v39  ;;  %v1177_v35 = vpop.f32.mrb[47].mxu0  ;;  %v952_v44 = vpop.f32.mrb[79].mxu1 }
 0x1b6   :  { %v1180_v59 = vpop.f32.mrb[48].mxu0  ;;  %v3964_v24 = vpop.f32.mrb[80].mxu1 }
 0x1b7   :  { %4587 = vst [vmem:[#allocation9_spill] sm:$0xff] %v3964_v24  ;;  %v3966_v33 = vadd.f32 %v1180_v59, %v796_v45  ;;  %v1182_v7 = vpop.f32.mrb[49].mxu0  ;;  %v957_v17 = vpop.f32.mrb[81].mxu1 }
 0x1ba   :  { %v1185_v18 = vpop.f32.mrb[50].mxu0  ;;  %v3970_v52 = vpop.f32.mrb[82].mxu1 }
 0x1bb   :  { %4588 = vst [vmem:[#allocation10_spill] sm:$0xff] %v3970_v52  ;;  %v3972_v39 = vadd.f32 %v1185_v18, %v801_v50  ;;  %v1187_v32 = vpop.f32.mrb[51].mxu0  ;;  %v962_v35 = vpop.f32.mrb[83].mxu1 }
 0x1be   :  { %v1190_v44 = vpop.f32.mrb[52].mxu0  ;;  %v3976_v60 = vpop.f32.mrb[84].mxu1 }
 0x1bf   :  { %4589 = vst [vmem:[#allocation11_spill] sm:$0xff] %v3976_v60  ;;  %v3978_v45 = vadd.f32 %v1190_v44, %v806_v56  ;;  %v1192_v59 = vpop.f32.mrb[53].mxu0  ;;  %v967_v7 = vpop.f32.mrb[85].mxu1 }
 0x1c2   :  { %v1195_v17 = vpop.f32.mrb[54].mxu0  ;;  %v3982_v24 = vpop.f32.mrb[86].mxu1 }
 0x1c3   :  { %4590 = vst [vmem:[#allocation12_spill] sm:$0xff] %v3982_v24  ;;  %v3984_v50 = vadd.f32 %v1195_v17, %v811_v62  ;;  %v1197_v18 = vpop.f32.mrb[55].mxu0  ;;  %v972_v32 = vpop.f32.mrb[87].mxu1 }
 0x1c6   :  { %v1200_v35 = vpop.f32.mrb[56].mxu0  ;;  %v3988_v52 = vpop.f32.mrb[88].mxu1 }
 0x1c7   :  { %4591 = vst [vmem:[#allocation13_spill] sm:$0xff] %v3988_v52  ;;  %v3990_v56 = vadd.f32 %v1200_v35, %v816_v5  ;;  %v1202_v44 = vpop.f32.mrb[57].mxu0  ;;  %v977_v59 = vpop.f32.mrb[89].mxu1 }
 0x1ca   :  { %v1205_v7 = vpop.f32.mrb[58].mxu0  ;;  %v3994_v60 = vpop.f32.mrb[90].mxu1 }
 0x1cb   :  { %v3996_v62 = vadd.f32 %v1205_v7, %v821_v12  ;;  %v1207_v17 = vpop.f32.mrb[59].mxu0  ;;  %v982_v18 = vpop.f32.mrb[91].mxu1 }
 0x1cc   :  { %v2354_v18 = vadd.f32 %v3908_v20, %v3728_v57  ;;  %v841_v57 = vadd.f32 %v3908_v20, %v3730_v58 }
 0x1ce   :  { %v1210_v32 = vpop.f32.mrb[60].mxu0  ;;  %v4000_v24 = vpop.f32.mrb[92].mxu1 }
 0x1cf   :  { %4592 = vst [vmem:[#allocation14_spill] sm:$0xff] %v4000_v24  ;;  %v4002_v5 = vadd.f32 %v1210_v32, %v826_v19  ;;  %v1212_v35 = vpop.f32.mrb[61].mxu0  ;;  %v987_v44 = vpop.f32.mrb[93].mxu1  ;;  %v2353_v19 = vadd.f32 %v3908_v20, %v3710_v48  ;;  %v2356_v48 = vadd.f32 %v3908_v20, %v3764_v14  ;;  %v2355_v24 = vadd.f32 %v3908_v20, %v3746_v3  ;;  %v1766_v3 = vld [vmem:[%s4578_s3 + $0x10] sm:$0xff] }
 0x1d2   :  { %v1215_v59 = vpop.f32.mrb[62].mxu0  ;;  %v4006_v52 = vpop.f32.mrb[94].mxu1 }
 0x1d3   :  { %4593 = vst [vmem:[#allocation15_spill] sm:$0xff] %v4006_v52  ;;  %v4008_v12 = vadd.f32 %v1215_v59, %v831_v26  ;;  %v1217_v7 = vpop.f32.mrb[63].mxu0  ;;  %v992_v17 = vpop.f32.mrb[95].mxu1 }
 0x1d6   :  { %v1220_v32 = vpop.f32.mrb[64].mxu0  ;;  %v2115_v35 = vpop.f32.mrb[96].mxu1 }
 0x1d7   :  { %v4019_v44 = vadd.f32 %v1220_v32, %v836_v34  ;;  %v1451_v26 = vadd.f32 %v2354_v18, %v2115_v35  ;;  %v1222_v59 = vpop.f32.mrb[65].mxu0  ;;  %v1445_v7 = vpop.f32.mrb[97].mxu1  ;;  %v1767_v35 = vld [vmem:[%s4578_s3 + $0x18] sm:$0xff] }
 0x1d8   :  { %v1446_v17 = vadd.f32 %v2353_v19, %v1445_v7 }
 0x1d9   :  { %v1829_v52 = vadd.f32 %v1765_v41, %v1451_v26  ;;  %v846_v26 = vadd.f32 %v3908_v20, %v3748_v4 }
 0x1da   :  { %v1828_v34 = vadd.f32 %v1764_v49, %v1446_v17  ;;  %v1225_v32 = vpop.f32.mrb[66].mxu0  ;;  %v2118_v18 = vpop.f32.mrb[98].mxu1  ;;  %v2357_v49 = vadd.f32 %v3908_v20, %v3782_v25  ;;  %v1768_v25 = vld [vmem:[%s4578_s3 + $0x20] sm:$0xff] }
 0x1db   :  { %1893 = vst [vmem:[%s4579_s4 + $0x8] sm:$0xff] %v1829_v52  ;;  %v4036_v19 = vadd.f32 %v1225_v32, %v841_v57  ;;  %v1461_v58 = vadd.f32 %v2356_v48, %v2118_v18  ;;  %v1227_v59 = vpop.f32.mrb[67].mxu0  ;;  %v1455_v14 = vpop.f32.mrb[99].mxu1  ;;  %v2358_v52 = vadd.f32 %v3908_v20, %v3800_v37  ;;  %v1769_v32 = vld [vmem:[%s4578_s3 + $0x28] sm:$0xff] }
 0x1dc   :  { %1892 = vst [vmem:[%s4579_s4] sm:$0xff] %v1828_v34  ;;  %v1456_v41 = vadd.f32 %v2355_v24, %v1455_v14  ;;  %v2359_v14 = vadd.f32 %v3908_v20, %v3818_v0  ;;  %v1770_v0 = vld [vmem:[%s4578_s3 + $0x30] sm:$0xff] }
 0x1dd   :  { %v1831_v7 = vadd.f32 %v1767_v35, %v1461_v58  ;;  %v851_v35 = vadd.f32 %v3908_v20, %v3766_v16  ;;  %v2360_v58 = vadd.f32 %v3908_v20, %v3836_v61 }
 0x1de   :  { %v1830_v17 = vadd.f32 %v1766_v3, %v1456_v41  ;;  %v1230_v57 = vpop.f32.mrb[68].mxu0  ;;  %v2121_v48 = vpop.f32.mrb[100].mxu1 }
 0x1df   :  { %1895 = vst [vmem:[%s4579_s4 + $0x18] sm:$0xff] %v1831_v7  ;;  %v4056_v24 = vadd.f32 %v1230_v57, %v846_v26  ;;  %v1471_v4 = vadd.f32 %v2358_v52, %v2121_v48  ;;  %v1232_v34 = vpop.f32.mrb[69].mxu0  ;;  %v1465_v37 = vpop.f32.mrb[101].mxu1  ;;  %v1771_v52 = vld [vmem:[%s4578_s3 + $0x38] sm:$0xff]  ;;  %v856_v57 = vadd.f32 %v3908_v20, %v3784_v28  ;;  %v2362_v48 = vadd.f32 %v3908_v20, %v3872_v29 }
 0x1e0   :  { %1894 = vst [vmem:[%s4579_s4 + $0x10] sm:$0xff] %v1830_v17  ;;  %v1466_v18 = vadd.f32 %v2357_v49, %v1465_v37 }
 0x1e1   :  { %v1833_v59 = vadd.f32 %v1769_v32, %v1471_v4  ;;  %v2361_v4 = vadd.f32 %v3908_v20, %v3854_v11  ;;  %v1772_v11 = vld [vmem:[%s4578_s3 + $0x40] sm:$0xff] }
 0x1e2   :  { %v1832_v3 = vadd.f32 %v1768_v25, %v1466_v18  ;;  %v1235_v41 = vpop.f32.mrb[70].mxu0  ;;  %v2124_v26 = vpop.f32.mrb[102].mxu1  ;;  %v1773_v18 = vld [vmem:[%s4578_s3 + $0x48] sm:$0xff] }
 0x1e3   :  { %1897 = vst [vmem:[%s4579_s4 + $0x28] sm:$0xff] %v1833_v59  ;;  %v4076_v7 = vadd.f32 %v1235_v41, %v851_v35  ;;  %v1481_v16 = vadd.f32 %v2360_v58, %v2124_v26  ;;  %v1237_v49 = vpop.f32.mrb[71].mxu0  ;;  %v1475_v61 = vpop.f32.mrb[103].mxu1  ;;  %v2363_v26 = vadd.f32 %v3908_v20, %v3884_v40  ;;  %v1774_v40 = vld [vmem:[%s4578_s3 + $0x50] sm:$0xff] }
 0x1e4   :  { %1896 = vst [vmem:[%s4579_s4 + $0x20] sm:$0xff] %v1832_v3  ;;  %v1476_v17 = vadd.f32 %v2359_v14, %v1475_v61  ;;  %v861_v14 = vadd.f32 %v3908_v20, %v3802_v38  ;;  %v2364_v3 = vadd.f32 %v3908_v20, %v3889_v46  ;;  %v1775_v61 = vld [vmem:[%s4578_s3 + $0x58] sm:$0xff] }
 0x1e5   :  { %v1835_v32 = vadd.f32 %v1771_v52, %v1481_v16 }
 0x1e6   :  { %v1834_v34 = vadd.f32 %v1770_v0, %v1476_v17  ;;  %v1240_v37 = vpop.f32.mrb[72].mxu0  ;;  %v2127_v25 = vpop.f32.mrb[104].mxu1 }
 0x1e7   :  { %1899 = vst [vmem:[%s4579_s4 + $0x38] sm:$0xff] %v1835_v32  ;;  %v4096_v35 = vadd.f32 %v1240_v37, %v856_v57  ;;  %v1491_v28 = vadd.f32 %v2362_v48, %v2127_v25  ;;  %v1242_v58 = vpop.f32.mrb[73].mxu0  ;;  %v1485_v29 = vpop.f32.mrb[105].mxu1  ;;  %v866_v48 = vadd.f32 %v3908_v20, %v3820_v51  ;;  %v2366_v32 = vadd.f32 %v3908_v20, %v3897_v1 }
 0x1e8   :  { %1898 = vst [vmem:[%s4579_s4 + $0x30] sm:$0xff] %v1834_v34  ;;  %v1486_v59 = vadd.f32 %v2361_v4, %v1485_v29  ;;  %v2365_v34 = vadd.f32 %v3908_v20, %v3893_v54  ;;  %v1776_v54 = vld [vmem:[%s4578_s3 + $0x60] sm:$0xff] }
 0x1e9   :  { %v1837_v41 = vadd.f32 %v1773_v18, %v1491_v28  ;;  %v1777_v28 = vld [vmem:[%s4578_s3 + $0x68] sm:$0xff] }
 0x1ea   :  { %v1836_v52 = vadd.f32 %v1772_v11, %v1486_v59  ;;  %v1245_v16 = vpop.f32.mrb[74].mxu0  ;;  %v2130_v49 = vpop.f32.mrb[106].mxu1  ;;  %v871_v59 = vadd.f32 %v3908_v20, %v3838_v63 }
 0x1eb   :  { %1901 = vst [vmem:[%s4579_s4 + $0x48] sm:$0xff] %v1837_v41  ;;  %v4116_v0 = vadd.f32 %v1245_v16, %v861_v14  ;;  %v1501_v38 = vadd.f32 %v2364_v3, %v2130_v49  ;;  %v1247_v17 = vpop.f32.mrb[75].mxu0  ;;  %v1495_v46 = vpop.f32.mrb[107].mxu1  ;;  %v2368_v14 = vadd.f32 %v3908_v20, %v3910_v22  ;;  %v2367_v41 = vadd.f32 %v3908_v20, %v3901_v8  ;;  %v1779_v49 = vld [vmem:[%s4578_s3 + $0x78] sm:$0xff]  ;;  %v1778_v8 = vld [vmem:[%s4578_s3 + $0x70] sm:$0xff] }
 0x1ec   :  { %1900 = vst [vmem:[%s4579_s4 + $0x40] sm:$0xff] %v1836_v52  ;;  %v1496_v57 = vadd.f32 %v2363_v26, %v1495_v46  ;;  %v876_v46 = vadd.f32 %v3908_v20, %v3856_v13  ;;  %v1780_v13 = vld [vmem:[%s4578_s3 + $0x80] sm:$0xff] }
 0x1ed   :  { %v1839_v4 = vadd.f32 %v1775_v61, %v1501_v38 }
 0x1ee   :  { %v1838_v37 = vadd.f32 %v1774_v40, %v1496_v57  ;;  %v1250_v25 = vpop.f32.mrb[76].mxu0  ;;  %v2133_v18 = vpop.f32.mrb[108].mxu1 }
 0x1ef   :  { %1903 = vst [vmem:[%s4579_s4 + $0x58] sm:$0xff] %v1839_v4  ;;  %v4136_v58 = vadd.f32 %v1250_v25, %v866_v48  ;;  %v1511_v51 = vadd.f32 %v2366_v32, %v2133_v18  ;;  %v1252_v29 = vpop.f32.mrb[77].mxu0  ;;  %v1505_v1 = vpop.f32.mrb[109].mxu1  ;;  %v1781_v4 = vld [vmem:[%s4578_s3 + $0x88] sm:$0xff] }
 0x1f0   :  { %1902 = vst [vmem:[%s4579_s4 + $0x50] sm:$0xff] %v1838_v37  ;;  %v1506_v11 = vadd.f32 %v2365_v34, %v1505_v1 }
 0x1f1   :  { %v1841_v3 = vadd.f32 %v1777_v28, %v1511_v51  ;;  %v881_v51 = vadd.f32 %v3908_v20, %v3874_v30  ;;  %v1782_v30 = vld [vmem:[%s4578_s3 + $0x90] sm:$0xff] }
 0x1f2   :  { %v1840_v26 = vadd.f32 %v1776_v54, %v1506_v11  ;;  %v1255_v52 = vpop.f32.mrb[78].mxu0  ;;  %v2136_v16 = vpop.f32.mrb[110].mxu1 }
 0x1f3   :  { %1905 = vst [vmem:[%s4579_s4 + $0x68] sm:$0xff] %v1841_v3  ;;  %v4156_v61 = vadd.f32 %v1255_v52, %v871_v59  ;;  %v1521_v63 = vadd.f32 %v2368_v14, %v2136_v16  ;;  %v1257_v38 = vpop.f32.mrb[79].mxu0  ;;  %v1515_v22 = vpop.f32.mrb[111].mxu1 }
 0x1f4   :  { %1904 = vst [vmem:[%s4579_s4 + $0x60] sm:$0xff] %v1840_v26  ;;  %v1516_v17 = vadd.f32 %v2367_v41, %v1515_v22  ;;  %v886_v26 = vadd.f32 %v3908_v20, %v3886_v42  ;;  %v1784_v42 = vld [vmem:[%s4578_s3 + $0xa0] sm:$0xff] }
 0x1f5   :  { %v1843_v40 = vadd.f32 %v1779_v49, %v1521_v63 }
 0x1f6   :  { %v1842_v57 = vadd.f32 %v1778_v8, %v1516_v17  ;;  %v1260_v48 = vpop.f32.mrb[80].mxu0  ;;  %v2139_v32 = vpop.f32.mrb[112].mxu1 }
 0x1f7   :  { %1907 = vst [vmem:[%s4579_s4 + $0x78] sm:$0xff] %v1843_v40  ;;  %v4172_v34 = vadd.f32 %v1260_v48, %v876_v46  ;;  %v1531_v37 = vadd.f32 %v2139_v32, %v3924_v6  ;;  %v1262_v25 = vpop.f32.mrb[81].mxu0  ;;  %v1525_v18 = vpop.f32.mrb[113].mxu1  ;;  %v1783_v6 = vld [vmem:[%s4578_s3 + $0x98] sm:$0xff]  ;;  %v891_v46 = vadd.f32 %v3908_v20, %v3891_v47  ;;  %v1786_v47 = vld [vmem:[%s4578_s3 + $0xb0] sm:$0xff] }
 0x1f8   :  { %1906 = vst [vmem:[%s4579_s4 + $0x70] sm:$0xff] %v1842_v57  ;;  %v1526_v28 = vadd.f32 %v1525_v18, %v3918_v43 }
 0x1f9   :  { %v1845_v29 = vadd.f32 %v1781_v4, %v1531_v37 }
 0x1fa   :  { %v1844_v1 = vadd.f32 %v1780_v13, %v1526_v28  ;;  %v1265_v54 = vpop.f32.mrb[82].mxu0  ;;  %v2142_v11 = vpop.f32.mrb[114].mxu1  ;;  %v896_v13 = vadd.f32 %v3908_v20, %v3895_v55  ;;  %v1788_v55 = vld [vmem:[%s4578_s3 + $0xc0] sm:$0xff] }
 0x1fb   :  { %1909 = vst [vmem:[%s4579_s4 + $0x88] sm:$0xff] %v1845_v29  ;;  %v4190_v59 = vadd.f32 %v1265_v54, %v881_v51  ;;  %v1541_v14 = vadd.f32 %v2142_v11, %v3936_v53  ;;  %v1267_v43 = vpop.f32.mrb[83].mxu0  ;;  %v1535_v3 = vpop.f32.mrb[115].mxu1  ;;  %v1785_v53 = vld [vmem:[%s4578_s3 + $0xa8] sm:$0xff] }
 0x1fc   :  { %1908 = vst [vmem:[%s4579_s4 + $0x80] sm:$0xff] %v1844_v1  ;;  %v1536_v41 = vadd.f32 %v1535_v3, %v3930_v31  ;;  %v901_v43 = vadd.f32 %v3908_v20, %v3899_v2  ;;  %v1790_v2 = vld [vmem:[%s4578_s3 + $0xd0] sm:$0xff] }
 0x1fd   :  { %v1847_v52 = vadd.f32 %v1783_v6, %v1541_v14 }
 0x1fe   :  { %v1846_v16 = vadd.f32 %v1782_v30, %v1536_v41  ;;  %v1270_v49 = vpop.f32.mrb[84].mxu0  ;;  %v2145_v63 = vpop.f32.mrb[116].mxu1 }
 0x1ff   :  { %1911 = vst [vmem:[%s4579_s4 + $0x98] sm:$0xff] %v1847_v52  ;;  %v4208_v38 = vadd.f32 %v1270_v49, %v886_v26  ;;  %v1551_v22 = vadd.f32 %v2145_v63, %v3948_v15  ;;  %v1272_v31 = vpop.f32.mrb[85].mxu0  ;;  %v1545_v8 = vpop.f32.mrb[117].mxu1  ;;  %v1787_v15 = vld [vmem:[%s4578_s3 + $0xb8] sm:$0xff] }
 0x200   :  { %1910 = vst [vmem:[%s4579_s4 + $0x90] sm:$0xff] %v1846_v16  ;;  %v1546_v17 = vadd.f32 %v1545_v8, %v3942_v9 }
 0x201   :  { %v1849_v40 = vadd.f32 %v1785_v53, %v1551_v22  ;;  %v906_v53 = vadd.f32 %v3908_v20, %v3903_v10  ;;  %v1792_v10 = vld [vmem:[%s4578_s3 + $0xe0] sm:$0xff] }
 0x202   :  { %v1848_v57 = vadd.f32 %v1784_v42, %v1546_v17  ;;  %v1275_v48 = vpop.f32.mrb[86].mxu0  ;;  %v2148_v32 = vpop.f32.mrb[118].mxu1 }
 0x203   :  { %1913 = vst [vmem:[%s4579_s4 + $0xa8] sm:$0xff] %v1849_v40  ;;  %v4226_v4 = vadd.f32 %v1275_v48, %v891_v46  ;;  %v1561_v37 = vadd.f32 %v2148_v32, %v3960_v27  ;;  %v1277_v9 = vpop.f32.mrb[87].mxu0  ;;  %v1555_v25 = vpop.f32.mrb[119].mxu1  ;;  %v1789_v27 = vld [vmem:[%s4578_s3 + $0xc8] sm:$0xff]  ;;  %v911_v48 = vadd.f32 %v3908_v20, %v3912_v23  ;;  %v1794_v23 = vld [vmem:[%s4578_s3 + $0xf0] sm:$0xff] }
 0x204   :  { %1912 = vst [vmem:[%s4579_s4 + $0xa0] sm:$0xff] %v1848_v57  ;;  %v1556_v18 = vadd.f32 %v1555_v25, %v3954_v21 }
 0x205   :  { %v1851_v28 = vadd.f32 %v1787_v15, %v1561_v37 }
 0x206   :  { %v1850_v51 = vadd.f32 %v1786_v47, %v1556_v18  ;;  %v1280_v29 = vpop.f32.mrb[88].mxu0  ;;  %v2151_v1 = vpop.f32.mrb[120].mxu1 }
 0x207   :  { %1915 = vst [vmem:[%s4579_s4 + $0xb8] sm:$0xff] %v1851_v28  ;;  %v4244_v54 = vadd.f32 %v1280_v29, %v896_v13  ;;  %v1571_v11 = vadd.f32 %v2151_v1, %v3972_v39  ;;  %v1282_v21 = vpop.f32.mrb[89].mxu0  ;;  %v1565_v6 = vpop.f32.mrb[121].mxu1  ;;  %v1791_v39 = vld [vmem:[%s4578_s3 + $0xd8] sm:$0xff]  ;;  %v916_v28 = vadd.f32 %v3908_v20, %v3916_v36  ;;  %v1796_v36 = vld [vmem:[%s4578_s3 + $0x100] sm:$0xff] }
 0x208   :  { %1914 = vst [vmem:[%s4579_s4 + $0xb0] sm:$0xff] %v1850_v51  ;;  %v1566_v14 = vadd.f32 %v1565_v6, %v3966_v33 }
 0x209   :  { %v1853_v3 = vadd.f32 %v1789_v27, %v1571_v11 }
 0x20a   :  { %v1852_v30 = vadd.f32 %v1788_v55, %v1566_v14  ;;  %v1285_v41 = vpop.f32.mrb[90].mxu0  ;;  %v2154_v26 = vpop.f32.mrb[122].mxu1  ;;  %v4594_v14 = vld [vmem:[#allocation2_spill] sm:$0xff] }
 0x20b   :  { %1917 = vst [vmem:[%s4579_s4 + $0xc8] sm:$0xff] %v1853_v3  ;;  %v4262_v52 = vadd.f32 %v1285_v41, %v901_v43  ;;  %v1581_v16 = vadd.f32 %v2154_v26, %v3984_v50  ;;  %v1287_v33 = vpop.f32.mrb[91].mxu0  ;;  %v1575_v49 = vpop.f32.mrb[123].mxu1  ;;  %v1793_v50 = vld [vmem:[%s4578_s3 + $0xe8] sm:$0xff]  ;;  %v921_v43 = vadd.f32 %v3908_v20, %v4594_v14 }
 0x20c   :  { %1916 = vst [vmem:[%s4579_s4 + $0xc0] sm:$0xff] %v1852_v30  ;;  %v1576_v63 = vadd.f32 %v1575_v49, %v3978_v45  ;;  %v1798_v49 = vld [vmem:[%s4578_s3 + $0x110] sm:$0xff] }
 0x20d   :  { %v1855_v22 = vadd.f32 %v1791_v39, %v1581_v16 }
 0x20e   :  { %v1854_v31 = vadd.f32 %v1790_v2, %v1576_v63  ;;  %v1290_v8 = vpop.f32.mrb[92].mxu0  ;;  %v2157_v42 = vpop.f32.mrb[124].mxu1  ;;  %v4595_v63 = vld [vmem:[#allocation3_spill] sm:$0xff] }
 0x20f   :  { %1919 = vst [vmem:[%s4579_s4 + $0xd8] sm:$0xff] %v1855_v22  ;;  %v4280_v17 = vadd.f32 %v1290_v8, %v906_v53  ;;  %v1591_v46 = vadd.f32 %v2157_v42, %v3996_v62  ;;  %v1292_v45 = vpop.f32.mrb[93].mxu0  ;;  %v1585_v40 = vpop.f32.mrb[125].mxu1  ;;  %v1795_v62 = vld [vmem:[%s4578_s3 + $0xf8] sm:$0xff]  ;;  %v926_v53 = vadd.f32 %v3908_v20, %v4595_v63 }
 0x210   :  { %1918 = vst [vmem:[%s4579_s4 + $0xd0] sm:$0xff] %v1854_v31  ;;  %v1586_v57 = vadd.f32 %v1585_v40, %v3990_v56  ;;  %v1800_v40 = vld [vmem:[%s4578_s3 + $0x120] sm:$0xff] }
 0x211   :  { %v1857_v32 = vadd.f32 %v1793_v50, %v1591_v46 }
 0x212   :  { %v1856_v15 = vadd.f32 %v1792_v10, %v1586_v57  ;;  %v1295_v37 = vpop.f32.mrb[94].mxu0  ;;  %v2160_v9 = vpop.f32.mrb[126].mxu1  ;;  %v4596_v57 = vld [vmem:[#allocation4_spill] sm:$0xff] }
 0x213   :  { %1921 = vst [vmem:[%s4579_s4 + $0xe8] sm:$0xff] %v1857_v32  ;;  %v4298_v25 = vadd.f32 %v1295_v37, %v911_v48  ;;  %v1601_v47 = vadd.f32 %v2160_v9, %v4008_v12  ;;  %v1297_v56 = vpop.f32.mrb[95].mxu0  ;;  %v1595_v18 = vpop.f32.mrb[127].mxu1  ;;  %v1797_v12 = vld [vmem:[%s4578_s3 + $0x108] sm:$0xff]  ;;  %v931_v48 = vadd.f32 %v3908_v20, %v4596_v57 }
 0x214   :  { %1920 = vst [vmem:[%s4579_s4 + $0xe0] sm:$0xff] %v1856_v15  ;;  %v1596_v13 = vadd.f32 %v1595_v18, %v4002_v5  ;;  %v1802_v18 = vld [vmem:[%s4578_s3 + $0x130] sm:$0xff] }
 0x215   :  { %v1859_v51 = vadd.f32 %v1795_v62, %v1601_v47 }
 0x216   :  { %v1858_v29 = vadd.f32 %v1794_v23, %v1596_v13  ;;  %v1300_v1 = vpop.f32.mrb[96].mxu0  ;;  %v2163_v27 = vpop.f32.mrb[128].mxu1  ;;  %v4597_v13 = vld [vmem:[#allocation5_spill] sm:$0xff] }
 0x217   :  { %1923 = vst [vmem:[%s4579_s4 + $0xf8] sm:$0xff] %v1859_v51  ;;  %v4316_v11 = vadd.f32 %v1300_v1, %v916_v28  ;;  %v1611_v21 = vadd.f32 %v2163_v27, %v4036_v19  ;;  %v1302_v5 = vpop.f32.mrb[97].mxu0  ;;  %v1605_v6 = vpop.f32.mrb[129].mxu1  ;;  %v1799_v19 = vld [vmem:[%s4578_s3 + $0x118] sm:$0xff]  ;;  %v936_v28 = vadd.f32 %v3908_v20, %v4597_v13 }
 0x218   :  { %1922 = vst [vmem:[%s4579_s4 + $0xf0] sm:$0xff] %v1858_v29  ;;  %v1606_v55 = vadd.f32 %v1605_v6, %v4019_v44  ;;  %v1804_v6 = vld [vmem:[%s4578_s3 + $0x140] sm:$0xff] }
 0x219   :  { %v1861_v3 = vadd.f32 %v1797_v12, %v1611_v21 }
 0x21a   :  { %v1860_v30 = vadd.f32 %v1796_v36, %v1606_v55  ;;  %v1305_v41 = vpop.f32.mrb[98].mxu0  ;;  %v2166_v26 = vpop.f32.mrb[130].mxu1  ;;  %v4598_v55 = vld [vmem:[#allocation6_spill] sm:$0xff] }
 0x21b   :  { %1925 = vst [vmem:[%s4579_s4 + $0x108] sm:$0xff] %v1861_v3  ;;  %v4334_v39 = vadd.f32 %v1305_v41, %v921_v43  ;;  %v1621_v16 = vadd.f32 %v2166_v26, %v4076_v7  ;;  %v1307_v44 = vpop.f32.mrb[99].mxu0  ;;  %v1615_v33 = vpop.f32.mrb[131].mxu1  ;;  %v1801_v7 = vld [vmem:[%s4578_s3 + $0x128] sm:$0xff]  ;;  %v941_v14 = vadd.f32 %v3908_v20, %v4598_v55 }
 0x21c   :  { %1924 = vst [vmem:[%s4579_s4 + $0x100] sm:$0xff] %v1860_v30  ;;  %v1616_v2 = vadd.f32 %v1615_v33, %v4056_v24  ;;  %v1806_v44 = vld [vmem:[%s4578_s3 + $0x150] sm:$0xff] }
 0x21d   :  { %v1863_v22 = vadd.f32 %v1799_v19, %v1621_v16 }
 0x21e   :  { %v1862_v31 = vadd.f32 %v1798_v49, %v1616_v2  ;;  %v1310_v8 = vpop.f32.mrb[100].mxu0  ;;  %v2169_v42 = vpop.f32.mrb[132].mxu1  ;;  %v4599_v49 = vld [vmem:[#allocation7_spill] sm:$0xff] }
 0x21f   :  { %1927 = vst [vmem:[%s4579_s4 + $0x118] sm:$0xff] %v1863_v22  ;;  %v4352_v50 = vadd.f32 %v1310_v8, %v926_v53  ;;  %v1631_v46 = vadd.f32 %v2169_v42, %v4116_v0  ;;  %v1312_v24 = vpop.f32.mrb[101].mxu0  ;;  %v1625_v45 = vpop.f32.mrb[133].mxu1  ;;  %v1803_v0 = vld [vmem:[%s4578_s3 + $0x138] sm:$0xff]  ;;  %v946_v2 = vadd.f32 %v3908_v20, %v4599_v49 }
 0x220   :  { %1926 = vst [vmem:[%s4579_s4 + $0x110] sm:$0xff] %v1862_v31  ;;  %v1626_v10 = vadd.f32 %v1625_v45, %v4096_v35  ;;  %v4600_v45 = vld [vmem:[#allocation8_spill] sm:$0xff] }
 0x221   :  { %v1865_v32 = vadd.f32 %v1801_v7, %v1631_v46  ;;  %v1808_v46 = vld [vmem:[%s4578_s3 + $0x160] sm:$0xff] }
 0x222   :  { %v1864_v15 = vadd.f32 %v1800_v40, %v1626_v10  ;;  %v1315_v37 = vpop.f32.mrb[102].mxu0  ;;  %v2172_v9 = vpop.f32.mrb[134].mxu1  ;;  %v951_v40 = vadd.f32 %v3908_v20, %v4600_v45 }
 0x223   :  { %1929 = vst [vmem:[%s4579_s4 + $0x128] sm:$0xff] %v1865_v32  ;;  %v4370_v62 = vadd.f32 %v1315_v37, %v931_v48  ;;  %v1641_v47 = vadd.f32 %v2172_v9, %v4156_v61  ;;  %v1317_v35 = vpop.f32.mrb[103].mxu0  ;;  %v1635_v56 = vpop.f32.mrb[135].mxu1  ;;  %v1805_v61 = vld [vmem:[%s4578_s3 + $0x148] sm:$0xff] }
 0x224   :  { %1928 = vst [vmem:[%s4579_s4 + $0x120] sm:$0xff] %v1864_v15  ;;  %v1636_v23 = vadd.f32 %v1635_v56, %v4136_v58  ;;  %v4601_v35 = vld [vmem:[#allocation9_spill] sm:$0xff] }
 0x225   :  { %v1867_v51 = vadd.f32 %v1803_v0, %v1641_v47  ;;  %v1810_v0 = vld [vmem:[%s4578_s3 + $0x170] sm:$0xff]  ;;  %v956_v56 = vadd.f32 %v3908_v20, %v4601_v35 }
 0x226   :  { %v1866_v29 = vadd.f32 %v1802_v18, %v1636_v23  ;;  %v1320_v1 = vpop.f32.mrb[104].mxu0  ;;  %v2175_v27 = vpop.f32.mrb[136].mxu1 }
 0x227   :  { %1931 = vst [vmem:[%s4579_s4 + $0x138] sm:$0xff] %v1867_v51  ;;  %v4388_v12 = vadd.f32 %v1320_v1, %v936_v28  ;;  %v1651_v21 = vadd.f32 %v2175_v27, %v4190_v59  ;;  %v1322_v58 = vpop.f32.mrb[105].mxu0  ;;  %v1645_v5 = vpop.f32.mrb[137].mxu1  ;;  %v1807_v59 = vld [vmem:[%s4578_s3 + $0x158] sm:$0xff]  ;;  %v1812_v27 = vld [vmem:[%s4578_s3 + $0x180] sm:$0xff] }
 0x228   :  { %1930 = vst [vmem:[%s4579_s4 + $0x130] sm:$0xff] %v1866_v29  ;;  %v1646_v36 = vadd.f32 %v1645_v5, %v4172_v34 }
 0x229   :  { %v1869_v43 = vadd.f32 %v1805_v61, %v1651_v21  ;;  %v4602_v21 = vld [vmem:[#allocation10_spill] sm:$0xff] }
 0x22a   :  { %v1868_v3 = vadd.f32 %v1804_v6, %v1646_v36  ;;  %v1325_v30 = vpop.f32.mrb[106].mxu0  ;;  %v2178_v41 = vpop.f32.mrb[138].mxu1  ;;  %v961_v58 = vadd.f32 %v3908_v20, %v4602_v21 }
 0x22b   :  { %1933 = vst [vmem:[%s4579_s4 + $0x148] sm:$0xff] %v1869_v43  ;;  %v4406_v26 = vadd.f32 %v1325_v30, %v941_v14  ;;  %v1661_v19 = vadd.f32 %v2178_v41, %v4226_v4  ;;  %v1327_v34 = vpop.f32.mrb[107].mxu0  ;;  %v1655_v16 = vpop.f32.mrb[139].mxu1  ;;  %v1809_v4 = vld [vmem:[%s4578_s3 + $0x168] sm:$0xff]  ;;  %v1814_v30 = vld [vmem:[%s4578_s3 + $0x190] sm:$0xff] }
 0x22c   :  { %1932 = vst [vmem:[%s4579_s4 + $0x140] sm:$0xff] %v1868_v3  ;;  %v1656_v33 = vadd.f32 %v1655_v16, %v4208_v38 }
 0x22d   :  { %v1871_v63 = vadd.f32 %v1807_v59, %v1661_v19  ;;  %v4603_v59 = vld [vmem:[#allocation11_spill] sm:$0xff] }
 0x22e   :  { %v1870_v53 = vadd.f32 %v1806_v44, %v1656_v33  ;;  %v1330_v22 = vpop.f32.mrb[108].mxu0  ;;  %v2181_v31 = vpop.f32.mrb[140].mxu1  ;;  %v966_v19 = vadd.f32 %v3908_v20, %v4603_v59 }
 0x22f   :  { %1935 = vst [vmem:[%s4579_s4 + $0x158] sm:$0xff] %v1871_v63  ;;  %v4424_v8 = vadd.f32 %v1330_v22, %v946_v2  ;;  %v1671_v42 = vadd.f32 %v2181_v31, %v4262_v52  ;;  %v1332_v38 = vpop.f32.mrb[109].mxu0  ;;  %v1665_v7 = vpop.f32.mrb[141].mxu1  ;;  %v1811_v52 = vld [vmem:[%s4578_s3 + $0x178] sm:$0xff]  ;;  %v4604_v31 = vld [vmem:[#allocation12_spill] sm:$0xff] }
 0x230   :  { %1934 = vst [vmem:[%s4579_s4 + $0x150] sm:$0xff] %v1870_v53  ;;  %v1666_v24 = vadd.f32 %v1665_v7, %v4244_v54  ;;  %v1816_v53 = vld [vmem:[%s4578_s3 + $0x1a0] sm:$0xff] }
 0x231   :  { %v1873_v10 = vadd.f32 %v1809_v4, %v1671_v42  ;;  %v971_v4 = vadd.f32 %v3908_v20, %v4604_v31 }
 0x232   :  { %v1872_v57 = vadd.f32 %v1808_v46, %v1666_v24  ;;  %v1335_v48 = vpop.f32.mrb[110].mxu0  ;;  %v2184_v32 = vpop.f32.mrb[142].mxu1 }
 0x233   :  { %1937 = vst [vmem:[%s4579_s4 + $0x168] sm:$0xff] %v1873_v10  ;;  %v1336_v15 = vadd.f32 %v1335_v48, %v951_v40  ;;  %v1681_v37 = vadd.f32 %v2184_v32, %v4298_v25  ;;  %v1337_v9 = vpop.f32.mrb[111].mxu0  ;;  %v1675_v54 = vpop.f32.mrb[143].mxu1  ;;  %v1813_v25 = vld [vmem:[%s4578_s3 + $0x188] sm:$0xff]  ;;  %v4605_v48 = vld [vmem:[#allocation13_spill] sm:$0xff] }
 0x234   :  { %1936 = vst [vmem:[%s4579_s4 + $0x160] sm:$0xff] %v1872_v57  ;;  %v1676_v47 = vadd.f32 %v1675_v54, %v4280_v17  ;;  %v976_v32 = vadd.f32 %v3908_v20, %v4605_v48  ;;  %v1820_v20 = vld [vmem:[%s4578_s3 + $0x1c0] sm:$0xff] }
 0x235   :  { %v1875_v18 = vadd.f32 %v1811_v52, %v1681_v37 }
 0x236   :  { %v1874_v23 = vadd.f32 %v1810_v0, %v1676_v47  ;;  %v1340_v13 = vpop.f32.mrb[112].mxu0  ;;  %v2187_v28 = vpop.f32.mrb[144].mxu1 }
 0x237   :  { %1939 = vst [vmem:[%s4579_s4 + $0x178] sm:$0xff] %v1875_v18  ;;  %v1341_v51 = vadd.f32 %v1340_v13, %v956_v56  ;;  %v1691_v29 = vadd.f32 %v2187_v28, %v4334_v39  ;;  %v1342_v1 = vpop.f32.mrb[113].mxu0  ;;  %v1685_v17 = vpop.f32.mrb[145].mxu1  ;;  %v1815_v39 = vld [vmem:[%s4578_s3 + $0x198] sm:$0xff]  ;;  %v2498_v18 = vld [vmem:[%s4577_s2] ss:$0 sm:$0xff] }
 0x238   :  { %1938 = vst [vmem:[%s4579_s4 + $0x170] sm:$0xff] %v1874_v23  ;;  %v1686_v61 = vadd.f32 %v1685_v17, %v4316_v11  ;;  %v981_v23 = vadd.f32 %v2498_v18, %v3994_v60  ;;  %v1823_v1 = vld [vmem:[%s4578_s3 + $0x1d8] sm:$0xff]  ;;  %v1822_v60 = vld [vmem:[%s4578_s3 + $0x1d0] sm:$0xff] }
 0x239   :  { %v1877_v5 = vadd.f32 %v1813_v25, %v1691_v29 }
 0x23a   :  { %v1876_v6 = vadd.f32 %v1812_v27, %v1686_v61  ;;  %v1345_v36 = vpop.f32.mrb[114].mxu0  ;;  %v2190_v55 = vpop.f32.mrb[146].mxu1 }
 0x23b   :  { %1941 = vst [vmem:[%s4579_s4 + $0x188] sm:$0xff] %v1877_v5  ;;  %v1346_v14 = vadd.f32 %v1345_v36, %v961_v58  ;;  %v1701_v43 = vadd.f32 %v2190_v55, %v4370_v62  ;;  %v1347_v3 = vpop.f32.mrb[115].mxu0  ;;  %v1695_v11 = vpop.f32.mrb[147].mxu1  ;;  %v1817_v62 = vld [vmem:[%s4578_s3 + $0x1a8] sm:$0xff]  ;;  %v4606_v58 = vld [vmem:[#allocation14_spill] sm:$0xff] }
 0x23c   :  { %1940 = vst [vmem:[%s4579_s4 + $0x180] sm:$0xff] %v1876_v6  ;;  %v1696_v41 = vadd.f32 %v1695_v11, %v4352_v50  ;;  %v986_v5 = vadd.f32 %v2498_v18, %v4606_v58 }
 0x23d   :  { %v1879_v34 = vadd.f32 %v1815_v39, %v1701_v43 }
 0x23e   :  { %v1878_v16 = vadd.f32 %v1814_v30, %v1696_v41  ;;  %v1350_v44 = vpop.f32.mrb[116].mxu0  ;;  %v2193_v33 = vpop.f32.mrb[148].mxu1  ;;  %v1824_v41 = vld [vmem:[%s4578_s3 + $0x1e0] sm:$0xff] }
 0x23f   :  { %1943 = vst [vmem:[%s4579_s4 + $0x198] sm:$0xff] %v1879_v34  ;;  %v1351_v49 = vadd.f32 %v1350_v44, %v966_v19  ;;  %v1711_v2 = vadd.f32 %v2193_v33, %v4406_v26  ;;  %v1352_v63 = vpop.f32.mrb[117].mxu0  ;;  %v1705_v50 = vpop.f32.mrb[149].mxu1  ;;  %v1819_v26 = vld [vmem:[%s4578_s3 + $0x1b8] sm:$0xff]  ;;  %v4607_v19 = vld [vmem:[#allocation15_spill] sm:$0xff] }
 0x240   :  { %1942 = vst [vmem:[%s4579_s4 + $0x190] sm:$0xff] %v1878_v16  ;;  %v1706_v22 = vadd.f32 %v1705_v50, %v4388_v12  ;;  %v1818_v12 = vld [vmem:[%s4578_s3 + $0x1b0] sm:$0xff]  ;;  %v991_v34 = vadd.f32 %v2498_v18, %v4607_v19 }
 0x241   :  { %v1881_v42 = vadd.f32 %v1817_v62, %v1711_v2  ;;  %v1826_v50 = vld [vmem:[%s4578_s3 + $0x1f0] sm:$0xff] }
 0x242   :  { %v1880_v38 = vadd.f32 %v1816_v53, %v1706_v22  ;;  %v1355_v7 = vpop.f32.mrb[118].mxu0  ;;  %v2196_v46 = vpop.f32.mrb[150].mxu1  ;;  %v1827_v53 = vld [vmem:[%s4578_s3 + $0x1f8] sm:$0xff] }
 0x243   :  { %1945 = vst [vmem:[%s4579_s4 + $0x1a8] sm:$0xff] %v1881_v42  ;;  %v1356_v24 = vadd.f32 %v1355_v7, %v971_v4  ;;  %v1721_v45 = vadd.f32 %v2196_v46, %v1336_v15  ;;  %v1357_v40 = vpop.f32.mrb[119].mxu0  ;;  %v1715_v10 = vpop.f32.mrb[151].mxu1  ;;  %v1821_v15 = vld [vmem:[%s4578_s3 + $0x1c8] sm:$0xff] }
 0x244   :  { %1944 = vst [vmem:[%s4579_s4 + $0x1a0] sm:$0xff] %v1880_v38  ;;  %v1716_v57 = vadd.f32 %v1715_v10, %v4424_v8 }
 0x245   :  { %v1883_v52 = vadd.f32 %v1819_v26, %v1721_v45 }
 0x246   :  { %v1882_v37 = vadd.f32 %v1818_v12, %v1716_v57  ;;  %v1360_v9 = vpop.f32.mrb[120].mxu0  ;;  %v2199_v54 = vpop.f32.mrb[152].mxu1 }
 0x247   :  { %1947 = vst [vmem:[%s4579_s4 + $0x1b8] sm:$0xff] %v1883_v52  ;;  %v1361_v0 = vadd.f32 %v1360_v9, %v976_v32  ;;  %v1731_v47 = vadd.f32 %v2199_v54, %v1346_v14  ;;  %v1362_v35 = vpop.f32.mrb[121].mxu0  ;;  %v1725_v56 = vpop.f32.mrb[153].mxu1  ;;  %v1825_v14 = vld [vmem:[%s4578_s3 + $0x1e8] sm:$0xff] }
 0x248   :  { %1946 = vst [vmem:[%s4579_s4 + $0x1b0] sm:$0xff] %v1882_v37  ;;  %v1726_v8 = vadd.f32 %v1725_v56, %v1341_v51 }
 0x249   :  { %v1885_v13 = vadd.f32 %v1821_v15, %v1731_v47 }
 0x24a   :  { %v1884_v28 = vadd.f32 %v1820_v20, %v1726_v8  ;;  %v1365_v25 = vpop.f32.mrb[122].mxu0  ;;  %v2202_v29 = vpop.f32.mrb[154].mxu1 }
 0x24b   :  { %1949 = vst [vmem:[%s4579_s4 + $0x1c8] sm:$0xff] %v1885_v13  ;;  %v1366_v17 = vadd.f32 %v1365_v25, %v981_v23  ;;  %v1741_v51 = vadd.f32 %v2202_v29, %v1356_v24  ;;  %v1367_v27 = vpop.f32.mrb[123].mxu0  ;;  %v1735_v61 = vpop.f32.mrb[155].mxu1 }
 0x24c   :  { %1948 = vst [vmem:[%s4579_s4 + $0x1c0] sm:$0xff] %v1884_v28  ;;  %v1736_v21 = vadd.f32 %v1735_v61, %v1351_v49 }
 0x24d   :  { %v1887_v6 = vadd.f32 %v1823_v1, %v1741_v51 }
 0x24e   :  { %v1886_v36 = vadd.f32 %v1822_v60, %v1736_v21  ;;  %v1370_v55 = vpop.f32.mrb[124].mxu0  ;;  %v2205_v39 = vpop.f32.mrb[156].mxu1 }
 0x24f   :  { %1951 = vst [vmem:[%s4579_s4 + $0x1d8] sm:$0xff] %v1887_v6  ;;  %v1371_v43 = vadd.f32 %v1370_v55, %v986_v5  ;;  %v1751_v3 = vadd.f32 %v2205_v39, %v1366_v17  ;;  %v1372_v11 = vpop.f32.mrb[125].mxu0  ;;  %v1745_v30 = vpop.f32.mrb[157].mxu1 }
 0x250   :  { %1950 = vst [vmem:[%s4579_s4 + $0x1d0] sm:$0xff] %v1886_v36  ;;  %v1746_v59 = vadd.f32 %v1745_v30, %v1361_v0 }
 0x251   :  { %v1889_v16 = vadd.f32 %v1825_v14, %v1751_v3 }
 0x252   :  { %v1888_v44 = vadd.f32 %v1824_v41, %v1746_v59  ;;  %v1375_v33 = vpop.f32.mrb[126].mxu0  ;;  %v2208_v62 = vpop.f32.mrb[158].mxu1 }
 0x253   :  { %1953 = vst [vmem:[%s4579_s4 + $0x1e8] sm:$0xff] %v1889_v16  ;;  %v1376_v49 = vadd.f32 %v1375_v33, %v991_v34  ;;  %v1377_v2 = vpop.f32.mrb[127].mxu0  ;;  %v1755_v63 = vpop.f32.mrb[159].mxu1 }
 0x254   :  { %1952 = vst [vmem:[%s4579_s4 + $0x1e0] sm:$0xff] %v1888_v44  ;;  %v1756_v22 = vadd.f32 %v1755_v63, %v1371_v43 }
 0x255   :  { %v1761_v31 = vadd.f32 %v2208_v62, %v1376_v49 }
 0x256   :  { %v1890_v4 = vadd.f32 %v1826_v50, %v1756_v22 }
 0x257   :  { %v1891_v42 = vadd.f32 %v1827_v53, %v1761_v31 }
 0x258   :  { %1954 = vst [vmem:[%s4579_s4 + $0x1f0] sm:$0xff] %v1890_v4 }
 0x259   :  { %1955 = vst [vmem:[%s4579_s4 + $0x1f8] sm:$0xff] %v1891_v42 }

// kernel: down_encoder_block2d_forward.15
= control target key start
LH: loop header
LB: loop body
LE: loop exit
PB: predicated region body
PF: predicated region fallthrough
CT: control target
= control target key end

     0   :  { %s1598_s0 = inlined_call_operand.vmem [shape: f32[128,576], index: 0, kind: input, shape index: {}]   ;;  %s1599_s1 = inlined_call_operand.vmem [shape: f32[576,128], index: 1, kind: input, shape index: {}]   ;;  %s1600_s2 = inlined_call_operand.vmem [shape: f32[1,128], index: 2, kind: input, shape index: {}]   ;;  %s1601_s3 = inlined_call_operand.hbm [shape: f32[128,128], index: 3, kind: output, shape index: {}]  }
   0x1   :  { %v111_v0 = vld [vmem:[%s1599_s1 + $0x80] sm:$0xff]  ;;  %v112_v1 = vld [vmem:[%s1599_s1 + $0x88] sm:$0xff]  ;;  %v113_v11 = vld [vmem:[%s1599_s1 + $0x90] sm:$0xff] }
   0x2   :  { %v143_v2 = vld [vmem:[%s1599_s1 + $0x180] sm:$0xff]  ;;  %v931_v3 = vpack.c.bf16 %v112_v1, %v111_v0  ;;  %v144_v4 = vld [vmem:[%s1599_s1 + $0x188] sm:$0xff]  ;;  %v114_v13 = vld [vmem:[%s1599_s1 + $0x98] sm:$0xff] }
   0x3   :  { %v95_v5 = vld [vmem:[%s1599_s1] sm:$0xff]  ;;  %v96_v6 = vld [vmem:[%s1599_s1 + $0x8] sm:$0xff]  ;;  %v963_v7 = vpack.c.bf16 %v144_v4, %v143_v2  ;;  %v145_v14 = vld [vmem:[%s1599_s1 + $0x190] sm:$0xff]  ;;  %v935_v16 = vpack.c.bf16 %v114_v13, %v113_v11 }
   0x4   :  { %v933_v8 = vpack.c.bf16 %v96_v6, %v95_v5  ;;  %v127_v9 = vld [vmem:[%s1599_s1 + $0x100] sm:$0xff]  ;;  %v128_v10 = vld [vmem:[%s1599_s1 + $0x108] sm:$0xff]  ;;  %932 = vmatprep.subr.bf16.mxu0 %v931_v3  ;;  %v146_v15 = vld [vmem:[%s1599_s1 + $0x198] sm:$0xff] }
   0x5   :  { %v965_v12 = vpack.c.bf16 %v128_v10, %v127_v9  ;;  %964 = vmatprep.subr.bf16.mxu1 %v963_v7  ;;  %v967_v17 = vpack.c.bf16 %v146_v15, %v145_v14  ;;  %v97_v18 = vld [vmem:[%s1599_s1 + $0x10] sm:$0xff]  ;;  %v98_v19 = vld [vmem:[%s1599_s1 + $0x18] sm:$0xff]  ;;  %v115_v23 = vld [vmem:[%s1599_s1 + $0xa0] sm:$0xff] }
   0x6   :  { %934 = vmatpush3.bf16.msra.mxu0 %v933_v8  ;;  %v129_v20 = vld [vmem:[%s1599_s1 + $0x110] sm:$0xff]  ;;  %v937_v21 = vpack.c.bf16 %v98_v19, %v97_v18  ;;  %v130_v22 = vld [vmem:[%s1599_s1 + $0x118] sm:$0xff]  ;;  %v116_v24 = vld [vmem:[%s1599_s1 + $0xa8] sm:$0xff] }
   0x7   :  { %966 = vmatpush3.bf16.msra.mxu1 %v965_v12  ;;  %936 = vmatprep.subr.bf16.mxu0 %v935_v16  ;;  %v969_v25 = vpack.c.bf16 %v130_v22, %v129_v20  ;;  %v939_v26 = vpack.c.bf16 %v116_v24, %v115_v23  ;;  %v147_v27 = vld [vmem:[%s1599_s1 + $0x1a0] sm:$0xff]  ;;  %v148_v28 = vld [vmem:[%s1599_s1 + $0x1a8] sm:$0xff]  ;;  %v117_v35 = vld [vmem:[%s1599_s1 + $0xb0] sm:$0xff] }
   0x8   :  { %968 = vmatprep.subr.bf16.mxu1 %v967_v17  ;;  %v99_v29 = vld [vmem:[%s1599_s1 + $0x20] sm:$0xff]  ;;  %v971_v30 = vpack.c.bf16 %v148_v28, %v147_v27  ;;  %v100_v31 = vld [vmem:[%s1599_s1 + $0x28] sm:$0xff]  ;;  %v118_v36 = vld [vmem:[%s1599_s1 + $0xb8] sm:$0xff] }
   0x9   :  { %v131_v32 = vld [vmem:[%s1599_s1 + $0x120] sm:$0xff]  ;;  %v132_v33 = vld [vmem:[%s1599_s1 + $0x128] sm:$0xff]  ;;  %v941_v34 = vpack.c.bf16 %v100_v31, %v99_v29  ;;  %v149_v37 = vld [vmem:[%s1599_s1 + $0x1b0] sm:$0xff]  ;;  %v943_v39 = vpack.c.bf16 %v118_v36, %v117_v35 }
   0xa   :  { %938 = vmatpush3.bf16.msra.mxu0 %v937_v21  ;;  %v973_v38 = vpack.c.bf16 %v132_v33, %v131_v32  ;;  %v150_v40 = vld [vmem:[%s1599_s1 + $0x1b8] sm:$0xff]  ;;  %v101_v41 = vld [vmem:[%s1599_s1 + $0x30] sm:$0xff]  ;;  %v119_v46 = vld [vmem:[%s1599_s1 + $0xc0] sm:$0xff] }
   0xb   :  { %970 = vmatpush3.bf16.msra.mxu1 %v969_v25  ;;  %940 = vmatprep.subr.bf16.mxu0 %v939_v26  ;;  %v102_v42 = vld [vmem:[%s1599_s1 + $0x38] sm:$0xff]  ;;  %v975_v43 = vpack.c.bf16 %v150_v40, %v149_v37  ;;  %v133_v44 = vld [vmem:[%s1599_s1 + $0x130] sm:$0xff]  ;;  %v120_v47 = vld [vmem:[%s1599_s1 + $0xc8] sm:$0xff] }
   0xc   :  { %972 = vmatprep.subr.bf16.mxu1 %v971_v30  ;;  %v134_v45 = vld [vmem:[%s1599_s1 + $0x138] sm:$0xff]  ;;  %v151_v48 = vld [vmem:[%s1599_s1 + $0x1c0] sm:$0xff]  ;;  %v152_v49 = vld [vmem:[%s1599_s1 + $0x1c8] sm:$0xff]  ;;  %v945_v50 = vpack.c.bf16 %v102_v42, %v101_v41  ;;  %v947_v52 = vpack.c.bf16 %v120_v47, %v119_v46 }
   0xd   :  { %v977_v51 = vpack.c.bf16 %v134_v45, %v133_v44  ;;  %v103_v53 = vld [vmem:[%s1599_s1 + $0x40] sm:$0xff]  ;;  %v104_v54 = vld [vmem:[%s1599_s1 + $0x48] sm:$0xff]  ;;  %v979_v56 = vpack.c.bf16 %v152_v49, %v151_v48  ;;  %v121_v58 = vld [vmem:[%s1599_s1 + $0xd0] sm:$0xff] }
   0xe   :  { %942 = vmatpush3.bf16.msra.mxu0 %v941_v34  ;;  %v135_v55 = vld [vmem:[%s1599_s1 + $0x140] sm:$0xff]  ;;  %v136_v57 = vld [vmem:[%s1599_s1 + $0x148] sm:$0xff]  ;;  %v122_v59 = vld [vmem:[%s1599_s1 + $0xd8] sm:$0xff]  ;;  %v949_v62 = vpack.c.bf16 %v104_v54, %v103_v53 }
   0xf   :  { %974 = vmatpush3.bf16.msra.mxu1 %v973_v38  ;;  %944 = vmatprep.subr.bf16.mxu0 %v943_v39  ;;  %v153_v60 = vld [vmem:[%s1599_s1 + $0x1d0] sm:$0xff]  ;;  %v154_v61 = vld [vmem:[%s1599_s1 + $0x1d8] sm:$0xff]  ;;  %v981_v63 = vpack.c.bf16 %v136_v57, %v135_v55  ;;  %v951_v0 = vpack.c.bf16 %v122_v59, %v121_v58  ;;  %v123_v6 = vld [vmem:[%s1599_s1 + $0xe0] sm:$0xff] }
  0x10   :  { %976 = vmatprep.subr.bf16.mxu1 %v975_v43  ;;  %v105_v1 = vld [vmem:[%s1599_s1 + $0x50] sm:$0xff]  ;;  %v106_v2 = vld [vmem:[%s1599_s1 + $0x58] sm:$0xff]  ;;  %v983_v4 = vpack.c.bf16 %v154_v61, %v153_v60  ;;  %v124_v7 = vld [vmem:[%s1599_s1 + $0xe8] sm:$0xff] }
  0x11   :  { %v137_v3 = vld [vmem:[%s1599_s1 + $0x150] sm:$0xff]  ;;  %v138_v5 = vld [vmem:[%s1599_s1 + $0x158] sm:$0xff]  ;;  %v155_v8 = vld [vmem:[%s1599_s1 + $0x1e0] sm:$0xff]  ;;  %v953_v10 = vpack.c.bf16 %v106_v2, %v105_v1  ;;  %v955_v14 = vpack.c.bf16 %v124_v7, %v123_v6 }
  0x12   :  { %946 = vmatpush3.bf16.msra.mxu0 %v945_v50  ;;  %v156_v9 = vld [vmem:[%s1599_s1 + $0x1e8] sm:$0xff]  ;;  %v107_v11 = vld [vmem:[%s1599_s1 + $0x60] sm:$0xff]  ;;  %v985_v13 = vpack.c.bf16 %v138_v5, %v137_v3  ;;  %v18_v17 = vld [vmem:[%s1598_s0 + $0x18] sm:$0xff] }
  0x13   :  { %978 = vmatpush3.bf16.msra.mxu1 %v977_v51  ;;  %948 = vmatprep.subr.bf16.mxu0 %v947_v52  ;;  %v108_v12 = vld [vmem:[%s1599_s1 + $0x68] sm:$0xff]  ;;  %v139_v15 = vld [vmem:[%s1599_s1 + $0x160] sm:$0xff]  ;;  %v987_v18 = vpack.c.bf16 %v156_v9, %v155_v8  ;;  %v125_v20 = vld [vmem:[%s1599_s1 + $0xf0] sm:$0xff] }
  0x14   :  { %980 = vmatprep.subr.bf16.mxu1 %v979_v56  ;;  %v16_v16 = vld [vmem:[%s1598_s0 + $0x8] sm:$0xff]  ;;  %v126_v21 = vld [vmem:[%s1599_s1 + $0xf8] sm:$0xff]  ;;  %v157_v22 = vld [vmem:[%s1599_s1 + $0x1f0] sm:$0xff]  ;;  %432 = vmatprep.mubr.f32.mxu1 %v18_v17  ;;  %v957_v24 = vpack.c.bf16 %v108_v12, %v107_v11 }
  0x15   :  { %v140_v19 = vld [vmem:[%s1599_s1 + $0x168] sm:$0xff]  ;;  %287 = vmatprep.mubr.f32.mxu0 %v16_v16  ;;  %v158_v23 = vld [vmem:[%s1599_s1 + $0x1f8] sm:$0xff]  ;;  %v959_v26 = vpack.c.bf16 %v126_v21, %v125_v20  ;;  %v109_v27 = vld [vmem:[%s1599_s1 + $0x70] sm:$0xff] }
  0x16   :  { %950 = vmatpush3.bf16.msra.mxu0 %v949_v62  ;;  %v989_v25 = vpack.c.bf16 %v140_v19, %v139_v15  ;;  %v110_v28 = vld [vmem:[%s1599_s1 + $0x78] sm:$0xff]  ;;  %v141_v29 = vld [vmem:[%s1599_s1 + $0x170] sm:$0xff]  ;;  %v991_v30 = vpack.c.bf16 %v158_v23, %v157_v22  ;;  %v159_v32 = vld [vmem:[%s1599_s1 + $0x200] sm:$0xff] }
  0x17   :  { %982 = vmatpush3.bf16.msra.mxu1 %v981_v63  ;;  %952 = vmatprep.subr.bf16.mxu0 %v951_v0  ;;  %v142_v31 = vld [vmem:[%s1599_s1 + $0x178] sm:$0xff]  ;;  %v160_v33 = vld [vmem:[%s1599_s1 + $0x208] sm:$0xff]  ;;  %v961_v34 = vpack.c.bf16 %v110_v28, %v109_v27  ;;  %v161_v37 = vld [vmem:[%s1599_s1 + $0x210] sm:$0xff] }
  0x18   :  { %984 = vmatprep.subr.bf16.mxu1 %v983_v4  ;;  %v993_v35 = vpack.c.bf16 %v142_v31, %v141_v29  ;;  %v995_v36 = vpack.c.bf16 %v160_v33, %v159_v32  ;;  %v162_v38 = vld [vmem:[%s1599_s1 + $0x218] sm:$0xff]  ;;  %v15_v39 = vld [vmem:[%s1598_s0] sm:$0xff]  ;;  %v17_v40 = vld [vmem:[%s1598_s0 + $0x10] sm:$0xff] }
  0x19   :  { %v21_v41 = vld [vmem:[%s1598_s0 + $0x30] sm:$0xff]  ;;  %v999_v42 = vpack.c.bf16 %v162_v38, %v161_v37  ;;  %v23_v43 = vld [vmem:[%s1598_s0 + $0x40] sm:$0xff]  ;;  %v164_v45 = vld [vmem:[%s1599_s1 + $0x228] sm:$0xff] }
  0x1a   :  { %954 = vmatpush3.bf16.msra.mxu0 %v953_v10  ;;  %v163_v44 = vld [vmem:[%s1599_s1 + $0x220] sm:$0xff]  ;;  %v20_v46 = vld [vmem:[%s1598_s0 + $0x28] sm:$0xff]  ;;  %v22_v47 = vld [vmem:[%s1598_s0 + $0x38] sm:$0xff] }
  0x1b   :  { %986 = vmatpush3.bf16.msra.mxu1 %v985_v13  ;;  %956 = vmatprep.subr.bf16.mxu0 %v955_v14  ;;  %v26_v48 = vld [vmem:[%s1598_s0 + $0x58] sm:$0xff]  ;;  %v28_v49 = vld [vmem:[%s1598_s0 + $0x68] sm:$0xff]  ;;  %v1003_v50 = vpack.c.bf16 %v164_v45, %v163_v44  ;;  %v25_v51 = vld [vmem:[%s1598_s0 + $0x50] sm:$0xff] }
  0x1c   :  { %988 = vmatprep.subr.bf16.mxu1 %v987_v18  ;;  %v165_v52 = vld [vmem:[%s1599_s1 + $0x230] sm:$0xff]  ;;  %v27_v53 = vld [vmem:[%s1598_s0 + $0x60] sm:$0xff]  ;;  %v166_v55 = vld [vmem:[%s1599_s1 + $0x238] sm:$0xff] }
  0x1d   :  { %v31_v54 = vld [vmem:[%s1598_s0 + $0x80] sm:$0xff]  ;;  %v33_v56 = vld [vmem:[%s1598_s0 + $0x90] sm:$0xff]  ;;  %v1007_v57 = vpack.c.bf16 %v166_v55, %v165_v52  ;;  %v30_v58 = vld [vmem:[%s1598_s0 + $0x78] sm:$0xff] }
  0x1e   :  { %958 = vmatpush3.bf16.msra.mxu0 %v957_v24  ;;  %v32_v59 = vld [vmem:[%s1598_s0 + $0x88] sm:$0xff]  ;;  %v38_v61 = vld [vmem:[%s1598_s0 + $0xb8] sm:$0xff]  ;;  %v35_v62 = vld [vmem:[%s1598_s0 + $0xa0] sm:$0xff] }
  0x1f   :  { %990 = vmatpush3.bf16.msra.mxu1 %v989_v25  ;;  %960 = vmatprep.subr.bf16.mxu0 %v959_v26  ;;  %v36_v60 = vld [vmem:[%s1598_s0 + $0xa8] sm:$0xff]  ;;  %v37_v63 = vld [vmem:[%s1598_s0 + $0xb0] sm:$0xff]  ;;  %v43_v1 = vld [vmem:[%s1598_s0 + $0xe0] sm:$0xff] }
  0x20   :  { %992 = vmatprep.subr.bf16.mxu1 %v991_v30  ;;  %v41_v0 = vld [vmem:[%s1598_s0 + $0xd0] sm:$0xff] }
  0x22   :  { %962 = vmatpush3.bf16.msra.mxu0 %v961_v34 }
  0x23   :  { %994 = vmatpush3.bf16.msra.mxu1 %v993_v35  ;;  %996 = vmatprep.subr.bf16.mxu0 %v995_v36 }
  0x24   :  { %1011 = vmatprep.subr.bf16.mxu1 %v995_v36 }
  0x25   :  { %288 = vmatmul.mubr.f32.vlgmr.msra.gmra.mrb[0].mxu0 %v15_v39 }
  0x26   :  { %433 = vmatmul.mubr.f32.vlgmr.msra.gmra.mrb[0].mxu1 %v17_v40  ;;  %998 = vmatpush3.bf16.msra.mxu0 %v995_v36 }
  0x27   :  { %1015 = vmatpush3.bf16.msra.mxu1 %v995_v36  ;;  %292 = vmatprep.mubr.f32.mxu0 %v21_v41 }
  0x28   :  { %437 = vmatprep.mubr.f32.mxu1 %v23_v43  ;;  %1000 = vmatprep.subr.bf16.mxu0 %v999_v42 }
  0x29   :  { %293 = vmatmul.mubr.f32.gmra.mrb[2].mxu0 %v20_v46  ;;  %1012 = vmatprep.subr.bf16.mxu1 %v999_v42 }
  0x2a   :  { %438 = vmatmul.mubr.f32.gmra.mrb[2].mxu1 %v22_v47  ;;  %297 = vmatprep.mubr.f32.mxu0 %v26_v48 }
  0x2b   :  { %442 = vmatprep.mubr.f32.mxu1 %v28_v49  ;;  %1002 = vmatpush3.bf16.msra.mxu0 %v999_v42 }
  0x2c   :  { %1016 = vmatpush3.bf16.msra.mxu1 %v999_v42  ;;  %1004 = vmatprep.subr.bf16.mxu0 %v1003_v50 }
  0x2d   :  { %298 = vmatmul.mubr.f32.gmra.mrb[4].mxu0 %v25_v51  ;;  %1013 = vmatprep.subr.bf16.mxu1 %v1003_v50 }
  0x2e   :  { %443 = vmatmul.mubr.f32.gmra.mrb[4].mxu1 %v27_v53  ;;  %302 = vmatprep.mubr.f32.mxu0 %v31_v54 }
  0x2f   :  { %447 = vmatprep.mubr.f32.mxu1 %v33_v56  ;;  %1006 = vmatpush3.bf16.msra.mxu0 %v1003_v50 }
  0x30   :  { %1017 = vmatpush3.bf16.msra.mxu1 %v1003_v50  ;;  %1008 = vmatprep.subr.bf16.mxu0 %v1007_v57 }
  0x31   :  { %303 = vmatmul.mubr.f32.gmra.mrb[6].mxu0 %v30_v58  ;;  %1014 = vmatprep.subr.bf16.mxu1 %v1007_v57 }
  0x32   :  { %448 = vmatmul.mubr.f32.gmra.mrb[6].mxu1 %v32_v59  ;;  %307 = vmatprep.mubr.f32.mxu0 %v36_v60 }
  0x33   :  { %452 = vmatprep.mubr.f32.mxu1 %v38_v61  ;;  %1010 = vmatpush3.bf16.msra.mxu0 %v1007_v57 }
  0x34   :  { %1018 = vmatpush3.bf16.msra.mxu1 %v1007_v57 }
  0x35   :  { %8 = vsyncpa [#allocation3], 0  ;;  %308 = vmatmul.mubr.f32.gmra.mrb[8].mxu0 %v35_v62  ;;  %v40_v2 = vld [vmem:[%s1598_s0 + $0xc8] sm:$0xff]  ;;  %v42_v3 = vld [vmem:[%s1598_s0 + $0xd8] sm:$0xff]  ;;  %vm174_vm0 = vcmask 523264  }
  0x36   :  { %453 = vmatmul.mubr.f32.gmra.mrb[8].mxu1 %v37_v63  ;;  %312 = vmatprep.mubr.f32.mxu0 %v41_v0  ;;  %v46_v4 = vld [vmem:[%s1598_s0 + $0xf8] sm:$0xff]  ;;  %v48_v5 = vld [vmem:[%s1598_s0 + $0x108] sm:$0xff]  ;;  %v45_v6 = vld [vmem:[%s1598_s0 + $0xf0] sm:$0xff] }
  0x37   :  { %457 = vmatprep.mubr.f32.mxu1 %v43_v1  ;;  %v47_v7 = vld [vmem:[%s1598_s0 + $0x100] sm:$0xff]  ;;  %v53_v9 = vld [vmem:[%s1598_s0 + $0x130] sm:$0xff]  ;;  %v50_v10 = vld [vmem:[%s1598_s0 + $0x118] sm:$0xff] }
  0x38   :  { %v51_v8 = vld [vmem:[%s1598_s0 + $0x120] sm:$0xff]  ;;  %v52_v11 = vld [vmem:[%s1598_s0 + $0x128] sm:$0xff]  ;;  %v58_v13 = vld [vmem:[%s1598_s0 + $0x158] sm:$0xff] }
  0x39   :  { %313 = vmatmul.mubr.f32.gmra.mrb[10].mxu0 %v40_v2  ;;  %v56_v12 = vld [vmem:[%s1598_s0 + $0x148] sm:$0xff]  ;;  %v55_v14 = vld [vmem:[%s1598_s0 + $0x140] sm:$0xff]  ;;  %v57_v15 = vld [vmem:[%s1598_s0 + $0x150] sm:$0xff] }
  0x3a   :  { %458 = vmatmul.mubr.f32.gmra.mrb[10].mxu1 %v42_v3  ;;  %317 = vmatprep.mubr.f32.mxu0 %v46_v4  ;;  %v61_v16 = vld [vmem:[%s1598_s0 + $0x170] sm:$0xff]  ;;  %v63_v17 = vld [vmem:[%s1598_s0 + $0x180] sm:$0xff]  ;;  %v60_v18 = vld [vmem:[%s1598_s0 + $0x168] sm:$0xff] }
  0x3b   :  { %462 = vmatprep.mubr.f32.mxu1 %v48_v5  ;;  %v62_v19 = vld [vmem:[%s1598_s0 + $0x178] sm:$0xff]  ;;  %v68_v21 = vld [vmem:[%s1598_s0 + $0x1a8] sm:$0xff]  ;;  %v65_v22 = vld [vmem:[%s1598_s0 + $0x190] sm:$0xff] }
  0x3c   :  { %v66_v20 = vld [vmem:[%s1598_s0 + $0x198] sm:$0xff]  ;;  %v67_v23 = vld [vmem:[%s1598_s0 + $0x1a0] sm:$0xff]  ;;  %v73_v25 = vld [vmem:[%s1598_s0 + $0x1d0] sm:$0xff] }
  0x3d   :  { %318 = vmatmul.mubr.f32.gmra.mrb[12].mxu0 %v45_v6  ;;  %v71_v24 = vld [vmem:[%s1598_s0 + $0x1c0] sm:$0xff]  ;;  %v70_v26 = vld [vmem:[%s1598_s0 + $0x1b8] sm:$0xff]  ;;  %v72_v27 = vld [vmem:[%s1598_s0 + $0x1c8] sm:$0xff] }
  0x3e   :  { %463 = vmatmul.mubr.f32.gmra.mrb[12].mxu1 %v47_v7  ;;  %322 = vmatprep.mubr.f32.mxu0 %v51_v8  ;;  %v76_v28 = vld [vmem:[%s1598_s0 + $0x1e8] sm:$0xff]  ;;  %v78_v29 = vld [vmem:[%s1598_s0 + $0x1f8] sm:$0xff]  ;;  %v75_v30 = vld [vmem:[%s1598_s0 + $0x1e0] sm:$0xff] }
  0x3f   :  { %467 = vmatprep.mubr.f32.mxu1 %v53_v9  ;;  %v77_v31 = vld [vmem:[%s1598_s0 + $0x1f0] sm:$0xff]  ;;  %v83_v33 = vld [vmem:[%s1598_s0 + $0x220] sm:$0xff]  ;;  %v80_v34 = vld [vmem:[%s1598_s0 + $0x208] sm:$0xff] }
  0x40   :  { %v81_v32 = vld [vmem:[%s1598_s0 + $0x210] sm:$0xff]  ;;  %v82_v35 = vld [vmem:[%s1598_s0 + $0x218] sm:$0xff]  ;;  %v88_v37 = vld [vmem:[%s1598_s0 + $0x248] sm:$0xff] }
  0x41   :  { %323 = vmatmul.mubr.f32.gmra.mrb[14].mxu0 %v50_v10  ;;  %v86_v36 = vld [vmem:[%s1598_s0 + $0x238] sm:$0xff]  ;;  %v85_v38 = vld [vmem:[%s1598_s0 + $0x230] sm:$0xff]  ;;  %v87_v39 = vld [vmem:[%s1598_s0 + $0x240] sm:$0xff] }
  0x42   :  { %468 = vmatmul.mubr.f32.gmra.mrb[14].mxu1 %v52_v11  ;;  %327 = vmatprep.mubr.f32.mxu0 %v56_v12  ;;  %v91_v40 = vld [vmem:[%s1598_s0 + $0x260] sm:$0xff]  ;;  %v93_v41 = vld [vmem:[%s1598_s0 + $0x270] sm:$0xff]  ;;  %v90_v42 = vld [vmem:[%s1598_s0 + $0x258] sm:$0xff] }
  0x43   :  { %472 = vmatprep.mubr.f32.mxu1 %v58_v13  ;;  %v92_v43 = vld [vmem:[%s1598_s0 + $0x268] sm:$0xff]  ;;  %v19_v44 = vld [vmem:[%s1598_s0 + $0x20] sm:$0xff]  ;;  %v29_v48 = vld [vmem:[%s1598_s0 + $0x70] sm:$0xff] }
  0x44   :  { %v59_v45 = vld [vmem:[%s1598_s0 + $0x160] sm:$0xff]  ;;  %v24_v46 = vld [vmem:[%s1598_s0 + $0x48] sm:$0xff]  ;;  %v69_v49 = vld [vmem:[%s1598_s0 + $0x1b0] sm:$0xff] }
  0x45   :  { %328 = vmatmul.mubr.f32.gmra.mrb[16].mxu0 %v55_v14  ;;  %v64_v47 = vld [vmem:[%s1598_s0 + $0x188] sm:$0xff]  ;;  %v34_v50 = vld [vmem:[%s1598_s0 + $0x98] sm:$0xff]  ;;  %v39_v52 = vld [vmem:[%s1598_s0 + $0xc0] sm:$0xff] }
  0x46   :  { %473 = vmatmul.mubr.f32.gmra.mrb[16].mxu1 %v57_v15  ;;  %332 = vmatprep.mubr.f32.mxu0 %v61_v16  ;;  %v74_v51 = vld [vmem:[%s1598_s0 + $0x1d8] sm:$0xff]  ;;  %v79_v53 = vld [vmem:[%s1598_s0 + $0x200] sm:$0xff]  ;;  %v44_v54 = vld [vmem:[%s1598_s0 + $0xe8] sm:$0xff] }
  0x47   :  { %477 = vmatprep.mubr.f32.mxu1 %v63_v17  ;;  %v84_v55 = vld [vmem:[%s1598_s0 + $0x228] sm:$0xff]  ;;  %v49_v56 = vld [vmem:[%s1598_s0 + $0x110] sm:$0xff]  ;;  %v54_v58 = vld [vmem:[%s1598_s0 + $0x138] sm:$0xff] }
  0x48   :  { %v89_v57 = vld [vmem:[%s1598_s0 + $0x250] sm:$0xff]  ;;  %v94_v59 = vld [vmem:[%s1598_s0 + $0x278] sm:$0xff]  ;;  %v1544_v62 = vld [vmem:[%s1600_s2] ss:$0 sm:$0xff]  ;;  %s1046_s0 = smov [#allocation2]  }
  0x49   :  { %333 = vmatmul.mubr.f32.gmra.mrb[18].mxu0 %v60_v18  ;;  %s679_s2 = sshll.u32 %s1046_s0, 4  ;;  %s680_s2 = int_to_ptr.vmem [resolvable:$true] %s679_s2 }
  0x4a   :  { %478 = vmatmul.mubr.f32.gmra.mrb[18].mxu1 %v62_v19  ;;  %337 = vmatprep.mubr.f32.mxu0 %v66_v20  ;;  %s1022_s16 = scalar_lea.vmem %s680_s2, 2048  ;;  %p1027_p1 = scmp.lt.s32.totalorder %s680_s2, %s680_s2 }
  0x4b   :  { %482 = vmatprep.mubr.f32.mxu1 %v68_v21  ;;  %p1023_p0 = scmp.ne.s32.totalorder %s680_s2, %s1022_s16  ;;  %p1028_p2 = scmp.lt.s32.totalorder %s1022_s16, %s1022_s16 }
  0x4d   :  { %338 = vmatmul.mubr.f32.gmra.mrb[20].mxu0 %v65_v22  ;;  %p1029_p3 = por %p1028_p2, %p1027_p1 }
  0x4e   :  { %483 = vmatmul.mubr.f32.gmra.mrb[20].mxu1 %v67_v23  ;;  %342 = vmatprep.mubr.f32.mxu0 %v71_v24 }
  0x4f   :  { %487 = vmatprep.mubr.f32.mxu1 %v73_v25  ;;  %p1030_p4 = pnand %p1029_p3, %p1023_p0 }
  0x51   :  { %343 = vmatmul.mubr.f32.gmra.mrb[22].mxu0 %v70_v26 }
  0x52   :  { %488 = vmatmul.mubr.f32.gmra.mrb[22].mxu1 %v72_v27  ;;  %347 = vmatprep.mubr.f32.mxu0 %v76_v28 }
  0x53   :  { %492 = vmatprep.mubr.f32.mxu1 %v78_v29 }
  0x55   :  { %348 = vmatmul.mubr.f32.gmra.mrb[24].mxu0 %v75_v30 }
  0x56   :  { %493 = vmatmul.mubr.f32.gmra.mrb[24].mxu1 %v77_v31  ;;  %352 = vmatprep.mubr.f32.mxu0 %v81_v32 }
  0x57   :  { %497 = vmatprep.mubr.f32.mxu1 %v83_v33 }
  0x59   :  { %353 = vmatmul.mubr.f32.gmra.mrb[26].mxu0 %v80_v34 }
  0x5a   :  { %498 = vmatmul.mubr.f32.gmra.mrb[26].mxu1 %v82_v35  ;;  %357 = vmatprep.mubr.f32.mxu0 %v86_v36 }
  0x5b   :  { %502 = vmatprep.mubr.f32.mxu1 %v88_v37 }
  0x5d   :  { %358 = vmatmul.mubr.f32.gmra.mrb[28].mxu0 %v85_v38 }
  0x5e   :  { %503 = vmatmul.mubr.f32.gmra.mrb[28].mxu1 %v87_v39  ;;  %362 = vmatprep.mubr.f32.mxu0 %v91_v40 }
  0x5f   :  { %507 = vmatprep.mubr.f32.mxu1 %v93_v41 }
  0x61   :  { %363 = vmatmul.mubr.f32.gmra.mrb[30].mxu0 %v90_v42 }
  0x62   :  { %508 = vmatmul.mubr.f32.gmra.mrb[30].mxu1 %v92_v43  ;;  %907 = vmatprep.mubr.msk.f32.mxu0 %vm174_vm0, %v19_v44 }
  0x63   :  { %919 = vmatprep.mubr.msk.f32.mxu1 %vm174_vm0, %v59_v45 }
  0x65   :  { %908 = vmatmul.mubr.msk.f32.vlgmr.msra.gmra.mrb[32].mxu0 %vm174_vm0, %v24_v46 }
  0x66   :  { %920 = vmatmul.mubr.msk.f32.vlgmr.msra.gmra.mrb[32].mxu1 %vm174_vm0, %v64_v47  ;;  %910 = vmatprep.mubr.msk.f32.mxu0 %vm174_vm0, %v29_v48 }
  0x67   :  { %922 = vmatprep.mubr.msk.f32.mxu1 %vm174_vm0, %v69_v49 }
  0x69   :  { %911 = vmatmul.mubr.msk.f32.gmra.mrb[34].mxu0 %vm174_vm0, %v34_v50 }
  0x6a   :  { %923 = vmatmul.mubr.msk.f32.gmra.mrb[34].mxu1 %vm174_vm0, %v74_v51  ;;  %913 = vmatprep.mubr.msk.f32.mxu0 %vm174_vm0, %v39_v52 }
  0x6b   :  { %925 = vmatprep.mubr.msk.f32.mxu1 %vm174_vm0, %v79_v53 }
  0x6d   :  { %914 = vmatmul.mubr.msk.f32.gmra.mrb[36].mxu0 %vm174_vm0, %v44_v54 }
  0x6e   :  { %926 = vmatmul.mubr.msk.f32.gmra.mrb[36].mxu1 %vm174_vm0, %v84_v55  ;;  %916 = vmatprep.mubr.msk.f32.mxu0 %vm174_vm0, %v49_v56 }
  0x6f   :  { %928 = vmatprep.mubr.msk.f32.mxu1 %vm174_vm0, %v89_v57 }
  0x71   :  { %917 = vmatmul.mubr.msk.f32.gmra.mrb[38].mxu0 %vm174_vm0, %v54_v58 }
  0x72   :  { %929 = vmatmul.mubr.msk.f32.gmra.mrb[38].mxu1 %vm174_vm0, %v94_v59 }
  0xf8   :  { %v739_v60 = vpop.f32.mrb[0].mxu0 }
  0xf9   :  { %v819_v61 = vpop.f32.mrb[0].mxu1  ;;  %v740_v63 = vpop.f32.mrb[1].mxu0 }
  0xfa   :  { %v741_v0 = vadd.f32 %v740_v63, %v739_v60  ;;  %v820_v1 = vpop.f32.mrb[1].mxu1 }
  0xfb   :  { %v821_v2 = vadd.f32 %v820_v1, %v819_v61 }
  0xfc   :  { %v290_v3 = vadd.f32 %v741_v0, %v1544_v62  ;;  %v742_v4 = vpop.f32.mrb[2].mxu0 }
  0xfd   :  { %v822_v5 = vpop.f32.mrb[2].mxu1  ;;  %v743_v6 = vpop.f32.mrb[3].mxu0 }
  0xfe   :  { %v744_v7 = vadd.f32 %v743_v6, %v742_v4  ;;  %v823_v8 = vpop.f32.mrb[3].mxu1  ;;  %v1547_v9 = vadd.f32 %v821_v2, %v290_v3 }
  0xff   :  { %v824_v10 = vadd.f32 %v823_v8, %v822_v5 }
 0x100   :  { %v295_v11 = vadd.f32 %v744_v7, %v1544_v62  ;;  %v745_v12 = vpop.f32.mrb[4].mxu0 }
 0x101   :  { %v825_v13 = vpop.f32.mrb[4].mxu1  ;;  %v746_v14 = vpop.f32.mrb[5].mxu0 }
 0x102   :  { %v747_v15 = vadd.f32 %v746_v14, %v745_v12  ;;  %v826_v16 = vpop.f32.mrb[5].mxu1  ;;  %v1550_v17 = vadd.f32 %v824_v10, %v295_v11 }
 0x103   :  { %v827_v18 = vadd.f32 %v826_v16, %v825_v13 }
 0x104   :  { %v300_v19 = vadd.f32 %v747_v15, %v1544_v62  ;;  %v748_v20 = vpop.f32.mrb[6].mxu0 }
 0x105   :  { %v828_v21 = vpop.f32.mrb[6].mxu1  ;;  %v749_v22 = vpop.f32.mrb[7].mxu0 }
 0x106   :  { %v750_v23 = vadd.f32 %v749_v22, %v748_v20  ;;  %v829_v24 = vpop.f32.mrb[7].mxu1  ;;  %v1553_v25 = vadd.f32 %v827_v18, %v300_v19 }
 0x107   :  { %v830_v26 = vadd.f32 %v829_v24, %v828_v21 }
 0x108   :  { %v305_v27 = vadd.f32 %v750_v23, %v1544_v62  ;;  %v751_v28 = vpop.f32.mrb[8].mxu0 }
 0x109   :  { %v831_v29 = vpop.f32.mrb[8].mxu1  ;;  %v752_v30 = vpop.f32.mrb[9].mxu0 }
 0x10a   :  { %v753_v31 = vadd.f32 %v752_v30, %v751_v28  ;;  %v832_v32 = vpop.f32.mrb[9].mxu1  ;;  %v1556_v33 = vadd.f32 %v830_v26, %v305_v27 }
 0x10b   :  { %v833_v34 = vadd.f32 %v832_v32, %v831_v29 }
 0x10c   :  { %v310_v35 = vadd.f32 %v753_v31, %v1544_v62  ;;  %v754_v36 = vpop.f32.mrb[10].mxu0 }
 0x10d   :  { %v834_v37 = vpop.f32.mrb[10].mxu1  ;;  %v755_v38 = vpop.f32.mrb[11].mxu0 }
 0x10e   :  { %v756_v39 = vadd.f32 %v755_v38, %v754_v36  ;;  %v835_v40 = vpop.f32.mrb[11].mxu1  ;;  %v1559_v41 = vadd.f32 %v833_v34, %v310_v35 }
 0x10f   :  { %v836_v42 = vadd.f32 %v835_v40, %v834_v37 }
 0x110   :  { %v315_v43 = vadd.f32 %v756_v39, %v1544_v62  ;;  %v757_v44 = vpop.f32.mrb[12].mxu0 }
 0x111   :  { %v837_v45 = vpop.f32.mrb[12].mxu1  ;;  %v758_v46 = vpop.f32.mrb[13].mxu0 }
 0x112   :  { %v759_v47 = vadd.f32 %v758_v46, %v757_v44  ;;  %v838_v48 = vpop.f32.mrb[13].mxu1  ;;  %v1562_v49 = vadd.f32 %v836_v42, %v315_v43 }
 0x113   :  { %v839_v50 = vadd.f32 %v838_v48, %v837_v45 }
 0x114   :  { %v320_v51 = vadd.f32 %v759_v47, %v1544_v62  ;;  %v760_v52 = vpop.f32.mrb[14].mxu0 }
 0x115   :  { %v840_v53 = vpop.f32.mrb[14].mxu1  ;;  %v761_v54 = vpop.f32.mrb[15].mxu0 }
 0x116   :  { %v762_v55 = vadd.f32 %v761_v54, %v760_v52  ;;  %v841_v56 = vpop.f32.mrb[15].mxu1  ;;  %v1565_v57 = vadd.f32 %v839_v50, %v320_v51 }
 0x117   :  { %v842_v58 = vadd.f32 %v841_v56, %v840_v53 }
 0x118   :  { %v325_v59 = vadd.f32 %v762_v55, %v1544_v62  ;;  %v763_v60 = vpop.f32.mrb[16].mxu0 }
 0x119   :  { %v843_v61 = vpop.f32.mrb[16].mxu1  ;;  %v764_v63 = vpop.f32.mrb[17].mxu0 }
 0x11a   :  { %v765_v0 = vadd.f32 %v764_v63, %v763_v60  ;;  %v844_v1 = vpop.f32.mrb[17].mxu1  ;;  %v1568_v2 = vadd.f32 %v842_v58, %v325_v59 }
 0x11b   :  { %v845_v3 = vadd.f32 %v844_v1, %v843_v61 }
 0x11c   :  { %v330_v4 = vadd.f32 %v765_v0, %v1544_v62  ;;  %v766_v5 = vpop.f32.mrb[18].mxu0 }
 0x11d   :  { %v846_v6 = vpop.f32.mrb[18].mxu1  ;;  %v767_v7 = vpop.f32.mrb[19].mxu0 }
 0x11e   :  { %v768_v8 = vadd.f32 %v767_v7, %v766_v5  ;;  %v847_v10 = vpop.f32.mrb[19].mxu1  ;;  %v475_v11 = vadd.f32 %v845_v3, %v330_v4 }
 0x11f   :  { %v848_v12 = vadd.f32 %v847_v10, %v846_v6 }
 0x120   :  { %v335_v13 = vadd.f32 %v768_v8, %v1544_v62  ;;  %v769_v14 = vpop.f32.mrb[20].mxu0 }
 0x121   :  { %v849_v15 = vpop.f32.mrb[20].mxu1  ;;  %v770_v16 = vpop.f32.mrb[21].mxu0 }
 0x122   :  { %v771_v18 = vadd.f32 %v770_v16, %v769_v14  ;;  %v850_v19 = vpop.f32.mrb[21].mxu1  ;;  %v480_v20 = vadd.f32 %v848_v12, %v335_v13 }
 0x123   :  { %v851_v21 = vadd.f32 %v850_v19, %v849_v15 }
 0x124   :  { %v340_v22 = vadd.f32 %v771_v18, %v1544_v62  ;;  %v772_v23 = vpop.f32.mrb[22].mxu0 }
 0x125   :  { %v852_v24 = vpop.f32.mrb[22].mxu1  ;;  %v773_v26 = vpop.f32.mrb[23].mxu0 }
 0x126   :  { %v774_v27 = vadd.f32 %v773_v26, %v772_v23  ;;  %v853_v28 = vpop.f32.mrb[23].mxu1  ;;  %v485_v29 = vadd.f32 %v851_v21, %v340_v22 }
 0x127   :  { %v854_v30 = vadd.f32 %v853_v28, %v852_v24 }
 0x128   :  { %v345_v31 = vadd.f32 %v774_v27, %v1544_v62  ;;  %v775_v32 = vpop.f32.mrb[24].mxu0 }
 0x129   :  { %v855_v34 = vpop.f32.mrb[24].mxu1  ;;  %v776_v35 = vpop.f32.mrb[25].mxu0 }
 0x12a   :  { %v777_v36 = vadd.f32 %v776_v35, %v775_v32  ;;  %v856_v37 = vpop.f32.mrb[25].mxu1  ;;  %v490_v38 = vadd.f32 %v854_v30, %v345_v31 }
 0x12b   :  { %v857_v39 = vadd.f32 %v856_v37, %v855_v34 }
 0x12c   :  { %v350_v40 = vadd.f32 %v777_v36, %v1544_v62  ;;  %v778_v42 = vpop.f32.mrb[26].mxu0 }
 0x12d   :  { %v858_v43 = vpop.f32.mrb[26].mxu1  ;;  %v779_v44 = vpop.f32.mrb[27].mxu0 }
 0x12e   :  { %v780_v45 = vadd.f32 %v779_v44, %v778_v42  ;;  %v859_v46 = vpop.f32.mrb[27].mxu1  ;;  %v495_v47 = vadd.f32 %v857_v39, %v350_v40 }
 0x12f   :  { %v860_v48 = vadd.f32 %v859_v46, %v858_v43 }
 0x130   :  { %v355_v50 = vadd.f32 %v780_v45, %v1544_v62  ;;  %v781_v51 = vpop.f32.mrb[28].mxu0 }
 0x131   :  { %v861_v52 = vpop.f32.mrb[28].mxu1  ;;  %v782_v53 = vpop.f32.mrb[29].mxu0 }
 0x132   :  { %v783_v54 = vadd.f32 %v782_v53, %v781_v51  ;;  %v862_v55 = vpop.f32.mrb[29].mxu1  ;;  %v500_v56 = vadd.f32 %v860_v48, %v355_v50 }
 0x133   :  { %v863_v58 = vadd.f32 %v862_v55, %v861_v52 }
 0x134   :  { %v360_v59 = vadd.f32 %v783_v54, %v1544_v62  ;;  %v784_v60 = vpop.f32.mrb[30].mxu0 }
 0x135   :  { %v864_v61 = vpop.f32.mrb[30].mxu1  ;;  %v785_v63 = vpop.f32.mrb[31].mxu0 }
 0x136   :  { %v786_v0 = vadd.f32 %v785_v63, %v784_v60  ;;  %v865_v1 = vpop.f32.mrb[31].mxu1  ;;  %v505_v3 = vadd.f32 %v863_v58, %v360_v59 }
 0x137   :  { %v866_v4 = vadd.f32 %v865_v1, %v864_v61 }
 0x138   :  { %v365_v5 = vadd.f32 %v786_v0, %v1544_v62  ;;  %v909_v6 = vpop.f32.mrb[32].mxu0 }
 0x139   :  { %v585_v7 = vadd.f32 %v909_v6, %v1550_v17  ;;  %v921_v8 = vpop.f32.mrb[32].mxu1  ;;  %v579_v10 = vpop.f32.mrb[33].mxu0 }
 0x13a   :  { %v625_v12 = vadd.f32 %v921_v8, %v480_v20  ;;  %v580_v13 = vadd.f32 %v579_v10, %v1547_v9  ;;  %v619_v14 = vpop.f32.mrb[33].mxu1  ;;  %v510_v15 = vadd.f32 %v866_v4, %v365_v5 }
 0x13b   :  { %659 = vst [vmem:[#allocation2 + $0x8] sm:$0xff] %v585_v7  ;;  %v620_v16 = vadd.f32 %v619_v14, %v475_v11 }
 0x13c   :  { %667 = vst [vmem:[#allocation2 + $0x48] sm:$0xff] %v625_v12  ;;  %658 = vst [vmem:[#allocation2] sm:$0xff] %v580_v13  ;;  %v912_v18 = vpop.f32.mrb[34].mxu0 }
 0x13d   :  { %666 = vst [vmem:[#allocation2 + $0x40] sm:$0xff] %v620_v16  ;;  %v595_v19 = vadd.f32 %v912_v18, %v1556_v33  ;;  %v924_v21 = vpop.f32.mrb[34].mxu1  ;;  %v589_v62 = vpop.f32.mrb[35].mxu0 }
 0x13e   :  { %v635_v22 = vadd.f32 %v924_v21, %v490_v38  ;;  %v590_v17 = vadd.f32 %v589_v62, %v1553_v25  ;;  %v629_v23 = vpop.f32.mrb[35].mxu1 }
 0x13f   :  { %661 = vst [vmem:[#allocation2 + $0x18] sm:$0xff] %v595_v19  ;;  %v630_v20 = vadd.f32 %v629_v23, %v485_v29 }
 0x140   :  { %669 = vst [vmem:[#allocation2 + $0x58] sm:$0xff] %v635_v22  ;;  %660 = vst [vmem:[#allocation2 + $0x10] sm:$0xff] %v590_v17  ;;  %v915_v9 = vpop.f32.mrb[36].mxu0 }
 0x141   :  { %668 = vst [vmem:[#allocation2 + $0x50] sm:$0xff] %v630_v20  ;;  %v605_v11 = vadd.f32 %v915_v9, %v1562_v49  ;;  %v927_v24 = vpop.f32.mrb[36].mxu1  ;;  %v599_v26 = vpop.f32.mrb[37].mxu0 }
 0x142   :  { %v645_v27 = vadd.f32 %v927_v24, %v500_v56  ;;  %v600_v28 = vadd.f32 %v599_v26, %v1559_v41  ;;  %v639_v33 = vpop.f32.mrb[37].mxu1 }
 0x143   :  { %663 = vst [vmem:[#allocation2 + $0x28] sm:$0xff] %v605_v11  ;;  %v640_v30 = vadd.f32 %v639_v33, %v495_v47 }
 0x144   :  { %671 = vst [vmem:[#allocation2 + $0x68] sm:$0xff] %v645_v27  ;;  %662 = vst [vmem:[#allocation2 + $0x20] sm:$0xff] %v600_v28  ;;  %v918_v25 = vpop.f32.mrb[38].mxu0 }
 0x145   :  { %670 = vst [vmem:[#allocation2 + $0x60] sm:$0xff] %v640_v30  ;;  %v615_v29 = vadd.f32 %v918_v25, %v1568_v2  ;;  %v930_v31 = vpop.f32.mrb[38].mxu1  ;;  %v609_v32 = vpop.f32.mrb[39].mxu0 }
 0x146   :  { %v655_v34 = vadd.f32 %v930_v31, %v510_v15  ;;  %v610_v49 = vadd.f32 %v609_v32, %v1565_v57  ;;  %v649_v35 = vpop.f32.mrb[39].mxu1 }
 0x147   :  { %665 = vst [vmem:[#allocation2 + $0x38] sm:$0xff] %v615_v29  ;;  %v650_v41 = vadd.f32 %v649_v35, %v505_v3 }
 0x148   :  { %673 = vst [vmem:[#allocation2 + $0x78] sm:$0xff] %v655_v34  ;;  %664 = vst [vmem:[#allocation2 + $0x30] sm:$0xff] %v610_v49 }
 0x149   :  { %672 = vst [vmem:[#allocation2 + $0x70] sm:$0xff] %v650_v41 }
 0x14a   :  { %1033 = shalt.err (!%p1030_p4)
}
 0x14b   :  { %s1034_s19 = scalar_lea.hbm %s1601_s3, 2048 }
 0x14c   :  { %p1035_p5 = scmp.ne.s32.totalorder %s1601_s3, %s1034_s19  ;;  %p1038_p6 = scmp.lt.u32.totalorder %s1034_s19, %s1601_s3 }
 0x14e   :  { %p1040_p7 = pnand %p1038_p6, %p1035_p5 }
 0x150   :  { %1043 = shalt.err (!%p1040_p7)
}
 0x151   :  { %s1047_s24 = smov 128   ;;  %s1048_s25 = smov 8  }
 0x152   :  { %685 = dma.vmem_to_hbm [thread:$0]  %s680_s2, 2048, %s1601_s3, [#allocation3], %s1047_s24, %s1047_s24, %s1048_s25  }
 0x153   :  { %1044 = dma.done.wait [#allocation3], 2048  }
 0x154   :  { %1045 = vsyncadd [#allocation3], 4294965248 }
 0x155   :  { %689 = vsyncpa [#allocation3], 1 }

</bundles_post_ra>
